<compile_context>
chip_gen: v7x
topology: tpu7x:2x2x1
jax: 0.10.0
libtpu: 0.0.40
codegen_flags: <defaults>
</compile_context>

<pallas_src>
import jax
import jax.numpy as jnp
from jax import lax
from jax.experimental import pallas as pl
from jax.experimental.pallas import tpu as pltpu

EPS = 1e-5
MXU_DTYPE = jnp.bfloat16   # MXU-native input dtype on v5e/v6e/v7x; accumulation stays f32.


def _conv3x3_from_scratch(pad_ref, w_taps, bias):
    """3x3 / stride-1 conv as 9 accumulating matmuls over the Cin axis.

    pad_ref: (N, Cin, H+2, W+2) f32 VMEM scratch with a zero 1-px border and
             the conv input in the interior.
    w_taps:  (9, Cout, Cin) bf16, tap-major (t = ky*3 + kx).
    bias:    (1, Cout, 1) f32.
    Returns  (N, Cout, H*W) f32.
    """
    n, cin, hp2, wp2 = pad_ref.shape
    h, w = hp2 - 2, wp2 - 2
    cout = w_taps.shape[1]

    acc = jnp.zeros((n, cout, h * w), jnp.float32)
    for ky in range(3):
        for kx in range(3):
            t = ky * 3 + kx
            # Tap read straight from the zero-bordered scratch ref: no jnp.pad,
            # no im2col concatenate, no 9x patches buffer ever materialized.
            xt = pad_ref[:, :, ky:ky + h, kx:kx + w]
            xt = xt.reshape(n, cin, h * w).astype(MXU_DTYPE)
            wt = jnp.broadcast_to(w_taps[t][None], (n, cout, cin))
            # Batched-over-N matmul: (Cout, Cin) @ (Cin, H*W), f32 accumulate.
            acc = acc + lax.dot_general(
                wt, xt,
                dimension_numbers=(((2,), (1,)), ((0,), (0,))),
                preferred_element_type=jnp.float32)
    return acc + bias


def _bn_train(x, gamma, beta, *, relu):
    """Training-mode BatchNorm2d (biased batch variance, eps=1e-5), two-pass stats.

    x: (N, C, H*W) f32 (spatial on lanes);  gamma/beta: (1, C, 1) f32.
    """
    cnt = x.shape[0] * x.shape[2]                      # N * H * W
    # Per-channel reduce: lane axis (H*W) first, then the batch rows.
    mean = jnp.sum(jnp.sum(x, axis=2, keepdims=True), axis=0, keepdims=True) / cnt
    d = x - mean
    var = jnp.sum(jnp.sum(d * d, axis=2, keepdims=True), axis=0, keepdims=True) / cnt
    y = d * (gamma * lax.rsqrt(var + EPS)) + beta
    return jnp.maximum(y, 0.0) if relu else y


def _residual_block_kernel(x_ref, w1_ref, b1_ref, g1_ref, be1_ref,
                           w2_ref, b2_ref, g2_ref, be2_ref,
                           out_ref, pad_ref):
    n, c = pad_ref.shape[0], pad_ref.shape[1]
    h, w = pad_ref.shape[2] - 2, pad_ref.shape[3] - 2
    nc, hw = x_ref.shape

    # Zero the padded scratch once: only the 1-pixel border must stay zero,
    # the interior is fully overwritten before each conv layer.
    pad_ref[...] = jnp.zeros(pad_ref.shape, pad_ref.dtype)

    # ---- layer 1: conv3x3 -> BN -> ReLU (everything stays in VMEM) ----
    pad_ref[:, :, 1:h + 1, 1:w + 1] = x_ref[...].reshape(n, c, h, w)
    acc1 = _conv3x3_from_scratch(pad_ref, w1_ref[...], b1_ref[...])
    hact = _bn_train(acc1, g1_ref[...], be1_ref[...], relu=True)       # (N, C, H*W)

    # ---- layer 2: conv3x3 -> BN (intermediate never leaves VMEM) ----
    pad_ref[:, :, 1:h + 1, 1:w + 1] = hact.reshape(n, c, h, w)
    acc2 = _conv3x3_from_scratch(pad_ref, w2_ref[...], b2_ref[...])
    y = _bn_train(acc2, g2_ref[...], be2_ref[...], relu=False)         # (N, C, H*W)

    # ---- residual add + final ReLU ----
    # x_ref is re-read here instead of being kept live across both convs;
    # the store is a lane-dense (N*C, H*W) slab (no masked partial stores).
    out_ref[...] = jnp.maximum(y.reshape(nc, hw) + x_ref[...], 0.0)


def residual_block(x_nchw, params):
    """ResidualBlock forward.  x_nchw: (N, C, H, W) float32 (PyTorch layout).

    params holds PyTorch-layout tensors: w* (Cout, Cin, 3, 3), b*/g*/be* (C,).
    """
    N, C, H, W = x_nchw.shape
    assert params["w1"].shape == (C, C, 3, 3) and params["w2"].shape == (C, C, 3, 3), (
        "residual add requires in_channels == out_channels; weights must be "
        "PyTorch (Cout, Cin, kH, kW)")

    # NCHW is kept end-to-end: the kernel sees lane-dense (N*C, H*W) slabs, so
    # the only wrapper-side layout ops are free contiguous reshapes.
    x2d = x_nchw.reshape(N * C, H * W)

    def prep_w(wt):  # (Cout, Cin, 3, 3) -> (9, Cout, Cin) tap-major, bf16 MXU input
        return jnp.transpose(wt, (2, 3, 0, 1)).reshape(9, C, C).astype(MXU_DTYPE)

    def prep_c(v):   # per-channel vector -> (1, C, 1) broadcastable over (N, C, H*W)
        return v.reshape(1, C, 1).astype(jnp.float32)

    # This fused single-program design requires the whole problem to fit VMEM.
    # TODO(synk): for large N*H*W (or large C, esp. on v7x's 64 MiB/TC VMEM)
    # switch to a row-tiled grid with two-pass BatchNorm (pass 1: conv tile +
    # partial sum/sumsq, pass 2: normalize) and dimension_semantics=
    # ("parallel", ...) to shard across v7x's two TensorCores; global batch
    # statistics prevent a correct one-shot tiling of this fused form.
    fused_bytes = 4 * (N * C * (H + 2) * (W + 2) + 8 * N * C * H * W)
    assert fused_bytes < 16 * 2**20, (
        "shape too large for the fused single-VMEM ResidualBlock kernel")

    vmem = pl.BlockSpec(memory_space=pltpu.MemorySpace.VMEM)
    out2d = pl.pallas_call(
        _residual_block_kernel,
        out_shape=jax.ShapeDtypeStruct((N * C, H * W), jnp.float32),
        in_specs=[vmem] * 9,
        out_specs=vmem,
        scratch_shapes=[pltpu.VMEM((N, C, H + 2, W + 2), jnp.float32)],
        compiler_params=pltpu.CompilerParams(vmem_limit_bytes=32 * 1024 * 1024),
    )(x2d,
      prep_w(params["w1"]), prep_c(params["b1"]), prep_c(params["g1"]), prep_c(params["be1"]),
      prep_w(params["w2"]), prep_c(params["b2"]), prep_c(params["g2"]), prep_c(params["be2"]))

    return out2d.reshape(N, C, H, W)


def residual_block_reference(x, p):
    """Pure-JAX (XLA) reference of the PyTorch module's training-mode forward."""
    def conv(z, wt, b):
        y = lax.conv_general_dilated(z, wt, (1, 1), ((1, 1), (1, 1)),
                                     dimension_numbers=("NCHW", "OIHW", "NCHW"))
        return y + b[None, :, None, None]

    def bn(z, g, be):
        m = jnp.mean(z, axis=(0, 2, 3), keepdims=True)
        v = jnp.mean((z - m) ** 2, axis=(0, 2, 3), keepdims=True)
        return (z - m) * lax.rsqrt(v + EPS) * g[None, :, None, None] + be[None, :, None, None]

    h = jax.nn.relu(bn(conv(x, p["w1"], p["b1"]), p["g1"], p["be1"]))
    y = bn(conv(h, p["w2"], p["b2"]), p["g2"], p["be2"])
    return jax.nn.relu(y + x)


def make_params(key, in_channels, out_channels):
    """Deterministic synthetic parameters in PyTorch layouts (Conv2d: OIHW)."""
    k1, k2, k3, k4 = jax.random.split(key, 4)
    fan1 = in_channels * 9
    fan2 = out_channels * 9
    return {
        "w1": jax.random.normal(k1, (out_channels, in_channels, 3, 3),
                                jnp.float32) / jnp.sqrt(fan1),
        "b1": jax.random.normal(k2, (out_channels,), jnp.float32) * 0.01,
        "g1": jnp.ones((out_channels,), jnp.float32),
        "be1": jnp.zeros((out_channels,), jnp.float32),
        "w2": jax.random.normal(k3, (out_channels, out_channels, 3, 3),
                                jnp.float32) / jnp.sqrt(fan2),
        "b2": jax.random.normal(k4, (out_channels,), jnp.float32) * 0.01,
        "g2": jnp.ones((out_channels,), jnp.float32),
        "be2": jnp.zeros((out_channels,), jnp.float32),
    }


if __name__ == "__main__":
    # Residual add requires in_channels == out_channels (as in the module's use).
    N, C, H, W = 2, 4, 16, 16
    key = jax.random.PRNGKey(0)
    kx, kp = jax.random.split(key)
    x = jax.random.normal(kx, (N, C, H, W), jnp.float32)     # NCHW, like PyTorch
    params = make_params(kp, C, C)

    out = jax.block_until_ready(residual_block(x, params))
    assert out.shape == (N, C, H, W)
    assert bool(jnp.all(jnp.isfinite(out)))
    assert bool(jnp.all(out >= 0.0))                         # trailing ReLU

    # Numeric check vs. the XLA reference (tolerance covers bf16 MXU inputs).
    ref = residual_block_reference(x, params)
    max_err = float(jnp.max(jnp.abs(out - ref)))
    assert max_err < 7.5e-2, f"mismatch vs reference: max abs err {max_err}"

    print("KERNEL_OK")
</pallas_src>

<mosaic_0001>
module attributes {stable_mosaic.version = 11 : i64} {
  func.func @_residual_block_kernel(%arg0: memref<8x256xf32, #tpu.memory_space<vmem>>, %arg1: memref<9x4x4xbf16, #tpu.memory_space<vmem>>, %arg2: memref<1x4x1xf32, #tpu.memory_space<vmem>>, %arg3: memref<1x4x1xf32, #tpu.memory_space<vmem>>, %arg4: memref<1x4x1xf32, #tpu.memory_space<vmem>>, %arg5: memref<9x4x4xbf16, #tpu.memory_space<vmem>>, %arg6: memref<1x4x1xf32, #tpu.memory_space<vmem>>, %arg7: memref<1x4x1xf32, #tpu.memory_space<vmem>>, %arg8: memref<1x4x1xf32, #tpu.memory_space<vmem>>, %arg9: memref<8x256xf32, #tpu.memory_space<vmem>>, %arg10: memref<2x4x18x18xf32, #tpu.memory_space<vmem>>) attributes {dimension_semantics = [], scalar_prefetch = 0 : i64, scratch_operands = 1 : i64, tpu.core_type = #tpu.core_type<tc>} {
    %cst = arith.constant 0.000000e+00 : f32
    %0 = vector.broadcast %cst : f32 to vector<2x4x18x18xf32>
    %c0 = arith.constant 0 : index
    %c0_0 = arith.constant 0 : index
    %c0_1 = arith.constant 0 : index
    %c0_2 = arith.constant 0 : index
    %1 = vector.load %arg10[%c0, %c0_0, %c0_1, %c0_2] : memref<2x4x18x18xf32, #tpu.memory_space<vmem>>, vector<2x4x18x18xf32>
    tpu.vector_store %arg10[%c0, %c0_0, %c0_1, %c0_2], %0 {strides = array<i32>} : memref<2x4x18x18xf32, #tpu.memory_space<vmem>>, vector<2x4x18x18xf32>,
    %c0_3 = arith.constant 0 : index
    %c0_4 = arith.constant 0 : index
    %2 = vector.load %arg0[%c0_3, %c0_4] : memref<8x256xf32, #tpu.memory_space<vmem>>, vector<8x256xf32>
    %3 = vector.shape_cast %2 : vector<8x256xf32> to vector<2x4x16x16xf32>
    %c0_5 = arith.constant 0 : index
    %c0_6 = arith.constant 0 : index
    %c1 = arith.constant 1 : index
    %c1_7 = arith.constant 1 : index
    %4 = vector.load %arg10[%c0_5, %c0_6, %c1, %c1_7] : memref<2x4x18x18xf32, #tpu.memory_space<vmem>>, vector<2x4x16x16xf32>
    tpu.vector_store %arg10[%c0_5, %c0_6, %c1, %c1_7], %3 {strides = array<i32>} : memref<2x4x18x18xf32, #tpu.memory_space<vmem>>, vector<2x4x16x16xf32>,
    %c0_8 = arith.constant 0 : index
    %c0_9 = arith.constant 0 : index
    %c0_10 = arith.constant 0 : index
    %5 = vector.load %arg1[%c0_8, %c0_9, %c0_10] : memref<9x4x4xbf16, #tpu.memory_space<vmem>>, vector<9x4x4xbf16>
    %c0_11 = arith.constant 0 : index
    %c0_12 = arith.constant 0 : index
    %c0_13 = arith.constant 0 : index
    %6 = vector.load %arg2[%c0_11, %c0_12, %c0_13] : memref<1x4x1xf32, #tpu.memory_space<vmem>>, vector<1x4x1xf32>
    %cst_14 = arith.constant 0.000000e+00 : f32
    %7 = vector.broadcast %cst_14 : f32 to vector<2x4x256xf32>
    %c0_15 = arith.constant 0 : index
    %c0_16 = arith.constant 0 : index
    %c0_17 = arith.constant 0 : index
    %c0_18 = arith.constant 0 : index
    %8 = vector.load %arg10[%c0_15, %c0_16, %c0_17, %c0_18] : memref<2x4x18x18xf32, #tpu.memory_space<vmem>>, vector<2x4x16x16xf32>
    %9 = vector.shape_cast %8 : vector<2x4x16x16xf32> to vector<2x4x256xf32>
    %10 = arith.truncf %9 : vector<2x4x256xf32> to vector<2x4x256xbf16>
    %11 = vector.extract_strided_slice %5 {offsets = [0, 0, 0], sizes = [1, 4, 4], strides = [1, 1, 1]} : vector<9x4x4xbf16> to vector<1x4x4xbf16>
    %12 = vector.shape_cast %11 : vector<1x4x4xbf16> to vector<4x4xbf16>
    %13 = vector.shape_cast %12 : vector<4x4xbf16> to vector<1x4x4xbf16>
    %14 = vector.shape_cast %13 : vector<1x4x4xbf16> to vector<1x4x4xbf16>
    %15 = vector.broadcast %14 : vector<1x4x4xbf16> to vector<2x4x4xbf16>
    %cst_19 = arith.constant dense<0.000000e+00> : vector<2x4x256xf32>
    %16 = tpu.matmul %15, %10, %cst_19 {dimension_numbers = #tpu.dot_dimension_numbers<[2], [1], [1], [2], [0, 0, 0, 1, 1, 2], [0], [0]>} : vector<2x4x4xbf16>, vector<2x4x256xbf16>, vector<2x4x256xf32> -> vector<2x4x256xf32>
    %17 = arith.addf %7, %16 : vector<2x4x256xf32>
    %c0_20 = arith.constant 0 : index
    %c0_21 = arith.constant 0 : index
    %c0_22 = arith.constant 0 : index
    %c1_23 = arith.constant 1 : index
    %18 = vector.load %arg10[%c0_20, %c0_21, %c0_22, %c1_23] : memref<2x4x18x18xf32, #tpu.memory_space<vmem>>, vector<2x4x16x16xf32>
    %19 = vector.shape_cast %18 : vector<2x4x16x16xf32> to vector<2x4x256xf32>
    %20 = arith.truncf %19 : vector<2x4x256xf32> to vector<2x4x256xbf16>
    %21 = vector.extract_strided_slice %5 {offsets = [1, 0, 0], sizes = [1, 4, 4], strides = [1, 1, 1]} : vector<9x4x4xbf16> to vector<1x4x4xbf16>
    %22 = vector.shape_cast %21 : vector<1x4x4xbf16> to vector<4x4xbf16>
    %23 = vector.shape_cast %22 : vector<4x4xbf16> to vector<1x4x4xbf16>
    %24 = vector.shape_cast %23 : vector<1x4x4xbf16> to vector<1x4x4xbf16>
    %25 = vector.broadcast %24 : vector<1x4x4xbf16> to vector<2x4x4xbf16>
    %cst_24 = arith.constant dense<0.000000e+00> : vector<2x4x256xf32>
    %26 = tpu.matmul %25, %20, %cst_24 {dimension_numbers = #tpu.dot_dimension_numbers<[2], [1], [1], [2], [0, 0, 0, 1, 1, 2], [0], [0]>} : vector<2x4x4xbf16>, vector<2x4x256xbf16>, vector<2x4x256xf32> -> vector<2x4x256xf32>
    %27 = arith.addf %17, %26 : vector<2x4x256xf32>
    %c0_25 = arith.constant 0 : index
    %c0_26 = arith.constant 0 : index
    %c0_27 = arith.constant 0 : index
    %c2 = arith.constant 2 : index
    %28 = vector.load %arg10[%c0_25, %c0_26, %c0_27, %c2] : memref<2x4x18x18xf32, #tpu.memory_space<vmem>>, vector<2x4x16x16xf32>
    %29 = vector.shape_cast %28 : vector<2x4x16x16xf32> to vector<2x4x256xf32>
    %30 = arith.truncf %29 : vector<2x4x256xf32> to vector<2x4x256xbf16>
    %31 = vector.extract_strided_slice %5 {offsets = [2, 0, 0], sizes = [1, 4, 4], strides = [1, 1, 1]} : vector<9x4x4xbf16> to vector<1x4x4xbf16>
    %32 = vector.shape_cast %31 : vector<1x4x4xbf16> to vector<4x4xbf16>
    %33 = vector.shape_cast %32 : vector<4x4xbf16> to vector<1x4x4xbf16>
    %34 = vector.shape_cast %33 : vector<1x4x4xbf16> to vector<1x4x4xbf16>
    %35 = vector.broadcast %34 : vector<1x4x4xbf16> to vector<2x4x4xbf16>
    %cst_28 = arith.constant dense<0.000000e+00> : vector<2x4x256xf32>
    %36 = tpu.matmul %35, %30, %cst_28 {dimension_numbers = #tpu.dot_dimension_numbers<[2], [1], [1], [2], [0, 0, 0, 1, 1, 2], [0], [0]>} : vector<2x4x4xbf16>, vector<2x4x256xbf16>, vector<2x4x256xf32> -> vector<2x4x256xf32>
    %37 = arith.addf %27, %36 : vector<2x4x256xf32>
    %c0_29 = arith.constant 0 : index
    %c0_30 = arith.constant 0 : index
    %c1_31 = arith.constant 1 : index
    %c0_32 = arith.constant 0 : index
    %38 = vector.load %arg10[%c0_29, %c0_30, %c1_31, %c0_32] : memref<2x4x18x18xf32, #tpu.memory_space<vmem>>, vector<2x4x16x16xf32>
    %39 = vector.shape_cast %38 : vector<2x4x16x16xf32> to vector<2x4x256xf32>
    %40 = arith.truncf %39 : vector<2x4x256xf32> to vector<2x4x256xbf16>
    %41 = vector.extract_strided_slice %5 {offsets = [3, 0, 0], sizes = [1, 4, 4], strides = [1, 1, 1]} : vector<9x4x4xbf16> to vector<1x4x4xbf16>
    %42 = vector.shape_cast %41 : vector<1x4x4xbf16> to vector<4x4xbf16>
    %43 = vector.shape_cast %42 : vector<4x4xbf16> to vector<1x4x4xbf16>
    %44 = vector.shape_cast %43 : vector<1x4x4xbf16> to vector<1x4x4xbf16>
    %45 = vector.broadcast %44 : vector<1x4x4xbf16> to vector<2x4x4xbf16>
    %cst_33 = arith.constant dense<0.000000e+00> : vector<2x4x256xf32>
    %46 = tpu.matmul %45, %40, %cst_33 {dimension_numbers = #tpu.dot_dimension_numbers<[2], [1], [1], [2], [0, 0, 0, 1, 1, 2], [0], [0]>} : vector<2x4x4xbf16>, vector<2x4x256xbf16>, vector<2x4x256xf32> -> vector<2x4x256xf32>
    %47 = arith.addf %37, %46 : vector<2x4x256xf32>
    %c0_34 = arith.constant 0 : index
    %c0_35 = arith.constant 0 : index
    %c1_36 = arith.constant 1 : index
    %c1_37 = arith.constant 1 : index
    %48 = vector.load %arg10[%c0_34, %c0_35, %c1_36, %c1_37] : memref<2x4x18x18xf32, #tpu.memory_space<vmem>>, vector<2x4x16x16xf32>
    %49 = vector.shape_cast %48 : vector<2x4x16x16xf32> to vector<2x4x256xf32>
    %50 = arith.truncf %49 : vector<2x4x256xf32> to vector<2x4x256xbf16>
    %51 = vector.extract_strided_slice %5 {offsets = [4, 0, 0], sizes = [1, 4, 4], strides = [1, 1, 1]} : vector<9x4x4xbf16> to vector<1x4x4xbf16>
    %52 = vector.shape_cast %51 : vector<1x4x4xbf16> to vector<4x4xbf16>
    %53 = vector.shape_cast %52 : vector<4x4xbf16> to vector<1x4x4xbf16>
    %54 = vector.shape_cast %53 : vector<1x4x4xbf16> to vector<1x4x4xbf16>
    %55 = vector.broadcast %54 : vector<1x4x4xbf16> to vector<2x4x4xbf16>
    %cst_38 = arith.constant dense<0.000000e+00> : vector<2x4x256xf32>
    %56 = tpu.matmul %55, %50, %cst_38 {dimension_numbers = #tpu.dot_dimension_numbers<[2], [1], [1], [2], [0, 0, 0, 1, 1, 2], [0], [0]>} : vector<2x4x4xbf16>, vector<2x4x256xbf16>, vector<2x4x256xf32> -> vector<2x4x256xf32>
    %57 = arith.addf %47, %56 : vector<2x4x256xf32>
    %c0_39 = arith.constant 0 : index
    %c0_40 = arith.constant 0 : index
    %c1_41 = arith.constant 1 : index
    %c2_42 = arith.constant 2 : index
    %58 = vector.load %arg10[%c0_39, %c0_40, %c1_41, %c2_42] : memref<2x4x18x18xf32, #tpu.memory_space<vmem>>, vector<2x4x16x16xf32>
    %59 = vector.shape_cast %58 : vector<2x4x16x16xf32> to vector<2x4x256xf32>
    %60 = arith.truncf %59 : vector<2x4x256xf32> to vector<2x4x256xbf16>
    %61 = vector.extract_strided_slice %5 {offsets = [5, 0, 0], sizes = [1, 4, 4], strides = [1, 1, 1]} : vector<9x4x4xbf16> to vector<1x4x4xbf16>
    %62 = vector.shape_cast %61 : vector<1x4x4xbf16> to vector<4x4xbf16>
    %63 = vector.shape_cast %62 : vector<4x4xbf16> to vector<1x4x4xbf16>
    %64 = vector.shape_cast %63 : vector<1x4x4xbf16> to vector<1x4x4xbf16>
    %65 = vector.broadcast %64 : vector<1x4x4xbf16> to vector<2x4x4xbf16>
    %cst_43 = arith.constant dense<0.000000e+00> : vector<2x4x256xf32>
    %66 = tpu.matmul %65, %60, %cst_43 {dimension_numbers = #tpu.dot_dimension_numbers<[2], [1], [1], [2], [0, 0, 0, 1, 1, 2], [0], [0]>} : vector<2x4x4xbf16>, vector<2x4x256xbf16>, vector<2x4x256xf32> -> vector<2x4x256xf32>
    %67 = arith.addf %57, %66 : vector<2x4x256xf32>
    %c0_44 = arith.constant 0 : index
    %c0_45 = arith.constant 0 : index
    %c2_46 = arith.constant 2 : index
    %c0_47 = arith.constant 0 : index
    %68 = vector.load %arg10[%c0_44, %c0_45, %c2_46, %c0_47] : memref<2x4x18x18xf32, #tpu.memory_space<vmem>>, vector<2x4x16x16xf32>
    %69 = vector.shape_cast %68 : vector<2x4x16x16xf32> to vector<2x4x256xf32>
    %70 = arith.truncf %69 : vector<2x4x256xf32> to vector<2x4x256xbf16>
    %71 = vector.extract_strided_slice %5 {offsets = [6, 0, 0], sizes = [1, 4, 4], strides = [1, 1, 1]} : vector<9x4x4xbf16> to vector<1x4x4xbf16>
    %72 = vector.shape_cast %71 : vector<1x4x4xbf16> to vector<4x4xbf16>
    %73 = vector.shape_cast %72 : vector<4x4xbf16> to vector<1x4x4xbf16>
    %74 = vector.shape_cast %73 : vector<1x4x4xbf16> to vector<1x4x4xbf16>
    %75 = vector.broadcast %74 : vector<1x4x4xbf16> to vector<2x4x4xbf16>
    %cst_48 = arith.constant dense<0.000000e+00> : vector<2x4x256xf32>
    %76 = tpu.matmul %75, %70, %cst_48 {dimension_numbers = #tpu.dot_dimension_numbers<[2], [1], [1], [2], [0, 0, 0, 1, 1, 2], [0], [0]>} : vector<2x4x4xbf16>, vector<2x4x256xbf16>, vector<2x4x256xf32> -> vector<2x4x256xf32>
    %77 = arith.addf %67, %76 : vector<2x4x256xf32>
    %c0_49 = arith.constant 0 : index
    %c0_50 = arith.constant 0 : index
    %c2_51 = arith.constant 2 : index
    %c1_52 = arith.constant 1 : index
    %78 = vector.load %arg10[%c0_49, %c0_50, %c2_51, %c1_52] : memref<2x4x18x18xf32, #tpu.memory_space<vmem>>, vector<2x4x16x16xf32>
    %79 = vector.shape_cast %78 : vector<2x4x16x16xf32> to vector<2x4x256xf32>
    %80 = arith.truncf %79 : vector<2x4x256xf32> to vector<2x4x256xbf16>
    %81 = vector.extract_strided_slice %5 {offsets = [7, 0, 0], sizes = [1, 4, 4], strides = [1, 1, 1]} : vector<9x4x4xbf16> to vector<1x4x4xbf16>
    %82 = vector.shape_cast %81 : vector<1x4x4xbf16> to vector<4x4xbf16>
    %83 = vector.shape_cast %82 : vector<4x4xbf16> to vector<1x4x4xbf16>
    %84 = vector.shape_cast %83 : vector<1x4x4xbf16> to vector<1x4x4xbf16>
    %85 = vector.broadcast %84 : vector<1x4x4xbf16> to vector<2x4x4xbf16>
    %cst_53 = arith.constant dense<0.000000e+00> : vector<2x4x256xf32>
    %86 = tpu.matmul %85, %80, %cst_53 {dimension_numbers = #tpu.dot_dimension_numbers<[2], [1], [1], [2], [0, 0, 0, 1, 1, 2], [0], [0]>} : vector<2x4x4xbf16>, vector<2x4x256xbf16>, vector<2x4x256xf32> -> vector<2x4x256xf32>
    %87 = arith.addf %77, %86 : vector<2x4x256xf32>
    %c0_54 = arith.constant 0 : index
    %c0_55 = arith.constant 0 : index
    %c2_56 = arith.constant 2 : index
    %c2_57 = arith.constant 2 : index
    %88 = vector.load %arg10[%c0_54, %c0_55, %c2_56, %c2_57] : memref<2x4x18x18xf32, #tpu.memory_space<vmem>>, vector<2x4x16x16xf32>
    %89 = vector.shape_cast %88 : vector<2x4x16x16xf32> to vector<2x4x256xf32>
    %90 = arith.truncf %89 : vector<2x4x256xf32> to vector<2x4x256xbf16>
    %91 = vector.extract_strided_slice %5 {offsets = [8, 0, 0], sizes = [1, 4, 4], strides = [1, 1, 1]} : vector<9x4x4xbf16> to vector<1x4x4xbf16>
    %92 = vector.shape_cast %91 : vector<1x4x4xbf16> to vector<4x4xbf16>
    %93 = vector.shape_cast %92 : vector<4x4xbf16> to vector<1x4x4xbf16>
    %94 = vector.shape_cast %93 : vector<1x4x4xbf16> to vector<1x4x4xbf16>
    %95 = vector.broadcast %94 : vector<1x4x4xbf16> to vector<2x4x4xbf16>
    %cst_58 = arith.constant dense<0.000000e+00> : vector<2x4x256xf32>
    %96 = tpu.matmul %95, %90, %cst_58 {dimension_numbers = #tpu.dot_dimension_numbers<[2], [1], [1], [2], [0, 0, 0, 1, 1, 2], [0], [0]>} : vector<2x4x4xbf16>, vector<2x4x256xbf16>, vector<2x4x256xf32> -> vector<2x4x256xf32>
    %97 = arith.addf %87, %96 : vector<2x4x256xf32>
    %98 = vector.broadcast %6 : vector<1x4x1xf32> to vector<2x4x256xf32>
    %99 = arith.addf %97, %98 : vector<2x4x256xf32>
    %c0_59 = arith.constant 0 : index
    %c0_60 = arith.constant 0 : index
    %c0_61 = arith.constant 0 : index
    %100 = vector.load %arg3[%c0_59, %c0_60, %c0_61] : memref<1x4x1xf32, #tpu.memory_space<vmem>>, vector<1x4x1xf32>
    %c0_62 = arith.constant 0 : index
    %c0_63 = arith.constant 0 : index
    %c0_64 = arith.constant 0 : index
    %101 = vector.load %arg4[%c0_62, %c0_63, %c0_64] : memref<1x4x1xf32, #tpu.memory_space<vmem>>, vector<1x4x1xf32>
    %cst_65 = arith.constant dense<0.000000e+00> : vector<2x4xf32>
    %102 = vector.multi_reduction <add>, %99, %cst_65 [2] : vector<2x4x256xf32> to vector<2x4xf32>
    %103 = vector.shape_cast %102 : vector<2x4xf32> to vector<2x4x1xf32>
    %cst_66 = arith.constant dense<0.000000e+00> : vector<4x1xf32>
    %104 = vector.multi_reduction <add>, %103, %cst_66 [0] : vector<2x4x1xf32> to vector<4x1xf32>
    %105 = vector.shape_cast %104 : vector<4x1xf32> to vector<1x4x1xf32>
    %cst_67 = arith.constant 5.120000e+02 : f32
    %106 = vector.broadcast %cst_67 : f32 to vector<1x4x1xf32>
    %107 = arith.divf %105, %106 : vector<1x4x1xf32>
    %108 = vector.broadcast %107 : vector<1x4x1xf32> to vector<2x4x256xf32>
    %109 = arith.subf %99, %108 : vector<2x4x256xf32>
    %110 = arith.mulf %109, %109 : vector<2x4x256xf32>
    %cst_68 = arith.constant dense<0.000000e+00> : vector<2x4xf32>
    %111 = vector.multi_reduction <add>, %110, %cst_68 [2] : vector<2x4x256xf32> to vector<2x4xf32>
    %112 = vector.shape_cast %111 : vector<2x4xf32> to vector<2x4x1xf32>
    %cst_69 = arith.constant dense<0.000000e+00> : vector<4x1xf32>
    %113 = vector.multi_reduction <add>, %112, %cst_69 [0] : vector<2x4x1xf32> to vector<4x1xf32>
    %114 = vector.shape_cast %113 : vector<4x1xf32> to vector<1x4x1xf32>
    %cst_70 = arith.constant 5.120000e+02 : f32
    %115 = vector.broadcast %cst_70 : f32 to vector<1x4x1xf32>
    %116 = arith.divf %114, %115 : vector<1x4x1xf32>
    %cst_71 = arith.constant 9.99999974E-6 : f32
    %117 = vector.broadcast %cst_71 : f32 to vector<1x4x1xf32>
    %118 = arith.addf %116, %117 : vector<1x4x1xf32>
    %119 = math.rsqrt %118 : vector<1x4x1xf32>
    %120 = arith.mulf %100, %119 : vector<1x4x1xf32>
    %121 = vector.broadcast %120 : vector<1x4x1xf32> to vector<2x4x256xf32>
    %122 = arith.mulf %109, %121 : vector<2x4x256xf32>
    %123 = vector.broadcast %101 : vector<1x4x1xf32> to vector<2x4x256xf32>
    %124 = arith.addf %122, %123 : vector<2x4x256xf32>
    %cst_72 = arith.constant 0.000000e+00 : f32
    %125 = vector.broadcast %cst_72 : f32 to vector<2x4x256xf32>
    %126 = arith.maximumf %124, %125 : vector<2x4x256xf32>
    %127 = vector.shape_cast %126 : vector<2x4x256xf32> to vector<2x4x16x16xf32>
    %c0_73 = arith.constant 0 : index
    %c0_74 = arith.constant 0 : index
    %c1_75 = arith.constant 1 : index
    %c1_76 = arith.constant 1 : index
    %128 = vector.load %arg10[%c0_73, %c0_74, %c1_75, %c1_76] : memref<2x4x18x18xf32, #tpu.memory_space<vmem>>, vector<2x4x16x16xf32>
    tpu.vector_store %arg10[%c0_73, %c0_74, %c1_75, %c1_76], %127 {strides = array<i32>} : memref<2x4x18x18xf32, #tpu.memory_space<vmem>>, vector<2x4x16x16xf32>,
    %c0_77 = arith.constant 0 : index
    %c0_78 = arith.constant 0 : index
    %c0_79 = arith.constant 0 : index
    %129 = vector.load %arg5[%c0_77, %c0_78, %c0_79] : memref<9x4x4xbf16, #tpu.memory_space<vmem>>, vector<9x4x4xbf16>
    %c0_80 = arith.constant 0 : index
    %c0_81 = arith.constant 0 : index
    %c0_82 = arith.constant 0 : index
    %130 = vector.load %arg6[%c0_80, %c0_81, %c0_82] : memref<1x4x1xf32, #tpu.memory_space<vmem>>, vector<1x4x1xf32>
    %cst_83 = arith.constant 0.000000e+00 : f32
    %131 = vector.broadcast %cst_83 : f32 to vector<2x4x256xf32>
    %c0_84 = arith.constant 0 : index
    %c0_85 = arith.constant 0 : index
    %c0_86 = arith.constant 0 : index
    %c0_87 = arith.constant 0 : index
    %132 = vector.load %arg10[%c0_84, %c0_85, %c0_86, %c0_87] : memref<2x4x18x18xf32, #tpu.memory_space<vmem>>, vector<2x4x16x16xf32>
    %133 = vector.shape_cast %132 : vector<2x4x16x16xf32> to vector<2x4x256xf32>
    %134 = arith.truncf %133 : vector<2x4x256xf32> to vector<2x4x256xbf16>
    %135 = vector.extract_strided_slice %129 {offsets = [0, 0, 0], sizes = [1, 4, 4], strides = [1, 1, 1]} : vector<9x4x4xbf16> to vector<1x4x4xbf16>
    %136 = vector.shape_cast %135 : vector<1x4x4xbf16> to vector<4x4xbf16>
    %137 = vector.shape_cast %136 : vector<4x4xbf16> to vector<1x4x4xbf16>
    %138 = vector.shape_cast %137 : vector<1x4x4xbf16> to vector<1x4x4xbf16>
    %139 = vector.broadcast %138 : vector<1x4x4xbf16> to vector<2x4x4xbf16>
    %cst_88 = arith.constant dense<0.000000e+00> : vector<2x4x256xf32>
    %140 = tpu.matmul %139, %134, %cst_88 {dimension_numbers = #tpu.dot_dimension_numbers<[2], [1], [1], [2], [0, 0, 0, 1, 1, 2], [0], [0]>} : vector<2x4x4xbf16>, vector<2x4x256xbf16>, vector<2x4x256xf32> -> vector<2x4x256xf32>
    %141 = arith.addf %131, %140 : vector<2x4x256xf32>
    %c0_89 = arith.constant 0 : index
    %c0_90 = arith.constant 0 : index
    %c0_91 = arith.constant 0 : index
    %c1_92 = arith.constant 1 : index
    %142 = vector.load %arg10[%c0_89, %c0_90, %c0_91, %c1_92] : memref<2x4x18x18xf32, #tpu.memory_space<vmem>>, vector<2x4x16x16xf32>
    %143 = vector.shape_cast %142 : vector<2x4x16x16xf32> to vector<2x4x256xf32>
    %144 = arith.truncf %143 : vector<2x4x256xf32> to vector<2x4x256xbf16>
    %145 = vector.extract_strided_slice %129 {offsets = [1, 0, 0], sizes = [1, 4, 4], strides = [1, 1, 1]} : vector<9x4x4xbf16> to vector<1x4x4xbf16>
    %146 = vector.shape_cast %145 : vector<1x4x4xbf16> to vector<4x4xbf16>
    %147 = vector.shape_cast %146 : vector<4x4xbf16> to vector<1x4x4xbf16>
    %148 = vector.shape_cast %147 : vector<1x4x4xbf16> to vector<1x4x4xbf16>
    %149 = vector.broadcast %148 : vector<1x4x4xbf16> to vector<2x4x4xbf16>
    %cst_93 = arith.constant dense<0.000000e+00> : vector<2x4x256xf32>
    %150 = tpu.matmul %149, %144, %cst_93 {dimension_numbers = #tpu.dot_dimension_numbers<[2], [1], [1], [2], [0, 0, 0, 1, 1, 2], [0], [0]>} : vector<2x4x4xbf16>, vector<2x4x256xbf16>, vector<2x4x256xf32> -> vector<2x4x256xf32>
    %151 = arith.addf %141, %150 : vector<2x4x256xf32>
    %c0_94 = arith.constant 0 : index
    %c0_95 = arith.constant 0 : index
    %c0_96 = arith.constant 0 : index
    %c2_97 = arith.constant 2 : index
    %152 = vector.load %arg10[%c0_94, %c0_95, %c0_96, %c2_97] : memref<2x4x18x18xf32, #tpu.memory_space<vmem>>, vector<2x4x16x16xf32>
    %153 = vector.shape_cast %152 : vector<2x4x16x16xf32> to vector<2x4x256xf32>
    %154 = arith.truncf %153 : vector<2x4x256xf32> to vector<2x4x256xbf16>
    %155 = vector.extract_strided_slice %129 {offsets = [2, 0, 0], sizes = [1, 4, 4], strides = [1, 1, 1]} : vector<9x4x4xbf16> to vector<1x4x4xbf16>
    %156 = vector.shape_cast %155 : vector<1x4x4xbf16> to vector<4x4xbf16>
    %157 = vector.shape_cast %156 : vector<4x4xbf16> to vector<1x4x4xbf16>
    %158 = vector.shape_cast %157 : vector<1x4x4xbf16> to vector<1x4x4xbf16>
    %159 = vector.broadcast %158 : vector<1x4x4xbf16> to vector<2x4x4xbf16>
    %cst_98 = arith.constant dense<0.000000e+00> : vector<2x4x256xf32>
    %160 = tpu.matmul %159, %154, %cst_98 {dimension_numbers = #tpu.dot_dimension_numbers<[2], [1], [1], [2], [0, 0, 0, 1, 1, 2], [0], [0]>} : vector<2x4x4xbf16>, vector<2x4x256xbf16>, vector<2x4x256xf32> -> vector<2x4x256xf32>
    %161 = arith.addf %151, %160 : vector<2x4x256xf32>
    %c0_99 = arith.constant 0 : index
    %c0_100 = arith.constant 0 : index
    %c1_101 = arith.constant 1 : index
    %c0_102 = arith.constant 0 : index
    %162 = vector.load %arg10[%c0_99, %c0_100, %c1_101, %c0_102] : memref<2x4x18x18xf32, #tpu.memory_space<vmem>>, vector<2x4x16x16xf32>
    %163 = vector.shape_cast %162 : vector<2x4x16x16xf32> to vector<2x4x256xf32>
    %164 = arith.truncf %163 : vector<2x4x256xf32> to vector<2x4x256xbf16>
    %165 = vector.extract_strided_slice %129 {offsets = [3, 0, 0], sizes = [1, 4, 4], strides = [1, 1, 1]} : vector<9x4x4xbf16> to vector<1x4x4xbf16>
    %166 = vector.shape_cast %165 : vector<1x4x4xbf16> to vector<4x4xbf16>
    %167 = vector.shape_cast %166 : vector<4x4xbf16> to vector<1x4x4xbf16>
    %168 = vector.shape_cast %167 : vector<1x4x4xbf16> to vector<1x4x4xbf16>
    %169 = vector.broadcast %168 : vector<1x4x4xbf16> to vector<2x4x4xbf16>
    %cst_103 = arith.constant dense<0.000000e+00> : vector<2x4x256xf32>
    %170 = tpu.matmul %169, %164, %cst_103 {dimension_numbers = #tpu.dot_dimension_numbers<[2], [1], [1], [2], [0, 0, 0, 1, 1, 2], [0], [0]>} : vector<2x4x4xbf16>, vector<2x4x256xbf16>, vector<2x4x256xf32> -> vector<2x4x256xf32>
    %171 = arith.addf %161, %170 : vector<2x4x256xf32>
    %c0_104 = arith.constant 0 : index
    %c0_105 = arith.constant 0 : index
    %c1_106 = arith.constant 1 : index
    %c1_107 = arith.constant 1 : index
    %172 = vector.load %arg10[%c0_104, %c0_105, %c1_106, %c1_107] : memref<2x4x18x18xf32, #tpu.memory_space<vmem>>, vector<2x4x16x16xf32>
    %173 = vector.shape_cast %172 : vector<2x4x16x16xf32> to vector<2x4x256xf32>
    %174 = arith.truncf %173 : vector<2x4x256xf32> to vector<2x4x256xbf16>
    %175 = vector.extract_strided_slice %129 {offsets = [4, 0, 0], sizes = [1, 4, 4], strides = [1, 1, 1]} : vector<9x4x4xbf16> to vector<1x4x4xbf16>
    %176 = vector.shape_cast %175 : vector<1x4x4xbf16> to vector<4x4xbf16>
    %177 = vector.shape_cast %176 : vector<4x4xbf16> to vector<1x4x4xbf16>
    %178 = vector.shape_cast %177 : vector<1x4x4xbf16> to vector<1x4x4xbf16>
    %179 = vector.broadcast %178 : vector<1x4x4xbf16> to vector<2x4x4xbf16>
    %cst_108 = arith.constant dense<0.000000e+00> : vector<2x4x256xf32>
    %180 = tpu.matmul %179, %174, %cst_108 {dimension_numbers = #tpu.dot_dimension_numbers<[2], [1], [1], [2], [0, 0, 0, 1, 1, 2], [0], [0]>} : vector<2x4x4xbf16>, vector<2x4x256xbf16>, vector<2x4x256xf32> -> vector<2x4x256xf32>
    %181 = arith.addf %171, %180 : vector<2x4x256xf32>
    %c0_109 = arith.constant 0 : index
    %c0_110 = arith.constant 0 : index
    %c1_111 = arith.constant 1 : index
    %c2_112 = arith.constant 2 : index
    %182 = vector.load %arg10[%c0_109, %c0_110, %c1_111, %c2_112] : memref<2x4x18x18xf32, #tpu.memory_space<vmem>>, vector<2x4x16x16xf32>
    %183 = vector.shape_cast %182 : vector<2x4x16x16xf32> to vector<2x4x256xf32>
    %184 = arith.truncf %183 : vector<2x4x256xf32> to vector<2x4x256xbf16>
    %185 = vector.extract_strided_slice %129 {offsets = [5, 0, 0], sizes = [1, 4, 4], strides = [1, 1, 1]} : vector<9x4x4xbf16> to vector<1x4x4xbf16>
    %186 = vector.shape_cast %185 : vector<1x4x4xbf16> to vector<4x4xbf16>
    %187 = vector.shape_cast %186 : vector<4x4xbf16> to vector<1x4x4xbf16>
    %188 = vector.shape_cast %187 : vector<1x4x4xbf16> to vector<1x4x4xbf16>
    %189 = vector.broadcast %188 : vector<1x4x4xbf16> to vector<2x4x4xbf16>
    %cst_113 = arith.constant dense<0.000000e+00> : vector<2x4x256xf32>
    %190 = tpu.matmul %189, %184, %cst_113 {dimension_numbers = #tpu.dot_dimension_numbers<[2], [1], [1], [2], [0, 0, 0, 1, 1, 2], [0], [0]>} : vector<2x4x4xbf16>, vector<2x4x256xbf16>, vector<2x4x256xf32> -> vector<2x4x256xf32>
    %191 = arith.addf %181, %190 : vector<2x4x256xf32>
    %c0_114 = arith.constant 0 : index
    %c0_115 = arith.constant 0 : index
    %c2_116 = arith.constant 2 : index
    %c0_117 = arith.constant 0 : index
    %192 = vector.load %arg10[%c0_114, %c0_115, %c2_116, %c0_117] : memref<2x4x18x18xf32, #tpu.memory_space<vmem>>, vector<2x4x16x16xf32>
    %193 = vector.shape_cast %192 : vector<2x4x16x16xf32> to vector<2x4x256xf32>
    %194 = arith.truncf %193 : vector<2x4x256xf32> to vector<2x4x256xbf16>
    %195 = vector.extract_strided_slice %129 {offsets = [6, 0, 0], sizes = [1, 4, 4], strides = [1, 1, 1]} : vector<9x4x4xbf16> to vector<1x4x4xbf16>
    %196 = vector.shape_cast %195 : vector<1x4x4xbf16> to vector<4x4xbf16>
    %197 = vector.shape_cast %196 : vector<4x4xbf16> to vector<1x4x4xbf16>
    %198 = vector.shape_cast %197 : vector<1x4x4xbf16> to vector<1x4x4xbf16>
    %199 = vector.broadcast %198 : vector<1x4x4xbf16> to vector<2x4x4xbf16>
    %cst_118 = arith.constant dense<0.000000e+00> : vector<2x4x256xf32>
    %200 = tpu.matmul %199, %194, %cst_118 {dimension_numbers = #tpu.dot_dimension_numbers<[2], [1], [1], [2], [0, 0, 0, 1, 1, 2], [0], [0]>} : vector<2x4x4xbf16>, vector<2x4x256xbf16>, vector<2x4x256xf32> -> vector<2x4x256xf32>
    %201 = arith.addf %191, %200 : vector<2x4x256xf32>
    %c0_119 = arith.constant 0 : index
    %c0_120 = arith.constant 0 : index
    %c2_121 = arith.constant 2 : index
    %c1_122 = arith.constant 1 : index
    %202 = vector.load %arg10[%c0_119, %c0_120, %c2_121, %c1_122] : memref<2x4x18x18xf32, #tpu.memory_space<vmem>>, vector<2x4x16x16xf32>
    %203 = vector.shape_cast %202 : vector<2x4x16x16xf32> to vector<2x4x256xf32>
    %204 = arith.truncf %203 : vector<2x4x256xf32> to vector<2x4x256xbf16>
    %205 = vector.extract_strided_slice %129 {offsets = [7, 0, 0], sizes = [1, 4, 4], strides = [1, 1, 1]} : vector<9x4x4xbf16> to vector<1x4x4xbf16>
    %206 = vector.shape_cast %205 : vector<1x4x4xbf16> to vector<4x4xbf16>
    %207 = vector.shape_cast %206 : vector<4x4xbf16> to vector<1x4x4xbf16>
    %208 = vector.shape_cast %207 : vector<1x4x4xbf16> to vector<1x4x4xbf16>
    %209 = vector.broadcast %208 : vector<1x4x4xbf16> to vector<2x4x4xbf16>
    %cst_123 = arith.constant dense<0.000000e+00> : vector<2x4x256xf32>
    %210 = tpu.matmul %209, %204, %cst_123 {dimension_numbers = #tpu.dot_dimension_numbers<[2], [1], [1], [2], [0, 0, 0, 1, 1, 2], [0], [0]>} : vector<2x4x4xbf16>, vector<2x4x256xbf16>, vector<2x4x256xf32> -> vector<2x4x256xf32>
    %211 = arith.addf %201, %210 : vector<2x4x256xf32>
    %c0_124 = arith.constant 0 : index
    %c0_125 = arith.constant 0 : index
    %c2_126 = arith.constant 2 : index
    %c2_127 = arith.constant 2 : index
    %212 = vector.load %arg10[%c0_124, %c0_125, %c2_126, %c2_127] : memref<2x4x18x18xf32, #tpu.memory_space<vmem>>, vector<2x4x16x16xf32>
    %213 = vector.shape_cast %212 : vector<2x4x16x16xf32> to vector<2x4x256xf32>
    %214 = arith.truncf %213 : vector<2x4x256xf32> to vector<2x4x256xbf16>
    %215 = vector.extract_strided_slice %129 {offsets = [8, 0, 0], sizes = [1, 4, 4], strides = [1, 1, 1]} : vector<9x4x4xbf16> to vector<1x4x4xbf16>
    %216 = vector.shape_cast %215 : vector<1x4x4xbf16> to vector<4x4xbf16>
    %217 = vector.shape_cast %216 : vector<4x4xbf16> to vector<1x4x4xbf16>
    %218 = vector.shape_cast %217 : vector<1x4x4xbf16> to vector<1x4x4xbf16>
    %219 = vector.broadcast %218 : vector<1x4x4xbf16> to vector<2x4x4xbf16>
    %cst_128 = arith.constant dense<0.000000e+00> : vector<2x4x256xf32>
    %220 = tpu.matmul %219, %214, %cst_128 {dimension_numbers = #tpu.dot_dimension_numbers<[2], [1], [1], [2], [0, 0, 0, 1, 1, 2], [0], [0]>} : vector<2x4x4xbf16>, vector<2x4x256xbf16>, vector<2x4x256xf32> -> vector<2x4x256xf32>
    %221 = arith.addf %211, %220 : vector<2x4x256xf32>
    %222 = vector.broadcast %130 : vector<1x4x1xf32> to vector<2x4x256xf32>
    %223 = arith.addf %221, %222 : vector<2x4x256xf32>
    %c0_129 = arith.constant 0 : index
    %c0_130 = arith.constant 0 : index
    %c0_131 = arith.constant 0 : index
    %224 = vector.load %arg7[%c0_129, %c0_130, %c0_131] : memref<1x4x1xf32, #tpu.memory_space<vmem>>, vector<1x4x1xf32>
    %c0_132 = arith.constant 0 : index
    %c0_133 = arith.constant 0 : index
    %c0_134 = arith.constant 0 : index
    %225 = vector.load %arg8[%c0_132, %c0_133, %c0_134] : memref<1x4x1xf32, #tpu.memory_space<vmem>>, vector<1x4x1xf32>
    %cst_135 = arith.constant dense<0.000000e+00> : vector<2x4xf32>
    %226 = vector.multi_reduction <add>, %223, %cst_135 [2] : vector<2x4x256xf32> to vector<2x4xf32>
    %227 = vector.shape_cast %226 : vector<2x4xf32> to vector<2x4x1xf32>
    %cst_136 = arith.constant dense<0.000000e+00> : vector<4x1xf32>
    %228 = vector.multi_reduction <add>, %227, %cst_136 [0] : vector<2x4x1xf32> to vector<4x1xf32>
    %229 = vector.shape_cast %228 : vector<4x1xf32> to vector<1x4x1xf32>
    %cst_137 = arith.constant 5.120000e+02 : f32
    %230 = vector.broadcast %cst_137 : f32 to vector<1x4x1xf32>
    %231 = arith.divf %229, %230 : vector<1x4x1xf32>
    %232 = vector.broadcast %231 : vector<1x4x1xf32> to vector<2x4x256xf32>
    %233 = arith.subf %223, %232 : vector<2x4x256xf32>
    %234 = arith.mulf %233, %233 : vector<2x4x256xf32>
    %cst_138 = arith.constant dense<0.000000e+00> : vector<2x4xf32>
    %235 = vector.multi_reduction <add>, %234, %cst_138 [2] : vector<2x4x256xf32> to vector<2x4xf32>
    %236 = vector.shape_cast %235 : vector<2x4xf32> to vector<2x4x1xf32>
    %cst_139 = arith.constant dense<0.000000e+00> : vector<4x1xf32>
    %237 = vector.multi_reduction <add>, %236, %cst_139 [0] : vector<2x4x1xf32> to vector<4x1xf32>
    %238 = vector.shape_cast %237 : vector<4x1xf32> to vector<1x4x1xf32>
    %cst_140 = arith.constant 5.120000e+02 : f32
    %239 = vector.broadcast %cst_140 : f32 to vector<1x4x1xf32>
    %240 = arith.divf %238, %239 : vector<1x4x1xf32>
    %cst_141 = arith.constant 9.99999974E-6 : f32
    %241 = vector.broadcast %cst_141 : f32 to vector<1x4x1xf32>
    %242 = arith.addf %240, %241 : vector<1x4x1xf32>
    %243 = math.rsqrt %242 : vector<1x4x1xf32>
    %244 = arith.mulf %224, %243 : vector<1x4x1xf32>
    %245 = vector.broadcast %244 : vector<1x4x1xf32> to vector<2x4x256xf32>
    %246 = arith.mulf %233, %245 : vector<2x4x256xf32>
    %247 = vector.broadcast %225 : vector<1x4x1xf32> to vector<2x4x256xf32>
    %248 = arith.addf %246, %247 : vector<2x4x256xf32>
    %249 = vector.shape_cast %248 : vector<2x4x256xf32> to vector<8x256xf32>
    %c0_142 = arith.constant 0 : index
    %c0_143 = arith.constant 0 : index
    %250 = vector.load %arg0[%c0_142, %c0_143] : memref<8x256xf32, #tpu.memory_space<vmem>>, vector<8x256xf32>
    %251 = arith.addf %249, %250 : vector<8x256xf32>
    %cst_144 = arith.constant 0.000000e+00 : f32
    %252 = vector.broadcast %cst_144 : f32 to vector<8x256xf32>
    %253 = arith.maximumf %251, %252 : vector<8x256xf32>
    %c0_145 = arith.constant 0 : index
    %c0_146 = arith.constant 0 : index
    %254 = vector.load %arg9[%c0_145, %c0_146] : memref<8x256xf32, #tpu.memory_space<vmem>>, vector<8x256xf32>
    tpu.vector_store %arg9[%c0_145, %c0_146], %253 {strides = array<i32>} : memref<8x256xf32, #tpu.memory_space<vmem>>, vector<8x256xf32>,
    return
  }
}

</mosaic_0001>

<bundles_post_ra>
// kernel: tpu_custom_call.1
= control target key start
LH: loop header
LB: loop body
LE: loop exit
PB: predicated region body
PF: predicated region fallthrough
CT: control target
= control target key end

     0   :  { %s12882_s11 = smov 80   ;;  %s12883_s12 = smov 112   ;;  %s19867_s0 = inlined_call_operand.vmem [shape: f32[8,256], index: 0, kind: input, shape index: {}]   ;;  %s19868_s1 = inlined_call_operand.vmem [shape: bf16[9,4,4], index: 1, kind: input, shape index: {}]   ;;  %s19869_s2 = inlined_call_operand.vmem [shape: f32[1,4,1], index: 2, kind: input, shape index: {}]   ;;  %s19870_s3 = inlined_call_operand.vmem [shape: f32[1,4,1], index: 3, kind: input, shape index: {}]   ;;  %s19871_s4 = inlined_call_operand.vmem [shape: f32[1,4,1], index: 4, kind: input, shape index: {}]   ;;  %s19872_s5 = inlined_call_operand.vmem [shape: bf16[9,4,4], index: 5, kind: input, shape index: {}]   ;;  %s19873_s6 = inlined_call_operand.vmem [shape: f32[1,4,1], index: 6, kind: input, shape index: {}]   ;;  %s19874_s7 = inlined_call_operand.vmem [shape: f32[1,4,1], index: 7, kind: input, shape index: {}]   ;;  %s19875_s8 = inlined_call_operand.vmem [shape: f32[1,4,1], index: 8, kind: input, shape index: {}]   ;;  %s19876_s9 = inlined_call_operand.hbm [shape: f32[8,256], index: 9, kind: output, shape index: {}]  }
   0x1   :  { %v12950_v0 = vld [vmem:[%s19867_s0] sm:$0xff] }
   0x2   :  { %69 = vrot.lane.b32.xlu1 %v12950_v0, %s12882_s11  ;;  %63 = vrot.lane.b32.xlu0 %v12950_v0, %s12883_s12 }
   0x3   :  { %14 = vsyncpa [#allocation4], 0  ;;  %s12884_s13 = smov 64   ;;  %s12885_s14 = smov 96   ;;  %v12967_v1 = vld [vmem:[%s19867_s0 + $0x8] sm:$0xff]  ;;  %v111_v6 = vlaneseq  ;;  %vm34_vm0 = vcmask 146432  }
   0x4   :  { %s12886_s15 = smov 32   ;;  %s12887_s16 = smov 48   ;;  %v12889_v4 = vmov 1983009808   ;;  %v12890_v12 = vmov 1934713408  }
   0x5   :  { %s12888_s19 = smov 16   ;;  %v109_v5 = vunpack.c.l.s4 %v12889_v4  ;;  %v112_v10 = vshrl.u32 %v111_v6, 7  ;;  %v173_v13 = vunpack.c.l.s4 %v12890_v12  ;;  %v19877_v21 = vmov 0.0   ;;  %s12892_s20 = smov 1  }
   0x6   :  { %72 = vrot.lane.b32.xlu1 %v12950_v0, %s12884_s13  ;;  %66 = vrot.lane.b32.xlu0 %v12950_v0, %s12885_s14  ;;  %35 = vst.msk [vmem:[#allocation2] sm:$0xff] %vm34_vm0, %v19877_v21  ;;  %36 = vst.msk [vmem:[#allocation2 + $0x8] sm:$0xff] %vm34_vm0, %v19877_v21  ;;  %vm37_vm1 = vcmask 140288   ;;  %vm442_vm2 = vcmask 138248   ;;  %s12893_s21 = smov 127   ;;  %s12894_s22 = smov 126  }
   0x7   :  { %v110_v9 = vunpack.c.0.s8 %v109_v5  ;;  %v174_v20 = vunpack.c.0.s8 %v173_v13  ;;  %39 = vst.msk [vmem:[#allocation2 + $0x18] sm:$0xff] %vm34_vm0, %v19877_v21  ;;  %40 = vst.msk [vmem:[#allocation2 + $0x20] sm:$0xff] %vm34_vm0, %v19877_v21  ;;  %vm869_vm3 = vcmask 130048   ;;  %vm872_vm4 = vcmask 261120  }
   0x8   :  { %42 = vst.msk [vmem:[#allocation2 + $0x30] sm:$0xff] %vm34_vm0, %v19877_v21  ;;  %43 = vst.msk [vmem:[#allocation2 + $0x38] sm:$0xff] %vm34_vm0, %v19877_v21  ;;  %vm875_vm5 = vcmask 392192   ;;  %vm878_vm6 = vcmask 523264   ;;  %vm881_vm7 = vcmask 654336   ;;  %vm884_vm8 = vcmask 785408  }
   0x9   :  { %v12995_v16 = vsub.s32 %v110_v9, %v112_v10  ;;  %45 = vst.msk [vmem:[#allocation2 + $0x48] sm:$0xff] %vm34_vm0, %v19877_v21  ;;  %46 = vst.msk [vmem:[#allocation2 + $0x50] sm:$0xff] %vm34_vm0, %v19877_v21  ;;  %v13041_v29 = vsub.s32 %v174_v20, %v112_v10  ;;  %vm887_vm9 = vcmask 916480   ;;  %vm1392_vm10 = vcmask 1041408  }
   0xa   :  { %78 = vrot.lane.b32.xlu1 %v12950_v0, %s12886_s15  ;;  %75 = vrot.lane.b32.xlu0 %v12950_v0, %s12887_s16  ;;  %48 = vst.msk [vmem:[#allocation2 + $0x60] sm:$0xff] %vm34_vm0, %v19877_v21  ;;  %49 = vst.msk [vmem:[#allocation2 + $0x68] sm:$0xff] %vm34_vm0, %v19877_v21  ;;  %vm1388_vm11 = vcmask 31744   ;;  %vm5646_vm12 = vcmask 1043456  }
   0xb   :  { %20306 = vst [vmem:[#allocation6_spill] sm:$0xff] %v12995_v16  ;;  %51 = vst.msk [vmem:[#allocation2 + $0x78] sm:$0xff] %vm34_vm0, %v19877_v21 }
   0xc   :  { %52 = vst.msk [vmem:[#allocation2 + $0x80] sm:$0xff] %vm34_vm0, %v19877_v21  ;;  %54 = vst.msk [vmem:[#allocation2 + $0x90] sm:$0xff] %vm34_vm0, %v19877_v21 }
   0xd   :  { %55 = vst.msk [vmem:[#allocation2 + $0x98] sm:$0xff] %vm34_vm0, %v19877_v21  ;;  %57 = vst.msk [vmem:[#allocation2 + $0xa8] sm:$0xff] %vm34_vm0, %v19877_v21 }
   0xe   :  { %85 = vrot.lane.b32.xlu1 %v12967_v1, %s12883_s12  ;;  %81 = vrot.lane.b32.xlu0 %v12950_v0, %s12888_s19  ;;  %58 = vst.msk [vmem:[#allocation2 + $0xb0] sm:$0xff] %vm34_vm0, %v19877_v21 }
   0xf   :  { %38 = vst.msk [vmem:[#allocation2 + $0x10] sm:$0x3] %vm37_vm1, %v19877_v21  ;;  %41 = vst.msk [vmem:[#allocation2 + $0x28] sm:$0x3] %vm37_vm1, %v19877_v21 }
  0x10   :  { %44 = vst.msk [vmem:[#allocation2 + $0x40] sm:$0x3] %vm37_vm1, %v19877_v21  ;;  %47 = vst.msk [vmem:[#allocation2 + $0x58] sm:$0x3] %vm37_vm1, %v19877_v21 }
  0x11   :  { %50 = vst.msk [vmem:[#allocation2 + $0x70] sm:$0x3] %vm37_vm1, %v19877_v21  ;;  %53 = vst.msk [vmem:[#allocation2 + $0x88] sm:$0x3] %vm37_vm1, %v19877_v21 }
  0x12   :  { %91 = vrot.lane.b32.xlu1 %v12967_v1, %s12882_s11  ;;  %88 = vrot.lane.b32.xlu0 %v12967_v1, %s12885_s14  ;;  %56 = vst.msk [vmem:[#allocation2 + $0xa0] sm:$0x3] %vm37_vm1, %v19877_v21  ;;  %59 = vst.msk [vmem:[#allocation2 + $0xb8] sm:$0x3] %vm37_vm1, %v19877_v21 }
  0x16   :  { %97 = vrot.lane.b32.xlu1 %v12967_v1, %s12887_s16  ;;  %94 = vrot.lane.b32.xlu0 %v12967_v1, %s12884_s13 }
  0x1a   :  { %103 = vrot.lane.b32.xlu1 %v12967_v1, %s12888_s19  ;;  %100 = vrot.lane.b32.xlu0 %v12967_v1, %s12886_s15 }
  0x74   :  { %v12985_v2 = vpop.permute.xlu1 %69  ;;  %v12987_v3 = vpop.permute.xlu0 %63 }
  0x75   :  { %v122_v17 = vcombine.low %v12987_v3, %v12985_v2  ;;  %v123_v47 = vcombine.high %v12987_v3, %v12985_v2 }
  0x77   :  { %v130_v24 = vrot.slane %v122_v17, %v12995_v16  ;;  %v137_v61 = vrot.slane %v123_v47, %v12995_v16 }
  0x78   :  { %v12989_v7 = vpop.permute.xlu1 %72  ;;  %v12991_v8 = vpop.permute.xlu0 %66 }
  0x79   :  { %v106_v11 = vcombine.low %v12950_v0, %v12991_v8  ;;  %v107_v42 = vcombine.high %v12950_v0, %v12991_v8 }
  0x7b   :  { %v13000_v18 = vrot.slane %v106_v11, %v12995_v16  ;;  %v121_v55 = vrot.slane %v107_v42, %v12995_v16 }
  0x7c   :  { %v79_v14 = vpop.permute.xlu1 %78  ;;  %v76_v15 = vpop.permute.xlu0 %75 }
  0x7d   :  { %v138_v19 = vcombine.low %v12989_v7, %v79_v14  ;;  %v170_v26 = vcombine.low %v13000_v18, %v130_v24  ;;  %v139_v43 = vcombine.high %v12989_v7, %v79_v14  ;;  %v171_v44 = vcombine.high %v13000_v18, %v130_v24 }
  0x7e   :  { %v186_v2 = vcombine.low %v121_v55, %v137_v61  ;;  %v187_v24 = vcombine.high %v121_v55, %v137_v61 }
  0x7f   :  { %v146_v27 = vrot.slane %v138_v19, %v12995_v16  ;;  %v178_v35 = vrot.slane %v170_v26, %v13041_v29  ;;  %v153_v56 = vrot.slane %v139_v43, %v12995_v16  ;;  %v185_v60 = vrot.slane %v171_v44, %v13041_v29 }
  0x80   :  { %v13035_v22 = vpop.permute.xlu1 %85  ;;  %v82_v23 = vpop.permute.xlu0 %81  ;;  %v194_v11 = vrot.slane %v186_v2, %v13041_v29 }
  0x81   :  { %v154_v25 = vcombine.low %v76_v15, %v82_v23  ;;  %v155_v37 = vcombine.high %v76_v15, %v82_v23 }
  0x83   :  { %v162_v28 = vrot.slane %v154_v25, %v12995_v16  ;;  %v169_v48 = vrot.slane %v155_v37, %v12995_v16 }
  0x84   :  { %v13043_v30 = vpop.permute.xlu1 %91  ;;  %v13045_v31 = vpop.permute.xlu0 %88 }
  0x85   :  { %v202_v32 = vcombine.low %v146_v27, %v162_v28  ;;  %v258_v33 = vcombine.low %v13035_v22, %v13043_v30  ;;  %v242_v34 = vcombine.low %v12967_v1, %v13045_v31  ;;  %v203_v40 = vcombine.high %v146_v27, %v162_v28 }
  0x86   :  { %v218_v62 = vcombine.low %v153_v56, %v169_v48  ;;  %v259_v12 = vcombine.high %v13035_v22, %v13043_v30  ;;  %v243_v13 = vcombine.high %v12967_v1, %v13045_v31  ;;  %v219_v15 = vcombine.high %v153_v56, %v169_v48 }
  0x87   :  { %v210_v36 = vrot.slane %v202_v32, %v13041_v29  ;;  %v266_v45 = vrot.slane %v258_v33, %v12995_v16  ;;  %v250_v46 = vrot.slane %v242_v34, %v12995_v16  ;;  %v217_v54 = vrot.slane %v203_v40, %v13041_v29 }
  0x88   :  { %v98_v38 = vpop.permute.xlu1 %97  ;;  %v95_v39 = vpop.permute.xlu0 %94  ;;  %v226_v6 = vrot.slane %v218_v62, %v13041_v29  ;;  %v273_v22 = vrot.slane %v259_v12, %v12995_v16  ;;  %v257_v25 = vrot.slane %v243_v13, %v12995_v16  ;;  %v233_v30 = vrot.slane %v219_v15, %v13041_v29 }
  0x89   :  { %v234_v41 = vcombine.low %v178_v35, %v210_v36  ;;  %v235_v53 = vcombine.high %v178_v35, %v210_v36  ;;  %v306_v57 = vcombine.low %v250_v46, %v266_v45  ;;  %v236_v0 = vcombine.low %v185_v60, %v217_v54 }
  0x8a   :  { %v237_v5 = vcombine.high %v185_v60, %v217_v54  ;;  %v307_v14 = vcombine.high %v250_v46, %v266_v45  ;;  %v238_v17 = vcombine.low %v194_v11, %v226_v6  ;;  %v239_v27 = vcombine.high %v194_v11, %v226_v6 }
  0x8b   :  { %394 = vrot.lane.b32.xlu0 %v234_v41, %s12892_s20  ;;  %v314_v3 = vrot.slane %v306_v57, %v13041_v29  ;;  %v322_v31 = vcombine.low %v257_v25, %v273_v22  ;;  %v201_v32 = vrot.slane %v187_v24, %v13041_v29  ;;  %v323_v40 = vcombine.high %v257_v25, %v273_v22 }
  0x8c   :  { %v104_v49 = vpop.permute.xlu1 %103  ;;  %v101_v50 = vpop.permute.xlu0 %100  ;;  %v321_v1 = vrot.slane %v307_v14, %v13041_v29 }
  0x8d   :  { %v290_v51 = vcombine.low %v98_v38, %v104_v49  ;;  %v274_v52 = vcombine.low %v95_v39, %v101_v50  ;;  %v291_v7 = vcombine.high %v98_v38, %v104_v49  ;;  %v275_v8 = vcombine.high %v95_v39, %v101_v50 }
  0x8e   :  { %v240_v33 = vcombine.low %v201_v32, %v233_v30  ;;  %v330_v36 = vrot.slane %v322_v31, %v13041_v29  ;;  %v241_v38 = vcombine.high %v201_v32, %v233_v30  ;;  %v337_v43 = vrot.slane %v323_v40, %v13041_v29 }
  0x8f   :  { %v298_v58 = vrot.slane %v290_v51, %v12995_v16  ;;  %v282_v59 = vrot.slane %v274_v52, %v12995_v16  ;;  %398 = vrot.lane.b32.xlu0 %v235_v53, %s12892_s20  ;;  %v305_v18 = vrot.slane %v291_v7, %v12995_v16  ;;  %v289_v19 = vrot.slane %v275_v8, %v12995_v16 }
  0x91   :  { %v338_v63 = vcombine.low %v282_v59, %v298_v58  ;;  %v339_v9 = vcombine.high %v282_v59, %v298_v58  ;;  %v354_v26 = vcombine.low %v289_v19, %v305_v18  ;;  %v355_v37 = vcombine.high %v289_v19, %v305_v18 }
  0x93   :  { %402 = vrot.lane.b32.xlu0 %v236_v0, %s12892_s20  ;;  %v346_v4 = vrot.slane %v338_v63, %v13041_v29  ;;  %v353_v23 = vrot.slane %v339_v9, %v13041_v29  ;;  %v362_v35 = vrot.slane %v354_v26, %v13041_v29  ;;  %v369_v42 = vrot.slane %v355_v37, %v13041_v29 }
  0x95   :  { %v370_v10 = vcombine.low %v314_v3, %v346_v4  ;;  %v371_v20 = vcombine.high %v314_v3, %v346_v4  ;;  %v372_v28 = vcombine.low %v321_v1, %v353_v23  ;;  %v373_v34 = vcombine.high %v321_v1, %v353_v23 }
  0x96   :  { %v374_v39 = vcombine.low %v330_v36, %v362_v35  ;;  %v375_v41 = vcombine.high %v330_v36, %v362_v35  ;;  %v376_v44 = vcombine.low %v337_v43, %v369_v42  ;;  %v377_v45 = vcombine.high %v337_v43, %v369_v42 }
  0x97   :  { %406 = vrot.lane.b32.xlu0 %v237_v5, %s12892_s20  ;;  %396 = vrot.lane.b32.xlu1 %v370_v10, %s12892_s20 }
  0x9b   :  { %410 = vrot.lane.b32.xlu0 %v238_v17, %s12892_s20  ;;  %400 = vrot.lane.b32.xlu1 %v371_v20, %s12892_s20 }
  0x9f   :  { %414 = vrot.lane.b32.xlu0 %v239_v27, %s12892_s20  ;;  %404 = vrot.lane.b32.xlu1 %v372_v28, %s12892_s20 }
  0xa3   :  { %418 = vrot.lane.b32.xlu0 %v240_v33, %s12892_s20  ;;  %408 = vrot.lane.b32.xlu1 %v373_v34, %s12892_s20 }
  0xa7   :  { %422 = vrot.lane.b32.xlu0 %v241_v38, %s12892_s20  ;;  %412 = vrot.lane.b32.xlu1 %v374_v39, %s12892_s20 }
  0xab   :  { %416 = vrot.lane.b32.xlu1 %v375_v41, %s12892_s20 }
  0xaf   :  { %420 = vrot.lane.b32.xlu1 %v376_v44, %s12892_s20 }
  0xb3   :  { %424 = vrot.lane.b32.xlu1 %v377_v45, %s12892_s20 }
  0xfd   :  { %v395_v46 = vpop.permute.xlu0 %394 }
  0xfe   :  { %443 = vst.msk [vmem:[#allocation2 + $0x1] sm:$0xff] %vm442_vm2, %v395_v46 }
 0x101   :  { %v399_v47 = vpop.permute.xlu0 %398 }
 0x102   :  { %445 = vst.msk [vmem:[#allocation2 + $0x19] sm:$0xff] %vm442_vm2, %v399_v47 }
 0x105   :  { %v403_v48 = vpop.permute.xlu0 %402  ;;  %v13115_v49 = vld [vmem:[#allocation2] sm:$0xff] }
 0x106   :  { %447 = vst.msk [vmem:[#allocation2 + $0x31] sm:$0xff] %vm442_vm2, %v403_v48  ;;  %924 = vrot.lane.b32.xlu0 %v13115_v49, %s12893_s21  ;;  %v13221_v15 = vld [vmem:[#allocation2 + $0x1] sm:$0xff] }
 0x109   :  { %v397_v50 = vpop.permute.xlu1 %396  ;;  %v407_v51 = vpop.permute.xlu0 %406  ;;  %v13120_v52 = vld [vmem:[#allocation2 + $0x18] sm:$0xff] }
 0x10a   :  { %444 = vst.msk [vmem:[#allocation2 + $0x9] sm:$0xff] %vm442_vm2, %v397_v50  ;;  %449 = vst.msk [vmem:[#allocation2 + $0x49] sm:$0xff] %vm442_vm2, %v407_v51  ;;  %928 = vrot.lane.b32.xlu0 %v13120_v52, %s12893_s21  ;;  %v13227_v17 = vld [vmem:[#allocation2 + $0x19] sm:$0xff] }
 0x10d   :  { %v401_v53 = vpop.permute.xlu1 %400  ;;  %v411_v54 = vpop.permute.xlu0 %410  ;;  %v13126_v55 = vld [vmem:[#allocation2 + $0x30] sm:$0xff] }
 0x10e   :  { %446 = vst.msk [vmem:[#allocation2 + $0x21] sm:$0xff] %vm442_vm2, %v401_v53  ;;  %451 = vst.msk [vmem:[#allocation2 + $0x61] sm:$0xff] %vm442_vm2, %v411_v54  ;;  %932 = vrot.lane.b32.xlu0 %v13126_v55, %s12893_s21  ;;  %v13233_v18 = vld [vmem:[#allocation2 + $0x31] sm:$0xff] }
 0x111   :  { %v405_v56 = vpop.permute.xlu1 %404  ;;  %v415_v57 = vpop.permute.xlu0 %414  ;;  %v13132_v58 = vld [vmem:[#allocation2 + $0x8] sm:$0xff] }
 0x112   :  { %v13134_v59 = vld [vmem:[#allocation2 + $0x48] sm:$0xff]  ;;  %448 = vst.msk [vmem:[#allocation2 + $0x39] sm:$0xff] %vm442_vm2, %v405_v56  ;;  %453 = vst.msk [vmem:[#allocation2 + $0x79] sm:$0xff] %vm442_vm2, %v415_v57  ;;  %926 = vrot.lane.b32.xlu1 %v13132_v58, %s12893_s21 }
 0x113   :  { %936 = vrot.lane.b32.xlu0 %v13134_v59, %s12893_s21  ;;  %v13237_v19 = vld [vmem:[#allocation2 + $0x9] sm:$0xff] }
 0x114   :  { %v13241_v20 = vld [vmem:[#allocation2 + $0x49] sm:$0xff] }
 0x115   :  { %v409_v60 = vpop.permute.xlu1 %408  ;;  %v419_v61 = vpop.permute.xlu0 %418  ;;  %v13142_v62 = vld [vmem:[#allocation2 + $0x20] sm:$0xff]  ;;  %v13352_v47 = vld [vmem:[#allocation2 + $0xa] sm:$0xff] }
 0x116   :  { %v13144_v63 = vld [vmem:[#allocation2 + $0x60] sm:$0xff]  ;;  %450 = vst.msk [vmem:[#allocation2 + $0x51] sm:$0xff] %vm442_vm2, %v409_v60  ;;  %455 = vst.msk [vmem:[#allocation2 + $0x91] sm:$0xff] %vm442_vm2, %v419_v61  ;;  %930 = vrot.lane.b32.xlu1 %v13142_v62, %s12893_s21 }
 0x117   :  { %940 = vrot.lane.b32.xlu0 %v13144_v63, %s12893_s21  ;;  %v13245_v23 = vld [vmem:[#allocation2 + $0x21] sm:$0xff] }
 0x118   :  { %v13249_v24 = vld [vmem:[#allocation2 + $0x61] sm:$0xff] }
 0x119   :  { %v413_v0 = vpop.permute.xlu1 %412  ;;  %v423_v2 = vpop.permute.xlu0 %422  ;;  %v13152_v3 = vld [vmem:[#allocation2 + $0x38] sm:$0xff]  ;;  %v4441_v38 = vld [vmem:[#allocation2 + $0x2] sm:$0xff] }
 0x11a   :  { %v13154_v4 = vld [vmem:[#allocation2 + $0x78] sm:$0xff]  ;;  %452 = vst.msk [vmem:[#allocation2 + $0x69] sm:$0xff] %vm442_vm2, %v413_v0  ;;  %457 = vst.msk [vmem:[#allocation2 + $0xa9] sm:$0xff] %vm442_vm2, %v423_v2  ;;  %934 = vrot.lane.b32.xlu1 %v13152_v3, %s12893_s21  ;;  %v13364_v53 = vld [vmem:[#allocation2 + $0x22] sm:$0xff] }
 0x11b   :  { %944 = vrot.lane.b32.xlu0 %v13154_v4, %s12893_s21  ;;  %v13253_v22 = vld [vmem:[#allocation2 + $0x39] sm:$0xff] }
 0x11c   :  { %v13257_v25 = vld [vmem:[#allocation2 + $0x79] sm:$0xff] }
 0x11d   :  { %v417_v5 = vpop.permute.xlu1 %416  ;;  %v13162_v6 = vld [vmem:[#allocation2 + $0x50] sm:$0xff]  ;;  %v13334_v41 = vld [vmem:[#allocation2 + $0x1a] sm:$0xff] }
 0x11e   :  { %v13164_v7 = vld [vmem:[#allocation2 + $0x90] sm:$0xff]  ;;  %454 = vst.msk [vmem:[#allocation2 + $0x81] sm:$0xff] %vm442_vm2, %v417_v5  ;;  %938 = vrot.lane.b32.xlu1 %v13162_v6, %s12893_s21  ;;  %v13376_v60 = vld [vmem:[#allocation2 + $0x3a] sm:$0xff] }
 0x11f   :  { %948 = vrot.lane.b32.xlu0 %v13164_v7, %s12893_s21  ;;  %v13261_v1 = vld [vmem:[#allocation2 + $0x51] sm:$0xff] }
 0x120   :  { %v13265_v26 = vld [vmem:[#allocation2 + $0x91] sm:$0xff] }
 0x121   :  { %v421_v8 = vpop.permute.xlu1 %420  ;;  %v13171_v9 = vld [vmem:[#allocation2 + $0x68] sm:$0xff]  ;;  %v13344_v44 = vld [vmem:[#allocation2 + $0x32] sm:$0xff] }
 0x122   :  { %v13173_v10 = vld [vmem:[#allocation2 + $0xa8] sm:$0xff]  ;;  %456 = vst.msk [vmem:[#allocation2 + $0x99] sm:$0xff] %vm442_vm2, %v421_v8  ;;  %942 = vrot.lane.b32.xlu1 %v13171_v9, %s12893_s21  ;;  %v13388_v5 = vld [vmem:[#allocation2 + $0x52] sm:$0xff] }
 0x123   :  { %952 = vrot.lane.b32.xlu0 %v13173_v10, %s12893_s21  ;;  %v13269_v27 = vld [vmem:[#allocation2 + $0x69] sm:$0xff] }
 0x124   :  { %v13273_v28 = vld [vmem:[#allocation2 + $0xa9] sm:$0xff] }
 0x125   :  { %v425_v11 = vpop.permute.xlu1 %424  ;;  %v13180_v12 = vld [vmem:[#allocation2 + $0x80] sm:$0xff]  ;;  %v13356_v48 = vld [vmem:[#allocation2 + $0x4a] sm:$0xff] }
 0x126   :  { %458 = vst.msk [vmem:[#allocation2 + $0xb1] sm:$0xff] %vm442_vm2, %v425_v11  ;;  %946 = vrot.lane.b32.xlu1 %v13180_v12, %s12893_s21  ;;  %v13277_v30 = vld [vmem:[#allocation2 + $0x81] sm:$0xff] }
 0x127   :  { %1616 = vrot.lane.b32.xlu0 %v13115_v49, %s12894_s22  ;;  %v13368_v54 = vld [vmem:[#allocation2 + $0x62] sm:$0xff]  ;;  %v13380_v61 = vld [vmem:[#allocation2 + $0x7a] sm:$0xff] }
 0x129   :  { %v13187_v13 = vld [vmem:[#allocation2 + $0x98] sm:$0xff] }
 0x12a   :  { %950 = vrot.lane.b32.xlu1 %v13187_v13, %s12893_s21  ;;  %v13283_v31 = vld [vmem:[#allocation2 + $0x99] sm:$0xff] }
 0x12b   :  { %1620 = vrot.lane.b32.xlu0 %v13120_v52, %s12894_s22  ;;  %v13392_v8 = vld [vmem:[#allocation2 + $0x92] sm:$0xff] }
 0x12d   :  { %v13193_v14 = vld [vmem:[#allocation2 + $0xb0] sm:$0xff] }
 0x12e   :  { %954 = vrot.lane.b32.xlu1 %v13193_v14, %s12893_s21  ;;  %v13289_v32 = vld [vmem:[#allocation2 + $0xb1] sm:$0xff]  ;;  %v705_v21 = vcombine.low %v13180_v12, %v13193_v14 }
 0x12f   :  { %1624 = vrot.lane.b32.xlu0 %v13126_v55, %s12894_s22 }
 0x132   :  { %1618 = vrot.lane.b32.xlu1 %v13132_v58, %s12894_s22 }
 0x133   :  { %1628 = vrot.lane.b32.xlu0 %v13134_v59, %s12894_s22 }
 0x136   :  { %1622 = vrot.lane.b32.xlu1 %v13142_v62, %s12894_s22 }
 0x137   :  { %1632 = vrot.lane.b32.xlu0 %v13144_v63, %s12894_s22 }
 0x13a   :  { %1626 = vrot.lane.b32.xlu1 %v13152_v3, %s12894_s22 }
 0x13b   :  { %1636 = vrot.lane.b32.xlu0 %v13154_v4, %s12894_s22 }
 0x13e   :  { %1630 = vrot.lane.b32.xlu1 %v13162_v6, %s12894_s22 }
 0x13f   :  { %1640 = vrot.lane.b32.xlu0 %v13164_v7, %s12894_s22 }
 0x142   :  { %1634 = vrot.lane.b32.xlu1 %v13171_v9, %s12894_s22 }
 0x143   :  { %1644 = vrot.lane.b32.xlu0 %v13173_v10, %s12894_s22 }
 0x146   :  { %1638 = vrot.lane.b32.xlu1 %v13180_v12, %s12894_s22 }
 0x147   :  { %2746 = vrot.lane.b32.xlu0 %v13221_v15, %s12893_s21 }
 0x14a   :  { %1642 = vrot.lane.b32.xlu1 %v13187_v13, %s12894_s22 }
 0x14b   :  { %2750 = vrot.lane.b32.xlu0 %v13227_v17, %s12893_s21 }
 0x14e   :  { %1646 = vrot.lane.b32.xlu1 %v13193_v14, %s12894_s22 }
 0x14f   :  { %2754 = vrot.lane.b32.xlu0 %v13233_v18, %s12893_s21 }
 0x152   :  { %2748 = vrot.lane.b32.xlu1 %v13237_v19, %s12893_s21 }
 0x153   :  { %2758 = vrot.lane.b32.xlu0 %v13241_v20, %s12893_s21 }
 0x156   :  { %2752 = vrot.lane.b32.xlu1 %v13245_v23, %s12893_s21 }
 0x157   :  { %2762 = vrot.lane.b32.xlu0 %v13249_v24, %s12893_s21 }
 0x15a   :  { %2756 = vrot.lane.b32.xlu1 %v13253_v22, %s12893_s21 }
 0x15b   :  { %2766 = vrot.lane.b32.xlu0 %v13257_v25, %s12893_s21 }
 0x15e   :  { %2760 = vrot.lane.b32.xlu1 %v13261_v1, %s12893_s21 }
 0x15f   :  { %2770 = vrot.lane.b32.xlu0 %v13265_v26, %s12893_s21 }
 0x162   :  { %2764 = vrot.lane.b32.xlu1 %v13269_v27, %s12893_s21 }
 0x163   :  { %2774 = vrot.lane.b32.xlu0 %v13273_v28, %s12893_s21 }
 0x166   :  { %2768 = vrot.lane.b32.xlu1 %v13277_v30, %s12893_s21 }
 0x167   :  { %3343 = vrot.lane.b32.xlu0 %v13221_v15, %s12894_s22 }
 0x16a   :  { %2772 = vrot.lane.b32.xlu1 %v13283_v31, %s12893_s21 }
 0x16b   :  { %3347 = vrot.lane.b32.xlu0 %v13227_v17, %s12894_s22 }
 0x16e   :  { %2776 = vrot.lane.b32.xlu1 %v13289_v32, %s12893_s21 }
 0x16f   :  { %3351 = vrot.lane.b32.xlu0 %v13233_v18, %s12894_s22 }
 0x172   :  { %3345 = vrot.lane.b32.xlu1 %v13237_v19, %s12894_s22 }
 0x173   :  { %3355 = vrot.lane.b32.xlu0 %v13241_v20, %s12894_s22 }
 0x176   :  { %3349 = vrot.lane.b32.xlu1 %v13245_v23, %s12894_s22 }
 0x177   :  { %3359 = vrot.lane.b32.xlu0 %v13249_v24, %s12894_s22 }
 0x178   :  { %v13303_v33 = vpop.permute.xlu0 %924 }
 0x179   :  { %20307 = vst [vmem:[#allocation7_spill] sm:$0xff] %v13303_v33  ;;  %v13422_v33 = vld [vmem:[#allocation2 + $0x82] sm:$0xff] }
 0x17a   :  { %3353 = vrot.lane.b32.xlu1 %v13253_v22, %s12894_s22 }
 0x17b   :  { %3363 = vrot.lane.b32.xlu0 %v13257_v25, %s12894_s22 }
 0x17c   :  { %v13309_v34 = vpop.permute.xlu0 %928 }
 0x17d   :  { %20308 = vst [vmem:[#allocation8_spill] sm:$0xff] %v13309_v34  ;;  %v570_v34 = vcombine.high %v13142_v62, %v13162_v6 }
 0x17e   :  { %3357 = vrot.lane.b32.xlu1 %v13261_v1, %s12894_s22 }
 0x17f   :  { %3367 = vrot.lane.b32.xlu0 %v13265_v26, %s12894_s22 }
 0x180   :  { %v13315_v35 = vpop.permute.xlu0 %932 }
 0x181   :  { %20309 = vst [vmem:[#allocation9_spill] sm:$0xff] %v13315_v35  ;;  %v13425_v35 = vrot.slane %v705_v21, %v12995_v16  ;;  %v554_v21 = vcombine.high %v13132_v58, %v13152_v3 }
 0x182   :  { %3361 = vrot.lane.b32.xlu1 %v13269_v27, %s12894_s22 }
 0x183   :  { %3371 = vrot.lane.b32.xlu0 %v13273_v28, %s12894_s22 }
 0x184   :  { %v13321_v36 = vpop.permute.xlu1 %926 }
 0x185   :  { %20310 = vst [vmem:[#allocation10_spill] sm:$0xff] %v13321_v36  ;;  %v13323_v37 = vpop.permute.xlu0 %936  ;;  %v706_v36 = vcombine.high %v13180_v12, %v13193_v14 }
 0x186   :  { %20311 = vst [vmem:[#allocation11_spill] sm:$0xff] %v13323_v37  ;;  %3365 = vrot.lane.b32.xlu1 %v13277_v30, %s12894_s22  ;;  %v637_v37 = vcombine.low %v13154_v4, %v13173_v10 }
 0x187   :  { %4473 = vrot.lane.b32.xlu0 %v4441_v38, %s12893_s21 }
 0x188   :  { %v13328_v39 = vpop.permute.xlu1 %930 }
 0x189   :  { %20312 = vst [vmem:[#allocation12_spill] sm:$0xff] %v13328_v39  ;;  %v13330_v40 = vpop.permute.xlu0 %940  ;;  %v568_v39 = vrot.slane %v554_v21, %v12995_v16  ;;  %v638_v21 = vcombine.high %v13154_v4, %v13173_v10 }
 0x18a   :  { %20313 = vst [vmem:[#allocation13_spill] sm:$0xff] %v13330_v40  ;;  %3369 = vrot.lane.b32.xlu1 %v13283_v31, %s12894_s22  ;;  %v13402_v40 = vld [vmem:[#allocation2 + $0x6a] sm:$0xff] }
 0x18b   :  { %4477 = vrot.lane.b32.xlu0 %v13334_v41, %s12893_s21 }
 0x18c   :  { %v13338_v42 = vpop.permute.xlu1 %934 }
 0x18d   :  { %20314 = vst [vmem:[#allocation14_spill] sm:$0xff] %v13338_v42  ;;  %v13340_v43 = vpop.permute.xlu0 %944 }
 0x18e   :  { %20315 = vst [vmem:[#allocation15_spill] sm:$0xff] %v13340_v43  ;;  %3373 = vrot.lane.b32.xlu1 %v13289_v32, %s12894_s22  ;;  %v689_v43 = vcombine.low %v13171_v9, %v13187_v13 }
 0x18f   :  { %4481 = vrot.lane.b32.xlu0 %v13344_v44, %s12893_s21 }
 0x190   :  { %v13348_v45 = vpop.permute.xlu1 %938  ;;  %v13438_v14 = vrot.slane %v689_v43, %v12995_v16 }
 0x191   :  { %20316 = vst [vmem:[#allocation16_spill] sm:$0xff] %v13348_v45  ;;  %v13350_v46 = vpop.permute.xlu0 %948 }
 0x192   :  { %20317 = vst [vmem:[#allocation17_spill] sm:$0xff] %v13350_v46  ;;  %4475 = vrot.lane.b32.xlu1 %v13352_v47, %s12893_s21  ;;  %v569_v46 = vcombine.low %v13142_v62, %v13162_v6  ;;  %v13448_v6 = vld [vmem:[#allocation2 + $0x9a] sm:$0xff] }
 0x193   :  { %4485 = vrot.lane.b32.xlu0 %v13356_v48, %s12893_s21 }
 0x194   :  { %v13360_v50 = vpop.permute.xlu1 %942  ;;  %v13435_v12 = vrot.slane %v569_v46, %v12995_v16  ;;  %v584_v46 = vrot.slane %v570_v34, %v12995_v16 }
 0x195   :  { %20318 = vst [vmem:[#allocation18_spill] sm:$0xff] %v13360_v50  ;;  %v13362_v51 = vpop.permute.xlu0 %952 }
 0x196   :  { %20319 = vst [vmem:[#allocation19_spill] sm:$0xff] %v13362_v51  ;;  %4479 = vrot.lane.b32.xlu1 %v13364_v53, %s12893_s21 }
 0x197   :  { %4489 = vrot.lane.b32.xlu0 %v13368_v54, %s12893_s21 }
 0x198   :  { %v13372_v56 = vpop.permute.xlu1 %946 }
 0x199   :  { %20320 = vst [vmem:[#allocation20_spill] sm:$0xff] %v13372_v56  ;;  %v13374_v57 = vpop.permute.xlu0 %1616 }
 0x19a   :  { %20321 = vst [vmem:[#allocation21_spill] sm:$0xff] %v13374_v57  ;;  %4483 = vrot.lane.b32.xlu1 %v13376_v60, %s12893_s21 }
 0x19b   :  { %4493 = vrot.lane.b32.xlu0 %v13380_v61, %s12893_s21 }
 0x19c   :  { %v13384_v0 = vpop.permute.xlu1 %950 }
 0x19d   :  { %20322 = vst [vmem:[#allocation22_spill] sm:$0xff] %v13384_v0  ;;  %v13386_v2 = vpop.permute.xlu0 %1620  ;;  %v13475_v0 = vld [vmem:[#allocation2 + $0xb2] sm:$0xff] }
 0x19e   :  { %20323 = vst [vmem:[#allocation23_spill] sm:$0xff] %v13386_v2  ;;  %4487 = vrot.lane.b32.xlu1 %v13388_v5, %s12893_s21  ;;  %v13406_v2 = vld [vmem:[#allocation2 + $0xaa] sm:$0xff] }
 0x19f   :  { %4497 = vrot.lane.b32.xlu0 %v13392_v8, %s12893_s21 }
 0x1a0   :  { %v13396_v11 = vpop.permute.xlu1 %954 }
 0x1a1   :  { %20324 = vst [vmem:[#allocation24_spill] sm:$0xff] %v13396_v11  ;;  %v13400_v57 = vpop.permute.xlu0 %1624 }
 0x1a2   :  { %20325 = vst [vmem:[#allocation25_spill] sm:$0xff] %v13400_v57  ;;  %4491 = vrot.lane.b32.xlu1 %v13402_v40, %s12893_s21  ;;  %v553_v57 = vcombine.low %v13132_v58, %v13152_v3  ;;  %v501_v58 = vcombine.low %v13120_v52, %v13134_v59  ;;  %v621_v3 = vcombine.low %v13144_v63, %v13164_v7 }
 0x1a3   :  { %4501 = vrot.lane.b32.xlu0 %v13406_v2, %s12893_s21 }
 0x1a4   :  { %v13414_v51 = vpop.permute.xlu1 %1618  ;;  %v509_v34 = vrot.slane %v501_v58, %v12995_v16 }
 0x1a5   :  { %20326 = vst [vmem:[#allocation26_spill] sm:$0xff] %v13414_v51  ;;  %v13420_v42 = vpop.permute.xlu0 %1628  ;;  %v690_v51 = vcombine.high %v13171_v9, %v13187_v13  ;;  %v13451_v9 = vrot.slane %v553_v57, %v12995_v16  ;;  %v722_v13 = vcombine.high %v13438_v14, %v13425_v35 }
 0x1a6   :  { %20327 = vst [vmem:[#allocation27_spill] sm:$0xff] %v13420_v42  ;;  %4495 = vrot.lane.b32.xlu1 %v13422_v33, %s12893_s21 }
 0x1a7   :  { %5070 = vrot.lane.b32.xlu0 %v4441_v38, %s12894_s22  ;;  %v720_v38 = vrot.slane %v706_v36, %v12995_v16  ;;  %v586_v43 = vcombine.high %v13451_v9, %v13435_v12  ;;  %v704_v57 = vrot.slane %v690_v51, %v12995_v16  ;;  %v485_v36 = vcombine.low %v13115_v49, %v13126_v55 }
 0x1a8   :  { %v13442_v42 = vpop.permute.xlu1 %1622  ;;  %v629_v51 = vrot.slane %v621_v3, %v12995_v16 }
 0x1a9   :  { %20328 = vst [vmem:[#allocation28_spill] sm:$0xff] %v13442_v42  ;;  %v13446_v62 = vpop.permute.xlu0 %1632  ;;  %v737_v45 = vcombine.low %v704_v57, %v720_v38 }
 0x1aa   :  { %20329 = vst [vmem:[#allocation29_spill] sm:$0xff] %v13446_v62  ;;  %4499 = vrot.lane.b32.xlu1 %v13448_v6, %s12893_s21  ;;  %v645_v62 = vrot.slane %v637_v37, %v12995_v16  ;;  %v13488_v37 = vrot.slane %v586_v43, %v13041_v29  ;;  %v502_v43 = vcombine.high %v13120_v52, %v13134_v59 }
 0x1ab   :  { %5074 = vrot.lane.b32.xlu0 %v13334_v41, %s12894_s22  ;;  %v13478_v41 = vrot.slane %v722_v13, %v13041_v29  ;;  %v493_v13 = vrot.slane %v485_v36, %v12995_v16  ;;  %v13500_v3 = vrot.slane %v737_v45, %v13041_v29  ;;  %v622_v36 = vcombine.high %v13144_v63, %v13164_v7 }
 0x1ac   :  { %v13470_v42 = vpop.permute.xlu1 %1626  ;;  %v653_v56 = vcombine.low %v629_v51, %v645_v62  ;;  %v486_v45 = vcombine.high %v13115_v49, %v13126_v55  ;;  %v654_v52 = vcombine.high %v629_v51, %v645_v62 }
 0x1ad   :  { %20330 = vst [vmem:[#allocation30_spill] sm:$0xff] %v13470_v42  ;;  %v13473_v50 = vpop.permute.xlu0 %1636  ;;  %v601_v42 = vcombine.low %v568_v39, %v584_v46  ;;  %v11528_v58 = vpack.i.bf16 %v13478_v41, %v13488_v37  ;;  %v517_v4 = vcombine.low %v493_v13, %v509_v34  ;;  %v636_v49 = vrot.slane %v622_v36, %v12995_v16 }
 0x1ae   :  { %20331 = vst [vmem:[#allocation31_spill] sm:$0xff] %v13473_v50  ;;  %4503 = vrot.lane.b32.xlu1 %v13475_v0, %s12893_s21  ;;  %v518_v55 = vcombine.high %v493_v13, %v509_v34  ;;  %v668_v51 = vrot.slane %v654_v52, %v13041_v29  ;;  %v20337_v34 = vmov 0.0   ;;  %v2213_v36 = vcombine.low %v13227_v17, %v13241_v20 }
 0x1af   :  { %5078 = vrot.lane.b32.xlu0 %v13344_v44, %s12894_s22  ;;  %v738_v44 = vcombine.high %v704_v57, %v720_v38  ;;  %v13510_v10 = vrot.slane %v601_v42, %v13041_v29  ;;  %v652_v38 = vrot.slane %v638_v21, %v12995_v16  ;;  %v13525_v42 = vrot.slane %v653_v56, %v13041_v29 }
 0x1b0   :  { %v13493_v50 = vpop.permute.xlu1 %1630  ;;  %v13536_v62 = vrot.slane %v517_v4, %v13041_v29 }
 0x1b1   :  { %20332 = vst [vmem:[#allocation32_spill] sm:$0xff] %v13493_v50  ;;  %v13495_v11 = vpop.permute.xlu0 %1640  ;;  %v602_v50 = vcombine.high %v568_v39, %v584_v46  ;;  %v11533_v63 = vpack.i.bf16 %v13500_v3, %v13510_v10  ;;  %v13522_v7 = vrot.slane %v738_v44, %v13041_v29  ;;  %20334 = vst [vmem:[#allocation34_spill] sm:$0xff] %v13525_v42 }
 0x1b2   :  { %5072 = vrot.lane.b32.xlu1 %v13352_v47, %s12894_s22  ;;  %v516_v39 = vrot.slane %v502_v43, %v12995_v16  ;;  %20335 = vst [vmem:[#allocation35_spill] sm:$0xff] %v13536_v62  ;;  %v500_v46 = vrot.slane %v486_v45, %v12995_v16  ;;  %v669_v21 = vcombine.low %v636_v49, %v652_v38 }
 0x1b3   :  { %11529 = vrot.lane.b32.xlu0 %v11528_v58, %s12886_s15  ;;  %v13533_v47 = vrot.slane %v602_v50, %v13041_v29  ;;  %v685_v13 = vcombine.high %v13525_v42, %v20337_v34  ;;  %v532_v50 = vrot.slane %v518_v55, %v13041_v29  ;;  %v549_v43 = vcombine.high %v13536_v62, %v20337_v34 }
 0x1b4   :  { %v13515_v57 = vpop.permute.xlu1 %1634  ;;  %v533_v44 = vcombine.low %v500_v46, %v516_v39  ;;  %v677_v52 = vrot.slane %v669_v21, %v13041_v29  ;;  %v2197_v62 = vcombine.low %v13221_v15, %v13233_v18  ;;  %v585_v21 = vcombine.low %v13451_v9, %v13435_v12 }
 0x1b5   :  { %20333 = vst [vmem:[#allocation33_spill] sm:$0xff] %v13515_v57  ;;  %v13517_v59 = vpop.permute.xlu0 %1644  ;;  %v11513_v45 = vpack.i.bf16 %v668_v51, %v532_v50  ;;  %v11543_v55 = vpack.i.bf16 %v685_v13, %v549_v43  ;;  %v534_v57 = vcombine.high %v500_v46, %v516_v39  ;;  %v2221_v12 = vrot.slane %v2213_v36, %v12995_v16 }
 0x1b6   :  { %5076 = vrot.lane.b32.xlu1 %v13364_v53, %s12894_s22  ;;  %v11538_v53 = vpack.i.bf16 %v13522_v7, %v13533_v47  ;;  %v2349_v43 = vcombine.low %v13257_v25, %v13273_v28 }
 0x1b7   :  { %11534 = vrot.lane.b32.xlu0 %v11533_v63, %s12884_s13  ;;  %v670_v63 = vcombine.high %v636_v49, %v652_v38  ;;  %v2214_v38 = vcombine.high %v13227_v17, %v13241_v20  ;;  %v687_v20 = vcombine.high %v677_v52, %v20337_v34  ;;  %v548_v46 = vrot.slane %v534_v57, %v13041_v29 }
 0x1b8   :  { %v13539_v56 = vpop.permute.xlu1 %1638 }
 0x1b9   :  { %v13542_v58 = vpop.permute.xlu0 %2746  ;;  %v684_v13 = vrot.slane %v670_v63, %v13041_v29 }
 0x1ba   :  { %20336 = vst [vmem:[#allocation36_spill] sm:$0xff] %v13542_v58  ;;  %5080 = vrot.lane.b32.xlu1 %v13376_v60, %s12894_s22  ;;  %v721_v60 = vcombine.low %v13438_v14, %v13425_v35  ;;  %v541_v58 = vrot.slane %v533_v44, %v13041_v29  ;;  %v550_v35 = vcombine.high %v532_v50, %v20337_v34 }
 0x1bb   :  { %11539 = vrot.lane.b32.xlu0 %v11538_v53, %s12885_s14  ;;  %v686_v53 = vcombine.high %v668_v51, %v20337_v34  ;;  %v2198_v14 = vcombine.high %v13221_v15, %v13233_v18  ;;  %v13589_v15 = vrot.slane %v585_v21, %v13041_v29  ;;  %v2205_v18 = vrot.slane %v2197_v62, %v12995_v16 }
 0x1bc   :  { %v13556_v4 = vpop.permute.xlu1 %1642  ;;  %v11518_v51 = vpack.i.bf16 %v677_v52, %v541_v58  ;;  %v13580_v39 = vrot.slane %v721_v60, %v13041_v29  ;;  %v2228_v50 = vrot.slane %v2214_v38, %v12995_v16  ;;  %v551_v44 = vcombine.high %v541_v58, %v20337_v34 }
 0x1bd   :  { %v13561_v42 = vpop.permute.xlu0 %2750  ;;  %v11548_v17 = vpack.i.bf16 %v686_v53, %v550_v35  ;;  %20341 = vst [vmem:[#allocation40_spill] sm:$0xff] %v13589_v15  ;;  %v2229_v52 = vcombine.low %v2205_v18, %v2221_v12  ;;  %v2212_v63 = vrot.slane %v2198_v14, %v12995_v16  ;;  %v2333_v58 = vcombine.low %v13249_v24, %v13265_v26 }
 0x1be   :  { %20338 = vst [vmem:[#allocation37_spill] sm:$0xff] %v13561_v42  ;;  %11514 = vrot.lane.b32.xlu1 %v11513_v45, %s12886_s15  ;;  %20339 = vst [vmem:[#allocation38_spill] sm:$0xff] %v13580_v39  ;;  %v11523_v45 = vpack.i.bf16 %v684_v13, %v548_v46  ;;  %v753_v57 = vcombine.high %v13580_v39, %v20337_v34  ;;  %v11553_v62 = vpack.i.bf16 %v687_v20, %v551_v44 }
 0x1bf   :  { %11544 = vrot.lane.b32.xlu0 %v11543_v55, %s12888_s19  ;;  %v688_v55 = vcombine.high %v684_v13, %v20337_v34  ;;  %v2230_v53 = vcombine.high %v2205_v18, %v2221_v12  ;;  %v617_v21 = vcombine.high %v13589_v15, %v20337_v34  ;;  %v2281_v38 = vcombine.low %v13245_v23, %v13261_v1 }
 0x1c0   :  { %v13576_v49 = vpop.permute.xlu1 %1646  ;;  %v2417_v35 = vcombine.low %v13277_v30, %v13289_v32  ;;  %v2245_v14 = vcombine.low %v2212_v63, %v2228_v50  ;;  %v2357_v13 = vrot.slane %v2349_v43, %v12995_v16  ;;  %v2265_v12 = vcombine.low %v13237_v19, %v13253_v22 }
 0x1c1   :  { %v13583_v9 = vpop.permute.xlu0 %2754  ;;  %v11563_v18 = vpack.i.bf16 %v753_v57, %v617_v21  ;;  %v754_v44 = vcombine.high %v13478_v41, %v20337_v34  ;;  %v13630_v43 = vrot.slane %v2229_v52, %v13041_v29  ;;  %v2341_v39 = vrot.slane %v2333_v58, %v12995_v16 }
 0x1c2   :  { %20340 = vst [vmem:[#allocation39_spill] sm:$0xff] %v13583_v9  ;;  %11519 = vrot.lane.b32.xlu1 %v11518_v51, %s12884_s13  ;;  %v552_v51 = vcombine.high %v548_v46, %v20337_v34  ;;  %v13639_v41 = vrot.slane %v2230_v53, %v13041_v29  ;;  %v2425_v57 = vrot.slane %v2417_v35, %v12995_v16 }
 0x1c3   :  { %11549 = vrot.lane.b32.xlu0 %v11548_v17, %s12887_s16  ;;  %v2350_v17 = vcombine.high %v13257_v25, %v13273_v28  ;;  %20346 = vst [vmem:[#allocation45_spill] sm:$0xff] %v13630_v43  ;;  %v2334_v25 = vcombine.high %v13249_v24, %v13265_v26  ;;  %v618_v28 = vcombine.high %v13488_v37, %v20337_v34 }
 0x1c4   :  { %v13597_v36 = vpop.permute.xlu1 %2748  ;;  %v11558_v46 = vpack.i.bf16 %v688_v55, %v552_v51  ;;  %v2365_v52 = vcombine.low %v2341_v39, %v2357_v13  ;;  %v13646_v55 = vrot.slane %v2245_v14, %v13041_v29  ;;  %v755_v58 = vcombine.high %v13500_v3, %v20337_v34 }
 0x1c5   :  { %20342 = vst [vmem:[#allocation41_spill] sm:$0xff] %v13597_v36  ;;  %v13602_v60 = vpop.permute.xlu0 %2758  ;;  %v2364_v24 = vrot.slane %v2350_v17, %v12995_v16  ;;  %v11568_v37 = vpack.i.bf16 %v754_v44, %v618_v28  ;;  %v2366_v53 = vcombine.high %v2341_v39, %v2357_v13  ;;  %v13658_v35 = vcombine.high %v13630_v43, %v20337_v34 }
 0x1c6   :  { %20343 = vst [vmem:[#allocation42_spill] sm:$0xff] %v13602_v60  ;;  %11524 = vrot.lane.b32.xlu1 %v11523_v45, %s12885_s14  ;;  %v2401_v45 = vcombine.low %v13269_v27, %v13283_v31  ;;  %v2348_v14 = vrot.slane %v2334_v25, %v12995_v16  ;;  %v619_v51 = vcombine.high %v13510_v10, %v20337_v34  ;;  %v12793_v10 = vld [vmem:[#allocation2 + $0x2] ss:$48 sps:$4 sm:$0xff]  }
 0x1c7   :  { %11554 = vrot.lane.b32.xlu0 %v11553_v62, %s12882_s11  ;;  %v2246_v62 = vcombine.high %v2212_v63, %v2228_v50  ;;  %v2289_v50 = vrot.slane %v2281_v38, %v12995_v16  ;;  %v2273_v63 = vrot.slane %v2265_v12, %v12995_v16  ;;  %v13666_v12 = vcombine.high %v13639_v41, %v20337_v34 }
 0x1c8   :  { %v13621_v20 = vpop.permute.xlu1 %2752  ;;  %v2409_v21 = vrot.slane %v2401_v45, %v12995_v16  ;;  %v13671_v13 = vrot.slane %v2365_v52, %v13041_v29  ;;  %v2381_v17 = vcombine.low %v2348_v14, %v2364_v24  ;;  %v12795_v45 = vld [vmem:[#allocation2 + $0x1a] ss:$48 sps:$4 sm:$0xff]   ;;  %v11573_v25 = vpack.i.bf16 %v755_v58, %v619_v51  ;;  %v12797_v51 = vld [vmem:[#allocation2 + $0x62] ss:$48 sps:$4 sm:$0xff]  }
 0x1c9   :  { %20344 = vst [vmem:[#allocation43_spill] sm:$0xff] %v13621_v20  ;;  %v13627_v15 = vpop.permute.xlu0 %2762  ;;  %v2297_v3 = vcombine.low %v2273_v63, %v2289_v50  ;;  %v13678_v44 = vrot.slane %v2246_v62, %v13041_v29  ;;  %v756_v28 = vcombine.high %v13522_v7, %v20337_v34  ;;  %v2282_v52 = vcombine.high %v13245_v23, %v13261_v1 }
 0x1ca   :  { %20345 = vst [vmem:[#allocation44_spill] sm:$0xff] %v13627_v15  ;;  %11564 = vrot.lane.b32.xlu1 %v11563_v18, %s12888_s19  ;;  %v2433_v39 = vcombine.low %v2409_v21, %v2425_v57  ;;  %20349 = vst [vmem:[#allocation48_spill] sm:$0xff] %v13671_v13  ;;  %v13675_v18 = vcombine.high %v13646_v55, %v20337_v34  ;;  %v2298_v43 = vcombine.high %v2273_v63, %v2289_v50  ;;  %v12814_v15 = vld [vmem:[#allocation2 + $0x26] ss:$48 sps:$4 sm:$0xff]  }
 0x1cb   :  { %11559 = vrot.lane.b32.xlu0 %v11558_v46, %s12883_s12  ;;  %v2434_v36 = vcombine.high %v2409_v21, %v2425_v57  ;;  %v2266_v62 = vcombine.high %v13237_v19, %v13253_v22  ;;  %v620_v7 = vcombine.high %v13533_v47, %v20337_v34  ;;  %v13699_v58 = vrot.slane %v2297_v3, %v13041_v29  ;;  %v12799_v47 = vld [vmem:[#allocation2 + $0x7a] ss:$48 sps:$4 sm:$0xff]   ;;  %v12807_v3 = vld [vmem:[#allocation2 + $0x82] ss:$48 sps:$4 sm:$0xff]  }
 0x1cc   :  { %v13649_v26 = vpop.permute.xlu1 %2756  ;;  %v13702_v23 = vrot.slane %v2433_v39, %v13041_v29  ;;  %v2382_v1 = vcombine.high %v2348_v14, %v2364_v24  ;;  %v13707_v19 = vrot.slane %v2381_v17, %v13041_v29  ;;  %v2402_v22 = vcombine.high %v13269_v27, %v13283_v31 }
 0x1cd   :  { %20347 = vst [vmem:[#allocation46_spill] sm:$0xff] %v13649_v26  ;;  %v13654_v38 = vpop.permute.xlu0 %2766  ;;  %v2418_v26 = vcombine.high %v13277_v30, %v13289_v32  ;;  %20352 = vst [vmem:[#allocation51_spill] sm:$0xff] %v13699_v58  ;;  %v13712_v30 = vrot.slane %v12793_v10, %v12995_v16  ;;  %v13715_v32 = vrot.slane %v12795_v45, %v12995_v16 }
 0x1ce   :  { %20348 = vst [vmem:[#allocation47_spill] sm:$0xff] %v13654_v38  ;;  %11569 = vrot.lane.b32.xlu1 %v11568_v37, %s12887_s16  ;;  %20353 = vst [vmem:[#allocation52_spill] sm:$0xff] %v13702_v23  ;;  %v11578_v57 = vpack.i.bf16 %v756_v28, %v620_v7  ;;  %v13721_v63 = vcombine.high %v13671_v13, %v20337_v34  ;;  %v2296_v27 = vrot.slane %v2282_v52, %v12995_v16  ;;  %v12812_v13 = vld [vmem:[#allocation2 + $0x7e] ss:$48 sps:$4 sm:$0xff]  }
 0x1cf   :  { %5082 = vrot.lane.b32.xlu0 %v13356_v48, %s12894_s22  ;;  %v13685_v48 = vrot.slane %v2366_v53, %v13041_v29  ;;  %v13731_v24 = vrot.slane %v2298_v43, %v13041_v29  ;;  %v13734_v53 = vrot.slane %v2434_v36, %v13041_v29  ;;  %v2280_v21 = vrot.slane %v2266_v62, %v12995_v16 }
 0x1d0   :  { %v13680_v46 = vpop.permute.xlu1 %2760  ;;  %v2432_v14 = vrot.slane %v2418_v26, %v12995_v16  ;;  %v13743_v39 = vcombine.high %v13699_v58, %v20337_v34  ;;  %v13747_v43 = vcombine.high %v13702_v23, %v20337_v34  ;;  %v13750_v36 = vrot.slane %v2382_v1, %v13041_v29  ;;  %v12803_v58 = vld [vmem:[#allocation2 + $0x22] ss:$48 sps:$4 sm:$0xff]   ;;  %v12805_v23 = vld [vmem:[#allocation2 + $0x6a] ss:$48 sps:$4 sm:$0xff]  }
 0x1d1   :  { %20350 = vst [vmem:[#allocation49_spill] sm:$0xff] %v13680_v46  ;;  %v13689_v37 = vpop.permute.xlu0 %2770  ;;  %v13756_v26 = vcombine.high %v13707_v19, %v20337_v34  ;;  %v2416_v17 = vrot.slane %v2402_v22, %v12995_v16  ;;  %v3956_v10 = vcombine.low %v13712_v30, %v13715_v32  ;;  %v13762_v45 = vrot.slane %v12799_v47, %v12995_v16  ;;  %v12810_v46 = vld [vmem:[#allocation2 + $0x1e] ss:$48 sps:$4 sm:$0xff]  }
 0x1d2   :  { %20351 = vst [vmem:[#allocation50_spill] sm:$0xff] %v13689_v37  ;;  %11574 = vrot.lane.b32.xlu1 %v11573_v25, %s12882_s11  ;;  %v2313_v52 = vcombine.low %v2280_v21, %v2296_v27  ;;  %v2314_v62 = vcombine.high %v2280_v21, %v2296_v27  ;;  %v13774_v1 = vcombine.high %v13731_v24, %v20337_v34  ;;  %v12815_v37 = vld [vmem:[#allocation2 + $0x6e] ss:$48 sps:$4 sm:$0xff]  }
 0x1d3   :  { %5086 = vrot.lane.b32.xlu0 %v13368_v54, %s12894_s22  ;;  %v13725_v54 = vcombine.high %v13685_v48, %v20337_v34  ;;  %v13778_v22 = vcombine.high %v13734_v53, %v20337_v34  ;;  %v2449_v47 = vcombine.low %v2416_v17, %v2432_v14  ;;  %v2450_v28 = vcombine.high %v2416_v17, %v2432_v14 }
 0x1d4   :  { %v13717_v50 = vpop.permute.xlu1 %2764  ;;  %v13798_v27 = vrot.slane %v3956_v10, %v13041_v29  ;;  %v13804_v14 = vrot.slane %v2313_v52, %v13041_v29  ;;  %v13811_v17 = vrot.slane %v2314_v62, %v13041_v29  ;;  %v3957_v10 = vcombine.high %v13712_v30, %v13715_v32  ;;  %v12811_v62 = vld [vmem:[#allocation2 + $0x66] ss:$48 sps:$4 sm:$0xff]  }
 0x1d5   :  { %20354 = vst [vmem:[#allocation53_spill] sm:$0xff] %v13717_v50  ;;  %v13728_v31 = vpop.permute.xlu0 %2774  ;;  %v4152_v20 = vrot.slane %v12807_v3, %v12995_v16  ;;  %v13830_v32 = vrot.slane %v2450_v28, %v13041_v29  ;;  %v4016_v52 = vrot.slane %v12803_v58, %v12995_v16  ;;  %v12809_v30 = vld [vmem:[#allocation2 + $0x6] ss:$48 sps:$4 sm:$0xff]   ;;  %v4091_v28 = vrot.slane %v12812_v13, %v12995_v16 }
 0x1d6   :  { %20355 = vst [vmem:[#allocation54_spill] sm:$0xff] %v13728_v31  ;;  %11579 = vrot.lane.b32.xlu1 %v11578_v57, %s12883_s12  ;;  %v4068_v57 = vrot.slane %v12797_v51, %v12995_v16  ;;  %20358 = vst [vmem:[#allocation57_spill] sm:$0xff] %v13798_v27  ;;  %v13838_v3 = vcombine.high %v13798_v27, %v20337_v34  ;;  %v13849_v58 = vcombine.high %v13804_v14, %v20337_v34 }
 0x1d7   :  { %5090 = vrot.lane.b32.xlu0 %v13380_v61, %s12894_s22  ;;  %v13789_v61 = vcombine.high %v13750_v36, %v20337_v34 }
 0x1d8   :  { %v13764_v25 = vpop.permute.xlu1 %2768  ;;  %v4092_v21 = vcombine.low %v4068_v57, %v13762_v45  ;;  %v4093_v50 = vcombine.high %v4068_v57, %v13762_v45  ;;  %20361 = vst [vmem:[#allocation60_spill] sm:$0xff] %v13838_v3  ;;  %v13856_v45 = vrot.slane %v3957_v10, %v13041_v29 }
 0x1d9   :  { %20356 = vst [vmem:[#allocation55_spill] sm:$0xff] %v13764_v25  ;;  %v13770_v7 = vpop.permute.xlu0 %3343  ;;  %v3955_v25 = vrot.slane %v12810_v46, %v12995_v16  ;;  %v20367_v46 = vpack.i.bf16 %v13721_v63, %v13658_v35  ;;  %v12813_v35 = vld [vmem:[#allocation2 + $0xe] ss:$48 sps:$4 sm:$0xff]  }
 0x1da   :  { %20357 = vst [vmem:[#allocation56_spill] sm:$0xff] %v13770_v7  ;;  %5084 = vrot.lane.b32.xlu1 %v13388_v5, %s12894_s22  ;;  %v12801_v5 = vld [vmem:[#allocation2 + $0xa] ss:$48 sps:$4 sm:$0xff]   ;;  %20364 = vst [vmem:[#allocation63_spill] sm:$0xff] %v13856_v45 }
 0x1db   :  { %5094 = vrot.lane.b32.xlu0 %v13392_v8, %s12894_s22  ;;  %v13808_v8 = vcombine.high %v13678_v44, %v20337_v34  ;;  %v4000_v57 = vrot.slane %v12801_v5, %v12995_v16  ;;  %v13872_v5 = vrot.slane %v4093_v50, %v13041_v29  ;;  %v4023_v50 = vrot.slane %v12814_v15, %v12995_v16 }
 0x1dc   :  { %v13801_v7 = vpop.permute.xlu1 %2772 }
 0x1dd   :  { %20359 = vst [vmem:[#allocation58_spill] sm:$0xff] %v13801_v7  ;;  %v13815_v51 = vpop.permute.xlu0 %3347  ;;  %v13822_v7 = vrot.slane %v2449_v47, %v13041_v29  ;;  %v13841_v47 = vrot.slane %v4092_v21, %v13041_v29  ;;  %v12816_v21 = vld [vmem:[#allocation2 + $0x86] ss:$48 sps:$4 sm:$0xff]   ;;  %20366 = vst [vmem:[#allocation65_spill] sm:$0xff] %v13872_v5  ;;  %v4024_v9 = vcombine.low %v4000_v57, %v4016_v52 }
 0x1de   :  { %20360 = vst [vmem:[#allocation59_spill] sm:$0xff] %v13815_v51  ;;  %5088 = vrot.lane.b32.xlu1 %v13402_v40, %s12894_s22  ;;  %v4136_v40 = vrot.slane %v12805_v23, %v12995_v16  ;;  %v4159_v63 = vrot.slane %v12816_v21, %v12995_v16 }
 0x1df   :  { %5098 = vrot.lane.b32.xlu0 %v13406_v2, %s12894_s22  ;;  %20362 = vst [vmem:[#allocation61_spill] sm:$0xff] %v13841_v47  ;;  %v13853_v2 = vcombine.high %v13811_v17, %v20337_v34  ;;  %v13869_v10 = vcombine.high %v13822_v7, %v20337_v34 }
 0x1e0   :  { %v13845_v51 = vpop.permute.xlu1 %2776  ;;  %v4160_v27 = vcombine.low %v4136_v40, %v4152_v20 }
 0x1e1   :  { %20363 = vst [vmem:[#allocation62_spill] sm:$0xff] %v13845_v51  ;;  %v13859_v23 = vpop.permute.xlu0 %3351  ;;  %v4075_v51 = vrot.slane %v12811_v62, %v12995_v16  ;;  %v3939_v62 = vrot.slane %v12809_v30, %v12995_v16 }
 0x1e2   :  { %20365 = vst [vmem:[#allocation64_spill] sm:$0xff] %v13859_v23  ;;  %5092 = vrot.lane.b32.xlu1 %v13422_v33, %s12894_s22  ;;  %v4161_v23 = vcombine.high %v4136_v40, %v4152_v20  ;;  %v4025_v33 = vcombine.high %v4000_v57, %v4016_v52  ;;  %v13885_v20 = vcombine.high %v13830_v32, %v20337_v34 }
 0x1e3   :  { %11584 = vrot.lane.b32.xlu0 %v20367_v46, %s12888_s19  ;;  %v4108_v13 = vcombine.low %v4075_v51, %v4091_v28  ;;  %v4109_v42 = vcombine.high %v4075_v51, %v4091_v28  ;;  %v13889_v40 = vcombine.high %v13841_v47, %v20337_v34  ;;  %v13896_v51 = vcombine.high %v13856_v45, %v20337_v34  ;;  %v20394_v45 = vld [vmem:[#allocation20_spill] sm:$0xff] }
 0x1e4   :  { %v13879_v60 = vpop.permute.xlu1 %3345  ;;  %v13899_v52 = vrot.slane %v4160_v27, %v13041_v29  ;;  %v3972_v28 = vcombine.low %v3939_v62, %v3955_v25  ;;  %v3973_v57 = vcombine.high %v3939_v62, %v3955_v25  ;;  %v13905_v46 = vcombine.high %v13872_v5, %v20337_v34 }
 0x1e5   :  { %20368 = vst [vmem:[#allocation66_spill] sm:$0xff] %v13879_v60  ;;  %20369 = vst [vmem:[#allocation67_spill] sm:$0xff] %v13889_v40  ;;  %v13892_v30 = vpop.permute.xlu0 %3355  ;;  %v13908_v21 = vrot.slane %v4161_v23, %v13041_v29  ;;  %v4143_v47 = vrot.slane %v12815_v37, %v12995_v16  ;;  %v20375_v27 = vpack.i.bf16 %v13685_v48, %v13639_v41  ;;  %v20400_v40 = vld [vmem:[#allocation16_spill] sm:$0xff] }
 0x1e6   :  { %20370 = vst [vmem:[#allocation68_spill] sm:$0xff] %v13892_v30  ;;  %20371 = vst [vmem:[#allocation69_spill] sm:$0xff] %v13896_v51  ;;  %5096 = vrot.lane.b32.xlu1 %v13448_v6, %s12894_s22  ;;  %v13917_v25 = vrot.slane %v4024_v9, %v13041_v29  ;;  %v13920_v6 = vrot.slane %v4108_v13, %v13041_v29  ;;  %v13923_v62 = vrot.slane %v4025_v33, %v13041_v29 }
 0x1e7   :  { %20372 = vst [vmem:[#allocation70_spill] sm:$0xff] %v13899_v52  ;;  %20373 = vst [vmem:[#allocation71_spill] sm:$0xff] %v13905_v46  ;;  %11594 = vrot.lane.b32.xlu0 %v20375_v27, %s12886_s15  ;;  %v13926_v23 = vrot.slane %v4109_v42, %v13041_v29  ;;  %v4007_v9 = vrot.slane %v12813_v35, %v12995_v16  ;;  %v4176_v48 = vcombine.low %v4143_v47, %v4159_v63  ;;  %v20393_v46 = vld [vmem:[#allocation24_spill] sm:$0xff] }
 0x1e8   :  { %20374 = vst [vmem:[#allocation72_spill] sm:$0xff] %v13908_v21  ;;  %20376 = vst [vmem:[#allocation73_spill] sm:$0xff] %v13917_v25  ;;  %v13928_v15 = vpop.permute.xlu1 %3349  ;;  %v13941_v42 = vcombine.high %v13899_v52, %v20337_v34  ;;  %v13944_v33 = vrot.slane %v3972_v28, %v13041_v29  ;;  %v13947_v37 = vrot.slane %v3973_v57, %v13041_v29 }
 0x1e9   :  { %20377 = vst [vmem:[#allocation74_spill] sm:$0xff] %v13920_v6  ;;  %20378 = vst [vmem:[#allocation75_spill] sm:$0xff] %v13923_v62  ;;  %v13935_v27 = vpop.permute.xlu0 %3359  ;;  %v13957_v13 = vcombine.high %v13908_v21, %v20337_v34  ;;  %v4040_v52 = vcombine.low %v4007_v9, %v4023_v50  ;;  %v20386_v28 = vpack.i.bf16 %v13725_v54, %v13666_v12 }
 0x1ea   :  { %20379 = vst [vmem:[#allocation76_spill] sm:$0xff] %v13926_v23  ;;  %20380 = vst [vmem:[#allocation77_spill] sm:$0xff] %v13928_v15  ;;  %5100 = vrot.lane.b32.xlu1 %v13475_v0, %s12894_s22  ;;  %v13965_v57 = vcombine.high %v13917_v25, %v20337_v34  ;;  %v13969_v0 = vcombine.high %v13920_v6, %v20337_v34  ;;  %v13973_v41 = vcombine.high %v13923_v62, %v20337_v34  ;;  %v20401_v62 = vld [vmem:[#allocation12_spill] sm:$0xff]  ;;  %v20433_v6 = vld [vmem:[#allocation27_spill] sm:$0xff] }
 0x1eb   :  { %20381 = vst [vmem:[#allocation78_spill] sm:$0xff] %v13935_v27  ;;  %20382 = vst [vmem:[#allocation79_spill] sm:$0xff] %v13941_v42  ;;  %11604 = vrot.lane.b32.xlu0 %v20386_v28, %s12887_s16  ;;  %v13977_v35 = vcombine.high %v13926_v23, %v20337_v34  ;;  %v13984_v54 = vrot.slane %v4176_v48, %v13041_v29  ;;  %v4041_v28 = vcombine.high %v4007_v9, %v4023_v50  ;;  %v20403_v42 = vld [vmem:[#allocation18_spill] sm:$0xff]  ;;  %v20405_v9 = vld [vmem:[#allocation11_spill] sm:$0xff] }
 0x1ec   :  { %20383 = vst [vmem:[#allocation80_spill] sm:$0xff] %v13944_v33  ;;  %20384 = vst [vmem:[#allocation81_spill] sm:$0xff] %v13947_v37  ;;  %v13979_v51 = vpop.permute.xlu1 %3353  ;;  %v4177_v25 = vcombine.high %v4143_v47, %v4159_v63  ;;  %v1192_v5 = vcombine.low %v20394_v45, %v20393_v46  ;;  %v13994_v27 = vcombine.high %v13944_v33, %v20337_v34  ;;  %v20456_v15 = vld [vmem:[#allocation44_spill] sm:$0xff] }
 0x1ed   :  { %20385 = vst [vmem:[#allocation82_spill] sm:$0xff] %v13957_v13  ;;  %20387 = vst [vmem:[#allocation83_spill] sm:$0xff] %v13965_v57  ;;  %v13988_v3 = vpop.permute.xlu0 %3363  ;;  %v13998_v12 = vcombine.high %v13947_v37, %v20337_v34  ;;  %v20398_v47 = vpack.i.bf16 %v13747_v43, %v13743_v39  ;;  %v14011_v48 = vrot.slane %v4040_v52, %v13041_v29  ;;  %v20402_v57 = vld [vmem:[#allocation22_spill] sm:$0xff]  ;;  %v20406_v52 = vld [vmem:[#allocation8_spill] sm:$0xff] }
 0x1ee   :  { %20388 = vst [vmem:[#allocation84_spill] sm:$0xff] %v13969_v0  ;;  %20389 = vst [vmem:[#allocation85_spill] sm:$0xff] %v13973_v41  ;;  %v1056_v21 = vcombine.low %v20401_v62, %v20400_v40  ;;  %v1176_v60 = vcombine.low %v20403_v42, %v20402_v57  ;;  %v20404_v39 = vpack.i.bf16 %v13707_v19, %v13646_v55  ;;  %v20410_v19 = vld [vmem:[#allocation9_spill] sm:$0xff]  ;;  %v20412_v41 = vld [vmem:[#allocation14_spill] sm:$0xff] }
 0x1ef   :  { %20390 = vst [vmem:[#allocation86_spill] sm:$0xff] %v13977_v35  ;;  %20391 = vst [vmem:[#allocation87_spill] sm:$0xff] %v13979_v51  ;;  %11589 = vrot.lane.b32.xlu1 %v20398_v47, %s12888_s19  ;;  %v988_v63 = vcombine.low %v20406_v52, %v20405_v9  ;;  %v14032_v23 = vrot.slane %v4041_v28, %v13041_v29  ;;  %v14035_v55 = vrot.slane %v4177_v25, %v13041_v29  ;;  %v20413_v13 = vld [vmem:[#allocation10_spill] sm:$0xff] }
 0x1f0   :  { %20392 = vst [vmem:[#allocation88_spill] sm:$0xff] %v13984_v54  ;;  %20395 = vst [vmem:[#allocation24_spill] sm:$0xff] %v13988_v3  ;;  %11614 = vrot.lane.b32.xlu0 %v20404_v39, %s12884_s13  ;;  %v14027_v50 = vpop.permute.xlu1 %3357  ;;  %v20411_v39 = vld [vmem:[#allocation7_spill] sm:$0xff]  ;;  %v1040_v47 = vcombine.low %v20413_v13, %v20412_v41  ;;  %v14044_v35 = vrot.slane %v1192_v5, %v12995_v16  ;;  %v989_v28 = vcombine.high %v20406_v52, %v20405_v9 }
 0x1f1   :  { %20396 = vst [vmem:[#allocation20_spill] sm:$0xff] %v13994_v27  ;;  %20397 = vst [vmem:[#allocation89_spill] sm:$0xff] %v13998_v12  ;;  %v972_v43 = vcombine.low %v20411_v39, %v20410_v19  ;;  %v1193_v12 = vcombine.high %v20394_v45, %v20393_v46  ;;  %v14046_v27 = vpop.permute.xlu0 %3367  ;;  %v1057_v25 = vcombine.high %v20401_v62, %v20400_v40  ;;  %v20422_v52 = vld [vmem:[#allocation19_spill] sm:$0xff] }
 0x1f2   :  { %20399 = vst [vmem:[#allocation90_spill] sm:$0xff] %v14011_v48  ;;  %20407 = vst [vmem:[#allocation16_spill] sm:$0xff] %v14027_v50  ;;  %v20415_v37 = vpack.i.bf16 %v13734_v53, %v13731_v24  ;;  %v14058_v0 = vcombine.high %v14011_v48, %v20337_v34  ;;  %v14062_v45 = vcombine.high %v13984_v54, %v20337_v34 }
 0x1f3   :  { %20408 = vst [vmem:[#allocation12_spill] sm:$0xff] %v14032_v23  ;;  %20409 = vst [vmem:[#allocation22_spill] sm:$0xff] %v14035_v55  ;;  %v973_v5 = vcombine.high %v20411_v39, %v20410_v19  ;;  %v14067_v46 = vrot.slane %v1056_v21, %v12995_v16  ;;  %v1177_v40 = vcombine.high %v20403_v42, %v20402_v57 }
 0x1f4   :  { %20414 = vst [vmem:[#allocation18_spill] sm:$0xff] %v14046_v27  ;;  %11599 = vrot.lane.b32.xlu1 %v20415_v37, %s12886_s15  ;;  %20416 = vst [vmem:[#allocation11_spill] sm:$0xff] %v14058_v0  ;;  %v14072_v24 = vrot.slane %v1176_v60, %v12995_v16  ;;  %v20418_v53 = vpack.i.bf16 %v13756_v26, %v13675_v18  ;;  %v14079_v62 = vrot.slane %v988_v63, %v12995_v16  ;;  %v14083_v9 = vpop.permute.xlu1 %3361  ;;  %v20469_v0 = vld [vmem:[#allocation55_spill] sm:$0xff] }
 0x1f5   :  { %20417 = vst [vmem:[#allocation8_spill] sm:$0xff] %v14062_v45  ;;  %v1041_v37 = vcombine.high %v20413_v13, %v20412_v41  ;;  %20419 = vst [vmem:[#allocation9_spill] sm:$0xff] %v14083_v9  ;;  %v14089_v60 = vcombine.high %v14032_v23, %v20337_v34  ;;  %v14092_v42 = vrot.slane %v972_v43, %v12995_v16  ;;  %v14102_v13 = vpop.permute.xlu0 %3371  ;;  %v20423_v43 = vld [vmem:[#allocation15_spill] sm:$0xff]  ;;  %v20435_v9 = vld [vmem:[#allocation29_spill] sm:$0xff] }
 0x1f6   :  { %11624 = vrot.lane.b32.xlu0 %v20418_v53, %s12882_s11  ;;  %v14095_v18 = vrot.slane %v1040_v47, %v12995_v16  ;;  %v14098_v26 = vrot.slane %v1193_v12, %v12995_v16  ;;  %v1209_v41 = vcombine.high %v14072_v24, %v14044_v35  ;;  %20421 = vst [vmem:[#allocation14_spill] sm:$0xff] %v14102_v13  ;;  %v20455_v13 = vld [vmem:[#allocation50_spill] sm:$0xff] }
 0x1f7   :  { %20420 = vst [vmem:[#allocation7_spill] sm:$0xff] %v14089_v60  ;;  %v14105_v57 = vrot.slane %v989_v28, %v12995_v16  ;;  %v14108_v63 = vrot.slane %v1057_v25, %v12995_v16  ;;  %v1124_v19 = vcombine.low %v20423_v43, %v20422_v52  ;;  %v1125_v47 = vcombine.high %v20423_v43, %v20422_v52  ;;  %v20428_v43 = vld [vmem:[#allocation13_spill] sm:$0xff] }
 0x1f8   :  { %v20424_v12 = vpack.i.bf16 %v13778_v22, %v13774_v1  ;;  %v987_v39 = vrot.slane %v973_v5, %v12995_v16  ;;  %v1073_v28 = vcombine.high %v14095_v18, %v14067_v46  ;;  %v1191_v53 = vrot.slane %v1177_v40, %v12995_v16  ;;  %v20427_v5 = vld [vmem:[#allocation17_spill] sm:$0xff]  ;;  %v14137_v21 = vpop.permute.xlu1 %3365 }
 0x1f9   :  { %v20425_v25 = vpack.i.bf16 %v13750_v36, %v13678_v44  ;;  %v14128_v52 = vcombine.high %v14035_v55, %v20337_v34  ;;  %v1055_v22 = vrot.slane %v1041_v37, %v12995_v16  ;;  %v1109_v40 = vcombine.high %v20428_v43, %v20427_v5  ;;  %20429 = vst [vmem:[#allocation19_spill] sm:$0xff] %v14137_v21  ;;  %v14144_v55 = vpop.permute.xlu0 %4473 }
 0x1fa   :  { %11609 = vrot.lane.b32.xlu1 %v20424_v12, %s12887_s16  ;;  %v1108_v12 = vcombine.low %v20428_v43, %v20427_v5  ;;  %v1005_v44 = vcombine.high %v14092_v42, %v14079_v62  ;;  %v1224_v36 = vcombine.low %v1191_v53, %v14098_v26  ;;  %20431 = vst [vmem:[#allocation15_spill] sm:$0xff] %v14144_v55  ;;  %v20434_v55 = vld [vmem:[#allocation23_spill] sm:$0xff] }
 0x1fb   :  { %11634 = vrot.lane.b32.xlu0 %v20425_v25, %s12885_s14  ;;  %20426 = vst [vmem:[#allocation10_spill] sm:$0xff] %v14128_v52  ;;  %v20430_v25 = vld [vmem:[#allocation31_spill] sm:$0xff]  ;;  %v14147_v37 = vrot.slane %v1209_v41, %v13041_v29  ;;  %v1020_v1 = vcombine.low %v987_v39, %v14105_v57  ;;  %v1088_v48 = vcombine.low %v1055_v22, %v14108_v63 }
 0x1fc   :  { %v1816_v23 = vcombine.low %v20430_v25, %v13517_v59  ;;  %v14152_v5 = vrot.slane %v1124_v19, %v12995_v16  ;;  %v1139_v43 = vrot.slane %v1125_v47, %v12995_v16  ;;  %v20432_v54 = vpack.i.bf16 %v13822_v7, %v13804_v14  ;;  %v14178_v51 = vpop.permute.xlu1 %3369 }
 0x1fd   :  { %v1021_v33 = vcombine.high %v987_v39, %v14105_v57  ;;  %v1680_v41 = vcombine.low %v20434_v55, %v20433_v6  ;;  %v1800_v21 = vcombine.low %v20435_v9, %v13495_v11  ;;  %v20436_v19 = vpack.i.bf16 %v13789_v61, %v13808_v8  ;;  %v20438_v57 = vld [vmem:[#allocation21_spill] sm:$0xff]  ;;  %20439 = vst [vmem:[#allocation17_spill] sm:$0xff] %v14178_v51  ;;  %v14185_v8 = vpop.permute.xlu0 %4477 }
 0x1fe   :  { %11619 = vrot.lane.b32.xlu1 %v20432_v54, %s12884_s13  ;;  %v14169_v47 = vrot.slane %v1073_v28, %v13041_v29  ;;  %v14172_v27 = vrot.slane %v1108_v12, %v12995_v16  ;;  %v1123_v7 = vrot.slane %v1109_v40, %v12995_v16  ;;  %v1225_v14 = vcombine.high %v1191_v53, %v14098_v26  ;;  %v20437_v54 = vld [vmem:[#allocation25_spill] sm:$0xff] }
 0x1ff   :  { %11644 = vrot.lane.b32.xlu0 %v20436_v19, %s12883_s12  ;;  %v1664_v39 = vcombine.low %v20438_v57, %v20437_v54  ;;  %v1817_v3 = vcombine.high %v20430_v25, %v13517_v59  ;;  %v14183_v61 = vrot.slane %v1816_v23, %v12995_v16  ;;  %20440 = vst [vmem:[#allocation13_spill] sm:$0xff] %v14185_v8  ;;  %v20454_v51 = vld [vmem:[#allocation37_spill] sm:$0xff] }
 0x200   :  { %v11668_v28 = vpack.i.bf16 %v14147_v37, %v14169_v47  ;;  %v14190_v12 = vrot.slane %v1224_v36, %v13041_v29  ;;  %v1089_v26 = vcombine.high %v1055_v22, %v14108_v63  ;;  %v1141_v53 = vcombine.high %v14172_v27, %v14152_v5 }
 0x201   :  { %v1156_v40 = vcombine.low %v1123_v7, %v1139_v43  ;;  %v20441_v59 = vpack.i.bf16 %v13869_v10, %v13849_v58  ;;  %v14200_v23 = vrot.slane %v1088_v48, %v13041_v29  ;;  %v1681_v25 = vcombine.high %v20434_v55, %v20433_v6  ;;  %v14218_v48 = vpop.permute.xlu1 %3373 }
 0x202   :  { %v14205_v36 = vrot.slane %v1680_v41, %v12995_v16  ;;  %v1801_v63 = vcombine.high %v20435_v9, %v13495_v11  ;;  %v14210_v22 = vrot.slane %v1800_v21, %v12995_v16  ;;  %v1157_v19 = vcombine.high %v1123_v7, %v1139_v43  ;;  %20442 = vst [vmem:[#allocation31_spill] sm:$0xff] %v14218_v48  ;;  %v14228_v9 = vpop.permute.xlu0 %4481 }
 0x203   :  { %11629 = vrot.lane.b32.xlu1 %v20441_v59, %s12882_s11  ;;  %11669 = vrot.lane.b32.xlu0 %v11668_v28, %s12886_s15  ;;  %v1665_v58 = vcombine.high %v20438_v57, %v20437_v54  ;;  %v14216_v10 = vrot.slane %v1664_v39, %v12995_v16  ;;  %v14221_v6 = vrot.slane %v1005_v44, %v13041_v29 }
 0x204   :  { %v14224_v55 = vrot.slane %v1817_v3, %v12995_v16  ;;  %v1833_v11 = vcombine.high %v14210_v22, %v14183_v61  ;;  %20443 = vst [vmem:[#allocation27_spill] sm:$0xff] %v14228_v9  ;;  %v11673_v21 = vpack.i.bf16 %v14190_v12, %v14200_v23  ;;  %v14233_v43 = vrot.slane %v1225_v14, %v13041_v29 }
 0x205   :  { %v20445_v41 = vpack.i.bf16 %v13830_v32, %v13811_v17  ;;  %v14240_v44 = vrot.slane %v1141_v53, %v13041_v29  ;;  %v14243_v3 = vrot.slane %v1020_v1, %v13041_v29  ;;  %v14246_v7 = vrot.slane %v1156_v40, %v13041_v29  ;;  %v14266_v28 = vpop.permute.xlu1 %4475  ;;  %v20451_v1 = vld [vmem:[#allocation33_spill] sm:$0xff] }
 0x206   :  { %20444 = vst [vmem:[#allocation23_spill] sm:$0xff] %v14233_v43  ;;  %v14249_v54 = vrot.slane %v1021_v33, %v13041_v29  ;;  %v14252_v14 = vrot.slane %v1681_v25, %v12995_v16  ;;  %v1697_v57 = vcombine.high %v14216_v10, %v14205_v36  ;;  %v1815_v17 = vrot.slane %v1801_v63, %v12995_v16 }
 0x207   :  { %11639 = vrot.lane.b32.xlu1 %v20445_v41, %s12885_s14  ;;  %11674 = vrot.lane.b32.xlu0 %v11673_v21, %s12884_s13  ;;  %v14259_v32 = vrot.slane %v1089_v26, %v13041_v29  ;;  %v1679_v39 = vrot.slane %v1665_v58, %v12995_v16  ;;  %v1884_v33 = vcombine.low %v13539_v56, %v13576_v49  ;;  %v14274_v26 = vpop.permute.xlu0 %4485  ;;  %v20449_v58 = vld [vmem:[#allocation32_spill] sm:$0xff] }
 0x208   :  { %20447 = vst [vmem:[#allocation25_spill] sm:$0xff] %v14266_v28  ;;  %v14269_v53 = vrot.slane %v1157_v19, %v13041_v29  ;;  %v1848_v40 = vcombine.low %v1815_v17, %v14224_v55  ;;  %v2946_v59 = vcombine.low %v13654_v38, %v13728_v31  ;;  %20448 = vst [vmem:[#allocation21_spill] sm:$0xff] %v14274_v26  ;;  %v20450_v21 = vld [vmem:[#allocation28_spill] sm:$0xff]  ;;  %v20453_v26 = vld [vmem:[#allocation42_spill] sm:$0xff] }
 0x209   :  { %20446 = vst [vmem:[#allocation29_spill] sm:$0xff] %v14259_v32  ;;  %v11678_v25 = vpack.i.bf16 %v14233_v43, %v14259_v32  ;;  %v14279_v63 = vrot.slane %v1833_v11, %v13041_v29  ;;  %v1748_v41 = vcombine.low %v20450_v21, %v20449_v58  ;;  %v1868_v19 = vcombine.low %v20451_v1, %v13556_v4 }
 0x20a   :  { %v20452_v28 = vpack.i.bf16 %v13885_v20, %v13853_v2  ;;  %v11653_v9 = vpack.i.bf16 %v14240_v44, %v14221_v6  ;;  %v11658_v8 = vpack.i.bf16 %v14246_v7, %v14243_v3  ;;  %v1712_v11 = vcombine.low %v1679_v39, %v14252_v14  ;;  %v20457_v2 = vld [vmem:[#allocation30_spill] sm:$0xff] }
 0x20b   :  { %v2810_v48 = vcombine.low %v20454_v51, %v20453_v26  ;;  %v2930_v50 = vcombine.low %v20456_v15, %v20455_v13  ;;  %11679 = vrot.lane.b32.xlu0 %v11678_v25, %s12885_s14  ;;  %v14300_v30 = vrot.slane %v1697_v57, %v13041_v29  ;;  %v20458_v20 = vld [vmem:[#allocation26_spill] sm:$0xff]  ;;  %v1849_v38 = vcombine.high %v1815_v17, %v14224_v55  ;;  %v14310_v51 = vpop.permute.xlu1 %4479  ;;  %v20460_v26 = vld [vmem:[#allocation39_spill] sm:$0xff]  ;;  %v20461_v15 = vld [vmem:[#allocation36_spill] sm:$0xff]  ;;  %v14317_v57 = vpop.permute.xlu0 %4489 }
 0x20c   :  { %11649 = vrot.lane.b32.xlu1 %v20452_v28, %s12883_s12  ;;  %v1732_v28 = vcombine.low %v20458_v20, %v20457_v2  ;;  %v1885_v31 = vcombine.high %v13539_v56, %v13576_v49  ;;  %v14308_v32 = vrot.slane %v1884_v33, %v12995_v16  ;;  %20459 = vst [vmem:[#allocation32_spill] sm:$0xff] %v14310_v51  ;;  %20462 = vst [vmem:[#allocation28_spill] sm:$0xff] %v14317_v57  ;;  %v20474_v51 = vld [vmem:[#allocation49_spill] sm:$0xff] }
 0x20d   :  { %v2794_v13 = vcombine.low %v20461_v15, %v20460_v26  ;;  %v14315_v25 = vrot.slane %v2946_v59, %v12995_v16  ;;  %v11683_v43 = vpack.i.bf16 %v14279_v63, %v14300_v30  ;;  %v14322_v55 = vrot.slane %v1848_v40, %v13041_v29 }
 0x20e   :  { %v1749_v56 = vcombine.high %v20450_v21, %v20449_v58  ;;  %v14327_v49 = vrot.slane %v1748_v41, %v12995_v16  ;;  %v1869_v17 = vcombine.high %v20451_v1, %v13556_v4  ;;  %v14332_v33 = vrot.slane %v1868_v19, %v12995_v16 }
 0x20f   :  { %v1713_v59 = vcombine.high %v1679_v39, %v14252_v14  ;;  %v14337_v57 = vrot.slane %v2810_v48, %v12995_v16  ;;  %v14340_v40 = vrot.slane %v2930_v50, %v12995_v16  ;;  %11684 = vrot.lane.b32.xlu0 %v11683_v43, %s12886_s15  ;;  %v14344_v58 = vrot.slane %v1712_v11, %v13041_v29  ;;  %v14356_v14 = vpop.permute.xlu1 %4483  ;;  %v14363_v39 = vpop.permute.xlu0 %4493  ;;  %v20468_v11 = vld [vmem:[#allocation62_spill] sm:$0xff] }
 0x210   :  { %11654 = vrot.lane.b32.xlu1 %v11653_v9, %s12886_s15  ;;  %v1733_v4 = vcombine.high %v20458_v20, %v20457_v2  ;;  %v14349_v1 = vrot.slane %v1732_v28, %v12995_v16  ;;  %v14352_v9 = vrot.slane %v1885_v31, %v12995_v16  ;;  %v1901_v48 = vcombine.high %v14332_v33, %v14308_v32 }
 0x211   :  { %20463 = vst [vmem:[#allocation33_spill] sm:$0xff] %v14340_v40  ;;  %20464 = vst [vmem:[#allocation30_spill] sm:$0xff] %v14356_v14  ;;  %v14359_v50 = vrot.slane %v2794_v13, %v12995_v16  ;;  %v2963_v43 = vcombine.high %v14340_v40, %v14315_v25  ;;  %v11693_v21 = vpack.i.bf16 %v14322_v55, %v14344_v58  ;;  %v20478_v40 = vld [vmem:[#allocation46_spill] sm:$0xff] }
 0x212   :  { %20465 = vst [vmem:[#allocation26_spill] sm:$0xff] %v14363_v39  ;;  %v14368_v41 = vrot.slane %v1849_v38, %v13041_v29  ;;  %v14371_v31 = vrot.slane %v1749_v56, %v12995_v16  ;;  %v1765_v19 = vcombine.high %v14349_v1, %v14327_v49  ;;  %v1883_v13 = vrot.slane %v1869_v17, %v12995_v16 }
 0x213   :  { %v20466_v2 = vcombine.low %v14092_v42, %v14079_v62  ;;  %v2827_v38 = vcombine.high %v14359_v50, %v14337_v57  ;;  %11694 = vrot.lane.b32.xlu0 %v11693_v21, %s12884_s13  ;;  %v11663_v28 = vpack.i.bf16 %v14269_v53, %v14249_v54  ;;  %v14391_v56 = vrot.slane %v1713_v59, %v13041_v29  ;;  %v14397_v42 = vpop.permute.xlu1 %4487 }
 0x214   :  { %11659 = vrot.lane.b32.xlu1 %v11658_v8, %s12884_s13  ;;  %v1747_v8 = vrot.slane %v1733_v4, %v12995_v16  ;;  %v1916_v17 = vcombine.low %v1883_v13, %v14352_v9  ;;  %v3014_v62 = vcombine.low %v20469_v0, %v20468_v11  ;;  %20470 = vst [vmem:[#allocation36_spill] sm:$0xff] %v14397_v42  ;;  %v14410_v4 = vpop.permute.xlu0 %4497  ;;  %v20475_v42 = vld [vmem:[#allocation43_spill] sm:$0xff] }
 0x215   :  { %v14383_v20 = vrot.slane %v20466_v2, %v13041_v29  ;;  %v14400_v2 = vrot.slane %v1901_v48, %v13041_v29  ;;  %v1072_v21 = vcombine.low %v14095_v18, %v14067_v46  ;;  %v20471_v59 = vcombine.low %v14172_v27, %v14152_v5  ;;  %20473 = vst [vmem:[#allocation92_spill] sm:$0xff] %v14410_v4  ;;  %v20476_v46 = vld [vmem:[#allocation58_spill] sm:$0xff]  ;;  %v20477_v18 = vld [vmem:[#allocation53_spill] sm:$0xff] }
 0x216   :  { %v11703_v14 = vpack.i.bf16 %v14368_v41, %v14391_v56  ;;  %v14415_v39 = vrot.slane %v2963_v43, %v13041_v29  ;;  %v1780_v48 = vcombine.low %v1747_v8, %v14371_v31  ;;  %v2878_v0 = vcombine.low %v20475_v42, %v20474_v51 }
 0x217   :  { %20467 = vst [vmem:[#allocation39_spill] sm:$0xff] %v14383_v20  ;;  %v14408_v45 = vrot.slane %v20471_v59, %v13041_v29  ;;  %v2998_v11 = vcombine.low %v20477_v18, %v20476_v46  ;;  %v14424_v27 = vrot.slane %v1765_v19, %v13041_v29  ;;  %v1208_v5 = vcombine.low %v14072_v24, %v14044_v35  ;;  %v20479_v18 = vld [vmem:[#allocation41_spill] sm:$0xff]  ;;  %v14440_v19 = vpop.permute.xlu1 %4491 }
 0x218   :  { %11664 = vrot.lane.b32.xlu1 %v11663_v28, %s12885_s14  ;;  %v1917_v59 = vcombine.high %v1883_v13, %v14352_v9  ;;  %11704 = vrot.lane.b32.xlu0 %v11703_v14, %s12885_s14  ;;  %v14431_v43 = vrot.slane %v2827_v38, %v13041_v29  ;;  %v2862_v46 = vcombine.low %v20479_v18, %v20478_v40  ;;  %v14450_v14 = vpop.permute.xlu0 %4501 }
 0x219   :  { %20472 = vst [vmem:[#allocation91_spill] sm:$0xff] %v14408_v45  ;;  %v14438_v28 = vrot.slane %v3014_v62, %v12995_v16  ;;  %v11688_v35 = vpack.i.bf16 %v14400_v2, %v14424_v27  ;;  %v14445_v24 = vrot.slane %v1916_v17, %v13041_v29  ;;  %v14448_v9 = vrot.slane %v1072_v21, %v13041_v29 }
 0x21a   :  { %v11713_v13 = vpack.i.bf16 %v14415_v39, %v14431_v43  ;;  %v1036_v38 = vcombine.high %v14383_v20, %v20337_v34  ;;  %v1172_v62 = vcombine.high %v14408_v45, %v20337_v34  ;;  %v1781_v4 = vcombine.high %v1747_v8, %v14371_v31 }
 0x21b   :  { %20480 = vst [vmem:[#allocation49_spill] sm:$0xff] %v14448_v9  ;;  %v14460_v60 = vrot.slane %v2878_v0, %v12995_v16  ;;  %v14463_v17 = vrot.slane %v2998_v11, %v12995_v16  ;;  %v14467_v21 = vrot.slane %v1780_v48, %v13041_v29  ;;  %v14470_v52 = vrot.slane %v1208_v5, %v13041_v29  ;;  %v14486_v48 = vpop.permute.xlu1 %4495 }
 0x21c   :  { %11689 = vrot.lane.b32.xlu1 %v11688_v35, %s12886_s15  ;;  %11714 = vrot.lane.b32.xlu0 %v11713_v13, %s12886_s15  ;;  %v1037_v45 = vcombine.high %v14221_v6, %v20337_v34  ;;  %v1038_v0 = vcombine.high %v14243_v3, %v20337_v34  ;;  %v14479_v31 = vcombine.high %v14249_v54, %v20337_v34  ;;  %v14495_v35 = vpop.permute.xlu0 %5070 }
 0x21d   :  { %20481 = vst [vmem:[#allocation43_spill] sm:$0xff] %v14470_v52  ;;  %v14482_v11 = vrot.slane %v2862_v46, %v12995_v16  ;;  %v3031_v8 = vcombine.high %v14463_v17, %v14438_v28  ;;  %v11698_v5 = vpack.i.bf16 %v14445_v24, %v14467_v21  ;;  %v14491_v6 = vrot.slane %v1917_v59, %v13041_v29 }
 0x21e   :  { %v1696_v3 = vcombine.low %v14216_v10, %v14205_v36  ;;  %v11723_v54 = vpack.i.bf16 %v1172_v62, %v1036_v38  ;;  %v1173_v46 = vcombine.high %v14240_v44, %v20337_v34  ;;  %v14501_v13 = vcombine.high %v14448_v9, %v20337_v34 }
 0x21f   :  { %v1832_v20 = vcombine.low %v14210_v22, %v14183_v61  ;;  %v2895_v59 = vcombine.high %v14482_v11, %v14460_v60  ;;  %v1795_v36 = vrot.slane %v1781_v4, %v13041_v29  ;;  %v1174_v10 = vcombine.high %v14246_v7, %v20337_v34  ;;  %v14522_v62 = vpop.permute.xlu1 %4499 }
 0x220   :  { %11699 = vrot.lane.b32.xlu1 %v11698_v5, %s12884_s13  ;;  %v1764_v44 = vcombine.low %v14349_v1, %v14327_v49  ;;  %11724 = vrot.lane.b32.xlu0 %v11723_v54, %s12888_s19  ;;  %v1240_v38 = vcombine.high %v14470_v52, %v20337_v34  ;;  %v1175_v61 = vcombine.high %v14269_v53, %v20337_v34  ;;  %v20486_v52 = vld [vmem:[#allocation29_spill] sm:$0xff] }
 0x221   :  { %v14520_v22 = vcombine.high %v14169_v47, %v20337_v34  ;;  %v11708_v4 = vpack.i.bf16 %v14491_v6, %v1795_v36  ;;  %v14526_v7 = vrot.slane %v3031_v8, %v13041_v29  ;;  %v14530_v49 = vcombine.high %v14147_v37, %v20337_v34  ;;  %v14539_v47 = vpop.permute.xlu0 %5074  ;;  %v20484_v8 = vld [vmem:[#allocation23_spill] sm:$0xff] }
 0x222   :  { %v14534_v1 = vcombine.high %v14190_v12, %v20337_v34  ;;  %v14537_v53 = vrot.slane %v1696_v3, %v13041_v29  ;;  %20483 = vst [vmem:[#allocation41_spill] sm:$0xff] %v14539_v47  ;;  %v11728_v5 = vpack.i.bf16 %v1173_v46, %v1037_v45  ;;  %v14543_v54 = vcombine.high %v14200_v23, %v20337_v34  ;;  %v20488_v46 = vld [vmem:[#allocation42_spill] sm:$0xff]  ;;  %v20489_v47 = vld [vmem:[#allocation37_spill] sm:$0xff] }
 0x223   :  { %v14547_v9 = vcombine.high %v20484_v8, %v20337_v34  ;;  %v14550_v37 = vrot.slane %v1832_v20, %v13041_v29  ;;  %v14554_v12 = vrot.slane %v2895_v59, %v13041_v29  ;;  %v11733_v3 = vpack.i.bf16 %v1174_v10, %v1038_v0  ;;  %v14570_v0 = vpop.permute.xlu1 %4503 }
 0x224   :  { %20482 = vst [vmem:[#allocation46_spill] sm:$0xff] %v14537_v53  ;;  %11709 = vrot.lane.b32.xlu1 %v11708_v4, %s12885_s14  ;;  %v14558_v45 = vcombine.high %v20486_v52, %v20337_v34  ;;  %v14561_v23 = vrot.slane %v1764_v44, %v13041_v29  ;;  %v2811_v8 = vcombine.high %v20489_v47, %v20488_v46 }
 0x225   :  { %20485 = vst [vmem:[#allocation23_spill] sm:$0xff] %v14550_v37  ;;  %11729 = vrot.lane.b32.xlu0 %v11728_v5, %s12887_s16  ;;  %v11743_v20 = vpack.i.bf16 %v1240_v38, %v14501_v13  ;;  %v11738_v4 = vpack.i.bf16 %v1175_v61, %v14479_v31  ;;  %v1900_v59 = vcombine.low %v14332_v33, %v14308_v32  ;;  %v14580_v13 = vpop.permute.xlu0 %5078 }
 0x226   :  { %20487 = vst [vmem:[#allocation29_spill] sm:$0xff] %v14561_v23  ;;  %v11718_v52 = vpack.i.bf16 %v14526_v7, %v14554_v12  ;;  %v11748_v10 = vpack.i.bf16 %v14530_v49, %v14520_v22  ;;  %v2795_v47 = vcombine.high %v20461_v15, %v20460_v26  ;;  %v1728_v31 = vcombine.high %v14537_v53, %v20337_v34  ;;  %v20490_v22 = vld [vmem:[#allocation54_spill] sm:$0xff]  ;;  %v20491_v49 = vld [vmem:[#allocation47_spill] sm:$0xff] }
 0x227   :  { %v14586_v32 = vcombine.high %v14300_v30, %v20337_v34  ;;  %v1864_v38 = vcombine.high %v14550_v37, %v20337_v34  ;;  %v14595_v15 = vcombine.high %v14279_v63, %v20337_v34  ;;  %v14599_v26 = vcombine.high %v14344_v58, %v20337_v34  ;;  %v20523_v53 = vld [vmem:[#allocation87_spill] sm:$0xff] }
 0x228   :  { %11719 = vrot.lane.b32.xlu1 %v11718_v52, %s12886_s15  ;;  %v14603_v30 = vcombine.high %v14391_v56, %v20337_v34  ;;  %v2825_v61 = vrot.slane %v2811_v8, %v12995_v16  ;;  %v2947_v5 = vcombine.high %v20491_v49, %v20490_v22  ;;  %v14611_v46 = vcombine.high %v14322_v55, %v20337_v34  ;;  %v14622_v8 = vpop.permute.xlu1 %5072  ;;  %v20494_v22 = vld [vmem:[#allocation50_spill] sm:$0xff]  ;;  %v20495_v49 = vld [vmem:[#allocation44_spill] sm:$0xff] }
 0x229   :  { %11734 = vrot.lane.b32.xlu0 %v11733_v3, %s12882_s11  ;;  %v14615_v63 = vcombine.high %v14561_v23, %v20337_v34  ;;  %v14618_v58 = vrot.slane %v1900_v59, %v13041_v29  ;;  %v2879_v56 = vcombine.high %v20475_v42, %v20474_v51  ;;  %20493 = vst [vmem:[#allocation37_spill] sm:$0xff] %v14622_v8  ;;  %v14635_v59 = vpop.permute.xlu0 %11529 }
 0x22a   :  { %v14626_v52 = vcombine.high %v14368_v41, %v20337_v34  ;;  %v14630_v55 = vcombine.high %v14424_v27, %v20337_v34  ;;  %v2809_v3 = vrot.slane %v2795_v47, %v12995_v16  ;;  %v2931_v33 = vcombine.high %v20495_v49, %v20494_v22 }
 0x22b   :  { %20492 = vst [vmem:[#allocation42_spill] sm:$0xff] %v14618_v58  ;;  %v14639_v51 = vcombine.high %v14467_v21, %v20337_v34  ;;  %v14642_v42 = vcombine.high %v1795_v36, %v20337_v34  ;;  %v2826_v41 = vcombine.low %v14359_v50, %v14337_v57  ;;  %v2863_v27 = vcombine.high %v20479_v18, %v20478_v40 }
 0x22c   :  { %11744 = vrot.lane.b32.xlu1 %v11743_v20, %s12888_s19  ;;  %v11763_v47 = vpack.i.bf16 %v1864_v38, %v1728_v31  ;;  %v11773_v22 = vpack.i.bf16 %v14595_v15, %v14586_v32  ;;  %v2842_v49 = vcombine.low %v2809_v3, %v2825_v61  ;;  %v2843_v44 = vcombine.high %v2809_v3, %v2825_v61  ;;  %v14656_v50 = vpop.permute.xlu1 %5076  ;;  %v20497_v32 = vld [vmem:[#allocation33_spill] sm:$0xff] }
 0x22d   :  { %v2961_v21 = vrot.slane %v2947_v5, %v12995_v16  ;;  %11739 = vrot.lane.b32.xlu0 %v11738_v4, %s12883_s12  ;;  %v11783_v36 = vpack.i.bf16 %v14611_v46, %v14599_v26  ;;  %v2893_v57 = vrot.slane %v2879_v56, %v12995_v16  ;;  %20496 = vst [vmem:[#allocation54_spill] sm:$0xff] %v14656_v50  ;;  %v14673_v15 = vpop.permute.xlu0 %11534  ;;  %v20500_v5 = vld [vmem:[#allocation62_spill] sm:$0xff]  ;;  %v20501_v46 = vld [vmem:[#allocation55_spill] sm:$0xff] }
 0x22e   :  { %v14660_v40 = vcombine.high %v14618_v58, %v20337_v34  ;;  %v14666_v20 = vcombine.high %v14400_v2, %v20337_v34  ;;  %v2894_v4 = vcombine.low %v14482_v11, %v14460_v60  ;;  %v2945_v31 = vrot.slane %v2931_v33, %v12995_v16  ;;  %20498 = vst [vmem:[#allocation47_spill] sm:$0xff] %v14673_v15  ;;  %v20524_v50 = vld [vmem:[#allocation66_spill] sm:$0xff] }
 0x22f   :  { %v2962_v38 = vcombine.low %v20497_v32, %v14315_v25  ;;  %v14677_v26 = vcombine.high %v14445_v24, %v20337_v34  ;;  %v14680_v61 = vrot.slane %v2826_v41, %v13041_v29  ;;  %v2877_v2 = vrot.slane %v2863_v27, %v12995_v16  ;;  %v20502_v41 = vld [vmem:[#allocation58_spill] sm:$0xff]  ;;  %v20503_v27 = vld [vmem:[#allocation53_spill] sm:$0xff] }
 0x230   :  { %v3015_v56 = vcombine.high %v20501_v46, %v20500_v5  ;;  %11749 = vrot.lane.b32.xlu1 %v11748_v10, %s12887_s16  ;;  %v14688_v60 = vcombine.high %v14491_v6, %v20337_v34  ;;  %v2978_v25 = vcombine.low %v2945_v31, %v2961_v21  ;;  %v2979_v11 = vcombine.high %v2945_v31, %v2961_v21  ;;  %v14699_v5 = vpop.permute.xlu1 %5080  ;;  %v20527_v15 = vld [vmem:[#allocation78_spill] sm:$0xff] }
 0x231   :  { %20499 = vst [vmem:[#allocation50_spill] sm:$0xff] %v14680_v61  ;;  %11764 = vrot.lane.b32.xlu0 %v11763_v47, %s12888_s19  ;;  %v14692_v24 = vrot.slane %v2842_v49, %v13041_v29  ;;  %v14695_v33 = vrot.slane %v2843_v44, %v13041_v29  ;;  %v2910_v3 = vcombine.low %v2877_v2, %v2893_v57  ;;  %20504 = vst [vmem:[#allocation44_spill] sm:$0xff] %v14699_v5  ;;  %v14711_v44 = vpop.permute.xlu0 %11539  ;;  %v20526_v5 = vld [vmem:[#allocation18_spill] sm:$0xff] }
 0x232   :  { %v2999_v32 = vcombine.high %v20503_v27, %v20502_v41  ;;  %v11768_v6 = vpack.i.bf16 %v14660_v40, %v14615_v63  ;;  %v14706_v47 = vrot.slane %v2894_v4, %v13041_v29  ;;  %v2911_v49 = vcombine.high %v2877_v2, %v2893_v57  ;;  %20507 = vst [vmem:[#allocation55_spill] sm:$0xff] %v14711_v44 }
 0x233   :  { %v14709_v21 = vrot.slane %v2962_v38, %v13041_v29  ;;  %v3029_v46 = vrot.slane %v3015_v56, %v12995_v16  ;;  %v20508_v63 = vpack.i.bf16 %v14534_v1, %v14543_v54  ;;  %v14722_v40 = vcombine.high %v14680_v61, %v20337_v34 }
 0x234   :  { %20505 = vst [vmem:[#allocation33_spill] sm:$0xff] %v14706_v47  ;;  %v14726_v57 = vcombine.high %v14431_v43, %v20337_v34  ;;  %v14732_v38 = vrot.slane %v2978_v25, %v13041_v29  ;;  %v14736_v1 = vcombine.high %v14692_v24, %v20337_v34  ;;  %v14739_v54 = vrot.slane %v2979_v11, %v13041_v29 }
 0x235   :  { %20506 = vst [vmem:[#allocation62_spill] sm:$0xff] %v14709_v21  ;;  %11754 = vrot.lane.b32.xlu1 %v20508_v63, %s12882_s11  ;;  %11774 = vrot.lane.b32.xlu0 %v11773_v22, %s12887_s16  ;;  %v14743_v2 = vcombine.high %v14695_v33, %v20337_v34  ;;  %v3013_v43 = vrot.slane %v2999_v32, %v12995_v16  ;;  %v14748_v22 = vpop.permute.xlu1 %11514  ;;  %v14753_v41 = vpop.permute.xlu0 %11544  ;;  %v20000_v32 = vmov 0  }
 0x236   :  { %v3030_v56 = vcombine.low %v14463_v17, %v14438_v28  ;;  %v14751_v25 = vrot.slane %v2910_v3, %v13041_v29  ;;  %v2994_v11 = vcombine.high %v14709_v21, %v20337_v34  ;;  %v14759_v27 = vcombine.high %v14706_v47, %v20337_v34  ;;  %1431 = vmatprep.mubr.bf16.mxu0 %v20000_v32  ;;  %v20509_v17 = vld [vmem:[#allocation68_spill] sm:$0xff]  ;;  %v20510_v3 = vld [vmem:[#allocation59_spill] sm:$0xff] }
 0x237   :  { %v14762_v63 = vrot.slane %v2911_v49, %v13041_v29  ;;  %1478 = vmatprep.mubr.bf16.mxu1 %v20000_v32  ;;  %v3046_v28 = vcombine.low %v3013_v43, %v3029_v46  ;;  %v3407_v4 = vcombine.low %v20510_v3, %v20509_v17  ;;  %v20511_v31 = vpack.i.bf16 %v14547_v9, %v14558_v45  ;;  %v20513_v9 = vld [vmem:[#allocation64_spill] sm:$0xff] }
 0x238   :  { %v14774_v10 = vcombine.high %v14415_v39, %v20337_v34  ;;  %12143 = vset.pattern.permute.xlu0 %v20000_v32  ;;  %v3408_v49 = vcombine.high %v20510_v3, %v20509_v17  ;;  %v14782_v18 = vcombine.high %v14732_v38, %v20337_v34  ;;  %v14786_v47 = vcombine.high %v14739_v54, %v20337_v34  ;;  %v20514_v45 = vld [vmem:[#allocation56_spill] sm:$0xff] }
 0x239   :  { %11759 = vrot.lane.b32.xlu1 %v20511_v31, %s12883_s12  ;;  %11784 = vrot.lane.b32.xlu0 %v11783_v36, %s12882_s11  ;;  %v14790_v39 = vrot.slane %v3030_v56, %v13041_v29  ;;  %v3391_v31 = vcombine.low %v20514_v45, %v20513_v9  ;;  %v3392_v17 = vcombine.high %v20514_v45, %v20513_v9  ;;  %v14796_v36 = vpop.permute.xlu1 %11519  ;;  %v14802_v21 = vpop.permute.xlu0 %11549 }
 0x23a   :  { %12144 = vset.pattern.permute.xlu1 %v20000_v32  ;;  %20515 = vst [vmem:[#allocation53_spill] sm:$0xff] %v14796_v36  ;;  %v14800_v3 = vcombine.high %v14554_v12, %v20337_v34  ;;  %v3047_v61 = vcombine.high %v3013_v43, %v3029_v46  ;;  %v14808_v56 = vcombine.high %v14751_v25, %v20337_v34  ;;  %v20518_v46 = vld [vmem:[#allocation77_spill] sm:$0xff] }
 0x23b   :  { %20512 = vst [vmem:[#allocation58_spill] sm:$0xff] %v14790_v39  ;;  %v14812_v23 = vcombine.high %v14762_v63, %v20337_v34  ;;  %v3415_v9 = vrot.slane %v3407_v4, %v12995_v16  ;;  %v11803_v12 = vpack.i.bf16 %v2994_v11, %v14722_v40  ;;  %v14820_v43 = vrot.slane %v3046_v28, %v13041_v29 }
 0x23c   :  { %v14823_v45 = vrot.slane %v3408_v49, %v12995_v16  ;;  %v20516_v32 = vpack.i.bf16 %v14626_v52, %v14603_v30  ;;  %v11813_v4 = vpack.i.bf16 %v14774_v10, %v14726_v57  ;;  %v3399_v11 = vrot.slane %v3391_v31, %v12995_v16  ;;  %v20517_v49 = vld [vmem:[#allocation16_spill] sm:$0xff]  ;;  %v20520_v10 = vld [vmem:[#allocation14_spill] sm:$0xff] }
 0x23d   :  { %11769 = vrot.lane.b32.xlu1 %v11768_v6, %s12888_s19  ;;  %v3406_v28 = vrot.slane %v3392_v17, %v12995_v16  ;;  %v3475_v58 = vcombine.low %v20518_v46, %v20517_v49  ;;  %v14839_v37 = vpop.permute.xlu1 %11524  ;;  %v14843_v30 = vcombine.high %v14790_v39, %v20337_v34  ;;  %v3476_v52 = vcombine.high %v20518_v46, %v20517_v49  ;;  %v20521_v57 = vld [vmem:[#allocation24_spill] sm:$0xff]  ;;  %v14849_v40 = vpop.permute.xlu0 %11554 }
 0x23e   :  { %11794 = vrot.lane.b32.xlu0 %v20516_v32, %s12883_s12  ;;  %20519 = vst [vmem:[#allocation68_spill] sm:$0xff] %v14839_v37  ;;  %v3543_v32 = vcombine.low %v20521_v57, %v20520_v10  ;;  %20522 = vst [vmem:[#allocation59_spill] sm:$0xff] %v14849_v40  ;;  %v14853_v31 = vcombine.high %v14526_v7, %v20337_v34  ;;  %v14856_v17 = vrot.slane %v3047_v61, %v13041_v29  ;;  %v20537_v40 = vld [vmem:[#allocation9_spill] sm:$0xff] }
 0x23f   :  { %v3423_v6 = vcombine.low %v3399_v11, %v3415_v9  ;;  %v3459_v39 = vcombine.low %v20524_v50, %v20523_v53  ;;  %v3544_v44 = vcombine.high %v20521_v57, %v20520_v10  ;;  %v20525_v46 = vpack.i.bf16 %v14666_v20, %v14630_v55 }
 0x240   :  { %v3424_v7 = vcombine.high %v3399_v11, %v3415_v9  ;;  %v3439_v8 = vcombine.low %v3406_v28, %v14823_v45  ;;  %v3460_v61 = vcombine.high %v20524_v50, %v20523_v53  ;;  %v3527_v37 = vcombine.low %v20527_v15, %v20526_v5 }
 0x241   :  { %11779 = vrot.lane.b32.xlu1 %v20525_v46, %s12887_s16  ;;  %v3440_v10 = vcombine.high %v3406_v28, %v14823_v45  ;;  %v3483_v57 = vrot.slane %v3475_v58, %v12995_v16  ;;  %v3528_v55 = vcombine.high %v20527_v15, %v20526_v5  ;;  %v14878_v20 = vpop.permute.xlu1 %11564  ;;  %v11808_v9 = vpack.i.bf16 %v14843_v30, %v14759_v27  ;;  %v14884_v50 = vpop.permute.xlu0 %11559  ;;  %v20533_v46 = vld [vmem:[#allocation19_spill] sm:$0xff] }
 0x242   :  { %11804 = vrot.lane.b32.xlu0 %v11803_v12, %s12888_s19  ;;  %20528 = vst [vmem:[#allocation64_spill] sm:$0xff] %v14878_v20  ;;  %v3490_v11 = vrot.slane %v3476_v52, %v12995_v16  ;;  %v3551_v53 = vrot.slane %v3543_v32, %v12995_v16  ;;  %20529 = vst [vmem:[#allocation56_spill] sm:$0xff] %v14884_v50  ;;  %v14890_v58 = vcombine.high %v14820_v43, %v20337_v34  ;;  %v20536_v20 = vld [vmem:[#allocation17_spill] sm:$0xff] }
 0x243   :  { %v14893_v15 = vrot.slane %v3423_v6, %v13041_v29  ;;  %v3467_v5 = vrot.slane %v3459_v39, %v12995_v16  ;;  %v3558_v27 = vrot.slane %v3544_v44, %v12995_v16  ;;  %v20531_v45 = vpack.i.bf16 %v14677_v26, %v14639_v51  ;;  %v20532_v26 = vld [vmem:[#allocation31_spill] sm:$0xff] }
 0x244   :  { %v3474_v30 = vrot.slane %v3460_v61, %v12995_v16  ;;  %v3535_v52 = vrot.slane %v3527_v37, %v12995_v16  ;;  %v14907_v6 = vrot.slane %v3424_v7, %v13041_v29  ;;  %v14911_v44 = vcombine.high %v14856_v17, %v20337_v34 }
 0x245   :  { %20530 = vst [vmem:[#allocation16_spill] sm:$0xff] %v14893_v15  ;;  %11789 = vrot.lane.b32.xlu1 %v20531_v45, %s12882_s11  ;;  %v3491_v39 = vcombine.low %v3467_v5, %v3483_v57  ;;  %v3492_v32 = vcombine.high %v3467_v5, %v3483_v57  ;;  %v3542_v51 = vrot.slane %v3528_v55, %v12995_v16  ;;  %v14916_v28 = vpop.permute.xlu1 %11569 }
 0x246   :  { %11814 = vrot.lane.b32.xlu0 %v11813_v4, %s12887_s16  ;;  %v3611_v45 = vcombine.low %v20533_v46, %v20532_v26  ;;  %20534 = vst [vmem:[#allocation77_spill] sm:$0xff] %v14916_v28  ;;  %v3507_v61 = vcombine.low %v3474_v30, %v3490_v11  ;;  %v3559_v37 = vcombine.low %v3535_v52, %v3551_v53  ;;  %v14918_v4 = vpop.permute.xlu0 %5082 }
 0x247   :  { %v3560_v49 = vcombine.high %v3535_v52, %v3551_v53  ;;  %20535 = vst [vmem:[#allocation14_spill] sm:$0xff] %v14918_v4  ;;  %v14921_v7 = vrot.slane %v3439_v8, %v13041_v29  ;;  %v3575_v12 = vcombine.low %v3542_v51, %v3558_v27  ;;  %v3576_v50 = vcombine.high %v3542_v51, %v3558_v27  ;;  %v20549_v8 = vld [vmem:[#allocation13_spill] sm:$0xff] }
 0x248   :  { %v3595_v57 = vcombine.low %v20537_v40, %v20536_v20  ;;  %v3612_v55 = vcombine.high %v20533_v46, %v20532_v26  ;;  %v20538_v5 = vpack.i.bf16 %v14688_v60, %v14642_v42  ;;  %v3508_v28 = vcombine.high %v3474_v30, %v3490_v11 }
 0x249   :  { %v20539_v53 = vpack.i.bf16 %v14732_v38, %v14692_v24  ;;  %v14939_v27 = vcombine.high %v14893_v15, %v20337_v34  ;;  %v14942_v52 = vrot.slane %v3440_v10, %v13041_v29  ;;  %v14945_v51 = vrot.slane %v3491_v39, %v13041_v29  ;;  %v14950_v24 = vpop.permute.xlu1 %11574  ;;  %v20548_v39 = vld [vmem:[#allocation21_spill] sm:$0xff] }
 0x24a   :  { %11799 = vrot.lane.b32.xlu1 %v20538_v5, %s12883_s12  ;;  %v3596_v42 = vcombine.high %v20537_v40, %v20536_v20  ;;  %v3619_v60 = vrot.slane %v3611_v45, %v12995_v16  ;;  %20541 = vst [vmem:[#allocation87_spill] sm:$0xff] %v14950_v24  ;;  %v14953_v38 = vrot.slane %v3492_v32, %v13041_v29  ;;  %v14958_v30 = vpop.permute.xlu0 %5086 }
 0x24b   :  { %11819 = vrot.lane.b32.xlu0 %v20539_v53, %s12884_s13  ;;  %20540 = vst [vmem:[#allocation24_spill] sm:$0xff] %v14945_v51  ;;  %v14956_v11 = vrot.slane %v3559_v37, %v13041_v29  ;;  %20543 = vst [vmem:[#allocation18_spill] sm:$0xff] %v14958_v30  ;;  %v14961_v10 = vrot.slane %v3560_v49, %v13041_v29  ;;  %v14966_v40 = vrot.slane %v3507_v61, %v13041_v29 }
 0x24c   :  { %v3603_v20 = vrot.slane %v3595_v57, %v12995_v16  ;;  %v3626_v26 = vrot.slane %v3612_v55, %v12995_v16  ;;  %v14972_v32 = vrot.slane %v3575_v12, %v13041_v29  ;;  %v14975_v46 = vrot.slane %v3576_v50, %v13041_v29 }
 0x24d   :  { %20542 = vst [vmem:[#allocation66_spill] sm:$0xff] %v14956_v11  ;;  %v20544_v49 = vpack.i.bf16 %v14782_v18, %v14736_v1  ;;  %v14983_v45 = vcombine.high %v14907_v6, %v20337_v34  ;;  %v14987_v61 = vcombine.high %v14921_v7, %v20337_v34  ;;  %v14994_v50 = vrot.slane %v3508_v28, %v13041_v29  ;;  %v14997_v18 = vpop.permute.xlu1 %11579 }
 0x24e   :  { %11809 = vrot.lane.b32.xlu1 %v11808_v9, %s12888_s19  ;;  %v14991_v9 = vcombine.high %v14942_v52, %v20337_v34  ;;  %v3610_v12 = vrot.slane %v3596_v42, %v12995_v16  ;;  %v3627_v37 = vcombine.low %v3603_v20, %v3619_v60  ;;  %20546 = vst [vmem:[#allocation31_spill] sm:$0xff] %v14997_v18  ;;  %v15007_v5 = vpop.permute.xlu0 %5090  ;;  %v20552_v18 = vld [vmem:[#allocation15_spill] sm:$0xff] }
 0x24f   :  { %11834 = vrot.lane.b32.xlu0 %v20544_v49, %s12882_s11  ;;  %v15001_v1 = vcombine.high %v14945_v51, %v20337_v34  ;;  %v15005_v57 = vcombine.high %v14953_v38, %v20337_v34  ;;  %v3628_v55 = vcombine.high %v3603_v20, %v3619_v60  ;;  %20547 = vst [vmem:[#allocation19_spill] sm:$0xff] %v15007_v5 }
 0x250   :  { %20545 = vst [vmem:[#allocation78_spill] sm:$0xff] %v14991_v9  ;;  %v3591_v28 = vcombine.high %v14956_v11, %v20337_v34  ;;  %v15013_v53 = vcombine.high %v14961_v10, %v20337_v34  ;;  %v15017_v42 = vcombine.high %v14966_v40, %v20337_v34  ;;  %v3643_v49 = vcombine.low %v3610_v12, %v3626_v26  ;;  %v20551_v11 = vld [vmem:[#allocation27_spill] sm:$0xff] }
 0x251   :  { %v4537_v51 = vcombine.low %v20549_v8, %v20548_v39  ;;  %v20550_v60 = vpack.i.bf16 %v14853_v31, %v14800_v3  ;;  %v15027_v20 = vcombine.high %v14972_v32, %v20337_v34  ;;  %v15031_v15 = vcombine.high %v14975_v46, %v20337_v34 }
 0x252   :  { %v4521_v30 = vcombine.low %v20552_v18, %v20551_v11  ;;  %v4522_v5 = vcombine.high %v20552_v18, %v20551_v11  ;;  %v20553_v24 = vpack.i.bf16 %v14739_v54, %v14695_v33  ;;  %v11873_v3 = vpack.i.bf16 %v14961_v10, %v14907_v6  ;;  %v15052_v11 = vpop.permute.xlu1 %5084  ;;  %v15056_v54 = vpop.permute.xlu0 %5094 }
 0x253   :  { %11824 = vrot.lane.b32.xlu1 %v20550_v60, %s12887_s16  ;;  %v15045_v31 = vcombine.high %v14994_v50, %v20337_v34  ;;  %v15048_v60 = vrot.slane %v3627_v37, %v13041_v29  ;;  %v3644_v4 = vcombine.high %v3610_v12, %v3626_v26  ;;  %v4538_v36 = vcombine.high %v20549_v8, %v20548_v39 }
 0x254   :  { %11844 = vrot.lane.b32.xlu0 %v20553_v24, %s12885_s14  ;;  %20555 = vst [vmem:[#allocation9_spill] sm:$0xff] %v15052_v11  ;;  %20556 = vst [vmem:[#allocation21_spill] sm:$0xff] %v15056_v54  ;;  %v11863_v6 = vpack.i.bf16 %v3591_v28, %v14939_v27  ;;  %v15062_v10 = vrot.slane %v3628_v55, %v13041_v29  ;;  %v4545_v8 = vrot.slane %v4537_v51, %v12995_v16  ;;  %v20558_v28 = vld [vmem:[#allocation36_spill] sm:$0xff] }
 0x255   :  { %20554 = vst [vmem:[#allocation17_spill] sm:$0xff] %v15048_v60  ;;  %v20557_v39 = vpack.i.bf16 %v14820_v43, %v14751_v25  ;;  %v15074_v27 = vrot.slane %v3643_v49, %v13041_v29  ;;  %v4529_v18 = vrot.slane %v4521_v30, %v12995_v16  ;;  %v4536_v55 = vrot.slane %v4522_v5, %v12995_v16  ;;  %v20559_v51 = vld [vmem:[#allocation32_spill] sm:$0xff] }
 0x256   :  { %v4605_v26 = vcombine.low %v20559_v51, %v20558_v28  ;;  %v4606_v25 = vcombine.high %v20559_v51, %v20558_v28  ;;  %v20560_v43 = vpack.i.bf16 %v14786_v47, %v14743_v2  ;;  %v4552_v49 = vrot.slane %v4538_v36, %v12995_v16  ;;  %v15091_v12 = vpop.permute.xlu1 %5088  ;;  %v20563_v28 = vld [vmem:[#allocation30_spill] sm:$0xff]  ;;  %v20564_v51 = vld [vmem:[#allocation25_spill] sm:$0xff]  ;;  %v15106_v36 = vpop.permute.xlu0 %5098 }
 0x257   :  { %11829 = vrot.lane.b32.xlu1 %v20557_v39, %s12884_s13  ;;  %v20561_v39 = vld [vmem:[#allocation26_spill] sm:$0xff]  ;;  %20562 = vst [vmem:[#allocation13_spill] sm:$0xff] %v15091_v12  ;;  %v15095_v30 = vcombine.high %v15048_v60, %v20337_v34  ;;  %v15098_v5 = vrot.slane %v3644_v4, %v13041_v29  ;;  %v4589_v33 = vcombine.low %v20564_v51, %v20563_v28  ;;  %20565 = vst [vmem:[#allocation27_spill] sm:$0xff] %v15106_v36  ;;  %v20566_v60 = vld [vmem:[#allocation92_spill] sm:$0xff] }
 0x258   :  { %11854 = vrot.lane.b32.xlu0 %v20560_v43, %s12883_s12  ;;  %v4673_v37 = vcombine.low %v20561_v39, %v14450_v14  ;;  %v4590_v47 = vcombine.high %v20564_v51, %v20563_v28  ;;  %v4674_v2 = vcombine.high %v20561_v39, %v14450_v14  ;;  %v4553_v24 = vcombine.low %v4529_v18, %v4545_v8  ;;  %v20567_v12 = vld [vmem:[#allocation28_spill] sm:$0xff] }
 0x259   :  { %v4657_v54 = vcombine.low %v20567_v12, %v20566_v60  ;;  %v20568_v4 = vpack.i.bf16 %v14890_v58, %v14808_v56  ;;  %v15118_v28 = vcombine.high %v15062_v10, %v20337_v34  ;;  %v4554_v39 = vcombine.high %v4529_v18, %v4545_v8 }
 0x25a   :  { %v4613_v51 = vrot.slane %v4605_v26, %v12995_v16  ;;  %v4620_v43 = vrot.slane %v4606_v25, %v12995_v16  ;;  %v4658_v36 = vcombine.high %v20567_v12, %v20566_v60  ;;  %v4569_v11 = vcombine.low %v4536_v55, %v4552_v49  ;;  %v15135_v25 = vpop.permute.xlu0 %11584 }
 0x25b   :  { %11839 = vrot.lane.b32.xlu1 %v20568_v4, %s12882_s11  ;;  %v4570_v56 = vcombine.high %v4536_v55, %v4552_v49  ;;  %v4681_v58 = vrot.slane %v4673_v37, %v12995_v16  ;;  %v15128_v4 = vpop.permute.xlu1 %5092  ;;  %v11868_v9 = vpack.i.bf16 %v15095_v30, %v15001_v1  ;;  %v4597_v8 = vrot.slane %v4589_v33, %v12995_v16 }
 0x25c   :  { %11864 = vrot.lane.b32.xlu0 %v11863_v6, %s12888_s19  ;;  %v4604_v26 = vrot.slane %v4590_v47, %v12995_v16  ;;  %v4688_v18 = vrot.slane %v4674_v2, %v12995_v16  ;;  %v15139_v60 = vcombine.high %v15074_v27, %v20337_v34  ;;  %v4665_v6 = vrot.slane %v4657_v54, %v12995_v16 }
 0x25d   :  { %v20569_v12 = vpack.i.bf16 %v14856_v17, %v14762_v63  ;;  %v15152_v37 = vcombine.high %v15098_v5, %v20337_v34  ;;  %v4621_v55 = vcombine.low %v4597_v8, %v4613_v51  ;;  %v4622_v49 = vcombine.high %v4597_v8, %v4613_v51 }
 0x25e   :  { %v4637_v30 = vcombine.low %v4604_v26, %v4620_v43  ;;  %v4672_v54 = vrot.slane %v4658_v36, %v12995_v16  ;;  %v15157_v63 = vrot.slane %v4553_v24, %v13041_v29  ;;  %v4638_v17 = vcombine.high %v4604_v26, %v4620_v43  ;;  %v15161_v14 = vpop.permute.xlu0 %11594 }
 0x25f   :  { %11849 = vrot.lane.b32.xlu1 %v20569_v12, %s12885_s14  ;;  %v4689_v47 = vcombine.low %v4665_v6, %v4681_v58  ;;  %v4690_v2 = vcombine.high %v4665_v6, %v4681_v58  ;;  %v15159_v12 = vpop.permute.xlu1 %5096  ;;  %v15166_v51 = vrot.slane %v4554_v39, %v13041_v29  ;;  %v15169_v36 = vrot.slane %v4569_v11, %v13041_v29 }
 0x260   :  { %11874 = vrot.lane.b32.xlu0 %v11873_v3, %s12886_s15  ;;  %20570 = vst [vmem:[#allocation15_spill] sm:$0xff] %v15157_v63  ;;  %v4705_v33 = vcombine.low %v4672_v54, %v4688_v18  ;;  %v4706_v3 = vcombine.high %v4672_v54, %v4688_v18  ;;  %v4741_v24 = vcombine.low %v14486_v48, %v14570_v0 }
 0x261   :  { %20571 = vst [vmem:[#allocation36_spill] sm:$0xff] %v15166_v51  ;;  %20572 = vst [vmem:[#allocation32_spill] sm:$0xff] %v15169_v36  ;;  %v20573_v43 = vpack.i.bf16 %v14911_v44, %v14812_v23  ;;  %v15180_v8 = vrot.slane %v4570_v56, %v13041_v29  ;;  %v15183_v39 = vrot.slane %v4621_v55, %v13041_v29 }
 0x262   :  { %v4742_v11 = vcombine.high %v14486_v48, %v14570_v0  ;;  %v20576_v26 = vpack.i.bf16 %v15013_v53, %v14983_v45  ;;  %v15192_v23 = vrot.slane %v4622_v49, %v13041_v29  ;;  %v15195_v44 = vrot.slane %v4637_v30, %v13041_v29  ;;  %v15212_v53 = vpop.permute.xlu0 %11604 }
 0x263   :  { %11859 = vrot.lane.b32.xlu1 %v20573_v43, %s12883_s12  ;;  %20574 = vst [vmem:[#allocation26_spill] sm:$0xff] %v15180_v8  ;;  %20575 = vst [vmem:[#allocation30_spill] sm:$0xff] %v15183_v39  ;;  %v15198_v56 = vrot.slane %v4689_v47, %v13041_v29  ;;  %v4725_v18 = vcombine.low %v14440_v19, %v14522_v62  ;;  %v15202_v6 = vpop.permute.xlu1 %5100  ;;  %v15205_v48 = vrot.slane %v4690_v2, %v13041_v29 }
 0x264   :  { %11884 = vrot.lane.b32.xlu0 %v20576_v26, %s12887_s16  ;;  %20577 = vst [vmem:[#allocation25_spill] sm:$0xff] %v15195_v44  ;;  %v15208_v0 = vrot.slane %v4638_v17, %v13041_v29  ;;  %v4726_v45 = vcombine.high %v14440_v19, %v14522_v62  ;;  %v15216_v55 = vcombine.high %v15157_v63, %v20337_v34 }
 0x265   :  { %20578 = vst [vmem:[#allocation92_spill] sm:$0xff] %v15198_v56  ;;  %20579 = vst [vmem:[#allocation28_spill] sm:$0xff] %v15205_v48  ;;  %v15220_v49 = vcombine.high %v15166_v51, %v20337_v34  ;;  %v15223_v30 = vrot.slane %v4705_v33, %v13041_v29  ;;  %v4749_v54 = vrot.slane %v4741_v24, %v12995_v16 }
 0x266   :  { %20580 = vst [vmem:[#allocation93_spill] sm:$0xff] %v15208_v0  ;;  %v15229_v19 = vcombine.high %v15169_v36, %v20337_v34  ;;  %v15232_v62 = vrot.slane %v4706_v3, %v13041_v29  ;;  %v15236_v17 = vcombine.high %v15180_v8, %v20337_v34  ;;  %v4756_v47 = vrot.slane %v4742_v11, %v12995_v16 }
 0x267   :  { %20581 = vst [vmem:[#allocation94_spill] sm:$0xff] %v15223_v30  ;;  %11869 = vrot.lane.b32.xlu1 %v11868_v9, %s12888_s19  ;;  %v20585_v33 = vpack.i.bf16 %v14972_v32, %v14921_v7  ;;  %v15245_v9 = vcombine.high %v15183_v39, %v20337_v34  ;;  %v15249_v2 = vcombine.high %v15192_v23, %v20337_v34  ;;  %v15256_v43 = vpop.permute.xlu1 %11589 }
 0x268   :  { %20582 = vst [vmem:[#allocation95_spill] sm:$0xff] %v15229_v19  ;;  %20583 = vst [vmem:[#allocation96_spill] sm:$0xff] %v15232_v62  ;;  %v15253_v3 = vcombine.high %v15195_v44, %v20337_v34  ;;  %v4733_v24 = vrot.slane %v4725_v18, %v12995_v16  ;;  %v15260_v7 = vcombine.high %v15198_v56, %v20337_v34  ;;  %v15272_v18 = vpop.permute.xlu0 %11614  ;;  %v20619_v19 = vld [vmem:[#allocation77_spill] sm:$0xff] }
 0x269   :  { %20584 = vst [vmem:[#allocation97_spill] sm:$0xff] %v15236_v17  ;;  %11894 = vrot.lane.b32.xlu0 %v20585_v33, %s12884_s13  ;;  %v15264_v32 = vcombine.high %v15205_v48, %v20337_v34  ;;  %v15268_v11 = vcombine.high %v15208_v0, %v20337_v34  ;;  %v4740_v26 = vrot.slane %v4726_v45, %v12995_v16  ;;  %v11546_v33 = vunpack.i.l.bf16 %v14753_v41  ;;  %v20608_v17 = vld [vmem:[#allocation56_spill] sm:$0xff] }
 0x26a   :  { %20586 = vst [vmem:[#allocation98_spill] sm:$0xff] %v15253_v3  ;;  %20588 = vst [vmem:[#allocation100_spill] sm:$0xff] %v15272_v18  ;;  %v15278_v1 = vcombine.high %v15223_v30, %v20337_v34  ;;  %v4757_v39 = vcombine.low %v4733_v24, %v4749_v54  ;;  %v4758_v63 = vcombine.high %v4733_v24, %v4749_v54  ;;  %v11547_v48 = vunpack.i.h.bf16 %v14753_v41  ;;  %v20593_v30 = vld [vmem:[#allocation35_spill] sm:$0xff] }
 0x26b   :  { %20587 = vst [vmem:[#allocation99_spill] sm:$0xff] %v15268_v11  ;;  %v20590_v56 = vpack.i.bf16 %v15062_v10, %v14953_v38  ;;  %v15288_v18 = vcombine.high %v15232_v62, %v20337_v34  ;;  %v4773_v58 = vcombine.low %v4740_v26, %v4756_v47  ;;  %v5118_v51 = vcombine.low %v14495_v35, %v14580_v13  ;;  %v15302_v24 = vpop.permute.xlu1 %11599 }
 0x26c   :  { %20589 = vst [vmem:[#allocation101_spill] sm:$0xff] %v15278_v1  ;;  %v20592_v54 = vpack.i.bf16 %v15027_v20, %v14987_v61  ;;  %v5119_v10 = vcombine.high %v14495_v35, %v14580_v13  ;;  %v4774_v36 = vcombine.high %v4740_v26, %v4756_v47  ;;  %v870_v61 = vsel %vm869_vm3, %v20593_v30, %v11546_v33  ;;  %v20596_v35 = vld [vmem:[#allocation34_spill] sm:$0xff] }
 0x26d   :  { %11879 = vrot.lane.b32.xlu1 %v20590_v56, %s12886_s15  ;;  %20591 = vst [vmem:[#allocation102_spill] sm:$0xff] %v15288_v18  ;;  %v11516_v56 = vunpack.i.l.bf16 %v14748_v22  ;;  %v11551_v20 = vunpack.i.l.bf16 %v14802_v21  ;;  %v15316_v13 = vrot.slane %v4757_v39, %v13041_v29  ;;  %v11517_v38 = vunpack.i.h.bf16 %v14748_v22 }
 0x26e   :  { %11904 = vrot.lane.b32.xlu0 %v20592_v54, %s12882_s11  ;;  %v15311_v54 = vpop.permute.xlu0 %11624  ;;  %v20595_v47 = vpack.i.bf16 %v15118_v28, %v15005_v57  ;;  %v15324_v30 = vrot.slane %v4758_v63, %v13041_v29  ;;  %v15329_v33 = vrot.slane %v5118_v51, %v12995_v16  ;;  %v871_v39 = vsel %vm869_vm3, %v20596_v35, %v11547_v48  ;;  %v20599_v51 = vld [vmem:[#allocation53_spill] sm:$0xff] }
 0x26f   :  { %20594 = vst [vmem:[#allocation35_spill] sm:$0xff] %v15316_v13  ;;  %v11552_v22 = vunpack.i.h.bf16 %v14802_v21  ;;  %v20597_v57 = vpack.i.bf16 %v14975_v46, %v14942_v52  ;;  %v15339_v28 = vrot.slane %v4773_v58, %v13041_v29  ;;  %v15342_v63 = vrot.slane %v5119_v10, %v12995_v16  ;;  %v15347_v48 = vpop.permute.xlu1 %11609  ;;  %v20600_v52 = vld [vmem:[#allocation59_spill] sm:$0xff] }
 0x270   :  { %v11521_v26 = vunpack.i.l.bf16 %v20599_v51  ;;  %v873_v41 = vsel %vm872_vm4, %v870_v61, %v11516_v56  ;;  %v11531_v21 = vunpack.i.l.bf16 %v14635_v59  ;;  %v11556_v46 = vunpack.i.l.bf16 %v20600_v52 }
 0x271   :  { %11889 = vrot.lane.b32.xlu1 %v20595_v47, %s12887_s16  ;;  %20598 = vst [vmem:[#allocation34_spill] sm:$0xff] %v15339_v28  ;;  %v11532_v47 = vunpack.i.h.bf16 %v14635_v59  ;;  %v876_v35 = vsel %vm875_vm5, %v873_v41, %v11551_v20  ;;  %v15355_v58 = vrot.slane %v4774_v36, %v13041_v29  ;;  %v11522_v10 = vunpack.i.h.bf16 %v20599_v51  ;;  %v20603_v20 = vld [vmem:[#allocation78_spill] sm:$0xff]  ;;  %v20606_v41 = vld [vmem:[#allocation64_spill] sm:$0xff] }
 0x272   :  { %11914 = vrot.lane.b32.xlu0 %v20597_v57, %s12885_s14  ;;  %v15352_v57 = vpop.permute.xlu0 %11634  ;;  %v874_v45 = vsel %vm872_vm4, %v871_v39, %v11517_v38  ;;  %v20602_v56 = vpack.i.bf16 %v15074_v27, %v14966_v40  ;;  %v15365_v59 = vcombine.high %v15316_v13, %v20337_v34  ;;  %v11557_v36 = vunpack.i.h.bf16 %v20600_v52  ;;  %v20605_v39 = vld [vmem:[#allocation68_spill] sm:$0xff]  ;;  %v20607_v13 = vld [vmem:[#allocation47_spill] sm:$0xff] }
 0x273   :  { %20601 = vst [vmem:[#allocation53_spill] sm:$0xff] %v15355_v58  ;;  %v877_v61 = vsel %vm875_vm5, %v874_v45, %v11552_v22  ;;  %v20604_v38 = vpack.i.bf16 %v15031_v15, %v20603_v20  ;;  %v15377_v40 = vcombine.high %v15324_v30, %v20337_v34  ;;  %v11526_v51 = vunpack.i.l.bf16 %v20605_v39  ;;  %v15385_v52 = vpop.permute.xlu1 %11619 }
 0x274   :  { %v11567_v45 = vunpack.i.h.bf16 %v20606_v41  ;;  %v11566_v22 = vunpack.i.l.bf16 %v20606_v41  ;;  %v11537_v15 = vunpack.i.h.bf16 %v20607_v13  ;;  %v11536_v20 = vunpack.i.l.bf16 %v20607_v13 }
 0x275   :  { %11899 = vrot.lane.b32.xlu1 %v20602_v56, %s12884_s13  ;;  %v879_v56 = vsel %vm878_vm6, %v876_v35, %v11521_v26  ;;  %v11561_v18 = vunpack.i.l.bf16 %v20608_v17  ;;  %v880_v27 = vsel %vm878_vm6, %v877_v61, %v11522_v10  ;;  %v20609_v26 = vpack.i.bf16 %v15139_v60, %v15017_v42  ;;  %v20610_v10 = vld [vmem:[#allocation14_spill] sm:$0xff]  ;;  %v20611_v61 = vld [vmem:[#allocation41_spill] sm:$0xff]  ;;  %v20612_v42 = vld [vmem:[#allocation67_spill] sm:$0xff] }
 0x276   :  { %11924 = vrot.lane.b32.xlu0 %v20604_v38, %s12883_s12  ;;  %v882_v38 = vsel %vm881_vm7, %v879_v56, %v11556_v46  ;;  %v15391_v8 = vpop.permute.xlu0 %11644  ;;  %v15402_v13 = vcombine.high %v15339_v28, %v20337_v34  ;;  %v11527_v41 = vunpack.i.h.bf16 %v20605_v39  ;;  %v883_v56 = vsel %vm881_vm7, %v880_v27, %v11557_v36  ;;  %v20613_v60 = vld [vmem:[#allocation60_spill] sm:$0xff]  ;;  %v20616_v28 = vld [vmem:[#allocation38_spill] sm:$0xff] }
 0x277   :  { %v5134_v44 = vcombine.low %v20611_v61, %v20610_v10  ;;  %v15416_v35 = vcombine.high %v15355_v58, %v20337_v34  ;;  %v891_v62 = vsel %vm869_vm3, %v20616_v28, %v11567_v45  ;;  %v20617_v46 = vld [vmem:[#allocation40_spill] sm:$0xff]  ;;  %v11562_v36 = vunpack.i.h.bf16 %v20608_v17  ;;  %v15423_v27 = vpop.permute.xlu1 %11629  ;;  %v20621_v58 = vld [vmem:[#allocation37_spill] sm:$0xff] }
 0x278   :  { %v890_v39 = vsel %vm869_vm3, %v20617_v46, %v11566_v22  ;;  %20618 = vst [vmem:[#allocation78_spill] sm:$0xff] %v15423_v27  ;;  %v885_v0 = vsel %vm884_vm8, %v882_v38, %v11526_v51  ;;  %v11572_v1 = vunpack.i.h.bf16 %v20619_v19  ;;  %v20620_v45 = vld [vmem:[#allocation44_spill] sm:$0xff]  ;;  %v20622_v51 = vpack.i.bf16 %v15098_v5, %v14994_v50  ;;  %v20623_v46 = vld [vmem:[#allocation55_spill] sm:$0xff] }
 0x279   :  { %11909 = vrot.lane.b32.xlu1 %v20609_v26, %s12882_s11  ;;  %v20614_v26 = vpack.i.bf16 %v20612_v42, %v20613_v60  ;;  %20615 = vst [vmem:[#allocation59_spill] sm:$0xff] %v15416_v35  ;;  %v11571_v42 = vunpack.i.l.bf16 %v20619_v19  ;;  %v5135_v60 = vcombine.high %v20611_v61, %v20610_v10  ;;  %v888_v28 = vsel %vm887_vm9, %v885_v0, %v11561_v18  ;;  %v20624_v18 = vld [vmem:[#allocation65_spill] sm:$0xff]  ;;  %v20625_v61 = vld [vmem:[#allocation63_spill] sm:$0xff] }
 0x27a   :  { %v5186_v22 = vcombine.low %v20621_v58, %v20620_v45  ;;  %v5187_v17 = vcombine.high %v20621_v58, %v20620_v45  ;;  %v11542_v10 = vunpack.i.h.bf16 %v20623_v46  ;;  %v5142_v0 = vrot.slane %v5134_v44, %v12995_v16 }
 0x27b   :  { %11934 = vrot.lane.b32.xlu0 %v20614_v26, %s12888_s19  ;;  %v15430_v26 = vpop.permute.xlu0 %11669  ;;  %v20626_v27 = vpack.i.bf16 %v20624_v18, %v20625_v61  ;;  %v886_v50 = vsel %vm884_vm8, %v883_v56, %v11527_v41  ;;  %v892_v5 = vsel %vm872_vm4, %v890_v39, %v11531_v21  ;;  %v893_v45 = vsel %vm872_vm4, %v891_v62, %v11532_v47  ;;  %v20628_v18 = vld [vmem:[#allocation87_spill] sm:$0xff]  ;;  %v20629_v21 = vld [vmem:[#allocation9_spill] sm:$0xff]  ;;  %v20630_v56 = vld [vmem:[#allocation54_spill] sm:$0xff] }
 0x27c   :  { %v904_v38 = vpack.c.bf16 %v888_v28, %v888_v28  ;;  %v889_v19 = vsel %vm887_vm9, %v886_v50, %v11562_v36  ;;  %v894_v44 = vsel %vm875_vm5, %v892_v5, %v11571_v42  ;;  %v895_v3 = vsel %vm875_vm5, %v893_v45, %v11572_v1  ;;  %v20632_v28 = vld [vmem:[#allocation71_spill] sm:$0xff] }
 0x27d   :  { %11919 = vrot.lane.b32.xlu1 %v20622_v51, %s12885_s14  ;;  %v15456_v51 = vpop.permute.xlu1 %11639  ;;  %v11576_v61 = vunpack.i.l.bf16 %v20628_v18  ;;  %v15466_v41 = vrot.slane %v5186_v22, %v12995_v16  ;;  %v11541_v62 = vunpack.i.l.bf16 %v20623_v46  ;;  %v11577_v47 = vunpack.i.h.bf16 %v20628_v18  ;;  %v20633_v22 = vld [vmem:[#allocation69_spill] sm:$0xff]  ;;  %v20635_v18 = vld [vmem:[#allocation27_spill] sm:$0xff] }
 0x27e   :  { %20627 = vst [vmem:[#allocation68_spill] sm:$0xff] %v15456_v51  ;;  %v5202_v39 = vcombine.low %v20630_v56, %v20629_v21  ;;  %v20631_v1 = vpack.i.bf16 %v15152_v37, %v15045_v31  ;;  %v15477_v36 = vrot.slane %v5187_v17, %v12995_v16  ;;  %v5150_v42 = vcombine.low %v15329_v33, %v5142_v0  ;;  %v20636_v31 = vld [vmem:[#allocation19_spill] sm:$0xff]  ;;  %v20668_v51 = vld [vmem:[#allocation81_spill] sm:$0xff] }
 0x27f   :  { %11944 = vrot.lane.b32.xlu0 %v20626_v27, %s12886_s15  ;;  %v5149_v27 = vrot.slane %v5135_v60, %v12995_v16  ;;  %v15463_v58 = vpop.permute.xlu0 %11674  ;;  %v5151_v60 = vcombine.high %v15329_v33, %v5142_v0  ;;  %v20634_v46 = vpack.i.bf16 %v20632_v28, %v20633_v22  ;;  %v906_v50 = vpack.c.bf16 %v889_v19, %v889_v19  ;;  %v20640_v22 = vld [vmem:[#allocation18_spill] sm:$0xff] }
 0x280   :  { %v896_v5 = vsel %vm878_vm6, %v894_v44, %v11536_v20  ;;  %v897_v45 = vsel %vm878_vm6, %v895_v3, %v11537_v15  ;;  %v5270_v37 = vcombine.low %v20636_v31, %v20635_v18  ;;  %v15492_v17 = vsel %vm1392_vm10, %v904_v38, 0  ;;  %v20639_v38 = vld [vmem:[#allocation21_spill] sm:$0xff] }
 0x281   :  { %11929 = vrot.lane.b32.xlu1 %v20631_v1, %s12883_s12  ;;  %v15489_v1 = vpop.permute.xlu1 %11649  ;;  %20638 = vst [vmem:[#allocation47_spill] sm:$0xff] %v15492_v17  ;;  %v5166_v33 = vcombine.low %v15342_v63, %v5149_v27  ;;  %v5167_v0 = vcombine.high %v15342_v63, %v5149_v27  ;;  %v898_v28 = vsel %vm881_vm7, %v896_v5, %v11576_v61  ;;  %v20642_v63 = vld [vmem:[#allocation83_spill] sm:$0xff] }
 0x282   :  { %20637 = vst [vmem:[#allocation64_spill] sm:$0xff] %v15489_v1  ;;  %v5271_v19 = vcombine.high %v20636_v31, %v20635_v18  ;;  %v899_v3 = vsel %vm881_vm7, %v897_v45, %v11577_v47  ;;  %v5203_v15 = vcombine.high %v20630_v56, %v20629_v21  ;;  %v5210_v44 = vrot.slane %v5202_v39, %v12995_v16  ;;  %v20641_v1 = vld [vmem:[#allocation79_spill] sm:$0xff]  ;;  %v20645_v47 = vld [vmem:[#allocation74_spill] sm:$0xff]  ;;  %v20646_v45 = vld [vmem:[#allocation80_spill] sm:$0xff] }
 0x283   :  { %11954 = vrot.lane.b32.xlu0 %v20634_v46, %s12887_s16  ;;  %v15499_v20 = vpop.permute.xlu0 %11679  ;;  %v5254_v46 = vcombine.low %v20640_v22, %v20639_v38  ;;  %v20643_v27 = vpack.i.bf16 %v20641_v1, %v20642_v63  ;;  %v15512_v61 = vrot.slane %v5150_v42, %v13041_v29  ;;  %v5255_v5 = vcombine.high %v20640_v22, %v20639_v38  ;;  %v20649_v18 = vld [vmem:[#allocation31_spill] sm:$0xff] }
 0x284   :  { %v20647_v21 = vpack.i.bf16 %v20645_v47, %v20646_v45  ;;  %v15521_v56 = vrot.slane %v5151_v60, %v13041_v29  ;;  %v15524_v39 = vsel %vm1392_vm10, %v906_v50, 0  ;;  %v11582_v31 = vunpack.i.h.bf16 %v20649_v18 }
 0x285   :  { %11939 = vrot.lane.b32.xlu1 %v20643_v27, %s12888_s19  ;;  %20644 = vst [vmem:[#allocation56_spill] sm:$0xff] %v15512_v61  ;;  %20648 = vst [vmem:[#allocation14_spill] sm:$0xff] %v15524_v39  ;;  %v11581_v1 = vunpack.i.l.bf16 %v20649_v18  ;;  %v5278_v42 = vrot.slane %v5270_v37, %v12995_v16  ;;  %v15529_v63 = vpop.permute.xlu1 %11654  ;;  %v900_v38 = vsel %vm884_vm8, %v898_v28, %v11541_v62  ;;  %v20652_v28 = vld [vmem:[#allocation72_spill] sm:$0xff] }
 0x286   :  { %v5285_v22 = vrot.slane %v5271_v19, %v12995_v16  ;;  %v901_v60 = vsel %vm884_vm8, %v899_v3, %v11542_v10  ;;  %v15537_v47 = vrot.slane %v5166_v33, %v13041_v29  ;;  %v15540_v50 = vrot.slane %v5167_v0, %v13041_v29  ;;  %v20653_v19 = vld [vmem:[#allocation75_spill] sm:$0xff]  ;;  %v20655_v0 = vld [vmem:[#allocation84_spill] sm:$0xff] }
 0x287   :  { %11964 = vrot.lane.b32.xlu0 %v20647_v21, %s12884_s13  ;;  %v15533_v27 = vpop.permute.xlu0 %11684  ;;  %v5217_v45 = vrot.slane %v5203_v15, %v12995_v16  ;;  %v5218_v37 = vcombine.low %v15466_v41, %v5210_v44  ;;  %v5219_v21 = vcombine.high %v15466_v41, %v5210_v44  ;;  %v5262_v62 = vrot.slane %v5254_v46, %v12995_v16  ;;  %v20656_v3 = vld [vmem:[#allocation20_spill] sm:$0xff] }
 0x288   :  { %20650 = vst [vmem:[#allocation41_spill] sm:$0xff] %v15537_v47  ;;  %20651 = vst [vmem:[#allocation67_spill] sm:$0xff] %v15540_v50  ;;  %v20654_v18 = vpack.i.bf16 %v20652_v28, %v20653_v19  ;;  %v5269_v10 = vrot.slane %v5255_v5, %v12995_v16  ;;  %v5338_v33 = vcombine.low %v15128_v4, %v15202_v6 }
 0x289   :  { %v20657_v15 = vpack.i.bf16 %v20655_v0, %v20656_v3  ;;  %v15559_v41 = vcombine.high %v15512_v61, %v20337_v34  ;;  %v15563_v44 = vcombine.high %v15521_v56, %v20337_v34  ;;  %v5286_v46 = vcombine.low %v5262_v62, %v5278_v42  ;;  %v15565_v19 = vpop.permute.xlu1 %11659  ;;  %v20659_v3 = vld [vmem:[#allocation13_spill] sm:$0xff] }
 0x28a   :  { %11949 = vrot.lane.b32.xlu1 %v20654_v18, %s12886_s15  ;;  %v5287_v28 = vcombine.high %v5262_v62, %v5278_v42  ;;  %v15568_v5 = vsel %vm887_vm9, %v900_v38, %v11581_v1  ;;  %v15571_v18 = vsel %vm887_vm9, %v901_v60, %v11582_v31  ;;  %v5302_v0 = vcombine.low %v5269_v10, %v5285_v22  ;;  %v20664_v60 = vld [vmem:[#allocation82_spill] sm:$0xff]  ;;  %v20665_v62 = vld [vmem:[#allocation85_spill] sm:$0xff] }
 0x28b   :  { %11974 = vrot.lane.b32.xlu0 %v20657_v15, %s12882_s11  ;;  %20658 = vst [vmem:[#allocation60_spill] sm:$0xff] %v15571_v18  ;;  %v5322_v15 = vcombine.low %v20659_v3, %v15159_v12  ;;  %v15575_v61 = vpop.permute.xlu0 %11694  ;;  %v15579_v39 = vcombine.high %v15537_v47, %v20337_v34  ;;  %v15583_v42 = vcombine.high %v15540_v50, %v20337_v34  ;;  %v20693_v47 = vld [vmem:[#allocation52_spill] sm:$0xff] }
 0x28c   :  { %20660 = vst [vmem:[#allocation38_spill] sm:$0xff] %v15575_v61  ;;  %v15586_v1 = vrot.slane %v5218_v37, %v13041_v29  ;;  %v5234_v31 = vcombine.low %v15477_v36, %v5217_v45  ;;  %v5235_v38 = vcombine.high %v15477_v36, %v5217_v45  ;;  %v20666_v17 = vpack.i.bf16 %v20664_v60, %v20665_v62  ;;  %v20667_v37 = vld [vmem:[#allocation76_spill] sm:$0xff]  ;;  %v20673_v60 = vld [vmem:[#allocation90_spill] sm:$0xff] }
 0x28d   :  { %20661 = vst [vmem:[#allocation40_spill] sm:$0xff] %v15579_v39  ;;  %20662 = vst [vmem:[#allocation77_spill] sm:$0xff] %v15583_v42  ;;  %v15595_v11 = vrot.slane %v5219_v21, %v13041_v29  ;;  %v5303_v35 = vcombine.high %v5269_v10, %v5285_v22  ;;  %v5339_v50 = vcombine.high %v15128_v4, %v15202_v6  ;;  %v15610_v21 = vpop.permute.xlu1 %11664  ;;  %v11586_v6 = vunpack.i.l.bf16 %v15135_v25  ;;  %v20681_v36 = vld [vmem:[#allocation48_spill] sm:$0xff] }
 0x28e   :  { %20663 = vst [vmem:[#allocation44_spill] sm:$0xff] %v15586_v1  ;;  %11959 = vrot.lane.b32.xlu1 %v20666_v17, %s12887_s16  ;;  %v5346_v42 = vrot.slane %v5338_v33, %v12995_v16  ;;  %v20669_v61 = vpack.i.bf16 %v20667_v37, %v20668_v51  ;;  %v15607_v45 = vrot.slane %v5286_v46, %v13041_v29  ;;  %v11587_v17 = vunpack.i.h.bf16 %v15135_v25  ;;  %v20672_v46 = vld [vmem:[#allocation88_spill] sm:$0xff] }
 0x28f   :  { %v15613_v22 = vrot.slane %v5287_v28, %v13041_v29  ;;  %v5323_v51 = vcombine.high %v20659_v3, %v15159_v12  ;;  %v15621_v10 = vpop.permute.xlu0 %11704  ;;  %v15624_v33 = vrot.slane %v5302_v0, %v13041_v29  ;;  %v20674_v28 = vpack.i.bf16 %v20672_v46, %v20673_v60  ;;  %v20677_v46 = vld [vmem:[#allocation86_spill] sm:$0xff]  ;;  %v20678_v60 = vld [vmem:[#allocation89_spill] sm:$0xff]  ;;  %v20695_v39 = vld [vmem:[#allocation36_spill] sm:$0xff] }
 0x290   :  { %11984 = vrot.lane.b32.xlu0 %v20669_v61, %s12885_s14  ;;  %20670 = vst [vmem:[#allocation37_spill] sm:$0xff] %v15607_v45  ;;  %v5330_v61 = vrot.slane %v5322_v15, %v12995_v16  ;;  %v15632_v62 = vcombine.high %v15586_v1, %v20337_v34  ;;  %v15636_v25 = vcombine.high %v15595_v11, %v20337_v34  ;;  %v11596_v0 = vunpack.i.l.bf16 %v15161_v14 }
 0x291   :  { %20671 = vst [vmem:[#allocation55_spill] sm:$0xff] %v15624_v33  ;;  %v15639_v12 = vrot.slane %v5234_v31, %v13041_v29  ;;  %v15642_v3 = vrot.slane %v5235_v38, %v13041_v29  ;;  %v15646_v15 = vrot.slane %v5339_v50, %v12995_v16  ;;  %v15653_v4 = vrot.slane %v5303_v35, %v13041_v29  ;;  %v15658_v1 = vpop.permute.xlu1 %11689 }
 0x292   :  { %11969 = vrot.lane.b32.xlu1 %v20674_v28, %s12884_s13  ;;  %v5354_v37 = vcombine.low %v5330_v61, %v5346_v42  ;;  %v20679_v28 = vpack.i.bf16 %v20677_v46, %v20678_v60  ;;  %v2582_v31 = vsel %vm869_vm3, %v20681_v36, %v11587_v17  ;;  %v11597_v38 = vunpack.i.h.bf16 %v15161_v14  ;;  %v20682_v46 = vld [vmem:[#allocation45_spill] sm:$0xff] }
 0x293   :  { %20675 = vst [vmem:[#allocation65_spill] sm:$0xff] %v15639_v12  ;;  %20676 = vst [vmem:[#allocation63_spill] sm:$0xff] %v15642_v3  ;;  %v15662_v50 = vcombine.high %v15607_v45, %v20337_v34  ;;  %v15666_v3 = vcombine.high %v15613_v22, %v20337_v34  ;;  %v2581_v60 = vsel %vm869_vm3, %v20682_v46, %v11586_v6  ;;  %v15673_v36 = vpop.permute.xlu0 %11714  ;;  %v11607_v17 = vunpack.i.h.bf16 %v15212_v53  ;;  %v20684_v12 = vld [vmem:[#allocation8_spill] sm:$0xff] }
 0x294   :  { %11994 = vrot.lane.b32.xlu0 %v20679_v28, %s12883_s12  ;;  %20680 = vst [vmem:[#allocation87_spill] sm:$0xff] %v15653_v4  ;;  %v15671_v35 = vrot.slane %v5323_v51, %v12995_v16  ;;  %v5355_v28 = vcombine.high %v5330_v61, %v5346_v42  ;;  %20683 = vst [vmem:[#allocation9_spill] sm:$0xff] %v15673_v36  ;;  %v15677_v14 = vcombine.high %v15624_v33, %v20337_v34  ;;  %v20685_v4 = vld [vmem:[#allocation11_spill] sm:$0xff] }
 0x295   :  { %v11606_v45 = vunpack.i.l.bf16 %v15212_v53  ;;  %v20686_v18 = vpack.i.bf16 %v20684_v12, %v20685_v4  ;;  %v2583_v51 = vsel %vm872_vm4, %v2581_v60, %v11596_v0  ;;  %v15691_v61 = vrot.slane %v5354_v37, %v13041_v29  ;;  %v15702_v42 = vpop.permute.xlu1 %11699  ;;  %v20689_v60 = vld [vmem:[#allocation100_spill] sm:$0xff]  ;;  %v20690_v37 = vld [vmem:[#allocation22_spill] sm:$0xff] }
 0x296   :  { %v5370_v46 = vcombine.low %v15671_v35, %v15646_v15  ;;  %v11592_v53 = vunpack.i.h.bf16 %v15256_v43  ;;  %v2584_v4 = vsel %vm872_vm4, %v2582_v31, %v11597_v38  ;;  %v11591_v12 = vunpack.i.l.bf16 %v15256_v43  ;;  %v20691_v0 = vld [vmem:[#allocation12_spill] sm:$0xff] }
 0x297   :  { %11979 = vrot.lane.b32.xlu1 %v20686_v18, %s12882_s11  ;;  %20687 = vst [vmem:[#allocation54_spill] sm:$0xff] %v15691_v61  ;;  %v20688_v18 = vpack.i.bf16 %v15260_v7, %v15216_v55  ;;  %v11617_v6 = vunpack.i.h.bf16 %v20689_v60  ;;  %v11616_v16 = vunpack.i.l.bf16 %v20689_v60  ;;  %v11725_v36 = vpop.permute.xlu0 %11724  ;;  %v15711_v55 = vrot.slane %v5355_v28, %v13041_v29  ;;  %v20694_v7 = vld [vmem:[#allocation28_spill] sm:$0xff] }
 0x298   :  { %v2585_v31 = vsel %vm875_vm5, %v2583_v51, %v11606_v45  ;;  %v2586_v38 = vsel %vm875_vm5, %v2584_v4, %v11607_v17  ;;  %v20692_v60 = vpack.i.bf16 %v20690_v37, %v20691_v0  ;;  %v2596_v28 = vsel %vm869_vm3, %v20693_v47, %v11592_v53  ;;  %v20698_v51 = vld [vmem:[#allocation51_spill] sm:$0xff] }
 0x299   :  { %12004 = vrot.lane.b32.xlu0 %v20688_v18, %s12888_s19  ;;  %v11601_v18 = vunpack.i.l.bf16 %v15302_v24  ;;  %v11602_v33 = vunpack.i.h.bf16 %v15302_v24  ;;  %v20696_v43 = vpack.i.bf16 %v20694_v7, %v20695_v39  ;;  %v15733_v45 = vcombine.high %v15691_v61, %v20337_v34  ;;  %v15742_v53 = vpop.permute.xlu1 %11709  ;;  %v20700_v61 = vld [vmem:[#allocation7_spill] sm:$0xff] }
 0x29a   :  { %v15736_v17 = vrot.slane %v5370_v46, %v13041_v29  ;;  %v2595_v4 = vsel %vm869_vm3, %v20698_v51, %v11591_v12  ;;  %v11627_v0 = vunpack.i.h.bf16 %v15311_v54  ;;  %v11626_v47 = vunpack.i.l.bf16 %v15311_v54  ;;  %v20699_v54 = vld [vmem:[#allocation10_spill] sm:$0xff] }
 0x29b   :  { %11989 = vrot.lane.b32.xlu1 %v20692_v60, %s12885_s14  ;;  %v11726_v24 = vunpack.i.l.bf16 %v11725_v36  ;;  %v2587_v39 = vsel %vm878_vm6, %v2585_v31, %v11616_v16  ;;  %v2588_v37 = vsel %vm878_vm6, %v2586_v38, %v11617_v6  ;;  %v11727_v7 = vunpack.i.h.bf16 %v11725_v36 }
 0x29c   :  { %20697 = vst [vmem:[#allocation71_spill] sm:$0xff] %v15736_v17  ;;  %v15748_v46 = vcombine.high %v15711_v55, %v20337_v34  ;;  %v2597_v60 = vsel %vm872_vm4, %v2595_v4, %v11601_v18  ;;  %v11612_v12 = vunpack.i.h.bf16 %v15347_v48  ;;  %v11611_v51 = vunpack.i.l.bf16 %v15347_v48 }
 0x29d   :  { %12014 = vrot.lane.b32.xlu0 %v20696_v43, %s12886_s15  ;;  %v11730_v43 = vpop.permute.xlu0 %11729  ;;  %v20701_v17 = vpack.i.bf16 %v20699_v54, %v20700_v61  ;;  %v2598_v36 = vsel %vm872_vm4, %v2596_v28, %v11602_v33  ;;  %v11637_v6 = vunpack.i.h.bf16 %v15352_v57  ;;  %v11636_v31 = vunpack.i.l.bf16 %v15352_v57  ;;  %v15772_v28 = vpop.permute.xlu1 %11719  ;;  %v20704_v54 = vld [vmem:[#allocation91_spill] sm:$0xff] }
 0x29e   :  { %v20702_v38 = vpack.i.bf16 %v15264_v32, %v15220_v49  ;;  %v12078_v48 = vpack.i.bf16 %v15733_v45, %v15632_v62  ;;  %v2589_v61 = vsel %vm881_vm7, %v2587_v39, %v11626_v47  ;;  %v2590_v18 = vsel %vm881_vm7, %v2588_v37, %v11627_v0 }
 0x29f   :  { %11999 = vrot.lane.b32.xlu1 %v20701_v17, %s12883_s12  ;;  %v20703_v17 = vld [vmem:[#allocation39_spill] sm:$0xff]  ;;  %v11731_v33 = vunpack.i.l.bf16 %v11730_v43  ;;  %v11656_v57 = vunpack.i.l.bf16 %v15529_v63  ;;  %v1357_v16 = vsel %vm869_vm3, %v20704_v54, %v11727_v7  ;;  %v11732_v49 = vunpack.i.h.bf16 %v11730_v43  ;;  %v20707_v54 = vld [vmem:[#allocation32_spill] sm:$0xff] }
 0x2a0   :  { %v1356_v4 = vsel %vm869_vm3, %v20703_v17, %v11726_v24  ;;  %v2599_v47 = vsel %vm875_vm5, %v2597_v60, %v11611_v51  ;;  %v2600_v0 = vsel %vm875_vm5, %v2598_v36, %v11612_v12  ;;  %v11621_v39 = vunpack.i.l.bf16 %v15385_v52  ;;  %v20706_v17 = vld [vmem:[#allocation94_spill] sm:$0xff] }
 0x2a1   :  { %12024 = vrot.lane.b32.xlu0 %v20702_v38, %s12887_s16  ;;  %v11735_v32 = vpop.permute.xlu0 %11734  ;;  %v11657_v24 = vunpack.i.h.bf16 %v15529_v63  ;;  %v20705_v37 = vpack.i.bf16 %v15365_v59, %v15245_v9  ;;  %v11622_v7 = vunpack.i.h.bf16 %v15385_v52  ;;  %v1358_v43 = vsel %vm872_vm4, %v1356_v4, %v11656_v57  ;;  %v11745_v52 = vpop.permute.xlu1 %11744 }
 0x2a2   :  { %v20708_v38 = vpack.i.bf16 %v20706_v17, %v20707_v54  ;;  %v2591_v60 = vsel %vm884_vm8, %v2589_v61, %v11636_v31  ;;  %v2592_v12 = vsel %vm884_vm8, %v2590_v18, %v11637_v6  ;;  %v11647_v63 = vunpack.i.h.bf16 %v15391_v8 }
 0x2a3   :  { %12009 = vrot.lane.b32.xlu1 %v20705_v37, %s12888_s19  ;;  %v11646_v51 = vunpack.i.l.bf16 %v15391_v8  ;;  %v1359_v9 = vsel %vm872_vm4, %v1357_v16, %v11657_v24  ;;  %v1360_v59 = vsel %vm875_vm5, %v1358_v43, %v11731_v33  ;;  %v11736_v4 = vunpack.i.l.bf16 %v11735_v32  ;;  %v20710_v33 = vld [vmem:[#allocation43_spill] sm:$0xff]  ;;  %v20712_v24 = vld [vmem:[#allocation101_spill] sm:$0xff] }
 0x2a4   :  { %v1361_v36 = vsel %vm875_vm5, %v1359_v9, %v11732_v49  ;;  %v11747_v57 = vunpack.i.h.bf16 %v11745_v52  ;;  %v11746_v37 = vunpack.i.l.bf16 %v11745_v52  ;;  %v11662_v6 = vunpack.i.h.bf16 %v15565_v19 }
 0x2a5   :  { %12034 = vrot.lane.b32.xlu0 %v20708_v38, %s12884_s13  ;;  %v11740_v17 = vpop.permute.xlu0 %11739  ;;  %v15801_v38 = vsel %vm878_vm6, %v2599_v47, %v11621_v39  ;;  %v11661_v31 = vunpack.i.l.bf16 %v15565_v19  ;;  %v11737_v61 = vunpack.i.h.bf16 %v11735_v32  ;;  %v20709_v8 = vpack.i.bf16 %v15324_v30, %v15192_v23  ;;  %v20711_v47 = vld [vmem:[#allocation49_spill] sm:$0xff]  ;;  %v20713_v19 = vld [vmem:[#allocation95_spill] sm:$0xff]  ;;  %v11750_v30 = vpop.permute.xlu1 %11749 }
 0x2a6   :  { %v15810_v16 = vsel %vm878_vm6, %v2600_v0, %v11622_v7  ;;  %v11672_v18 = vunpack.i.h.bf16 %v15430_v26  ;;  %v1371_v49 = vsel %vm869_vm3, %v20710_v33, %v11747_v57  ;;  %v1370_v39 = vsel %vm869_vm3, %v20711_v47, %v11746_v37 }
 0x2a7   :  { %12019 = vrot.lane.b32.xlu1 %v20709_v8, %s12886_s15  ;;  %v20714_v32 = vpack.i.bf16 %v20712_v24, %v20713_v19  ;;  %v11671_v43 = vunpack.i.l.bf16 %v15430_v26  ;;  %v11666_v23 = vunpack.i.l.bf16 %v15610_v21  ;;  %v1362_v0 = vsel %vm878_vm6, %v1360_v59, %v11661_v31 }
 0x2a8   :  { %v1363_v7 = vsel %vm878_vm6, %v1361_v36, %v11662_v6  ;;  %v11741_v54 = vunpack.i.l.bf16 %v11740_v17  ;;  %v11752_v9 = vunpack.i.h.bf16 %v11750_v30  ;;  %v11751_v52 = vunpack.i.l.bf16 %v11750_v30 }
 0x2a9   :  { %12044 = vrot.lane.b32.xlu0 %v20714_v32, %s12882_s11  ;;  %v11765_v57 = vpop.permute.xlu0 %11764  ;;  %v1364_v37 = vsel %vm881_vm7, %v1362_v0, %v11736_v4  ;;  %v11742_v8 = vunpack.i.h.bf16 %v11740_v17  ;;  %v1372_v33 = vsel %vm872_vm4, %v1370_v39, %v11671_v43  ;;  %v1373_v47 = vsel %vm872_vm4, %v1371_v49, %v11672_v18  ;;  %v20716_v4 = vld [vmem:[#allocation96_spill] sm:$0xff]  ;;  %v20717_v17 = vld [vmem:[#allocation26_spill] sm:$0xff] }
 0x2aa   :  { %v20715_v26 = vpack.i.bf16 %v15377_v40, %v15249_v2  ;;  %v1365_v59 = vsel %vm881_vm7, %v1363_v7, %v11737_v61  ;;  %v11667_v36 = vunpack.i.h.bf16 %v15610_v21  ;;  %v1374_v6 = vsel %vm875_vm5, %v1372_v33, %v11751_v52  ;;  %v11755_v40 = vpop.permute.xlu1 %11754 }
 0x2ab   :  { %v1375_v31 = vsel %vm875_vm5, %v1373_v47, %v11752_v9  ;;  %v20718_v24 = vpack.i.bf16 %v20716_v4, %v20717_v17  ;;  %v15841_v18 = vsel %vm887_vm9, %v2591_v60, %v11646_v51  ;;  %v11677_v49 = vunpack.i.h.bf16 %v15463_v58  ;;  %v20719_v60 = vld [vmem:[#allocation34_spill] sm:$0xff]  ;;  %v20720_v51 = vld [vmem:[#allocation25_spill] sm:$0xff] }
 0x2ac   :  { %12029 = vrot.lane.b32.xlu1 %v20715_v26, %s12887_s16  ;;  %v11676_v2 = vunpack.i.l.bf16 %v15463_v58  ;;  %v1366_v61 = vsel %vm884_vm8, %v1364_v37, %v11666_v23  ;;  %v15847_v21 = vsel %vm887_vm9, %v2592_v12, %v11647_v63  ;;  %v11757_v39 = vunpack.i.h.bf16 %v11755_v40  ;;  %v20722_v63 = vld [vmem:[#allocation78_spill] sm:$0xff] }
 0x2ad   :  { %12054 = vrot.lane.b32.xlu0 %v20718_v24, %s12885_s14  ;;  %v11756_v19 = vunpack.i.l.bf16 %v11755_v40  ;;  %v11775_v32 = vpop.permute.xlu0 %11774  ;;  %v1368_v43 = vsel %vm887_vm9, %v1366_v61, %v11741_v54  ;;  %v1367_v30 = vsel %vm884_vm8, %v1365_v59, %v11667_v36  ;;  %v11766_v0 = vunpack.i.l.bf16 %v11765_v57  ;;  %v20723_v37 = vld [vmem:[#allocation102_spill] sm:$0xff]  ;;  %v20724_v54 = vld [vmem:[#allocation97_spill] sm:$0xff] }
 0x2ae   :  { %v20721_v7 = vpack.i.bf16 %v20719_v60, %v20720_v51  ;;  %v1376_v58 = vsel %vm878_vm6, %v1374_v6, %v11676_v2  ;;  %v1377_v23 = vsel %vm878_vm6, %v1375_v31, %v11677_v49  ;;  %v1369_v12 = vsel %vm887_vm9, %v1367_v30, %v11742_v8  ;;  %v11760_v31 = vpop.permute.xlu1 %11759  ;;  %v20726_v2 = vld [vmem:[#allocation46_spill] sm:$0xff]  ;;  %v20729_v60 = vld [vmem:[#allocation23_spill] sm:$0xff] }
 0x2af   :  { %v11632_v9 = vunpack.i.h.bf16 %v20722_v63  ;;  %v11767_v52 = vunpack.i.h.bf16 %v11765_v57  ;;  %v20725_v33 = vpack.i.bf16 %v20723_v37, %v20724_v54  ;;  %v1378_v47 = vsel %vm881_vm7, %v1376_v58, %v11756_v19 }
 0x2b0   :  { %12039 = vrot.lane.b32.xlu1 %v20721_v7, %s12884_s13  ;;  %v1379_v26 = vsel %vm881_vm7, %v1377_v23, %v11757_v39  ;;  %v11631_v59 = vunpack.i.l.bf16 %v20722_v63  ;;  %v11682_v36 = vunpack.i.h.bf16 %v15499_v20  ;;  %v11681_v6 = vunpack.i.l.bf16 %v15499_v20  ;;  %v20727_v39 = vld [vmem:[#allocation98_spill] sm:$0xff] }
 0x2b1   :  { %12064 = vrot.lane.b32.xlu0 %v20725_v33, %s12883_s12  ;;  %v11686_v8 = vunpack.i.l.bf16 %v15533_v27  ;;  %v11762_v57 = vunpack.i.h.bf16 %v11760_v31  ;;  %v11761_v4 = vunpack.i.l.bf16 %v11760_v31  ;;  %v15869_v17 = vpop.permute.xlu0 %11784  ;;  %v1384_v24 = vpack.c.bf16 %v1368_v43, %v1368_v43 }
 0x2b2   :  { %v1386_v49 = vpack.c.bf16 %v1369_v12, %v1369_v12  ;;  %v2048_v40 = vsel %vm869_vm3, %v20726_v2, %v11766_v0  ;;  %v11776_v61 = vunpack.i.l.bf16 %v11775_v32  ;;  %v20728_v19 = vpack.i.bf16 %v15402_v13, %v20727_v39  ;;  %v11770_v12 = vpop.permute.xlu1 %11769 }
 0x2b3   :  { %v1380_v20 = vsel %vm884_vm8, %v1378_v47, %v11681_v6  ;;  %v1381_v30 = vsel %vm884_vm8, %v1379_v26, %v11682_v36  ;;  %v2049_v51 = vsel %vm869_vm3, %v20729_v60, %v11767_v52  ;;  %v11777_v7 = vunpack.i.h.bf16 %v11775_v32  ;;  %v20731_v52 = vld [vmem:[#allocation38_spill] sm:$0xff]  ;;  %v460_v60 = vld [vmem:[%s19868_s1 + $0x2] sm:$0x3] }
 0x2b4   :  { %12049 = vrot.lane.b32.xlu1 %v20728_v19, %s12882_s11  ;;  %v20730_v43 = vpack.i.bf16 %v15662_v50, %v15559_v41  ;;  %v1382_v0 = vsel %vm887_vm9, %v1380_v20, %v11761_v4  ;;  %v1383_v58 = vsel %vm887_vm9, %v1381_v30, %v11762_v57  ;;  %v15889_v13 = vsel %vm881_vm7, %v15801_v38, %v11631_v59  ;;  %v20732_v38 = vld [vmem:[#allocation53_spill] sm:$0xff]  ;;  %v20735_v4 = vld [vmem:[#allocation42_spill] sm:$0xff] }
 0x2b5   :  { %v11687_v23 = vunpack.i.h.bf16 %v15533_v27  ;;  %v1385_v37 = vpack.c.bf16 %v1382_v0, %v1382_v0  ;;  %v1387_v54 = vpack.c.bf16 %v1383_v58, %v1383_v58  ;;  %v11697_v32 = vunpack.i.h.bf16 %v20731_v52  ;;  %v15894_v50 = vpop.permute.xlu0 %11794  ;;  %v20733_v59 = vld [vmem:[#allocation93_spill] sm:$0xff] }
 0x2b6   :  { %12074 = vrot.lane.b32.xlu0 %v20730_v43, %s12888_s19  ;;  %v2050_v33 = vsel %vm872_vm4, %v2048_v40, %v11686_v8  ;;  %v11772_v47 = vunpack.i.h.bf16 %v11770_v12  ;;  %v11771_v41 = vunpack.i.l.bf16 %v11770_v12  ;;  %v20734_v6 = vpack.i.bf16 %v20732_v38, %v20733_v59  ;;  %v20736_v40 = vld [vmem:[#allocation29_spill] sm:$0xff]  ;;  %v11780_v30 = vpop.permute.xlu1 %11779 }
 0x2b7   :  { %v2051_v26 = vsel %vm872_vm4, %v2049_v51, %v11687_v23  ;;  %v2052_v36 = vsel %vm875_vm5, %v2050_v33, %v11776_v61  ;;  %11426 = vmatprep.subr.msk.bf16.mxu0 %vm1392_vm10, %v1385_v37  ;;  %v1394_v27 = vsel %vm1392_vm10, %v1384_v24, 0  ;;  %v1441_v31 = vsel %vm1392_vm10, %v1386_v49, 0  ;;  %11428 = vmatprep.subr.msk.bf16.mxu1 %vm1392_vm10, %v1387_v54  ;;  %v20738_v51 = vld [vmem:[#allocation68_spill] sm:$0xff]  ;;  %v20743_v33 = vld [vmem:[#allocation99_spill] sm:$0xff] }
 0x2b8   :  { %12059 = vrot.lane.b32.xlu1 %v20734_v6, %s12885_s14  ;;  %v2053_v8 = vsel %vm875_vm5, %v2051_v26, %v11777_v7  ;;  %v11786_v57 = vunpack.i.l.bf16 %v15869_v17  ;;  %v2063_v2 = vsel %vm869_vm3, %v20735_v4, %v11772_v47  ;;  %v2062_v61 = vsel %vm869_vm3, %v20736_v40, %v11771_v41  ;;  %1400 = vmatpush1.bf16.msra.mxu0 %v1394_v27 }
 0x2b9   :  { %v20737_v39 = vpack.i.bf16 %v15613_v22, %v15521_v56  ;;  %v11696_v24 = vunpack.i.l.bf16 %v20731_v52  ;;  %v11692_v49 = vunpack.i.h.bf16 %v15658_v1  ;;  %v11691_v19 = vunpack.i.l.bf16 %v15658_v1  ;;  %1447 = vmatpush1.bf16.msra.mxu1 %v1441_v31  ;;  %v15925_v0 = vpop.permute.xlu0 %11804  ;;  %v20742_v52 = vld [vmem:[#allocation59_spill] sm:$0xff] }
 0x2ba   :  { %v11787_v20 = vunpack.i.h.bf16 %v15869_v17  ;;  %v11642_v56 = vunpack.i.h.bf16 %v20738_v51  ;;  %v11706_v22 = vunpack.i.l.bf16 %v15621_v10  ;;  %v11782_v7 = vunpack.i.h.bf16 %v11780_v30  ;;  %v20740_v17 = vld [vmem:[#allocation60_spill] sm:$0xff]  ;;  %v20746_v31 = vld [vmem:[#allocation47_spill] sm:$0xff] }
 0x2bb   :  { %12084 = vrot.lane.b32.xlu0 %v20737_v39, %s12886_s15  ;;  %v11781_v43 = vunpack.i.l.bf16 %v11780_v30  ;;  %v20739_v1 = vpack.c.bf16 %v15568_v5, %v15568_v5  ;;  %v20741_v58 = vpack.c.bf16 %v20740_v17, %v20740_v17  ;;  %v2054_v23 = vsel %vm878_vm6, %v2052_v36, %v11696_v24  ;;  %11427 = vmatmul.mubr.msk.bf16.vlgmr.msra.gmra.mrb[0].mxu0 %vm1388_vm11, %v460_v60  ;;  %v20751_v30 = vld [vmem:[#allocation41_spill] sm:$0xff] }
 0x2bc   :  { %v2055_v12 = vsel %vm878_vm6, %v2053_v8, %v11697_v32  ;;  %v2064_v37 = vsel %vm872_vm4, %v2062_v61, %v11691_v19  ;;  %v2065_v54 = vsel %vm872_vm4, %v2063_v2, %v11692_v49  ;;  %v20744_v47 = vpack.i.bf16 %v20742_v52, %v20743_v33  ;;  %11429 = vmatmul.mubr.msk.bf16.vlgmr.msra.gmra.mrb[0].mxu1 %vm1388_vm11, %v460_v60  ;;  %v11790_v8 = vpop.permute.xlu1 %11789  ;;  %v20749_v61 = vld [vmem:[#allocation64_spill] sm:$0xff] }
 0x2bd   :  { %11430 = vmatprep.subr.msk.bf16.mxu0 %vm1392_vm10, %v20739_v1  ;;  %11432 = vmatprep.subr.msk.bf16.mxu1 %vm1392_vm10, %v20741_v58  ;;  %v2056_v5 = vsel %vm881_vm7, %v2054_v23, %v11786_v57  ;;  %v11796_v41 = vunpack.i.l.bf16 %v15894_v50  ;;  %v2066_v26 = vsel %vm875_vm5, %v2064_v37, %v11781_v43  ;;  %v2067_v38 = vsel %vm875_vm5, %v2065_v54, %v11782_v7  ;;  %v15961_v40 = vpop.permute.xlu0 %11814  ;;  %v459_v43 = vld [vmem:[%s19868_s1] sm:$0x3] }
 0x2be   :  { %12069 = vrot.lane.b32.xlu1 %v20744_v47, %s12883_s12  ;;  %v20745_v32 = vpack.i.bf16 %v15666_v3, %v15563_v44  ;;  %v11702_v36 = vunpack.i.h.bf16 %v15702_v42  ;;  %v11701_v59 = vunpack.i.l.bf16 %v15702_v42  ;;  %v2057_v6 = vsel %vm881_vm7, %v2055_v12, %v11787_v20  ;;  %1497 = vmatpush1.bf16.msra.mxu0 %v20746_v31  ;;  %v20747_v3 = vld [vmem:[#allocation14_spill] sm:$0xff]  ;;  %v20750_v20 = vld [vmem:[#allocation55_spill] sm:$0xff] }
 0x2bf   :  { %v11797_v27 = vunpack.i.h.bf16 %v15894_v50  ;;  %v11641_v57 = vunpack.i.l.bf16 %v20738_v51  ;;  %v11707_v44 = vunpack.i.h.bf16 %v15621_v10  ;;  %1544 = vmatpush1.bf16.msra.mxu1 %v20747_v3  ;;  %v11792_v4 = vunpack.i.h.bf16 %v11790_v8 }
 0x2c0   :  { %12094 = vrot.lane.b32.xlu0 %v20745_v32, %s12887_s16  ;;  %v11791_v2 = vunpack.i.l.bf16 %v11790_v8  ;;  %v20748_v42 = vmov 0   ;;  %v11652_v39 = vunpack.i.h.bf16 %v20749_v61  ;;  %v2068_v50 = vsel %vm878_vm6, %v2066_v26, %v11701_v59  ;;  %v20757_v32 = vld [vmem:[#allocation87_spill] sm:$0xff] }
 0x2c1   :  { %1528 = vmatprep.mubr.bf16.mxu0 %v20748_v42  ;;  %v2069_v24 = vsel %vm878_vm6, %v2067_v38, %v11702_v36  ;;  %1575 = vmatprep.mubr.bf16.mxu1 %v20748_v42  ;;  %v2058_v10 = vsel %vm884_vm8, %v2056_v5, %v11706_v22  ;;  %v20752_v60 = vpack.i.bf16 %v20750_v20, %v20751_v30  ;;  %v11651_v62 = vunpack.i.l.bf16 %v20749_v61  ;;  %v11800_v22 = vpop.permute.xlu1 %11799  ;;  %v15994_v37 = vpop.permute.xlu0 %11819 }
 0x2c2   :  { %12079 = vrot.lane.b32.xlu1 %v12078_v48, %s12888_s19  ;;  %v2070_v49 = vsel %vm881_vm7, %v2068_v50, %v11791_v2  ;;  %v2071_v19 = vsel %vm881_vm7, %v2069_v24, %v11792_v4  ;;  %v2060_v51 = vsel %vm887_vm9, %v2058_v10, %v11796_v41  ;;  %v2059_v7 = vsel %vm884_vm8, %v2057_v6, %v11707_v44  ;;  %v20760_v44 = vld [vmem:[#allocation71_spill] sm:$0xff]  ;;  %v20761_v2 = vld [vmem:[#allocation65_spill] sm:$0xff] }
 0x2c3   :  { %v11712_v45 = vunpack.i.h.bf16 %v15742_v53  ;;  %v11711_v48 = vunpack.i.l.bf16 %v15742_v53  ;;  %v2061_v1 = vsel %vm887_vm9, %v2059_v7, %v11797_v27  ;;  %v2604_v17 = vsel %vm881_vm7, %v15810_v16, %v11632_v9  ;;  %v20754_v16 = vld [vmem:[#allocation40_spill] sm:$0xff]  ;;  %11431 = vmatmul.mubr.msk.bf16.vlgmr.msra.gmra.mrb[4].mxu0 %vm1388_vm11, %v459_v43  ;;  %v20762_v24 = vld [vmem:[#allocation77_spill] sm:$0xff]  ;;  %v20764_v7 = vld [vmem:[#allocation62_spill] sm:$0xff] }
 0x2c4   :  { %12104 = vrot.lane.b32.xlu0 %v20752_v60, %s12884_s13  ;;  %v2605_v58 = vsel %vm884_vm8, %v15889_v13, %v11641_v57  ;;  %v11802_v23 = vunpack.i.h.bf16 %v11800_v22  ;;  %v11801_v12 = vunpack.i.l.bf16 %v11800_v22  ;;  %v2606_v53 = vsel %vm884_vm8, %v2604_v17, %v11642_v56  ;;  %11433 = vmatmul.mubr.msk.bf16.vlgmr.msra.gmra.mrb[4].mxu1 %vm1388_vm11, %v459_v43  ;;  %v20766_v17 = vld [vmem:[#allocation9_spill] sm:$0xff] }
 0x2c5   :  { %v20753_v54 = vpack.i.bf16 %v15711_v55, %v15595_v11  ;;  %v2072_v52 = vsel %vm884_vm8, %v2070_v49, %v11711_v48  ;;  %v2073_v63 = vsel %vm884_vm8, %v2071_v19, %v11712_v45  ;;  %v2076_v33 = vpack.c.bf16 %v2060_v51, %v2060_v51  ;;  %v16011_v11 = vpop.permute.xlu1 %11809  ;;  %v16015_v38 = vpop.permute.xlu0 %11834  ;;  %2121 = vmatprep.mubr.bf16.mxu0 %v20748_v42  ;;  %v20763_v49 = vld [vmem:[#allocation63_spill] sm:$0xff]  ;;  %v20765_v45 = vld [vmem:[#allocation50_spill] sm:$0xff] }
 0x2c6   :  { %v20755_v9 = vpack.i.bf16 %v15677_v14, %v20754_v16  ;;  %v2074_v13 = vsel %vm887_vm9, %v2072_v52, %v11801_v12  ;;  %v2075_v56 = vsel %vm887_vm9, %v2073_v63, %v11802_v23  ;;  %v2078_v47 = vpack.c.bf16 %v2061_v1, %v2061_v1  ;;  %v20756_v14 = vld [vmem:[#allocation67_spill] sm:$0xff]  ;;  %2168 = vmatprep.mubr.bf16.mxu1 %v20748_v42 }
 0x2c7   :  { %12089 = vrot.lane.b32.xlu1 %v20753_v54, %s12886_s15  ;;  %v2077_v55 = vpack.c.bf16 %v2074_v13, %v2074_v13  ;;  %v2079_v5 = vpack.c.bf16 %v2075_v56, %v2075_v56  ;;  %v2607_v41 = vsel %vm887_vm9, %v2605_v58, %v11651_v62  ;;  %v2608_v26 = vsel %vm887_vm9, %v2606_v53, %v11652_v39  ;;  %v461_v39 = vld [vmem:[%s19868_s1 + $0x4] sm:$0x3] }
 0x2c8   :  { %12114 = vrot.lane.b32.xlu0 %v20755_v9, %s12882_s11  ;;  %v12123_v36 = vpack.i.bf16 %v20757_v32, %v20756_v14  ;;  %v5321_v59 = vcombine.high %v20757_v32, %v20337_v34  ;;  %v20758_v6 = vcombine.high %v15671_v35, %v15646_v15  ;;  %v20759_v31 = vpack.i.bf16 %v15748_v46, %v15636_v25 }
 0x2c9   :  { %11434 = vmatprep.subr.msk.bf16.mxu0 %vm1392_vm10, %v2077_v55  ;;  %v2609_v8 = vpack.c.bf16 %v15841_v18, %v15841_v18  ;;  %v2611_v57 = vpack.c.bf16 %v15847_v21, %v15847_v21  ;;  %v5388_v3 = vcombine.high %v20760_v44, %v20337_v34  ;;  %11436 = vmatprep.subr.msk.bf16.mxu1 %vm1392_vm10, %v2079_v5  ;;  %v2084_v15 = vsel %vm1392_vm10, %v2076_v33, 0  ;;  %v16046_v21 = vpop.permute.xlu1 %11824  ;;  %v16053_v50 = vpop.permute.xlu0 %11844  ;;  %v462_v55 = vld [vmem:[%s19868_s1 + $0x6] sm:$0x3] }
 0x2ca   :  { %v16027_v27 = vrot.slane %v20758_v6, %v13041_v29  ;;  %v2131_v25 = vsel %vm1392_vm10, %v2078_v47, 0  ;;  %v2610_v35 = vpack.c.bf16 %v2607_v41, %v2607_v41  ;;  %v2612_v46 = vpack.c.bf16 %v2608_v26, %v2608_v26  ;;  %2090 = vmatpush1.bf16.msra.mxu0 %v2084_v15  ;;  %v20768_v6 = vld [vmem:[#allocation33_spill] sm:$0xff] }
 0x2cb   :  { %12099 = vrot.lane.b32.xlu1 %v20759_v31, %s12887_s16  ;;  %v11807_v4 = vunpack.i.h.bf16 %v15925_v0  ;;  %v11806_v18 = vunpack.i.l.bf16 %v15925_v0  ;;  %2137 = vmatpush1.bf16.msra.mxu1 %v2131_v25  ;;  %v12108_v61 = vpack.i.bf16 %v20760_v44, %v20761_v2  ;;  %v12133_v10 = vpack.i.bf16 %v5321_v59, %v20762_v24 }
 0x2cc   :  { %12124 = vrot.lane.b32.xlu0 %v12123_v36, %s12885_s14  ;;  %11438 = vmatprep.subr.msk.bf16.mxu0 %vm1392_vm10, %v2610_v35  ;;  %v5252_v0 = vcombine.high %v20761_v2, %v20337_v34  ;;  %v16063_v19 = vcombine.high %v20763_v49, %v20337_v34  ;;  %v2617_v20 = vsel %vm1392_vm10, %v2609_v8, 0  ;;  %v2664_v30 = vsel %vm1392_vm10, %v2611_v57, 0  ;;  %v20767_v36 = vld [vmem:[#allocation58_spill] sm:$0xff] }
 0x2cd   :  { %11440 = vmatprep.subr.msk.bf16.mxu1 %vm1392_vm10, %v2612_v46  ;;  %11435 = vmatmul.mubr.msk.bf16.vlgmr.msra.gmra.mrb[8].mxu0 %vm1388_vm11, %v461_v39  ;;  %v5389_v51 = vcombine.high %v16027_v27, %v20337_v34  ;;  %v3179_v62 = vsel %vm869_vm3, %v20764_v7, %v11807_v4  ;;  %v3178_v48 = vsel %vm869_vm3, %v20765_v45, %v11806_v18  ;;  %v11817_v22 = vunpack.i.h.bf16 %v15961_v40  ;;  %v16078_v1 = vpop.permute.xlu1 %11829  ;;  %v11855_v54 = vpop.permute.xlu0 %11854  ;;  %v5645_v18 = vld [vmem:[%s19871_s4] sm:$0xf] }
 0x2ce   :  { %v12118_v60 = vpack.i.bf16 %v5388_v3, %v5252_v0  ;;  %v11816_v43 = vunpack.i.l.bf16 %v15961_v40  ;;  %11437 = vmatmul.mubr.msk.bf16.vlgmr.msra.gmra.mrb[8].mxu1 %vm1388_vm11, %v461_v39  ;;  %2623 = vmatpush1.bf16.msra.mxu0 %v2617_v20  ;;  %v11717_v58 = vunpack.i.h.bf16 %v20766_v17  ;;  %v11716_v23 = vunpack.i.l.bf16 %v20766_v17 }
 0x2cf   :  { %12109 = vrot.lane.b32.xlu1 %v12108_v61, %s12884_s13  ;;  %v11822_v12 = vunpack.i.h.bf16 %v15994_v37  ;;  %v11821_v53 = vunpack.i.l.bf16 %v15994_v37  ;;  %2670 = vmatpush1.bf16.msra.mxu1 %v2664_v30  ;;  %v11812_v52 = vunpack.i.h.bf16 %v16011_v11  ;;  %v11811_v40 = vunpack.i.l.bf16 %v16011_v11 }
 0x2d0   :  { %12134 = vrot.lane.b32.xlu0 %v12133_v10, %s12883_s12  ;;  %2654 = vmatprep.mubr.bf16.mxu0 %v20748_v42  ;;  %v3180_v63 = vsel %vm872_vm4, %v3178_v48, %v11716_v23  ;;  %v3181_v33 = vsel %vm872_vm4, %v3179_v62, %v11717_v58  ;;  %v12128_v16 = vpack.i.bf16 %v16027_v27, %v20763_v49  ;;  %v11837_v56 = vunpack.i.h.bf16 %v16015_v38 }
 0x2d1   :  { %2701 = vmatprep.mubr.bf16.mxu1 %v20748_v42  ;;  %v12138_v37 = vpack.i.bf16 %v5389_v51, %v16063_v19  ;;  %v3182_v9 = vsel %vm875_vm5, %v3180_v63, %v11816_v43  ;;  %v3183_v13 = vsel %vm875_vm5, %v3181_v33, %v11817_v22  ;;  %v11836_v47 = vunpack.i.l.bf16 %v16015_v38  ;;  %v11840_v11 = vpop.permute.xlu1 %11839  ;;  %v16105_v32 = vpop.permute.xlu0 %11864 }
 0x2d2   :  { %v11722_v5 = vunpack.i.h.bf16 %v15772_v28  ;;  %v11721_v41 = vunpack.i.l.bf16 %v15772_v28  ;;  %v3184_v26 = vsel %vm878_vm6, %v3182_v9, %v11821_v53  ;;  %v3185_v14 = vsel %vm878_vm6, %v3183_v13, %v11822_v12  ;;  %v468_v28 = vld [vmem:[%s19869_s2] sm:$0xf]  ;;  %v463_v9 = vld [vmem:[%s19868_s1 + $0x8] sm:$0x3] }
 0x2d3   :  { %12119 = vrot.lane.b32.xlu1 %v12118_v60, %s12882_s11  ;;  %v3193_v59 = vsel %vm869_vm3, %v20767_v36, %v11812_v52  ;;  %v3192_v38 = vsel %vm869_vm3, %v20768_v6, %v11811_v40  ;;  %v11847_v27 = vunpack.i.h.bf16 %v16053_v50  ;;  %v11846_v31 = vunpack.i.l.bf16 %v16053_v50 }
 0x2d4   :  { %v11827_v8 = vunpack.i.h.bf16 %v16046_v21  ;;  %v11826_v57 = vunpack.i.l.bf16 %v16046_v21  ;;  %v11857_v44 = vunpack.i.h.bf16 %v11855_v54  ;;  %v11856_v3 = vunpack.i.l.bf16 %v11855_v54  ;;  %5637 = vperm.xlu0 %12143, %v468_v28  }
 0x2d5   :  { %11439 = vmatmul.mubr.msk.bf16.vlgmr.msra.gmra.mrb[12].mxu0 %vm1388_vm11, %v462_v55  ;;  %v3186_v15 = vsel %vm881_vm7, %v3184_v26, %v11836_v47  ;;  %v3187_v25 = vsel %vm881_vm7, %v3185_v14, %v11837_v56  ;;  %v11832_v35 = vunpack.i.h.bf16 %v16078_v1  ;;  %v11831_v46 = vunpack.i.l.bf16 %v16078_v1  ;;  %v11850_v4 = vpop.permute.xlu1 %11849  ;;  %v11875_v50 = vpop.permute.xlu0 %11874 }
 0x2d6   :  { %11441 = vmatmul.mubr.msk.bf16.vlgmr.msra.gmra.mrb[12].mxu1 %vm1388_vm11, %v462_v55  ;;  %3251 = vmatprep.mubr.bf16.mxu0 %v20748_v42  ;;  %v3194_v21 = vsel %vm872_vm4, %v3192_v38, %v11721_v41  ;;  %v3195_v2 = vsel %vm872_vm4, %v3193_v59, %v11722_v5  ;;  %v11842_v61 = vunpack.i.h.bf16 %v11840_v11  ;;  %v11841_v39 = vunpack.i.l.bf16 %v11840_v11 }
 0x2d7   :  { %12129 = vrot.lane.b32.xlu1 %v12128_v16, %s12885_s14  ;;  %3298 = vmatprep.mubr.bf16.mxu1 %v20748_v42  ;;  %v11852_v24 = vunpack.i.h.bf16 %v11850_v4  ;;  %v11851_v10 = vunpack.i.l.bf16 %v11850_v4  ;;  %v3188_v0 = vsel %vm884_vm8, %v3186_v15, %v11846_v31  ;;  %v3189_v49 = vsel %vm884_vm8, %v3187_v25, %v11847_v27  ;;  %v20769_v31 = vld [vmem:[#allocation66_spill] sm:$0xff] }
 0x2d8   :  { %v3196_v19 = vsel %vm875_vm5, %v3194_v21, %v11826_v57  ;;  %v3197_v20 = vsel %vm875_vm5, %v3195_v2, %v11827_v8  ;;  %v3190_v30 = vsel %vm887_vm9, %v3188_v0, %v11856_v3  ;;  %v3191_v60 = vsel %vm887_vm9, %v3189_v49, %v11857_v44  ;;  %5698 = vperm.xlu0 %12143, %v5645_v18   ;;  %v20770_v8 = vld [vmem:[#allocation16_spill] sm:$0xff]  ;;  %v20771_v21 = vld [vmem:[#allocation17_spill] sm:$0xff] }
 0x2d9   :  { %v3198_v51 = vsel %vm878_vm6, %v3196_v19, %v11831_v46  ;;  %v3199_v7 = vsel %vm878_vm6, %v3197_v20, %v11832_v35  ;;  %v11860_v62 = vpop.permute.xlu1 %11859  ;;  %v11885_v1 = vpop.permute.xlu0 %11884  ;;  %v3206_v23 = vpack.c.bf16 %v3190_v30, %v3190_v30  ;;  %v3208_v12 = vpack.c.bf16 %v3191_v60, %v3191_v60 }
 0x2da   :  { %v3200_v45 = vsel %vm881_vm7, %v3198_v51, %v11841_v39  ;;  %v3201_v48 = vsel %vm881_vm7, %v3199_v7, %v11842_v61  ;;  %v11862_v22 = vunpack.i.h.bf16 %v11860_v62  ;;  %v11861_v43 = vunpack.i.l.bf16 %v11860_v62  ;;  %v20772_v61 = vld [vmem:[#allocation24_spill] sm:$0xff] }
 0x2db   :  { %12139 = vrot.lane.b32.xlu1 %v12138_v37, %s12883_s12  ;;  %v3202_v17 = vsel %vm884_vm8, %v3200_v45, %v11851_v10  ;;  %v3203_v58 = vsel %vm884_vm8, %v3201_v48, %v11852_v24  ;;  %v3214_v16 = vsel %vm1392_vm10, %v3206_v23, 0  ;;  %v3261_v37 = vsel %vm1392_vm10, %v3208_v12, 0 }
 0x2dc   :  { %v3204_v53 = vsel %vm887_vm9, %v3202_v17, %v11861_v43  ;;  %v3205_v54 = vsel %vm887_vm9, %v3203_v58, %v11862_v22  ;;  %v11867_v55 = vunpack.i.h.bf16 %v16105_v32  ;;  %v11866_v5 = vunpack.i.l.bf16 %v16105_v32 }
 0x2dd   :  { %v11870_v52 = vpop.permute.xlu1 %11869  ;;  %v3207_v40 = vpack.c.bf16 %v3204_v53, %v3204_v53  ;;  %v3209_v63 = vpack.c.bf16 %v3205_v54, %v3205_v54  ;;  %v11895_v33 = vpop.permute.xlu0 %11894  ;;  %v11877_v41 = vunpack.i.h.bf16 %v11875_v50  ;;  %v11876_v26 = vunpack.i.l.bf16 %v11875_v50 }
 0x2de   :  { %v11887_v14 = vunpack.i.h.bf16 %v11885_v1  ;;  %v11886_v36 = vunpack.i.l.bf16 %v11885_v1  ;;  %v11872_v6 = vunpack.i.h.bf16 %v11870_v52  ;;  %v11871_v38 = vunpack.i.l.bf16 %v11870_v52 }
 0x2df   :  { %11442 = vmatprep.subr.msk.bf16.mxu0 %vm1392_vm10, %v3207_v40  ;;  %11444 = vmatprep.subr.msk.bf16.mxu1 %vm1392_vm10, %v3209_v63  ;;  %v3776_v28 = vsel %vm869_vm3, %v20769_v31, %v11867_v55  ;;  %v3775_v57 = vsel %vm869_vm3, %v20770_v8, %v11866_v5  ;;  %v11897_v44 = vunpack.i.h.bf16 %v11895_v33  ;;  %v11896_v3 = vunpack.i.l.bf16 %v11895_v33 }
 0x2e0   :  { %3220 = vmatpush1.bf16.msra.mxu0 %v3214_v16  ;;  %3267 = vmatpush1.bf16.msra.mxu1 %v3261_v37  ;;  %v3777_v15 = vsel %vm872_vm4, %v3775_v57, %v11876_v26  ;;  %v3778_v32 = vsel %vm872_vm4, %v3776_v28, %v11877_v41  ;;  %v3790_v2 = vsel %vm869_vm3, %v20771_v21, %v11872_v6 }
 0x2e1   :  { %v11880_v13 = vpop.permute.xlu1 %11879  ;;  %v11905_v56 = vpop.permute.xlu0 %11904  ;;  %v3779_v25 = vsel %vm875_vm5, %v3777_v15, %v11886_v36  ;;  %v3780_v35 = vsel %vm875_vm5, %v3778_v32, %v11887_v14  ;;  %v3789_v39 = vsel %vm869_vm3, %v20772_v61, %v11871_v38 }
 0x2e2   :  { %v11882_v46 = vunpack.i.h.bf16 %v11880_v13  ;;  %v11881_v4 = vunpack.i.l.bf16 %v11880_v13  ;;  %v11907_v50 = vunpack.i.h.bf16 %v11905_v56  ;;  %v11906_v24 = vunpack.i.l.bf16 %v11905_v56 }
 0x2e3   :  { %11443 = vmatmul.mubr.msk.bf16.vlgmr.msra.gmra.mrb[16].mxu0 %vm1388_vm11, %v463_v9  ;;  %11445 = vmatmul.mubr.msk.bf16.vlgmr.msra.gmra.mrb[16].mxu1 %vm1388_vm11, %v463_v9  ;;  %v3781_v0 = vsel %vm878_vm6, %v3779_v25, %v11896_v3  ;;  %v3782_v49 = vsel %vm878_vm6, %v3780_v35, %v11897_v44  ;;  %v464_v3 = vld [vmem:[%s19868_s1 + $0xa] sm:$0x3] }
 0x2e4   :  { %3848 = vmatprep.mubr.bf16.mxu0 %v20748_v42  ;;  %3895 = vmatprep.mubr.bf16.mxu1 %v20748_v42  ;;  %v3791_v62 = vsel %vm872_vm4, %v3789_v39, %v11881_v4  ;;  %v3792_v45 = vsel %vm872_vm4, %v3790_v2, %v11882_v46  ;;  %v3783_v1 = vsel %vm881_vm7, %v3781_v0, %v11906_v24 }
 0x2e5   :  { %v11890_v47 = vpop.permute.xlu1 %11889  ;;  %v11915_v11 = vpop.permute.xlu0 %11914  ;;  %v3784_v17 = vsel %vm881_vm7, %v3782_v49, %v11907_v50  ;;  %v20773_v49 = vld [vmem:[#allocation61_spill] sm:$0xff] }
 0x2e6   :  { %v11917_v19 = vunpack.i.h.bf16 %v11915_v11  ;;  %v11916_v20 = vunpack.i.l.bf16 %v11915_v11  ;;  %v11892_v30 = vunpack.i.h.bf16 %v11890_v47  ;;  %v11891_v60 = vunpack.i.l.bf16 %v11890_v47 }
 0x2e8   :  { %v3785_v52 = vsel %vm884_vm8, %v3783_v1, %v11916_v20  ;;  %v3786_v40 = vsel %vm884_vm8, %v3784_v17, %v11917_v19  ;;  %v3793_v63 = vsel %vm875_vm5, %v3791_v62, %v11891_v60  ;;  %v3794_v33 = vsel %vm875_vm5, %v3792_v45, %v11892_v30  ;;  %v20774_v20 = vld [vmem:[#allocation57_spill] sm:$0xff]  ;;  %v20775_v1 = vld [vmem:[#allocation70_spill] sm:$0xff] }
 0x2e9   :  { %v11900_v59 = vpop.permute.xlu1 %11899  ;;  %v11925_v27 = vpop.permute.xlu0 %11924 }
 0x2ea   :  { %v11927_v51 = vunpack.i.h.bf16 %v11925_v27  ;;  %v11926_v7 = vunpack.i.l.bf16 %v11925_v27  ;;  %v11902_v48 = vunpack.i.h.bf16 %v11900_v59  ;;  %v11901_v22 = vunpack.i.l.bf16 %v11900_v59 }
 0x2ec   :  { %v3787_v16 = vsel %vm887_vm9, %v3785_v52, %v11926_v7  ;;  %v3788_v37 = vsel %vm887_vm9, %v3786_v40, %v11927_v51  ;;  %v3795_v9 = vsel %vm878_vm6, %v3793_v63, %v11901_v22  ;;  %v3796_v13 = vsel %vm878_vm6, %v3794_v33, %v11902_v48 }
 0x2ed   :  { %v11910_v18 = vpop.permute.xlu1 %11909  ;;  %v16172_v10 = vpop.permute.xlu0 %11934  ;;  %v3803_v36 = vpack.c.bf16 %v3787_v16, %v3787_v16  ;;  %v3805_v59 = vpack.c.bf16 %v3788_v37, %v3788_v37 }
 0x2ee   :  { %v11912_v58 = vunpack.i.h.bf16 %v11910_v18  ;;  %v11911_v23 = vunpack.i.l.bf16 %v11910_v18  ;;  %v11937_v46 = vunpack.i.h.bf16 %v16172_v10  ;;  %v11936_v4 = vunpack.i.l.bf16 %v16172_v10 }
 0x2ef   :  { %v3811_v57 = vsel %vm1392_vm10, %v3803_v36, 0  ;;  %v3858_v44 = vsel %vm1392_vm10, %v3805_v59, 0 }
 0x2f0   :  { %v3797_v47 = vsel %vm881_vm7, %v3795_v9, %v11911_v23  ;;  %v3798_v11 = vsel %vm881_vm7, %v3796_v13, %v11912_v58  ;;  %v4309_v19 = vsel %vm869_vm3, %v20773_v49, %v11937_v46  ;;  %v4308_v30 = vsel %vm869_vm3, %v20774_v20, %v11936_v4  ;;  %v20776_v58 = vld [vmem:[#allocation73_spill] sm:$0xff] }
 0x2f1   :  { %v11920_v43 = vpop.permute.xlu1 %11919  ;;  %v11945_v12 = vpop.permute.xlu0 %11944 }
 0x2f2   :  { %v11922_v53 = vunpack.i.h.bf16 %v11920_v43  ;;  %v11921_v54 = vunpack.i.l.bf16 %v11920_v43  ;;  %v11947_v18 = vunpack.i.h.bf16 %v11945_v12  ;;  %v11946_v21 = vunpack.i.l.bf16 %v11945_v12 }
 0x2f4   :  { %v3799_v26 = vsel %vm884_vm8, %v3797_v47, %v11921_v54  ;;  %v3800_v14 = vsel %vm884_vm8, %v3798_v11, %v11922_v53  ;;  %v4310_v7 = vsel %vm872_vm4, %v4308_v30, %v11946_v21  ;;  %v4311_v10 = vsel %vm872_vm4, %v4309_v19, %v11947_v18 }
 0x2f5   :  { %v11930_v56 = vpop.permute.xlu1 %11929  ;;  %v11955_v41 = vpop.permute.xlu0 %11954 }
 0x2f6   :  { %v11932_v55 = vunpack.i.h.bf16 %v11930_v56  ;;  %v11931_v5 = vunpack.i.l.bf16 %v11930_v56  ;;  %v11957_v2 = vunpack.i.h.bf16 %v11955_v41  ;;  %v11956_v61 = vunpack.i.l.bf16 %v11955_v41 }
 0x2f8   :  { %v3801_v6 = vsel %vm887_vm9, %v3799_v26, %v11931_v5  ;;  %v3802_v38 = vsel %vm887_vm9, %v3800_v14, %v11932_v55  ;;  %v4312_v62 = vsel %vm875_vm5, %v4310_v7, %v11956_v61  ;;  %v4313_v45 = vsel %vm875_vm5, %v4311_v10, %v11957_v2 }
 0x2f9   :  { %v11940_v27 = vpop.permute.xlu1 %11939  ;;  %v3804_v31 = vpack.c.bf16 %v3801_v6, %v3801_v6  ;;  %v3806_v28 = vpack.c.bf16 %v3802_v38, %v3802_v38  ;;  %v11965_v8 = vpop.permute.xlu0 %11964 }
 0x2fa   :  { %v11942_v50 = vunpack.i.h.bf16 %v11940_v27  ;;  %v11941_v24 = vunpack.i.l.bf16 %v11940_v27  ;;  %v11967_v60 = vunpack.i.h.bf16 %v11965_v8  ;;  %v11966_v51 = vunpack.i.l.bf16 %v11965_v8 }
 0x2fb   :  { %11446 = vmatprep.subr.msk.bf16.mxu0 %vm1392_vm10, %v3804_v31  ;;  %11448 = vmatprep.subr.msk.bf16.mxu1 %vm1392_vm10, %v3806_v28 }
 0x2fc   :  { %3817 = vmatpush1.bf16.msra.mxu0 %v3811_v57  ;;  %3864 = vmatpush1.bf16.msra.mxu1 %v3858_v44  ;;  %v4323_v17 = vsel %vm869_vm3, %v20775_v1, %v11942_v50  ;;  %v4322_v23 = vsel %vm869_vm3, %v20776_v58, %v11941_v24  ;;  %v4314_v52 = vsel %vm878_vm6, %v4312_v62, %v11966_v51  ;;  %v465_v51 = vld [vmem:[%s19868_s1 + $0xc] sm:$0x3] }
 0x2fd   :  { %v11950_v15 = vpop.permute.xlu1 %11949  ;;  %v11975_v32 = vpop.permute.xlu0 %11974  ;;  %v4315_v40 = vsel %vm878_vm6, %v4313_v45, %v11967_v60 }
 0x2fe   :  { %v11952_v48 = vunpack.i.h.bf16 %v11950_v15  ;;  %v11951_v22 = vunpack.i.l.bf16 %v11950_v15  ;;  %v11977_v12 = vunpack.i.h.bf16 %v11975_v32  ;;  %v11976_v53 = vunpack.i.l.bf16 %v11975_v32 }
 0x2ff   :  { %11447 = vmatmul.mubr.msk.bf16.vlgmr.msra.gmra.mrb[20].mxu0 %vm1388_vm11, %v464_v3  ;;  %11449 = vmatmul.mubr.msk.bf16.vlgmr.msra.gmra.mrb[20].mxu1 %vm1388_vm11, %v464_v3 }
 0x300   :  { %4381 = vmatprep.mubr.bf16.mxu0 %v20748_v42  ;;  %4428 = vmatprep.mubr.bf16.mxu1 %v20748_v42  ;;  %v4324_v56 = vsel %vm872_vm4, %v4322_v23, %v11951_v22  ;;  %v4325_v47 = vsel %vm872_vm4, %v4323_v17, %v11952_v48  ;;  %v4316_v41 = vsel %vm881_vm7, %v4314_v52, %v11976_v53 }
 0x301   :  { %v11960_v25 = vpop.permute.xlu1 %11959  ;;  %v4317_v26 = vsel %vm881_vm7, %v4315_v40, %v11977_v12  ;;  %v20777_v40 = vld [vmem:[#allocation92_spill] sm:$0xff] }
 0x302   :  { %v11985_v35 = vpop.permute.xlu0 %11984  ;;  %v11962_v16 = vunpack.i.h.bf16 %v11960_v25  ;;  %v11961_v37 = vunpack.i.l.bf16 %v11960_v25 }
 0x303   :  { %v11987_v63 = vunpack.i.h.bf16 %v11985_v35  ;;  %v11986_v33 = vunpack.i.l.bf16 %v11985_v35 }
 0x304   :  { %v4326_v28 = vsel %vm875_vm5, %v4324_v56, %v11961_v37  ;;  %v4327_v8 = vsel %vm875_vm5, %v4325_v47, %v11962_v16 }
 0x305   :  { %v11970_v39 = vpop.permute.xlu1 %11969  ;;  %v4318_v27 = vsel %vm884_vm8, %v4316_v41, %v11986_v33  ;;  %v4319_v31 = vsel %vm884_vm8, %v4317_v26, %v11987_v63  ;;  %v20778_v33 = vld [vmem:[#allocation15_spill] sm:$0xff] }
 0x306   :  { %v11995_v0 = vpop.permute.xlu0 %11994  ;;  %v11972_v11 = vunpack.i.h.bf16 %v11970_v39  ;;  %v11971_v55 = vunpack.i.l.bf16 %v11970_v39  ;;  %v20779_v41 = vld [vmem:[#allocation35_spill] sm:$0xff] }
 0x307   :  { %v11997_v9 = vunpack.i.h.bf16 %v11995_v0  ;;  %v11996_v13 = vunpack.i.l.bf16 %v11995_v0 }
 0x308   :  { %v4328_v3 = vsel %vm878_vm6, %v4326_v28, %v11971_v55  ;;  %v4329_v15 = vsel %vm878_vm6, %v4327_v8, %v11972_v11 }
 0x309   :  { %v11980_v43 = vpop.permute.xlu1 %11979  ;;  %v4320_v57 = vsel %vm887_vm9, %v4318_v27, %v11996_v13  ;;  %v4321_v44 = vsel %vm887_vm9, %v4319_v31, %v11997_v9 }
 0x30a   :  { %v11982_v14 = vunpack.i.h.bf16 %v11980_v43  ;;  %v11981_v36 = vunpack.i.l.bf16 %v11980_v43  ;;  %v4336_v61 = vpack.c.bf16 %v4320_v57, %v4320_v57  ;;  %v4338_v39 = vpack.c.bf16 %v4321_v44, %v4321_v44 }
 0x30b   :  { %v16219_v54 = vpop.permute.xlu0 %12004 }
 0x30c   :  { %v4330_v25 = vsel %vm881_vm7, %v4328_v3, %v11981_v36  ;;  %v4331_v35 = vsel %vm881_vm7, %v4329_v15, %v11982_v14  ;;  %v4344_v30 = vsel %vm1392_vm10, %v4336_v61, 0  ;;  %v4391_v60 = vsel %vm1392_vm10, %v4338_v39, 0  ;;  %v20780_v14 = vld [vmem:[#allocation30_spill] sm:$0xff] }
 0x30d   :  { %v11990_v5 = vpop.permute.xlu1 %11989  ;;  %v12007_v48 = vunpack.i.h.bf16 %v16219_v54  ;;  %v12006_v22 = vunpack.i.l.bf16 %v16219_v54 }
 0x30e   :  { %v11992_v6 = vunpack.i.h.bf16 %v11990_v5  ;;  %v11991_v38 = vunpack.i.l.bf16 %v11990_v5 }
 0x30f   :  { %v12015_v59 = vpop.permute.xlu0 %12014  ;;  %v4906_v63 = vsel %vm869_vm3, %v20777_v40, %v12007_v48  ;;  %v4905_v16 = vsel %vm869_vm3, %v20778_v33, %v12006_v22 }
 0x310   :  { %v4332_v21 = vsel %vm884_vm8, %v4330_v25, %v11991_v38  ;;  %v4333_v2 = vsel %vm884_vm8, %v4331_v35, %v11992_v6  ;;  %v12017_v43 = vunpack.i.h.bf16 %v12015_v59  ;;  %v12016_v1 = vunpack.i.l.bf16 %v12015_v59 }
 0x311   :  { %v12000_v32 = vpop.permute.xlu1 %11999 }
 0x312   :  { %v12002_v46 = vunpack.i.h.bf16 %v12000_v32  ;;  %v12001_v4 = vunpack.i.l.bf16 %v12000_v32  ;;  %v4907_v13 = vsel %vm872_vm4, %v4905_v16, %v12016_v1  ;;  %v4908_v54 = vsel %vm872_vm4, %v4906_v63, %v12017_v43 }
 0x313   :  { %v12025_v18 = vpop.permute.xlu0 %12024 }
 0x314   :  { %v4334_v50 = vsel %vm887_vm9, %v4332_v21, %v12001_v4  ;;  %v4335_v24 = vsel %vm887_vm9, %v4333_v2, %v12002_v46  ;;  %v12027_v17 = vunpack.i.h.bf16 %v12025_v18  ;;  %v12026_v58 = vunpack.i.l.bf16 %v12025_v18 }
 0x315   :  { %v12010_v0 = vpop.permute.xlu1 %12009  ;;  %v4337_v49 = vpack.c.bf16 %v4334_v50, %v4334_v50  ;;  %v4339_v19 = vpack.c.bf16 %v4335_v24, %v4335_v24 }
 0x316   :  { %v12012_v12 = vunpack.i.h.bf16 %v12010_v0  ;;  %v12011_v53 = vunpack.i.l.bf16 %v12010_v0  ;;  %v4909_v56 = vsel %vm875_vm5, %v4907_v13, %v12026_v58  ;;  %v4910_v47 = vsel %vm875_vm5, %v4908_v54, %v12027_v17 }
 0x317   :  { %v12035_v20 = vpop.permute.xlu0 %12034  ;;  %11450 = vmatprep.subr.msk.bf16.mxu0 %vm1392_vm10, %v4337_v49  ;;  %11452 = vmatprep.subr.msk.bf16.mxu1 %vm1392_vm10, %v4339_v19 }
 0x318   :  { %4350 = vmatpush1.bf16.msra.mxu0 %v4344_v30  ;;  %4397 = vmatpush1.bf16.msra.mxu1 %v4391_v60  ;;  %v12037_v37 = vunpack.i.h.bf16 %v12035_v20  ;;  %v12036_v9 = vunpack.i.l.bf16 %v12035_v20  ;;  %v4920_v26 = vsel %vm869_vm3, %v20779_v41, %v12012_v12  ;;  %v4919_v36 = vsel %vm869_vm3, %v20780_v14, %v12011_v53 }
 0x319   :  { %v12020_v7 = vpop.permute.xlu1 %12019 }
 0x31a   :  { %v12022_v11 = vunpack.i.h.bf16 %v12020_v7  ;;  %v12021_v55 = vunpack.i.l.bf16 %v12020_v7  ;;  %v4911_v27 = vsel %vm878_vm6, %v4909_v56, %v12036_v9  ;;  %v4912_v31 = vsel %vm878_vm6, %v4910_v47, %v12037_v37  ;;  %v466_v9 = vld [vmem:[%s19868_s1 + $0xe] sm:$0x3] }
 0x31b   :  { %v12045_v10 = vpop.permute.xlu0 %12044  ;;  %11451 = vmatmul.mubr.msk.bf16.vlgmr.msra.gmra.mrb[24].mxu0 %vm1388_vm11, %v465_v51  ;;  %11453 = vmatmul.mubr.msk.bf16.vlgmr.msra.gmra.mrb[24].mxu1 %vm1388_vm11, %v465_v51 }
 0x31c   :  { %4978 = vmatprep.mubr.bf16.mxu0 %v20748_v42  ;;  %5025 = vmatprep.mubr.bf16.mxu1 %v20748_v42  ;;  %v12047_v59 = vunpack.i.h.bf16 %v12045_v10  ;;  %v12046_v6 = vunpack.i.l.bf16 %v12045_v10  ;;  %v4921_v32 = vsel %vm872_vm4, %v4919_v36, %v12021_v55  ;;  %v4922_v25 = vsel %vm872_vm4, %v4920_v26, %v12022_v11 }
 0x31e   :  { %v12030_v62 = vpop.permute.xlu1 %12029  ;;  %v4913_v18 = vsel %vm881_vm7, %v4911_v27, %v12046_v6  ;;  %v4914_v21 = vsel %vm881_vm7, %v4912_v31, %v12047_v59  ;;  %v20781_v27 = vld [vmem:[#allocation37_spill] sm:$0xff] }
 0x31f   :  { %v12055_v45 = vpop.permute.xlu0 %12054  ;;  %v12032_v57 = vunpack.i.h.bf16 %v12030_v62  ;;  %v12031_v44 = vunpack.i.l.bf16 %v12030_v62 }
 0x320   :  { %v12057_v28 = vunpack.i.h.bf16 %v12055_v45  ;;  %v12056_v8 = vunpack.i.l.bf16 %v12055_v45 }
 0x321   :  { %v4923_v19 = vsel %vm875_vm5, %v4921_v32, %v12031_v44  ;;  %v4924_v20 = vsel %vm875_vm5, %v4922_v25, %v12032_v57 }
 0x322   :  { %v12040_v23 = vpop.permute.xlu1 %12039  ;;  %v4915_v0 = vsel %vm884_vm8, %v4913_v18, %v12056_v8  ;;  %v4916_v49 = vsel %vm884_vm8, %v4914_v21, %v12057_v28  ;;  %v20782_v28 = vld [vmem:[#allocation56_spill] sm:$0xff]  ;;  %v20783_v18 = vld [vmem:[#allocation54_spill] sm:$0xff] }
 0x323   :  { %v12065_v52 = vpop.permute.xlu0 %12064  ;;  %v12042_v35 = vunpack.i.h.bf16 %v12040_v23  ;;  %v12041_v46 = vunpack.i.l.bf16 %v12040_v23 }
 0x324   :  { %v12067_v3 = vunpack.i.h.bf16 %v12065_v52  ;;  %v12066_v15 = vunpack.i.l.bf16 %v12065_v52 }
 0x325   :  { %v4925_v51 = vsel %vm878_vm6, %v4923_v19, %v12041_v46  ;;  %v4926_v7 = vsel %vm878_vm6, %v4924_v20, %v12042_v35 }
 0x326   :  { %v12050_v5 = vpop.permute.xlu1 %12049  ;;  %v4917_v30 = vsel %vm887_vm9, %v4915_v0, %v12066_v15  ;;  %v4918_v60 = vsel %vm887_vm9, %v4916_v49, %v12067_v3 }
 0x327   :  { %v12052_v2 = vunpack.i.h.bf16 %v12050_v5  ;;  %v12051_v61 = vunpack.i.l.bf16 %v12050_v5  ;;  %v4933_v58 = vpack.c.bf16 %v4917_v30, %v4917_v30  ;;  %v4935_v23 = vpack.c.bf16 %v4918_v60, %v4918_v60 }
 0x328   :  { %v16266_v38 = vpop.permute.xlu0 %12074 }
 0x329   :  { %v4927_v62 = vsel %vm881_vm7, %v4925_v51, %v12051_v61  ;;  %v4928_v45 = vsel %vm881_vm7, %v4926_v7, %v12052_v2  ;;  %v4941_v16 = vsel %vm1392_vm10, %v4933_v58, 0  ;;  %v4988_v37 = vsel %vm1392_vm10, %v4935_v23, 0  ;;  %v20784_v2 = vld [vmem:[#allocation44_spill] sm:$0xff] }
 0x32a   :  { %v12060_v4 = vpop.permute.xlu1 %12059  ;;  %v12077_v47 = vunpack.i.h.bf16 %v16266_v38  ;;  %v12076_v11 = vunpack.i.l.bf16 %v16266_v38 }
 0x32b   :  { %v12062_v50 = vunpack.i.h.bf16 %v12060_v4  ;;  %v12061_v24 = vunpack.i.l.bf16 %v12060_v4 }
 0x32c   :  { %v5503_v31 = vsel %vm869_vm3, %v20781_v27, %v12077_v47  ;;  %v5502_v8 = vsel %vm869_vm3, %v20782_v28, %v12076_v11 }
 0x32d   :  { %v12085_v39 = vpop.permute.xlu0 %12084  ;;  %v4929_v1 = vsel %vm884_vm8, %v4927_v62, %v12061_v24  ;;  %v4930_v17 = vsel %vm884_vm8, %v4928_v45, %v12062_v50 }
 0x32e   :  { %v12087_v5 = vunpack.i.h.bf16 %v12085_v39  ;;  %v12086_v41 = vunpack.i.l.bf16 %v12085_v39 }
 0x330   :  { %v12070_v10 = vpop.permute.xlu1 %12069  ;;  %v5504_v3 = vsel %vm872_vm4, %v5502_v8, %v12086_v41  ;;  %v5505_v38 = vsel %vm872_vm4, %v5503_v31, %v12087_v5  ;;  %v467_v31 = vld [vmem:[%s19868_s1 + $0x10] sm:$0x3] }
 0x331   :  { %v12072_v48 = vunpack.i.h.bf16 %v12070_v10  ;;  %v12071_v22 = vunpack.i.l.bf16 %v12070_v10 }
 0x332   :  { %v12095_v43 = vpop.permute.xlu0 %12094 }
 0x333   :  { %v4931_v12 = vsel %vm887_vm9, %v4929_v1, %v12071_v22  ;;  %v4932_v53 = vsel %vm887_vm9, %v4930_v17, %v12072_v48  ;;  %v12097_v26 = vunpack.i.h.bf16 %v12095_v43  ;;  %v12096_v14 = vunpack.i.l.bf16 %v12095_v43 }
 0x334   :  { %v12080_v52 = vpop.permute.xlu1 %12079  ;;  %v4934_v40 = vpack.c.bf16 %v4931_v12, %v4931_v12  ;;  %v4936_v63 = vpack.c.bf16 %v4932_v53, %v4932_v53 }
 0x335   :  { %v12082_v59 = vunpack.i.h.bf16 %v12080_v52  ;;  %v12081_v6 = vunpack.i.l.bf16 %v12080_v52  ;;  %v5506_v15 = vsel %vm875_vm5, %v5504_v3, %v12096_v14  ;;  %v5507_v32 = vsel %vm875_vm5, %v5505_v38, %v12097_v26 }
 0x336   :  { %v12105_v33 = vpop.permute.xlu0 %12104  ;;  %11454 = vmatprep.subr.msk.bf16.mxu0 %vm1392_vm10, %v4934_v40  ;;  %11456 = vmatprep.subr.msk.bf16.mxu1 %vm1392_vm10, %v4936_v63 }
 0x337   :  { %4947 = vmatpush1.bf16.msra.mxu0 %v4941_v16  ;;  %4994 = vmatpush1.bf16.msra.mxu1 %v4988_v37  ;;  %v12107_v57 = vunpack.i.h.bf16 %v12105_v33  ;;  %v12106_v44 = vunpack.i.l.bf16 %v12105_v33  ;;  %v5517_v21 = vsel %vm869_vm3, %v20783_v18, %v12082_v59  ;;  %v5516_v61 = vsel %vm869_vm3, %v20784_v2, %v12081_v6 }
 0x339   :  { %v12090_v13 = vpop.permute.xlu1 %12089  ;;  %v5508_v24 = vsel %vm878_vm6, %v5506_v15, %v12106_v44  ;;  %v5509_v0 = vsel %vm878_vm6, %v5507_v32, %v12107_v57 }
 0x33a   :  { %v12115_v54 = vpop.permute.xlu0 %12114  ;;  %11455 = vmatmul.mubr.msk.bf16.vlgmr.msra.gmra.mrb[28].mxu0 %vm1388_vm11, %v466_v9  ;;  %11457 = vmatmul.mubr.msk.bf16.vlgmr.msra.gmra.mrb[28].mxu1 %vm1388_vm11, %v466_v9  ;;  %v12092_v25 = vunpack.i.h.bf16 %v12090_v13  ;;  %v12091_v35 = vunpack.i.l.bf16 %v12090_v13 }
 0x33b   :  { %5575 = vmatprep.mubr.bf16.mxu0 %v20748_v42  ;;  %5622 = vmatprep.mubr.bf16.mxu1 %v20748_v42  ;;  %v12117_v39 = vunpack.i.h.bf16 %v12115_v54  ;;  %v12116_v50 = vunpack.i.l.bf16 %v12115_v54 }
 0x33c   :  { %v5518_v7 = vsel %vm872_vm4, %v5516_v61, %v12091_v35  ;;  %v5519_v10 = vsel %vm872_vm4, %v5517_v21, %v12092_v25 }
 0x33d   :  { %v12100_v56 = vpop.permute.xlu1 %12099  ;;  %v5510_v22 = vsel %vm881_vm7, %v5508_v24, %v12116_v50  ;;  %v5511_v43 = vsel %vm881_vm7, %v5509_v0, %v12117_v39 }
 0x33e   :  { %v12125_v55 = vpop.permute.xlu0 %12124  ;;  %v12102_v20 = vunpack.i.h.bf16 %v12100_v56  ;;  %v12101_v30 = vunpack.i.l.bf16 %v12100_v56 }
 0x33f   :  { %v12127_v49 = vunpack.i.h.bf16 %v12125_v55  ;;  %v12126_v19 = vunpack.i.l.bf16 %v12125_v55 }
 0x340   :  { %v5520_v52 = vsel %vm875_vm5, %v5518_v7, %v12101_v30  ;;  %v5521_v40 = vsel %vm875_vm5, %v5519_v10, %v12102_v20 }
 0x341   :  { %v12110_v36 = vpop.permute.xlu1 %12109  ;;  %v5512_v12 = vsel %vm884_vm8, %v5510_v22, %v12126_v19  ;;  %v5513_v53 = vsel %vm884_vm8, %v5511_v43, %v12127_v49 }
 0x342   :  { %v12135_v46 = vpop.permute.xlu0 %12134  ;;  %v12112_v62 = vunpack.i.h.bf16 %v12110_v36  ;;  %v12111_v45 = vunpack.i.l.bf16 %v12110_v36 }
 0x343   :  { %v12137_v60 = vunpack.i.h.bf16 %v12135_v46  ;;  %v12136_v51 = vunpack.i.l.bf16 %v12135_v46 }
 0x344   :  { %v5522_v16 = vsel %vm878_vm6, %v5520_v52, %v12111_v45  ;;  %v5523_v37 = vsel %vm878_vm6, %v5521_v40, %v12112_v62 }
 0x345   :  { %v12120_v4 = vpop.permute.xlu1 %12119  ;;  %v5514_v63 = vsel %vm887_vm9, %v5512_v12, %v12136_v51  ;;  %v5515_v33 = vsel %vm887_vm9, %v5513_v53, %v12137_v60 }
 0x346   :  { %v12122_v1 = vunpack.i.h.bf16 %v12120_v4  ;;  %v12121_v17 = vunpack.i.l.bf16 %v12120_v4  ;;  %v5530_v5 = vpack.c.bf16 %v5514_v63, %v5514_v63  ;;  %v5532_v41 = vpack.c.bf16 %v5515_v33, %v5515_v33 }
 0x348   :  { %v5524_v13 = vsel %vm881_vm7, %v5522_v16, %v12121_v17  ;;  %v5525_v54 = vsel %vm881_vm7, %v5523_v37, %v12122_v1  ;;  %v5538_v6 = vsel %vm1392_vm10, %v5530_v5, 0  ;;  %v5585_v27 = vsel %vm1392_vm10, %v5532_v41, 0 }
 0x349   :  { %v12130_v48 = vpop.permute.xlu1 %12129 }
 0x34a   :  { %v12132_v58 = vunpack.i.h.bf16 %v12130_v48  ;;  %v12131_v23 = vunpack.i.l.bf16 %v12130_v48 }
 0x34c   :  { %v5526_v11 = vsel %vm884_vm8, %v5524_v13, %v12131_v23  ;;  %v5527_v55 = vsel %vm884_vm8, %v5525_v54, %v12132_v58 }
 0x34d   :  { %v12140_v9 = vpop.permute.xlu1 %12139 }
 0x34e   :  { %v12142_v56 = vunpack.i.h.bf16 %v12140_v9  ;;  %v12141_v47 = vunpack.i.l.bf16 %v12140_v9 }
 0x350   :  { %v5528_v26 = vsel %vm887_vm9, %v5526_v11, %v12141_v47  ;;  %v5529_v14 = vsel %vm887_vm9, %v5527_v55, %v12142_v56 }
 0x351   :  { %v5531_v36 = vpack.c.bf16 %v5528_v26, %v5528_v26  ;;  %v5533_v59 = vpack.c.bf16 %v5529_v14, %v5529_v14 }
 0x353   :  { %11458 = vmatprep.subr.msk.bf16.mxu0 %vm1392_vm10, %v5531_v36  ;;  %11460 = vmatprep.subr.msk.bf16.mxu1 %vm1392_vm10, %v5533_v59 }
 0x354   :  { %5544 = vmatpush1.bf16.msra.mxu0 %v5538_v6  ;;  %5591 = vmatpush1.bf16.msra.mxu1 %v5585_v27 }
 0x357   :  { %11459 = vmatmul.mubr.msk.bf16.vlgmr.msra.gmra.mrb[32].mxu0 %vm1388_vm11, %v467_v31  ;;  %11461 = vmatmul.mubr.msk.bf16.vlgmr.msra.gmra.mrb[32].mxu1 %vm1388_vm11, %v467_v31 }
 0x358   :  { %7112 = vmatprep.mubr.bf16.mxu0 %v20748_v42  ;;  %7159 = vmatprep.mubr.bf16.mxu1 %v20748_v42 }
 0x38e   :  { %v1433_v28 = vpop.f32.mrb[0].mxu0 }
 0x38f   :  { %v1480_v8 = vpop.f32.mrb[0].mxu1  ;;  %v1435_v57 = vpop.f32.mrb[1].mxu0 }
 0x390   :  { %v1482_v44 = vpop.f32.mrb[1].mxu1  ;;  %v1437_v3 = vpop.f32.mrb[2].mxu0 }
 0x391   :  { %v1484_v38 = vpop.f32.mrb[2].mxu1  ;;  %v1438_v15 = vpop.f32.mrb[3].mxu0 }
 0x392   :  { %v1485_v32 = vpop.f32.mrb[3].mxu1 }
 0x396   :  { %v1530_v25 = vpop.f32.mrb[4].mxu0 }
 0x397   :  { %v1531_v35 = vadd.f32 %v1530_v25, %v1433_v28  ;;  %v1577_v46 = vpop.f32.mrb[4].mxu1  ;;  %v1532_v4 = vpop.f32.mrb[5].mxu0 }
 0x398   :  { %v1578_v18 = vadd.f32 %v1577_v46, %v1480_v8  ;;  %v1533_v21 = vadd.f32 %v1532_v4, %v1435_v57  ;;  %v1579_v2 = vpop.f32.mrb[5].mxu1  ;;  %v1534_v61 = vpop.f32.mrb[6].mxu0 }
 0x399   :  { %v1580_v39 = vadd.f32 %v1579_v2, %v1482_v44  ;;  %v1581_v50 = vpop.f32.mrb[6].mxu1  ;;  %v1535_v24 = vpop.f32.mrb[7].mxu0 }
 0x39a   :  { %v1582_v0 = vpop.f32.mrb[7].mxu1 }
 0x3a0   :  { %v2123_v49 = vpop.f32.mrb[8].mxu0 }
 0x3a1   :  { %v2177_v19 = vadd.f32 %v2123_v49, %v1531_v35  ;;  %v2170_v20 = vpop.f32.mrb[8].mxu1  ;;  %v2125_v30 = vpop.f32.mrb[9].mxu0 }
 0x3a2   :  { %v2179_v60 = vadd.f32 %v2170_v20, %v1578_v18  ;;  %v2178_v51 = vadd.f32 %v2125_v30, %v1533_v21  ;;  %v2172_v7 = vpop.f32.mrb[9].mxu1  ;;  %v2127_v10 = vpop.f32.mrb[10].mxu0 }
 0x3a3   :  { %v2180_v62 = vadd.f32 %v2172_v7, %v1580_v39  ;;  %v2174_v45 = vpop.f32.mrb[10].mxu1  ;;  %v2128_v48 = vpop.f32.mrb[11].mxu0 }
 0x3a4   :  { %v2175_v22 = vpop.f32.mrb[11].mxu1 }
 0x3a5   :  { %v5638_v22 = vpop.permute.xlu0 %5637 }
 0x3a8   :  { %v2656_v43 = vpop.f32.mrb[12].mxu0 }
 0x3a9   :  { %v2710_v1 = vadd.f32 %v2656_v43, %v2177_v19  ;;  %v2703_v17 = vpop.f32.mrb[12].mxu1  ;;  %v2658_v58 = vpop.f32.mrb[13].mxu0 }
 0x3aa   :  { %v2712_v23 = vadd.f32 %v2703_v17, %v2179_v60  ;;  %v2711_v12 = vadd.f32 %v2658_v58, %v2178_v51  ;;  %v2705_v53 = vpop.f32.mrb[13].mxu1  ;;  %v2660_v52 = vpop.f32.mrb[14].mxu0 }
 0x3ab   :  { %v2713_v40 = vadd.f32 %v2705_v53, %v2180_v62  ;;  %v2707_v63 = vpop.f32.mrb[14].mxu1  ;;  %v2661_v33 = vpop.f32.mrb[15].mxu0 }
 0x3ac   :  { %v2708_v16 = vpop.f32.mrb[15].mxu1 }
 0x3b6   :  { %v3253_v37 = vpop.f32.mrb[16].mxu0  ;;  %v3300_v9 = vpop.f32.mrb[16].mxu1 }
 0x3b7   :  { %v3307_v13 = vadd.f32 %v3253_v37, %v2710_v1  ;;  %v3309_v54 = vadd.f32 %v3300_v9, %v2712_v23  ;;  %v3255_v56 = vpop.f32.mrb[17].mxu0  ;;  %v3302_v47 = vpop.f32.mrb[17].mxu1 }
 0x3b8   :  { %v3308_v11 = vadd.f32 %v3255_v56, %v2711_v12  ;;  %v3310_v55 = vadd.f32 %v3302_v47, %v2713_v40  ;;  %v3257_v5 = vpop.f32.mrb[18].mxu0  ;;  %v3304_v41 = vpop.f32.mrb[18].mxu1 }
 0x3b9   :  { %v3258_v26 = vpop.f32.mrb[19].mxu0  ;;  %v3305_v14 = vpop.f32.mrb[19].mxu1 }
 0x3ba   :  { %v5699_v26 = vpop.permute.xlu0 %5698 }
 0x3d2   :  { %v3850_v36 = vpop.f32.mrb[20].mxu0  ;;  %v3897_v59 = vpop.f32.mrb[20].mxu1 }
 0x3d3   :  { %v3904_v6 = vadd.f32 %v3850_v36, %v3307_v13  ;;  %v3906_v27 = vadd.f32 %v3897_v59, %v3309_v54  ;;  %v3852_v31 = vpop.f32.mrb[21].mxu0  ;;  %v3899_v28 = vpop.f32.mrb[21].mxu1 }
 0x3d4   :  { %v3905_v8 = vadd.f32 %v3852_v31, %v3308_v11  ;;  %v3907_v57 = vadd.f32 %v3899_v28, %v3310_v55  ;;  %v3854_v44 = vpop.f32.mrb[22].mxu0  ;;  %v3901_v3 = vpop.f32.mrb[22].mxu1 }
 0x3d5   :  { %v3855_v38 = vpop.f32.mrb[23].mxu0  ;;  %v3902_v15 = vpop.f32.mrb[23].mxu1 }
 0x3ee   :  { %v4383_v32 = vpop.f32.mrb[24].mxu0  ;;  %v4430_v25 = vpop.f32.mrb[24].mxu1 }
 0x3ef   :  { %v4437_v35 = vadd.f32 %v4383_v32, %v3904_v6  ;;  %v4439_v46 = vadd.f32 %v4430_v25, %v3906_v27  ;;  %v4385_v4 = vpop.f32.mrb[25].mxu0  ;;  %v4432_v18 = vpop.f32.mrb[25].mxu1 }
 0x3f0   :  { %v4438_v21 = vadd.f32 %v4385_v4, %v3905_v8  ;;  %v4440_v2 = vadd.f32 %v4432_v18, %v3907_v57  ;;  %v4387_v61 = vpop.f32.mrb[26].mxu0  ;;  %v4434_v39 = vpop.f32.mrb[26].mxu1 }
 0x3f1   :  { %v4388_v50 = vpop.f32.mrb[27].mxu0  ;;  %v4435_v24 = vpop.f32.mrb[27].mxu1 }
 0x40d   :  { %v4980_v0 = vpop.f32.mrb[28].mxu0  ;;  %v5027_v49 = vpop.f32.mrb[28].mxu1 }
 0x40e   :  { %v5034_v19 = vadd.f32 %v4980_v0, %v4437_v35  ;;  %v5036_v20 = vadd.f32 %v5027_v49, %v4439_v46  ;;  %v4982_v30 = vpop.f32.mrb[29].mxu0  ;;  %v5029_v60 = vpop.f32.mrb[29].mxu1 }
 0x40f   :  { %v5035_v51 = vadd.f32 %v4982_v30, %v4438_v21  ;;  %v5037_v7 = vadd.f32 %v5029_v60, %v4440_v2  ;;  %v4984_v10 = vpop.f32.mrb[30].mxu0  ;;  %v5031_v62 = vpop.f32.mrb[30].mxu1 }
 0x410   :  { %v4985_v45 = vpop.f32.mrb[31].mxu0  ;;  %v5032_v48 = vpop.f32.mrb[31].mxu1 }
 0x42a   :  { %v5577_v43 = vpop.f32.mrb[32].mxu0  ;;  %v5624_v1 = vpop.f32.mrb[32].mxu1 }
 0x42b   :  { %v5631_v17 = vadd.f32 %v5577_v43, %v5034_v19  ;;  %v5633_v58 = vadd.f32 %v5624_v1, %v5036_v20  ;;  %v5579_v23 = vpop.f32.mrb[33].mxu0  ;;  %v5626_v12 = vpop.f32.mrb[33].mxu1  ;;  %v5644_v19 = vld [vmem:[%s19870_s3] sm:$0xf] }
 0x42c   :  { %v5632_v53 = vadd.f32 %v5579_v23, %v5035_v51  ;;  %v5634_v52 = vadd.f32 %v5626_v12, %v5037_v7  ;;  %v5581_v40 = vpop.f32.mrb[34].mxu0  ;;  %v5628_v63 = vpop.f32.mrb[34].mxu1 }
 0x42d   :  { %v5640_v33 = vadd.f32 %v5638_v22, %v5631_v17  ;;  %v5642_v16 = vadd.f32 %v5638_v22, %v5633_v58  ;;  %v5582_v37 = vpop.f32.mrb[35].mxu0  ;;  %v5629_v9 = vpop.f32.mrb[35].mxu1 }
 0x42e   :  { %v5641_v13 = vadd.f32 %v5638_v22, %v5632_v53  ;;  %v5643_v54 = vadd.f32 %v5638_v22, %v5634_v52 }
 0x42f   :  { %v5647_v56 = vsel %vm5646_vm12, %v5640_v33, 0.0  ;;  %v5652_v47 = vsel %vm5646_vm12, %v5642_v16, 0.0 }
 0x430   :  { %v5648_v11 = vsel %vm5646_vm12, %v5641_v13, 0.0  ;;  %v5653_v55 = vsel %vm5646_vm12, %v5643_v54, 0.0 }
 0x431   :  { %v5654_v5 = vadd.f32 %v5653_v55, %v5652_v47  ;;  %v5649_v41 = vadd.f32 %v5648_v11, %v5647_v56  ;;  %v20785_v47 = vld [vmem:[#allocation6_spill] sm:$0xff] }
 0x433   :  { %5655 = vadd.xlane.f32.xlu0 %v5654_v5  ;;  %5650 = vadd.xlane.f32.xlu1 %v5649_v41 }
 0x4c0   :  { %v5656_v14 = vpop.xlane.xlu0 %5655  ;;  %v5651_v36 = vpop.xlane.xlu1 %5650 }
 0x4c1   :  { %v5658_v59 = vsel %vm5646_vm12, %v5656_v14, 0.0  ;;  %v5657_v6 = vsel %vm5646_vm12, %v5651_v36, 0.0 }
 0x4c2   :  { %v5659_v27 = vadd.f32 %v5658_v59, %v5657_v6 }
 0x4c4   :  { %v5661_v31 = vmul.f32 0.001953125, %v5659_v27 }
 0x4c6   :  { %v5664_v28 = vsub.f32 %v5642_v16, %v5661_v31  ;;  %v5665_v8 = vsub.f32 %v5643_v54, %v5661_v31  ;;  %v5662_v57 = vsub.f32 %v5640_v33, %v5661_v31  ;;  %v5663_v44 = vsub.f32 %v5641_v13, %v5661_v31 }
 0x4c8   :  { %v5668_v3 = vmul.f32 %v5664_v28, %v5664_v28  ;;  %v5669_v38 = vmul.f32 %v5665_v8, %v5665_v8  ;;  %v5666_v15 = vmul.f32 %v5662_v57, %v5662_v57  ;;  %v5667_v32 = vmul.f32 %v5663_v44, %v5663_v44 }
 0x4ca   :  { %v5675_v25 = vsel %vm5646_vm12, %v5668_v3, 0.0  ;;  %v5676_v35 = vsel %vm5646_vm12, %v5669_v38, 0.0  ;;  %v5670_v46 = vsel %vm5646_vm12, %v5666_v15, 0.0  ;;  %v5671_v4 = vsel %vm5646_vm12, %v5667_v32, 0.0 }
 0x4cb   :  { %v5677_v18 = vadd.f32 %v5676_v35, %v5675_v25  ;;  %v5672_v21 = vadd.f32 %v5671_v4, %v5670_v46 }
 0x4cd   :  { %5678 = vadd.xlane.f32.xlu0 %v5677_v18  ;;  %5673 = vadd.xlane.f32.xlu1 %v5672_v21 }
 0x55a   :  { %v5679_v2 = vpop.xlane.xlu0 %5678  ;;  %v5674_v61 = vpop.xlane.xlu1 %5673 }
 0x55b   :  { %v5681_v39 = vsel %vm5646_vm12, %v5679_v2, 0.0  ;;  %v5680_v50 = vsel %vm5646_vm12, %v5674_v61, 0.0 }
 0x55c   :  { %v5682_v24 = vadd.f32 %v5681_v39, %v5680_v50 }
 0x55e   :  { %v5683_v0 = vmul.f32 0.001953125, %v5682_v24 }
 0x560   :  { %v5684_v49 = vadd.f32 1e-05, %v5683_v0 }
 0x562   :  { %12854 = vrsqrt.f32 %v5684_v49 }
 0x56c   :  { %v12855_v20 = vpop.eup %12854 }
 0x56d   :  { %v5686_v30 = vmul.f32 %v12855_v20, %v5644_v19 }
 0x56f   :  { %5689 = vperm.xlu1 %12144, %v5686_v30  }
 0x5ee   :  { %v5690_v60 = vpop.permute.xlu1 %5689 }
 0x5ef   :  { %v5692_v51 = vmul.f32 %v5690_v60, %v5662_v57  ;;  %v5694_v7 = vmul.f32 %v5690_v60, %v5664_v28  ;;  %v5693_v22 = vmul.f32 %v5690_v60, %v5663_v44  ;;  %v5695_v1 = vmul.f32 %v5690_v60, %v5665_v8 }
 0x5f1   :  { %v5701_v10 = vadd.f32 %v5699_v26, %v5692_v51  ;;  %v5703_v62 = vadd.f32 %v5699_v26, %v5694_v7  ;;  %v5702_v43 = vadd.f32 %v5699_v26, %v5693_v22  ;;  %v5704_v58 = vadd.f32 %v5699_v26, %v5695_v1 }
 0x5f3   :  { %v5705_v45 = vmax.f32 %v5701_v10, 0.0  ;;  %v16361_v48 = vmax.f32 %v5703_v62, 0.0  ;;  %v16378_v17 = vmax.f32 %v5702_v43, 0.0  ;;  %v16388_v23 = vmax.f32 %v5704_v58, 0.0 }
 0x5f5   :  { %5717 = vrot.lane.b32.xlu0 %v5705_v45, %s12885_s14  ;;  %5711 = vrot.lane.b32.xlu1 %v5705_v45, %s12883_s12 }
 0x5f9   :  { %5723 = vrot.lane.b32.xlu0 %v5705_v45, %s12882_s11  ;;  %5713 = vrot.lane.b32.xlu1 %v16361_v48, %s12883_s12 }
 0x5fd   :  { %5729 = vrot.lane.b32.xlu0 %v5705_v45, %s12884_s13  ;;  %5719 = vrot.lane.b32.xlu1 %v16361_v48, %s12885_s14 }
 0x601   :  { %5735 = vrot.lane.b32.xlu0 %v5705_v45, %s12887_s16  ;;  %5725 = vrot.lane.b32.xlu1 %v16361_v48, %s12882_s11 }
 0x605   :  { %5741 = vrot.lane.b32.xlu0 %v5705_v45, %s12886_s15  ;;  %5731 = vrot.lane.b32.xlu1 %v16361_v48, %s12884_s13 }
 0x609   :  { %5747 = vrot.lane.b32.xlu0 %v5705_v45, %s12888_s19  ;;  %5737 = vrot.lane.b32.xlu1 %v16361_v48, %s12887_s16 }
 0x60d   :  { %5755 = vrot.lane.b32.xlu0 %v16378_v17, %s12883_s12  ;;  %5743 = vrot.lane.b32.xlu1 %v16361_v48, %s12886_s15 }
 0x611   :  { %5761 = vrot.lane.b32.xlu0 %v16378_v17, %s12885_s14  ;;  %5749 = vrot.lane.b32.xlu1 %v16361_v48, %s12888_s19 }
 0x615   :  { %5767 = vrot.lane.b32.xlu0 %v16378_v17, %s12882_s11  ;;  %5757 = vrot.lane.b32.xlu1 %v16388_v23, %s12883_s12 }
 0x619   :  { %5773 = vrot.lane.b32.xlu0 %v16378_v17, %s12884_s13  ;;  %5763 = vrot.lane.b32.xlu1 %v16388_v23, %s12885_s14 }
 0x61d   :  { %5779 = vrot.lane.b32.xlu0 %v16378_v17, %s12887_s16  ;;  %5769 = vrot.lane.b32.xlu1 %v16388_v23, %s12882_s11 }
 0x621   :  { %5785 = vrot.lane.b32.xlu0 %v16378_v17, %s12886_s15  ;;  %5775 = vrot.lane.b32.xlu1 %v16388_v23, %s12884_s13 }
 0x625   :  { %5791 = vrot.lane.b32.xlu0 %v16378_v17, %s12888_s19  ;;  %5781 = vrot.lane.b32.xlu1 %v16388_v23, %s12887_s16 }
 0x629   :  { %5787 = vrot.lane.b32.xlu1 %v16388_v23, %s12886_s15 }
 0x62d   :  { %5793 = vrot.lane.b32.xlu1 %v16388_v23, %s12888_s19 }
 0x667   :  { %v5718_v12 = vpop.permute.xlu0 %5717  ;;  %v5712_v53 = vpop.permute.xlu1 %5711 }
 0x668   :  { %v5797_v56 = vcombine.low %v5705_v45, %v5718_v12 }
 0x66a   :  { %v5804_v26 = vrot.slane %v5797_v56, %v20785_v47 }
 0x66b   :  { %v5724_v52 = vpop.permute.xlu0 %5723  ;;  %v5714_v40 = vpop.permute.xlu1 %5713 }
 0x66c   :  { %v5805_v9 = vcombine.low %v5712_v53, %v5724_v52 }
 0x66e   :  { %v5812_v11 = vrot.slane %v5805_v9, %v20785_v47 }
 0x66f   :  { %v5730_v63 = vpop.permute.xlu0 %5729  ;;  %v5720_v33 = vpop.permute.xlu1 %5719 }
 0x670   :  { %v5829_v36 = vcombine.low %v5804_v26, %v5812_v11  ;;  %v5830_v25 = vcombine.high %v5804_v26, %v5812_v11  ;;  %v5933_v21 = vcombine.low %v16361_v48, %v5720_v33 }
 0x672   :  { %v5837_v8 = vrot.slane %v5829_v36, %v13041_v29  ;;  %v5844_v50 = vrot.slane %v5830_v25, %v13041_v29  ;;  %v5940_v20 = vrot.slane %v5933_v21, %v20785_v47 }
 0x673   :  { %v5736_v16 = vpop.permute.xlu0 %5735  ;;  %v5726_v37 = vpop.permute.xlu1 %5725 }
 0x674   :  { %v5941_v35 = vcombine.low %v5714_v40, %v5726_v37 }
 0x676   :  { %v5948_v24 = vrot.slane %v5941_v35, %v20785_v47 }
 0x677   :  { %v5742_v13 = vpop.permute.xlu0 %5741  ;;  %v5732_v54 = vpop.permute.xlu1 %5731 }
 0x678   :  { %v5813_v55 = vcombine.low %v5730_v63, %v5742_v13  ;;  %v5965_v51 = vcombine.low %v5940_v20, %v5948_v24  ;;  %v5966_v52 = vcombine.high %v5940_v20, %v5948_v24 }
 0x67a   :  { %v5820_v59 = vrot.slane %v5813_v55, %v20785_v47  ;;  %v5973_v48 = vrot.slane %v5965_v51, %v13041_v29  ;;  %v5980_v56 = vrot.slane %v5966_v52, %v13041_v29 }
 0x67b   :  { %v5748_v5 = vpop.permute.xlu0 %5747  ;;  %v5738_v41 = vpop.permute.xlu1 %5737 }
 0x67c   :  { %v5821_v14 = vcombine.low %v5736_v16, %v5748_v5 }
 0x67e   :  { %v5828_v6 = vrot.slane %v5821_v14, %v20785_v47 }
 0x67f   :  { %v5756_v27 = vpop.permute.xlu0 %5755  ;;  %v5744_v31 = vpop.permute.xlu1 %5743 }
 0x680   :  { %v5845_v28 = vcombine.low %v5820_v59, %v5828_v6  ;;  %v5846_v38 = vcombine.high %v5820_v59, %v5828_v6  ;;  %v5949_v46 = vcombine.low %v5732_v54, %v5744_v31 }
 0x682   :  { %v5853_v57 = vrot.slane %v5845_v28, %v13041_v29  ;;  %v5860_v2 = vrot.slane %v5846_v38, %v13041_v29  ;;  %v5956_v0 = vrot.slane %v5949_v46, %v20785_v47 }
 0x683   :  { %v5762_v44 = vpop.permute.xlu0 %5761  ;;  %v5750_v3 = vpop.permute.xlu1 %5749 }
 0x684   :  { %v5957_v15 = vcombine.low %v5738_v41, %v5750_v3  ;;  %v5861_v32 = vcombine.low %v5837_v8, %v5853_v57  ;;  %v5862_v39 = vcombine.high %v5837_v8, %v5853_v57  ;;  %v5863_v60 = vcombine.low %v5844_v50, %v5860_v2 }
 0x685   :  { %v5864_v45 = vcombine.high %v5844_v50, %v5860_v2  ;;  %v5865_v58 = vcombine.low %v16378_v17, %v5762_v44 }
 0x686   :  { %6085 = vrot.lane.b32.xlu0 %v5861_v32, %s12892_s20  ;;  %v5964_v61 = vrot.slane %v5957_v15, %v20785_v47 }
 0x687   :  { %v5768_v4 = vpop.permute.xlu0 %5767  ;;  %v16421_v18 = vpop.permute.xlu1 %5757  ;;  %v5872_v37 = vrot.slane %v5865_v58, %v20785_v47 }
 0x688   :  { %v5981_v30 = vcombine.low %v5956_v0, %v5964_v61  ;;  %v5873_v22 = vcombine.low %v5756_v27, %v5768_v4  ;;  %v5982_v12 = vcombine.high %v5956_v0, %v5964_v61 }
 0x68a   :  { %6089 = vrot.lane.b32.xlu0 %v5862_v39, %s12892_s20  ;;  %v5989_v62 = vrot.slane %v5981_v30, %v13041_v29  ;;  %v5880_v40 = vrot.slane %v5873_v22, %v20785_v47  ;;  %v5996_v9 = vrot.slane %v5982_v12, %v13041_v29 }
 0x68b   :  { %v5774_v49 = vpop.permute.xlu0 %5773  ;;  %v5764_v19 = vpop.permute.xlu1 %5763 }
 0x68c   :  { %v5997_v53 = vcombine.low %v5973_v48, %v5989_v62  ;;  %v5998_v54 = vcombine.high %v5973_v48, %v5989_v62  ;;  %v5897_v11 = vcombine.low %v5872_v37, %v5880_v40  ;;  %v5999_v26 = vcombine.low %v5980_v56, %v5996_v9 }
 0x68d   :  { %v6000_v28 = vcombine.high %v5980_v56, %v5996_v9  ;;  %v5898_v8 = vcombine.high %v5872_v37, %v5880_v40  ;;  %v6001_v3 = vcombine.low %v16388_v23, %v5764_v19 }
 0x68e   :  { %6093 = vrot.lane.b32.xlu0 %v5863_v60, %s12892_s20  ;;  %v5905_v14 = vrot.slane %v5897_v11, %v13041_v29 }
 0x68f   :  { %v5780_v7 = vpop.permute.xlu0 %5779  ;;  %v5770_v10 = vpop.permute.xlu1 %5769  ;;  %v5912_v25 = vrot.slane %v5898_v8, %v13041_v29  ;;  %v6008_v4 = vrot.slane %v6001_v3, %v20785_v47 }
 0x690   :  { %v6009_v57 = vcombine.low %v16421_v18, %v5770_v10 }
 0x692   :  { %6097 = vrot.lane.b32.xlu0 %v5864_v45, %s12892_s20  ;;  %v6016_v35 = vrot.slane %v6009_v57, %v20785_v47 }
 0x693   :  { %v5786_v43 = vpop.permute.xlu0 %5785  ;;  %v5776_v1 = vpop.permute.xlu1 %5775 }
 0x694   :  { %v5881_v63 = vcombine.low %v5774_v49, %v5786_v43  ;;  %v6033_v2 = vcombine.low %v6008_v4, %v6016_v35  ;;  %v6034_v0 = vcombine.high %v6008_v4, %v6016_v35 }
 0x696   :  { %6101 = vrot.lane.b32.xlu0 %v5997_v53, %s12892_s20  ;;  %v5888_v17 = vrot.slane %v5881_v63, %v20785_v47  ;;  %v6041_v39 = vrot.slane %v6033_v2, %v13041_v29  ;;  %v6048_v20 = vrot.slane %v6034_v0, %v13041_v29 }
 0x697   :  { %v5792_v33 = vpop.permute.xlu0 %5791  ;;  %v5782_v16 = vpop.permute.xlu1 %5781 }
 0x698   :  { %v5889_v13 = vcombine.low %v5780_v7, %v5792_v33 }
 0x69a   :  { %v5896_v55 = vrot.slane %v5889_v13, %v20785_v47  ;;  %6105 = vrot.lane.b32.xlu0 %v5998_v54, %s12892_s20 }
 0x69b   :  { %v5788_v5 = vpop.permute.xlu1 %5787 }
 0x69c   :  { %v5913_v41 = vcombine.low %v5888_v17, %v5896_v55  ;;  %v5914_v6 = vcombine.high %v5888_v17, %v5896_v55  ;;  %v6017_v44 = vcombine.low %v5776_v1, %v5788_v5 }
 0x69e   :  { %v5921_v36 = vrot.slane %v5913_v41, %v13041_v29  ;;  %6109 = vrot.lane.b32.xlu0 %v5999_v26, %s12892_s20  ;;  %v5928_v38 = vrot.slane %v5914_v6, %v13041_v29  ;;  %v6024_v46 = vrot.slane %v6017_v44, %v20785_v47 }
 0x69f   :  { %v5794_v59 = vpop.permute.xlu1 %5793 }
 0x6a0   :  { %v6025_v27 = vcombine.low %v5782_v16, %v5794_v59  ;;  %v5929_v31 = vcombine.low %v5905_v14, %v5921_v36  ;;  %v5930_v32 = vcombine.high %v5905_v14, %v5921_v36  ;;  %v5931_v21 = vcombine.low %v5912_v25, %v5928_v38 }
 0x6a1   :  { %v5932_v61 = vcombine.high %v5912_v25, %v5928_v38 }
 0x6a2   :  { %6087 = vrot.lane.b32.xlu1 %v5929_v31, %s12892_s20  ;;  %6113 = vrot.lane.b32.xlu0 %v6000_v28, %s12892_s20  ;;  %v6032_v15 = vrot.slane %v6025_v27, %v20785_v47 }
 0x6a4   :  { %v6049_v18 = vcombine.low %v6024_v46, %v6032_v15  ;;  %v6050_v50 = vcombine.high %v6024_v46, %v6032_v15 }
 0x6a6   :  { %6091 = vrot.lane.b32.xlu1 %v5930_v32, %s12892_s20  ;;  %v6057_v23 = vrot.slane %v6049_v18, %v13041_v29  ;;  %v6064_v49 = vrot.slane %v6050_v50, %v13041_v29 }
 0x6a8   :  { %v6065_v24 = vcombine.low %v6041_v39, %v6057_v23  ;;  %v6066_v19 = vcombine.high %v6041_v39, %v6057_v23  ;;  %v6067_v30 = vcombine.low %v6048_v20, %v6064_v49  ;;  %v6068_v60 = vcombine.high %v6048_v20, %v6064_v49 }
 0x6aa   :  { %6095 = vrot.lane.b32.xlu1 %v5931_v21, %s12892_s20 }
 0x6ae   :  { %6099 = vrot.lane.b32.xlu1 %v5932_v61, %s12892_s20 }
 0x6b2   :  { %6103 = vrot.lane.b32.xlu1 %v6065_v24, %s12892_s20 }
 0x6b6   :  { %6107 = vrot.lane.b32.xlu1 %v6066_v19, %s12892_s20 }
 0x6ba   :  { %6111 = vrot.lane.b32.xlu1 %v6067_v30, %s12892_s20 }
 0x6be   :  { %6115 = vrot.lane.b32.xlu1 %v6068_v60, %s12892_s20 }
 0x6f8   :  { %v6086_v51 = vpop.permute.xlu0 %6085 }
 0x6f9   :  { %6133 = vst.msk [vmem:[#allocation2 + $0x1] sm:$0xff] %vm442_vm2, %v6086_v51 }
 0x6fc   :  { %v6090_v7 = vpop.permute.xlu0 %6089 }
 0x6fd   :  { %6135 = vst.msk [vmem:[#allocation2 + $0x19] sm:$0xff] %vm442_vm2, %v6090_v7 }
 0x700   :  { %v6094_v10 = vpop.permute.xlu0 %6093  ;;  %v6159_v62 = vld [vmem:[#allocation2] sm:$0xff] }
 0x701   :  { %6137 = vst.msk [vmem:[#allocation2 + $0x31] sm:$0xff] %vm442_vm2, %v6094_v10  ;;  %6607 = vrot.lane.b32.xlu0 %v6159_v62, %s12893_s21 }
 0x704   :  { %v6098_v45 = vpop.permute.xlu0 %6097  ;;  %v16472_v48 = vld [vmem:[#allocation2 + $0x18] sm:$0xff] }
 0x705   :  { %6139 = vst.msk [vmem:[#allocation2 + $0x49] sm:$0xff] %vm442_vm2, %v6098_v45  ;;  %6611 = vrot.lane.b32.xlu0 %v16472_v48, %s12893_s21 }
 0x708   :  { %v6102_v22 = vpop.permute.xlu0 %6101  ;;  %v16477_v43 = vld [vmem:[#allocation2 + $0x30] sm:$0xff] }
 0x709   :  { %6141 = vst.msk [vmem:[#allocation2 + $0x61] sm:$0xff] %vm442_vm2, %v6102_v22  ;;  %v6175_v1 = vcombine.low %v6159_v62, %v16477_v43  ;;  %v6176_v58 = vcombine.high %v6159_v62, %v16477_v43  ;;  %6615 = vrot.lane.b32.xlu0 %v16477_v43, %s12893_s21 }
 0x70b   :  { %v16494_v63 = vrot.slane %v6175_v1, %v20785_v47  ;;  %v6190_v33 = vrot.slane %v6176_v58, %v20785_v47 }
 0x70c   :  { %v6106_v12 = vpop.permute.xlu0 %6105  ;;  %v16484_v53 = vld [vmem:[#allocation2 + $0x48] sm:$0xff] }
 0x70d   :  { %6143 = vst.msk [vmem:[#allocation2 + $0x79] sm:$0xff] %vm442_vm2, %v6106_v12  ;;  %v6191_v52 = vcombine.low %v16472_v48, %v16484_v53  ;;  %v6192_v40 = vcombine.high %v16472_v48, %v16484_v53  ;;  %6619 = vrot.lane.b32.xlu0 %v16484_v53, %s12893_s21 }
 0x70f   :  { %v16498_v16 = vrot.slane %v6191_v52, %v20785_v47  ;;  %v6206_v37 = vrot.slane %v6192_v40, %v20785_v47 }
 0x710   :  { %v6110_v9 = vpop.permute.xlu0 %6109  ;;  %v16501_v13 = vld [vmem:[#allocation2 + $0x60] sm:$0xff] }
 0x711   :  { %v6208_v56 = vcombine.high %v16494_v63, %v16498_v16  ;;  %v6223_v11 = vcombine.low %v6190_v33, %v6206_v37  ;;  %v6224_v17 = vcombine.high %v6190_v33, %v6206_v37  ;;  %6145 = vst.msk [vmem:[#allocation2 + $0x91] sm:$0xff] %vm442_vm2, %v6110_v9  ;;  %6623 = vrot.lane.b32.xlu0 %v16501_v13, %s12893_s21 }
 0x713   :  { %v16557_v18 = vrot.slane %v6208_v56, %v13041_v29  ;;  %v16580_v49 = vrot.slane %v6223_v11, %v13041_v29  ;;  %v16585_v19 = vrot.slane %v6224_v17, %v13041_v29 }
 0x714   :  { %v6114_v55 = vpop.permute.xlu0 %6113  ;;  %v6088_v5 = vpop.permute.xlu1 %6087  ;;  %v16510_v41 = vld [vmem:[#allocation2 + $0x78] sm:$0xff] }
 0x715   :  { %6147 = vst.msk [vmem:[#allocation2 + $0xa9] sm:$0xff] %vm442_vm2, %v6114_v55  ;;  %6134 = vst.msk [vmem:[#allocation2 + $0x9] sm:$0xff] %vm442_vm2, %v6088_v5  ;;  %6627 = vrot.lane.b32.xlu0 %v16510_v41, %s12893_s21  ;;  %v16595_v7 = vcombine.high %v16557_v18, %v20337_v34  ;;  %v16622_v40 = vcombine.high %v16580_v49, %v20337_v34 }
 0x716   :  { %20786 = vst [vmem:[#allocation69_spill] sm:$0xff] %v16557_v18  ;;  %20790 = vst [vmem:[#allocation18_spill] sm:$0xff] %v16580_v49 }
 0x717   :  { %20791 = vst [vmem:[#allocation79_spill] sm:$0xff] %v16585_v19  ;;  %20792 = vst [vmem:[#allocation83_spill] sm:$0xff] %v16595_v7 }
 0x718   :  { %v6092_v26 = vpop.permute.xlu1 %6091  ;;  %v16516_v14 = vld [vmem:[#allocation2 + $0x90] sm:$0xff]  ;;  %20796 = vst [vmem:[#allocation72_spill] sm:$0xff] %v16622_v40 }
 0x719   :  { %6136 = vst.msk [vmem:[#allocation2 + $0x21] sm:$0xff] %vm442_vm2, %v6092_v26  ;;  %6631 = vrot.lane.b32.xlu0 %v16516_v14, %s12893_s21  ;;  %v6311_v36 = vcombine.low %v16501_v13, %v16516_v14  ;;  %v6312_v59 = vcombine.high %v16501_v13, %v16516_v14  ;;  %v16643_v26 = vcombine.high %v16585_v19, %v20337_v34 }
 0x71b   :  { %v16539_v57 = vrot.slane %v6311_v36, %v20785_v47  ;;  %v6326_v44 = vrot.slane %v6312_v59, %v20785_v47  ;;  %20798 = vst [vmem:[#allocation84_spill] sm:$0xff] %v16643_v26 }
 0x71c   :  { %v6096_v6 = vpop.permute.xlu1 %6095  ;;  %v16525_v27 = vld [vmem:[#allocation2 + $0xa8] sm:$0xff] }
 0x71d   :  { %v16527_v31 = vld [vmem:[#allocation2 + $0x8] sm:$0xff]  ;;  %6138 = vst.msk [vmem:[#allocation2 + $0x39] sm:$0xff] %vm442_vm2, %v6096_v6  ;;  %6635 = vrot.lane.b32.xlu0 %v16525_v27, %s12893_s21  ;;  %v6327_v28 = vcombine.low %v16510_v41, %v16525_v27  ;;  %v6328_v8 = vcombine.high %v16510_v41, %v16525_v27 }
 0x71e   :  { %6609 = vrot.lane.b32.xlu1 %v16527_v31, %s12893_s21  ;;  %v16820_v0 = vld [vmem:[#allocation2 + $0x2] sm:$0xff]  ;;  %v16962_v7 = vld [vmem:[#allocation2 + $0xa] sm:$0xff] }
 0x71f   :  { %v16543_v3 = vrot.slane %v6327_v28, %v20785_v47  ;;  %v6342_v38 = vrot.slane %v6328_v8, %v20785_v47 }
 0x720   :  { %v6100_v15 = vpop.permute.xlu1 %6099  ;;  %v16546_v32 = vld [vmem:[#allocation2 + $0x20] sm:$0xff] }
 0x721   :  { %v6344_v35 = vcombine.high %v16539_v57, %v16543_v3  ;;  %v6359_v46 = vcombine.low %v6326_v44, %v6342_v38  ;;  %v6360_v4 = vcombine.high %v6326_v44, %v6342_v38  ;;  %6140 = vst.msk [vmem:[#allocation2 + $0x51] sm:$0xff] %vm442_vm2, %v6100_v15  ;;  %7297 = vrot.lane.b32.xlu0 %v6159_v62, %s12894_s22  ;;  %v16834_v54 = vld [vmem:[#allocation2 + $0x1a] sm:$0xff] }
 0x722   :  { %6613 = vrot.lane.b32.xlu1 %v16546_v32, %s12893_s21 }
 0x723   :  { %v16560_v21 = vrot.slane %v6344_v35, %v13041_v29  ;;  %v16563_v2 = vrot.slane %v6359_v46, %v13041_v29  ;;  %v16568_v39 = vrot.slane %v6360_v4, %v13041_v29 }
 0x724   :  { %v6104_v23 = vpop.permute.xlu1 %6103  ;;  %v16565_v61 = vld [vmem:[#allocation2 + $0x38] sm:$0xff] }
 0x725   :  { %20787 = vst [vmem:[#allocation27_spill] sm:$0xff] %v16560_v21  ;;  %20788 = vst [vmem:[#allocation19_spill] sm:$0xff] %v16563_v2  ;;  %7301 = vrot.lane.b32.xlu0 %v16472_v48, %s12894_s22  ;;  %v6243_v50 = vcombine.low %v16527_v31, %v16565_v61  ;;  %v6244_v24 = vcombine.high %v16527_v31, %v16565_v61  ;;  %v16599_v10 = vcombine.high %v16560_v21, %v20337_v34  ;;  %v16840_v42 = vld [vmem:[#allocation2 + $0x32] sm:$0xff] }
 0x726   :  { %20789 = vst [vmem:[#allocation21_spill] sm:$0xff] %v16568_v39  ;;  %6142 = vst.msk [vmem:[#allocation2 + $0x69] sm:$0xff] %vm442_vm2, %v6104_v23  ;;  %6617 = vrot.lane.b32.xlu1 %v16565_v61, %s12893_s21  ;;  %v16626_v33 = vcombine.high %v16563_v2, %v20337_v34  ;;  %v16647_v36 = vcombine.high %v16568_v39, %v20337_v34 }
 0x727   :  { %20793 = vst [vmem:[#allocation74_spill] sm:$0xff] %v16599_v10  ;;  %v16613_v22 = vrot.slane %v6243_v50, %v20785_v47  ;;  %v6258_v1 = vrot.slane %v6244_v24, %v20785_v47 }
 0x728   :  { %v6108_v30 = vpop.permute.xlu1 %6107  ;;  %v16589_v60 = vld [vmem:[#allocation2 + $0x50] sm:$0xff]  ;;  %20797 = vst [vmem:[#allocation75_spill] sm:$0xff] %v16626_v33  ;;  %20799 = vst [vmem:[#allocation20_spill] sm:$0xff] %v16647_v36 }
 0x729   :  { %6144 = vst.msk [vmem:[#allocation2 + $0x81] sm:$0xff] %vm442_vm2, %v6108_v30  ;;  %7305 = vrot.lane.b32.xlu0 %v16477_v43, %s12894_s22  ;;  %v6259_v62 = vcombine.low %v16546_v32, %v16589_v60  ;;  %v6260_v45 = vcombine.high %v16546_v32, %v16589_v60  ;;  %20794 = vst [vmem:[#allocation80_spill] sm:$0xff] %v16613_v22 }
 0x72a   :  { %6621 = vrot.lane.b32.xlu1 %v16589_v60, %s12893_s21 }
 0x72b   :  { %v16617_v58 = vrot.slane %v6259_v62, %v20785_v47  ;;  %v6274_v43 = vrot.slane %v6260_v45, %v20785_v47 }
 0x72c   :  { %v6112_v12 = vpop.permute.xlu1 %6111 }
 0x72d   :  { %20795 = vst [vmem:[#allocation31_spill] sm:$0xff] %v16617_v58  ;;  %v6168_v52 = vld [vmem:[#allocation2 + $0x68] sm:$0xff]  ;;  %v6276_v9 = vcombine.high %v16613_v22, %v16617_v58  ;;  %v6291_v56 = vcombine.low %v6258_v1, %v6274_v43  ;;  %v6292_v11 = vcombine.high %v6258_v1, %v6274_v43  ;;  %6146 = vst.msk [vmem:[#allocation2 + $0x99] sm:$0xff] %vm442_vm2, %v6112_v12  ;;  %7309 = vrot.lane.b32.xlu0 %v16484_v53, %s12894_s22 }
 0x72e   :  { %6625 = vrot.lane.b32.xlu1 %v6168_v52, %s12893_s21  ;;  %v16692_v1 = vld [vmem:[#allocation2 + $0x1] sm:$0xff] }
 0x72f   :  { %v16675_v50 = vrot.slane %v6276_v9, %v13041_v29  ;;  %v16678_v24 = vrot.slane %v6291_v56, %v13041_v29  ;;  %v16687_v45 = vrot.slane %v6292_v11, %v13041_v29  ;;  %v16704_v9 = vld [vmem:[#allocation2 + $0x19] sm:$0xff]  ;;  %v16710_v56 = vld [vmem:[#allocation2 + $0x31] sm:$0xff] }
 0x730   :  { %v6116_v55 = vpop.permute.xlu1 %6115  ;;  %v6170_v5 = vld [vmem:[#allocation2 + $0x80] sm:$0xff] }
 0x731   :  { %6148 = vst.msk [vmem:[#allocation2 + $0xb1] sm:$0xff] %vm442_vm2, %v6116_v55  ;;  %7313 = vrot.lane.b32.xlu0 %v16501_v13, %s12894_s22  ;;  %20802 = vst [vmem:[#allocation85_spill] sm:$0xff] %v16687_v45  ;;  %v16718_v11 = vcombine.high %v16675_v50, %v20337_v34  ;;  %v16724_v55 = vld [vmem:[#allocation2 + $0x49] sm:$0xff] }
 0x732   :  { %6629 = vrot.lane.b32.xlu1 %v6170_v5, %s12893_s21 }
 0x733   :  { %20804 = vst [vmem:[#allocation81_spill] sm:$0xff] %v16718_v11 }
 0x734   :  { %v6172_v59 = vld [vmem:[#allocation2 + $0x98] sm:$0xff] }
 0x735   :  { %7317 = vrot.lane.b32.xlu0 %v16510_v41, %s12894_s22  ;;  %v6379_v6 = vcombine.low %v6168_v52, %v6172_v59  ;;  %v6380_v28 = vcombine.high %v6168_v52, %v6172_v59  ;;  %v16806_v53 = vld [vmem:[#allocation2 + $0x99] sm:$0xff] }
 0x736   :  { %6633 = vrot.lane.b32.xlu1 %v6172_v59, %s12893_s21  ;;  %v16910_v33 = vld [vmem:[#allocation2 + $0x92] sm:$0xff] }
 0x737   :  { %v16659_v38 = vrot.slane %v6379_v6, %v20785_v47  ;;  %v6394_v15 = vrot.slane %v6380_v28, %v20785_v47  ;;  %v16741_v28 = vcombine.high %v16687_v45, %v20337_v34 }
 0x738   :  { %v6174_v13 = vld [vmem:[#allocation2 + $0xb0] sm:$0xff] }
 0x739   :  { %7321 = vrot.lane.b32.xlu0 %v16516_v14, %s12894_s22  ;;  %v6395_v8 = vcombine.low %v6170_v5, %v6174_v13  ;;  %v6396_v44 = vcombine.high %v6170_v5, %v6174_v13  ;;  %20800 = vst [vmem:[#allocation13_spill] sm:$0xff] %v16659_v38  ;;  %20808 = vst [vmem:[#allocation89_spill] sm:$0xff] %v16741_v28  ;;  %v16812_v46 = vld [vmem:[#allocation2 + $0xb1] sm:$0xff] }
 0x73a   :  { %6637 = vrot.lane.b32.xlu1 %v6174_v13, %s12893_s21 }
 0x73b   :  { %v16663_v35 = vrot.slane %v6395_v8, %v20785_v47  ;;  %v6410_v41 = vrot.slane %v6396_v44, %v20785_v47  ;;  %v16747_v44 = vld [vmem:[#allocation2 + $0x61] sm:$0xff] }
 0x73d   :  { %20801 = vst [vmem:[#allocation82_spill] sm:$0xff] %v16663_v35  ;;  %v6412_v14 = vcombine.high %v16659_v38, %v16663_v35  ;;  %v6427_v4 = vcombine.low %v6394_v15, %v6410_v41  ;;  %v6428_v23 = vcombine.high %v6394_v15, %v6410_v41  ;;  %7325 = vrot.lane.b32.xlu0 %v16525_v27, %s12894_s22  ;;  %v16756_v41 = vld [vmem:[#allocation2 + $0x79] sm:$0xff]  ;;  %v16794_v15 = vld [vmem:[#allocation2 + $0x69] sm:$0xff] }
 0x73e   :  { %7299 = vrot.lane.b32.xlu1 %v16527_v31, %s12894_s22 }
 0x73f   :  { %v16681_v30 = vrot.slane %v6412_v14, %v13041_v29  ;;  %v16684_v62 = vrot.slane %v6427_v4, %v13041_v29  ;;  %v16690_v27 = vrot.slane %v6428_v23, %v13041_v29  ;;  %v16761_v14 = vld [vmem:[#allocation2 + $0x91] sm:$0xff]  ;;  %v16766_v4 = vld [vmem:[#allocation2 + $0xa9] sm:$0xff] }
 0x740   :  { %v16788_v23 = vld [vmem:[#allocation2 + $0x51] sm:$0xff]  ;;  %v8030_v58 = vcombine.low %v16756_v41, %v16766_v4 }
 0x741   :  { %20803 = vst [vmem:[#allocation76_spill] sm:$0xff] %v16690_v27  ;;  %8427 = vrot.lane.b32.xlu0 %v16692_v1, %s12893_s21  ;;  %v16737_v6 = vcombine.high %v16684_v62, %v20337_v34  ;;  %v16745_v8 = vcombine.high %v16690_v27, %v20337_v34 }
 0x742   :  { %7303 = vrot.lane.b32.xlu1 %v16546_v32, %s12894_s22  ;;  %v16722_v32 = vcombine.high %v16681_v30, %v20337_v34 }
 0x743   :  { %20807 = vst [vmem:[#allocation86_spill] sm:$0xff] %v16737_v6  ;;  %20809 = vst [vmem:[#allocation48_spill] sm:$0xff] %v16745_v8  ;;  %v16846_v8 = vld [vmem:[#allocation2 + $0x4a] sm:$0xff] }
 0x744   :  { %20805 = vst [vmem:[#allocation88_spill] sm:$0xff] %v16722_v32 }
 0x745   :  { %8431 = vrot.lane.b32.xlu0 %v16704_v9, %s12893_s21 }
 0x746   :  { %7307 = vrot.lane.b32.xlu1 %v16565_v61, %s12894_s22 }
 0x749   :  { %8435 = vrot.lane.b32.xlu0 %v16710_v56, %s12893_s21 }
 0x74a   :  { %7311 = vrot.lane.b32.xlu1 %v16589_v60, %s12894_s22  ;;  %v16733_v60 = vcombine.high %v16678_v24, %v20337_v34 }
 0x74c   :  { %20806 = vst [vmem:[#allocation90_spill] sm:$0xff] %v16733_v60 }
 0x74d   :  { %8439 = vrot.lane.b32.xlu0 %v16724_v55, %s12893_s21 }
 0x74e   :  { %7315 = vrot.lane.b32.xlu1 %v6168_v52, %s12894_s22  ;;  %v16800_v52 = vld [vmem:[#allocation2 + $0x81] sm:$0xff] }
 0x74f   :  { %20810 = vst [vmem:[#allocation45_spill] sm:$0xff] %v16800_v52 }
 0x751   :  { %8443 = vrot.lane.b32.xlu0 %v16747_v44, %s12893_s21 }
 0x752   :  { %7319 = vrot.lane.b32.xlu1 %v6170_v5, %s12894_s22  ;;  %v16770_v5 = vld [vmem:[#allocation2 + $0x9] sm:$0xff] }
 0x755   :  { %8447 = vrot.lane.b32.xlu0 %v16756_v41, %s12893_s21 }
 0x756   :  { %7323 = vrot.lane.b32.xlu1 %v6172_v59, %s12894_s22  ;;  %v16776_v59 = vld [vmem:[#allocation2 + $0x21] sm:$0xff] }
 0x759   :  { %8451 = vrot.lane.b32.xlu0 %v16761_v14, %s12893_s21 }
 0x75a   :  { %7327 = vrot.lane.b32.xlu1 %v6174_v13, %s12894_s22  ;;  %v16782_v13 = vld [vmem:[#allocation2 + $0x39] sm:$0xff] }
 0x75d   :  { %8455 = vrot.lane.b32.xlu0 %v16766_v4, %s12893_s21 }
 0x75e   :  { %8429 = vrot.lane.b32.xlu1 %v16770_v5, %s12893_s21 }
 0x761   :  { %9024 = vrot.lane.b32.xlu0 %v16692_v1, %s12894_s22 }
 0x762   :  { %8433 = vrot.lane.b32.xlu1 %v16776_v59, %s12893_s21 }
 0x765   :  { %9028 = vrot.lane.b32.xlu0 %v16704_v9, %s12894_s22 }
 0x766   :  { %8437 = vrot.lane.b32.xlu1 %v16782_v13, %s12893_s21 }
 0x769   :  { %9032 = vrot.lane.b32.xlu0 %v16710_v56, %s12894_s22 }
 0x76a   :  { %8441 = vrot.lane.b32.xlu1 %v16788_v23, %s12893_s21 }
 0x76d   :  { %9036 = vrot.lane.b32.xlu0 %v16724_v55, %s12894_s22 }
 0x76e   :  { %8445 = vrot.lane.b32.xlu1 %v16794_v15, %s12893_s21 }
 0x771   :  { %9040 = vrot.lane.b32.xlu0 %v16747_v44, %s12894_s22 }
 0x772   :  { %8449 = vrot.lane.b32.xlu1 %v16800_v52, %s12893_s21 }
 0x773   :  { %v6608_v61 = vpop.permute.xlu0 %6607 }
 0x775   :  { %9044 = vrot.lane.b32.xlu0 %v16756_v41, %s12894_s22 }
 0x776   :  { %8453 = vrot.lane.b32.xlu1 %v16806_v53, %s12893_s21 }
 0x777   :  { %v6612_v17 = vpop.permute.xlu0 %6611 }
 0x779   :  { %9048 = vrot.lane.b32.xlu0 %v16761_v14, %s12894_s22 }
 0x77a   :  { %8457 = vrot.lane.b32.xlu1 %v16812_v46, %s12893_s21 }
 0x77b   :  { %v6616_v37 = vpop.permute.xlu0 %6615 }
 0x77c   :  { %v6655_v48 = vcombine.low %v6608_v61, %v6616_v37  ;;  %v6656_v28 = vcombine.high %v6608_v61, %v6616_v37  ;;  %v16856_v61 = vld [vmem:[#allocation2 + $0x62] sm:$0xff] }
 0x77d   :  { %9052 = vrot.lane.b32.xlu0 %v16766_v4, %s12894_s22 }
 0x77e   :  { %9026 = vrot.lane.b32.xlu1 %v16770_v5, %s12894_s22  ;;  %v16825_v12 = vrot.slane %v6655_v48, %v20785_v47 }
 0x77f   :  { %v6620_v51 = vpop.permute.xlu0 %6619 }
 0x780   :  { %v6671_v20 = vcombine.low %v6612_v17, %v6620_v51  ;;  %20811 = vst [vmem:[#allocation8_spill] sm:$0xff] %v16825_v12 }
 0x781   :  { %10154 = vrot.lane.b32.xlu0 %v16820_v0, %s12893_s21 }
 0x782   :  { %v16828_v43 = vrot.slane %v6671_v20, %v20785_v47  ;;  %9030 = vrot.lane.b32.xlu1 %v16776_v59, %s12894_s22  ;;  %v6672_v20 = vcombine.high %v6612_v17, %v6620_v51  ;;  %v6670_v51 = vrot.slane %v6656_v28, %v20785_v47 }
 0x783   :  { %v6624_v31 = vpop.permute.xlu0 %6623 }
 0x784   :  { %20812 = vst [vmem:[#allocation11_spill] sm:$0xff] %v16828_v43  ;;  %v6686_v60 = vrot.slane %v6672_v20, %v20785_v47  ;;  %v6688_v20 = vcombine.high %v16825_v12, %v16828_v43 }
 0x785   :  { %10158 = vrot.lane.b32.xlu0 %v16834_v54, %s12893_s21 }
 0x786   :  { %9034 = vrot.lane.b32.xlu1 %v16782_v13, %s12894_s22  ;;  %v6703_v36 = vcombine.low %v6670_v51, %v6686_v60  ;;  %v6704_v40 = vcombine.high %v6670_v51, %v6686_v60 }
 0x787   :  { %v6628_v48 = vpop.permute.xlu0 %6627 }
 0x789   :  { %10162 = vrot.lane.b32.xlu0 %v16840_v42, %s12893_s21 }
 0x78a   :  { %9038 = vrot.lane.b32.xlu1 %v16788_v23, %s12894_s22 }
 0x78b   :  { %v6632_v25 = vpop.permute.xlu0 %6631 }
 0x78c   :  { %v6791_v6 = vcombine.low %v6624_v31, %v6632_v25  ;;  %v6792_v11 = vcombine.high %v6624_v31, %v6632_v25 }
 0x78d   :  { %10166 = vrot.lane.b32.xlu0 %v16846_v8, %s12893_s21 }
 0x78e   :  { %9042 = vrot.lane.b32.xlu1 %v16794_v15, %s12894_s22  ;;  %v16863_v25 = vrot.slane %v6791_v6, %v20785_v47  ;;  %v6806_v31 = vrot.slane %v6792_v11, %v20785_v47  ;;  %v16880_v11 = vld [vmem:[#allocation2 + $0x7a] sm:$0xff] }
 0x78f   :  { %v6636_v17 = vpop.permute.xlu0 %6635 }
 0x790   :  { %v16854_v32 = vpop.permute.xlu1 %6609  ;;  %v6807_v26 = vcombine.low %v6628_v48, %v6636_v17  ;;  %v6808_v37 = vcombine.high %v6628_v48, %v6636_v17  ;;  %20813 = vst [vmem:[#allocation100_spill] sm:$0xff] %v16863_v25 }
 0x791   :  { %10170 = vrot.lane.b32.xlu0 %v16856_v61, %s12893_s21 }
 0x792   :  { %v16867_v28 = vrot.slane %v6807_v26, %v20785_v47  ;;  %v6822_v48 = vrot.slane %v6808_v37, %v20785_v47  ;;  %9046 = vrot.lane.b32.xlu1 %v16800_v52, %s12894_s22  ;;  %v16885_v26 = vrot.slane %v6688_v20, %v13041_v29  ;;  %v16888_v37 = vrot.slane %v6703_v36, %v13041_v29 }
 0x793   :  { %v16872_v17 = vpop.permute.xlu0 %7297  ;;  %v7894_v36 = vcombine.low %v16704_v9, %v16724_v55 }
 0x794   :  { %20814 = vst [vmem:[#allocation22_spill] sm:$0xff] %v16867_v28  ;;  %v6824_v51 = vcombine.high %v16863_v25, %v16867_v28  ;;  %v6839_v6 = vcombine.low %v6806_v31, %v6822_v48  ;;  %v6840_v43 = vcombine.high %v6806_v31, %v6822_v48  ;;  %v16878_v12 = vpop.permute.xlu1 %6613  ;;  %20815 = vst [vmem:[#allocation12_spill] sm:$0xff] %v16885_v26 }
 0x795   :  { %10174 = vrot.lane.b32.xlu0 %v16880_v11, %s12893_s21  ;;  %20816 = vst [vmem:[#allocation52_spill] sm:$0xff] %v16888_v37  ;;  %v16899_v48 = vrot.slane %v6704_v40, %v13041_v29  ;;  %v16920_v40 = vcombine.high %v16885_v26, %v20337_v34  ;;  %v16928_v35 = vcombine.high %v16888_v37, %v20337_v34 }
 0x796   :  { %9050 = vrot.lane.b32.xlu1 %v16806_v53, %s12894_s22  ;;  %v16893_v60 = vrot.slane %v6824_v51, %v13041_v29  ;;  %v16896_v31 = vrot.slane %v6839_v6, %v13041_v29  ;;  %v16902_v28 = vrot.slane %v6840_v43, %v13041_v29  ;;  %v7878_v51 = vcombine.low %v16692_v1, %v16710_v56 }
 0x797   :  { %20819 = vst [vmem:[#allocation51_spill] sm:$0xff] %v16899_v48  ;;  %v16904_v20 = vpop.permute.xlu0 %7301  ;;  %v7895_v6 = vcombine.high %v16704_v9, %v16724_v55  ;;  %20821 = vst [vmem:[#allocation7_spill] sm:$0xff] %v16920_v40  ;;  %v7879_v9 = vcombine.high %v16692_v1, %v16710_v56  ;;  %v16940_v55 = vcombine.high %v16899_v48, %v20337_v34  ;;  %v16955_v48 = vld [vmem:[#allocation2 + $0xaa] sm:$0xff] }
 0x798   :  { %20817 = vst [vmem:[#allocation28_spill] sm:$0xff] %v16893_v60  ;;  %20818 = vst [vmem:[#allocation36_spill] sm:$0xff] %v16896_v31  ;;  %v16908_v25 = vpop.permute.xlu1 %6617  ;;  %v16924_v43 = vcombine.high %v16893_v60, %v20337_v34  ;;  %v16932_v38 = vcombine.high %v16896_v31, %v20337_v34  ;;  %v16944_v60 = vcombine.high %v16902_v28, %v20337_v34 }
 0x799   :  { %20820 = vst [vmem:[#allocation10_spill] sm:$0xff] %v16902_v28  ;;  %10178 = vrot.lane.b32.xlu0 %v16910_v33, %s12893_s21  ;;  %20823 = vst [vmem:[#allocation91_spill] sm:$0xff] %v16928_v35  ;;  %v6723_v37 = vcombine.low %v16854_v32, %v16908_v25  ;;  %v7902_v31 = vrot.slane %v7894_v36, %v20785_v47  ;;  %v7886_v36 = vrot.slane %v7878_v51, %v20785_v47 }
 0x79a   :  { %20822 = vst [vmem:[#allocation39_spill] sm:$0xff] %v16924_v43  ;;  %20824 = vst [vmem:[#allocation94_spill] sm:$0xff] %v16932_v38  ;;  %9054 = vrot.lane.b32.xlu1 %v16812_v46, %s12894_s22  ;;  %v7909_v1 = vrot.slane %v7895_v6, %v20785_v47  ;;  %v7893_v28 = vrot.slane %v7879_v9, %v20785_v47  ;;  %v8014_v9 = vcombine.low %v16747_v44, %v16761_v14 }
 0x79b   :  { %20825 = vst [vmem:[#allocation32_spill] sm:$0xff] %v16940_v55  ;;  %20826 = vst [vmem:[#allocation43_spill] sm:$0xff] %v16944_v60  ;;  %v16948_v26 = vpop.permute.xlu0 %7305  ;;  %v8031_v55 = vcombine.high %v16756_v41, %v16766_v4  ;;  %v16976_v60 = vrot.slane %v6723_v37, %v20785_v47  ;;  %v7911_v6 = vcombine.high %v7886_v36, %v7902_v31 }
 0x79c   :  { %v6622_v56 = vpop.permute.xlu1 %6621  ;;  %v7345_v35 = vcombine.low %v16872_v17, %v16948_v26  ;;  %v7910_v40 = vcombine.low %v7886_v36, %v7902_v31  ;;  %v8015_v41 = vcombine.high %v16747_v44, %v16761_v14  ;;  %v16998_v37 = vrot.slane %v8030_v58, %v20785_v47 }
 0x79d   :  { %v6739_v22 = vcombine.low %v16878_v12, %v6622_v56  ;;  %10182 = vrot.lane.b32.xlu0 %v16955_v48, %s12893_s21  ;;  %20827 = vst [vmem:[#allocation49_spill] sm:$0xff] %v16976_v60  ;;  %v7926_v31 = vcombine.low %v7893_v28, %v7909_v1  ;;  %v7927_v36 = vcombine.high %v7893_v28, %v7909_v1 }
 0x79e   :  { %10156 = vrot.lane.b32.xlu1 %v16962_v7, %s12893_s21  ;;  %v17001_v19 = vrot.slane %v7345_v35, %v20785_v47  ;;  %v6740_v39 = vcombine.high %v16878_v12, %v6622_v56  ;;  %v17010_v14 = vrot.slane %v8031_v55, %v20785_v47  ;;  %v17015_v58 = vrot.slane %v7911_v6, %v13041_v29 }
 0x79f   :  { %v16979_v51 = vrot.slane %v6739_v22, %v20785_v47  ;;  %v16981_v38 = vpop.permute.xlu0 %7309  ;;  %v16995_v22 = vld [vmem:[#allocation2 + $0x22] sm:$0xff]  ;;  %v20831_v35 = vcombine.low %v16494_v63, %v16498_v16  ;;  %v17024_v12 = vrot.slane %v7910_v40, %v13041_v29  ;;  %v17031_v56 = vrot.slane %v8014_v9, %v20785_v47  ;;  %v17038_v63 = vld [vmem:[#allocation2 + $0x3a] sm:$0xff] }
 0x7a0   :  { %v7361_v43 = vcombine.low %v16904_v20, %v16981_v38  ;;  %v16985_v10 = vpop.permute.xlu1 %6625  ;;  %20829 = vst [vmem:[#allocation95_spill] sm:$0xff] %v17001_v19  ;;  %v17034_v6 = vrot.slane %v8015_v41, %v20785_v47  ;;  %v17041_v16 = vrot.slane %v7926_v31, %v13041_v29  ;;  %v17053_v9 = vrot.slane %v7927_v36, %v13041_v29 }
 0x7a1   :  { %20828 = vst [vmem:[#allocation101_spill] sm:$0xff] %v16979_v51  ;;  %10751 = vrot.lane.b32.xlu0 %v16820_v0, %s12894_s22  ;;  %v17021_v28 = vrot.slane %v20831_v35, %v13041_v29  ;;  %20833 = vst [vmem:[#allocation34_spill] sm:$0xff] %v17024_v12  ;;  %v9605_v31 = vcombine.low %v16820_v0, %v16840_v42  ;;  %v17065_v55 = vcombine.high %v17024_v12, %v20337_v34  ;;  %v17080_v12 = vld [vmem:[#allocation2 + $0x52] sm:$0xff] }
 0x7a2   :  { %v17005_v44 = vrot.slane %v7361_v43, %v20785_v47  ;;  %10160 = vrot.lane.b32.xlu1 %v16995_v22, %s12893_s21  ;;  %v6724_v43 = vcombine.high %v16854_v32, %v16908_v25  ;;  %v17044_v32 = vrot.slane %v6740_v39, %v20785_v47  ;;  %v8047_v25 = vcombine.high %v17031_v56, %v16998_v37 }
 0x7a3   :  { %v17012_v4 = vpop.permute.xlu0 %7313  ;;  %20832 = vst [vmem:[#allocation26_spill] sm:$0xff] %v17021_v28  ;;  %v8062_v40 = vcombine.low %v17034_v6, %v17010_v14  ;;  %v9606_v39 = vcombine.high %v16820_v0, %v16840_v42  ;;  %v17061_v35 = vcombine.high %v17021_v28, %v20337_v34  ;;  %20834 = vst [vmem:[#allocation25_spill] sm:$0xff] %v17065_v55 }
 0x7a4   :  { %20830 = vst [vmem:[#allocation96_spill] sm:$0xff] %v17005_v44  ;;  %v6630_v1 = vpop.permute.xlu1 %6629  ;;  %v6738_v49 = vrot.slane %v6724_v43, %v20785_v47  ;;  %v7346_v36 = vcombine.high %v16872_v17, %v16948_v26  ;;  %v7362_v2 = vcombine.high %v16904_v20, %v16981_v38  ;;  %v17074_v0 = vcombine.high %v17015_v58, %v20337_v34 }
 0x7a5   :  { %10755 = vrot.lane.b32.xlu0 %v16834_v54, %s12894_s22  ;;  %v6756_v28 = vcombine.high %v16976_v60, %v16979_v51  ;;  %v17088_v38 = vcombine.high %v17041_v16, %v20337_v34  ;;  %v17094_v20 = vrot.slane %v8047_v25, %v13041_v29  ;;  %v20837_v43 = vcombine.low %v16539_v57, %v16543_v3 }
 0x7a6   :  { %10164 = vrot.lane.b32.xlu1 %v17038_v63, %s12893_s21  ;;  %20835 = vst [vmem:[#allocation78_spill] sm:$0xff] %v17074_v0  ;;  %v6771_v26 = vcombine.low %v6738_v49, %v17044_v32  ;;  %v17108_v0 = vrot.slane %v9605_v31, %v20785_v47  ;;  %v17111_v25 = vrot.slane %v9606_v39, %v20785_v47  ;;  %v17122_v31 = vld [vmem:[#allocation2 + $0x6a] sm:$0xff] }
 0x7a7   :  { %v7318_v41 = vpop.permute.xlu0 %7317  ;;  %20836 = vst [vmem:[#allocation102_spill] sm:$0xff] %v17088_v38  ;;  %v17103_v17 = vrot.slane %v20837_v43, %v13041_v29  ;;  %v7376_v21 = vrot.slane %v7362_v2, %v20785_v47  ;;  %v9621_v57 = vcombine.low %v16834_v54, %v16846_v8  ;;  %v9622_v3 = vcombine.high %v16834_v54, %v16846_v8 }
 0x7a8   :  { %v6634_v18 = vpop.permute.xlu1 %6633  ;;  %20839 = vst [vmem:[#allocation46_spill] sm:$0xff] %v17122_v31  ;;  %v17125_v39 = vrot.slane %v6756_v28, %v13041_v29  ;;  %v7378_v2 = vcombine.high %v17001_v19, %v17005_v44  ;;  %v17134_v54 = vrot.slane %v6771_v26, %v13041_v29 }
 0x7a9   :  { %10759 = vrot.lane.b32.xlu0 %v16840_v42, %s12894_s22  ;;  %v17097_v42 = vrot.slane %v8062_v40, %v13041_v29  ;;  %20838 = vst [vmem:[#allocation97_spill] sm:$0xff] %v17103_v17  ;;  %v6859_v51 = vcombine.low %v16985_v10, %v6634_v18  ;;  %v6860_v60 = vcombine.high %v16985_v10, %v6634_v18 }
 0x7aa   :  { %10168 = vrot.lane.b32.xlu1 %v17080_v12, %s12893_s21  ;;  %v7360_v40 = vrot.slane %v7346_v36, %v20785_v47  ;;  %v6772_v18 = vcombine.high %v6738_v49, %v17044_v32  ;;  %20840 = vst [vmem:[#allocation98_spill] sm:$0xff] %v17125_v39  ;;  %20841 = vst [vmem:[#allocation23_spill] sm:$0xff] %v17134_v54 }
 0x7ab   :  { %v7322_v38 = vpop.permute.xlu0 %7321  ;;  %v17137_v49 = vrot.slane %v6859_v51, %v20785_v47 }
 0x7ac   :  { %v6638_v55 = vpop.permute.xlu1 %6637  ;;  %v7481_v36 = vcombine.low %v17012_v4, %v7322_v38  ;;  %v7482_v45 = vcombine.high %v17012_v4, %v7322_v38  ;;  %v7393_v32 = vcombine.low %v7360_v40, %v7376_v21  ;;  %v7394_v44 = vcombine.high %v7360_v40, %v7376_v21 }
 0x7ad   :  { %v6875_v10 = vcombine.low %v6630_v1, %v6638_v55  ;;  %v6876_v43 = vcombine.high %v6630_v1, %v6638_v55  ;;  %10763 = vrot.lane.b32.xlu0 %v16846_v8, %s12894_s22  ;;  %20842 = vst [vmem:[#allocation38_spill] sm:$0xff] %v17137_v49  ;;  %v6874_v8 = vrot.slane %v6860_v60, %v20785_v47 }
 0x7ae   :  { %10172 = vrot.lane.b32.xlu1 %v17122_v31, %s12893_s21  ;;  %v7496_v21 = vrot.slane %v7482_v45, %v20785_v47 }
 0x7af   :  { %v17141_v28 = vrot.slane %v6875_v10, %v20785_v47  ;;  %v6890_v55 = vrot.slane %v6876_v43, %v20785_v47  ;;  %v7326_v1 = vpop.permute.xlu0 %7325  ;;  %v17152_v10 = vld [vmem:[#allocation2 + $0x82] sm:$0xff]  ;;  %v17155_v43 = vrot.slane %v7481_v36, %v20785_v47  ;;  %v17173_v36 = vrot.slane %v6772_v18, %v13041_v29 }
 0x7b0   :  { %v7497_v4 = vcombine.low %v7318_v41, %v7326_v1  ;;  %v7498_v38 = vcombine.high %v7318_v41, %v7326_v1  ;;  %v17144_v19 = vpop.permute.xlu1 %7299  ;;  %20844 = vst [vmem:[#allocation93_spill] sm:$0xff] %v17152_v10  ;;  %v7946_v18 = vcombine.low %v16770_v5, %v16782_v13 }
 0x7b1   :  { %20843 = vst [vmem:[#allocation53_spill] sm:$0xff] %v17141_v28  ;;  %v6892_v51 = vcombine.high %v17137_v49, %v17141_v28  ;;  %v6907_v31 = vcombine.low %v6874_v8, %v6890_v55  ;;  %v6908_v60 = vcombine.high %v6874_v8, %v6890_v55  ;;  %10767 = vrot.lane.b32.xlu0 %v16856_v61, %s12894_s22  ;;  %20845 = vst [vmem:[#allocation42_spill] sm:$0xff] %v17155_v43 }
 0x7b2   :  { %v17159_v41 = vrot.slane %v7497_v4, %v20785_v47  ;;  %v7512_v40 = vrot.slane %v7498_v38, %v20785_v47  ;;  %10176 = vrot.lane.b32.xlu1 %v17152_v10, %s12893_s21  ;;  %20849 = vst [vmem:[#allocation59_spill] sm:$0xff] %v17173_v36  ;;  %v17196_v4 = vrot.slane %v7393_v32, %v13041_v29 }
 0x7b3   :  { %v17164_v1 = vpop.permute.xlu0 %8427  ;;  %v17167_v8 = vrot.slane %v6892_v51, %v13041_v29  ;;  %v17170_v55 = vrot.slane %v6907_v31, %v13041_v29  ;;  %v17176_v45 = vrot.slane %v6908_v60, %v13041_v29  ;;  %v17186_v31 = vld [vmem:[#allocation2 + $0x9a] sm:$0xff]  ;;  %v7962_v51 = vcombine.low %v16776_v59, %v16788_v23 }
 0x7b4   :  { %20846 = vst [vmem:[#allocation29_spill] sm:$0xff] %v17159_v41  ;;  %v7514_v38 = vcombine.high %v17155_v43, %v17159_v41  ;;  %v7529_v26 = vcombine.low %v7496_v21, %v7512_v40  ;;  %v7530_v28 = vcombine.high %v7496_v21, %v7512_v40  ;;  %v17182_v49 = vpop.permute.xlu1 %7303  ;;  %20851 = vst [vmem:[#allocation47_spill] sm:$0xff] %v17186_v31 }
 0x7b5   :  { %20847 = vst [vmem:[#allocation68_spill] sm:$0xff] %v17167_v8  ;;  %20848 = vst [vmem:[#allocation60_spill] sm:$0xff] %v17170_v55  ;;  %10771 = vrot.lane.b32.xlu0 %v16880_v11, %s12894_s22  ;;  %v17193_v60 = vrot.slane %v7378_v2, %v13041_v29  ;;  %v17207_v41 = vrot.slane %v7394_v44, %v13041_v29  ;;  %v17215_v32 = vrot.slane %v9621_v57, %v20785_v47 }
 0x7b6   :  { %20850 = vst [vmem:[#allocation99_spill] sm:$0xff] %v17176_v45  ;;  %20853 = vst [vmem:[#allocation64_spill] sm:$0xff] %v17196_v4  ;;  %10180 = vrot.lane.b32.xlu1 %v17186_v31, %s12893_s21  ;;  %v17201_v21 = vrot.slane %v7514_v38, %v13041_v29  ;;  %v17204_v40 = vrot.slane %v7529_v26, %v13041_v29  ;;  %v17210_v43 = vrot.slane %v7530_v28, %v13041_v29 }
 0x7b7   :  { %20852 = vst [vmem:[#allocation14_spill] sm:$0xff] %v17193_v60  ;;  %20856 = vst [vmem:[#allocation40_spill] sm:$0xff] %v17207_v41  ;;  %v17212_v2 = vpop.permute.xlu0 %8431  ;;  %v9636_v10 = vrot.slane %v9622_v3, %v20785_v47  ;;  %v17220_v38 = vcombine.high %v17167_v8, %v20337_v34  ;;  %v17224_v26 = vcombine.high %v17170_v55, %v20337_v34  ;;  %v17246_v55 = vld [vmem:[#allocation2 + $0xb2] sm:$0xff] }
 0x7b8   :  { %20854 = vst [vmem:[#allocation55_spill] sm:$0xff] %v17201_v21  ;;  %20855 = vst [vmem:[#allocation41_spill] sm:$0xff] %v17204_v40  ;;  %v17226_v44 = vpop.permute.xlu1 %7307  ;;  %v17230_v28 = vcombine.high %v17125_v39, %v20337_v34  ;;  %v17234_v57 = vcombine.high %v17134_v54, %v20337_v34  ;;  %v17238_v3 = vcombine.high %v17173_v36, %v20337_v34 }
 0x7b9   :  { %20857 = vst [vmem:[#allocation67_spill] sm:$0xff] %v17210_v43  ;;  %20858 = vst [vmem:[#allocation87_spill] sm:$0xff] %v17220_v38  ;;  %v17242_v8 = vcombine.high %v17176_v45, %v20337_v34  ;;  %10775 = vrot.lane.b32.xlu0 %v16910_v33, %s12894_s22  ;;  %v17250_v39 = vcombine.high %v17193_v60, %v20337_v34  ;;  %v17254_v54 = vcombine.high %v17201_v21, %v20337_v34 }
 0x7ba   :  { %20859 = vst [vmem:[#allocation71_spill] sm:$0xff] %v17224_v26  ;;  %20860 = vst [vmem:[#allocation65_spill] sm:$0xff] %v17230_v28  ;;  %v17258_v36 = vcombine.high %v17196_v4, %v20337_v34  ;;  %v17262_v45 = vcombine.high %v17204_v40, %v20337_v34  ;;  %10184 = vrot.lane.b32.xlu1 %v17246_v55, %s12893_s21  ;;  %v17268_v31 = vcombine.high %v17207_v41, %v20337_v34 }
 0x7bb   :  { %20861 = vst [vmem:[#allocation77_spill] sm:$0xff] %v17234_v57  ;;  %20862 = vst [vmem:[#allocation63_spill] sm:$0xff] %v17238_v3  ;;  %v17272_v60 = vcombine.high %v17210_v43, %v20337_v34  ;;  %v7413_v40 = vcombine.low %v17144_v19, %v17226_v44  ;;  %v17280_v27 = vpop.permute.xlu0 %8435  ;;  %v20871_v21 = vcombine.high %v17034_v6, %v17010_v14 }
 0x7bc   :  { %20863 = vst [vmem:[#allocation62_spill] sm:$0xff] %v17242_v8  ;;  %20864 = vst [vmem:[#allocation50_spill] sm:$0xff] %v17246_v55  ;;  %v17283_v55 = vrot.slane %v7962_v51, %v20785_v47  ;;  %v7312_v52 = vpop.permute.xlu1 %7311  ;;  %v17297_v57 = vcombine.high %v17103_v17, %v20337_v34  ;;  %v9638_v14 = vcombine.high %v17108_v0, %v17215_v32 }
 0x7bd   :  { %20865 = vst [vmem:[#allocation9_spill] sm:$0xff] %v17250_v39  ;;  %20866 = vst [vmem:[#allocation58_spill] sm:$0xff] %v17254_v54  ;;  %v17293_v4 = vrot.slane %v20871_v21, %v13041_v29  ;;  %v7429_v26 = vcombine.low %v17182_v49, %v7312_v52  ;;  %10779 = vrot.lane.b32.xlu0 %v16955_v48, %s12894_s22  ;;  %v9653_v6 = vcombine.low %v17111_v25, %v9636_v10 }
 0x7be   :  { %20867 = vst [vmem:[#allocation33_spill] sm:$0xff] %v17258_v36  ;;  %20868 = vst [vmem:[#allocation66_spill] sm:$0xff] %v17262_v45  ;;  %v17310_v21 = vrot.slane %v7946_v18, %v20785_v47  ;;  %v8475_v43 = vcombine.low %v17164_v1, %v17280_v27  ;;  %10753 = vrot.lane.b32.xlu1 %v16962_v7, %s12894_s22  ;;  %v20872_v17 = vcombine.low %v17031_v56, %v16998_v37 }
 0x7bf   :  { %20869 = vst [vmem:[#allocation16_spill] sm:$0xff] %v17268_v31  ;;  %20870 = vst [vmem:[#allocation17_spill] sm:$0xff] %v17272_v60  ;;  %v17327_v18 = vrot.slane %v7413_v40, %v20785_v47  ;;  %v17330_v8 = vrot.slane %v7429_v26, %v20785_v47  ;;  %v17332_v28 = vpop.permute.xlu0 %8439  ;;  %v9654_v38 = vcombine.high %v17111_v25, %v9636_v10 }
 0x7c0   :  { %v17324_v3 = vrot.slane %v20872_v17, %v13041_v29  ;;  %v7979_v41 = vcombine.high %v17310_v21, %v17283_v55  ;;  %v8491_v51 = vcombine.low %v17212_v2, %v17332_v28  ;;  %v17339_v31 = vpop.permute.xlu1 %7315  ;;  %v9757_v56 = vcombine.low %v16880_v11, %v16955_v48 }
 0x7c1   :  { %20874 = vst [vmem:[#allocation61_spill] sm:$0xff] %v17327_v18  ;;  %20875 = vst [vmem:[#allocation57_spill] sm:$0xff] %v17330_v8  ;;  %v7947_v17 = vcombine.high %v16770_v5, %v16782_v13  ;;  %v20876_v10 = vpack.i.bf16 %v16681_v30, %v16675_v50  ;;  %v17354_v40 = vrot.slane %v9638_v14, %v13041_v29 }
 0x7c2   :  { %20873 = vst [vmem:[#allocation24_spill] sm:$0xff] %v17324_v3  ;;  %v17357_v26 = vrot.slane %v9653_v6, %v13041_v29  ;;  %v17362_v60 = vrot.slane %v8475_v43, %v20785_v47  ;;  %v7430_v5 = vcombine.high %v17182_v49, %v7312_v52  ;;  %v17366_v13 = vrot.slane %v8491_v51, %v20785_v47 }
 0x7c3   :  { %12161 = vrot.lane.b32.xlu0 %v20876_v10, %s12886_s15  ;;  %10757 = vrot.lane.b32.xlu1 %v16995_v22, %s12894_s22  ;;  %v9741_v50 = vcombine.low %v16856_v61, %v16910_v33  ;;  %v17372_v30 = vpop.permute.xlu0 %8443  ;;  %v9758_v14 = vcombine.high %v16880_v11, %v16955_v48  ;;  %v17377_v6 = vrot.slane %v9654_v38, %v13041_v29 }
 0x7c4   :  { %20877 = vst [vmem:[#allocation70_spill] sm:$0xff] %v17357_v26  ;;  %20878 = vst [vmem:[#allocation73_spill] sm:$0xff] %v17362_v60  ;;  %v17380_v43 = vrot.slane %v7979_v41, %v13041_v29  ;;  %v7963_v52 = vcombine.high %v16776_v59, %v16788_v23  ;;  %v7414_v49 = vcombine.high %v17144_v19, %v17226_v44  ;;  %v7320_v10 = vpop.permute.xlu1 %7319 }
 0x7c5   :  { %20879 = vst [vmem:[#allocation92_spill] sm:$0xff] %v17366_v13  ;;  %20880 = vst [vmem:[#allocation15_spill] sm:$0xff] %v17377_v6  ;;  %v17389_v25 = vrot.slane %v9757_v56, %v20785_v47  ;;  %v17392_v11 = vrot.slane %v7947_v17, %v20785_v47  ;;  %v20881_v48 = vpack.i.bf16 %v16684_v62, %v16678_v24  ;;  %v20882_v56 = vld [vmem:[#allocation45_spill] sm:$0xff] }
 0x7c6   :  { %v9742_v59 = vcombine.high %v16856_v61, %v16910_v33  ;;  %v17402_v19 = vcombine.high %v17324_v3, %v20337_v34  ;;  %v17409_v38 = vrot.slane %v7430_v5, %v20785_v47  ;;  %v17414_v24 = vrot.slane %v9741_v50, %v20785_v47  ;;  %v20884_v3 = vld [vmem:[#allocation85_spill] sm:$0xff] }
 0x7c7   :  { %12166 = vrot.lane.b32.xlu0 %v20881_v48, %s12884_s13  ;;  %10761 = vrot.lane.b32.xlu1 %v17038_v63, %s12894_s22  ;;  %v8082_v33 = vcombine.low %v16794_v15, %v16806_v53  ;;  %v17420_v62 = vcombine.high %v17094_v20, %v20337_v34  ;;  %v8448_v61 = vpop.permute.xlu0 %8447  ;;  %v17423_v44 = vrot.slane %v9758_v14, %v20785_v47  ;;  %v20886_v50 = vld [vmem:[#allocation25_spill] sm:$0xff] }
 0x7c8   :  { %v8098_v17 = vcombine.low %v20882_v56, %v16812_v46  ;;  %v17428_v5 = vrot.slane %v7963_v52, %v20785_v47  ;;  %v7428_v48 = vrot.slane %v7414_v49, %v20785_v47  ;;  %v8476_v51 = vcombine.high %v17164_v1, %v17280_v27  ;;  %v7324_v41 = vpop.permute.xlu1 %7323  ;;  %v20883_v52 = vld [vmem:[#allocation76_spill] sm:$0xff] }
 0x7c9   :  { %v8492_v37 = vcombine.high %v17212_v2, %v17332_v28  ;;  %v9774_v14 = vcombine.high %v17414_v24, %v17389_v25  ;;  %v7446_v23 = vcombine.high %v17327_v18, %v17330_v8  ;;  %v20885_v36 = vpack.i.bf16 %v20883_v52, %v20884_v3 }
 0x7ca   :  { %v17446_v49 = vrot.slane %v9742_v59, %v20785_v47  ;;  %v7461_v2 = vcombine.low %v7428_v48, %v17409_v38  ;;  %v17456_v28 = vrot.slane %v8082_v33, %v20785_v47  ;;  %v8099_v3 = vcombine.high %v20882_v56, %v16812_v46 }
 0x7cb   :  { %12171 = vrot.lane.b32.xlu0 %v20885_v36, %s12885_s14  ;;  %10765 = vrot.lane.b32.xlu1 %v17080_v12, %s12894_s22  ;;  %v7549_v59 = vcombine.low %v17339_v31, %v7324_v41  ;;  %v7550_v52 = vcombine.high %v17339_v31, %v7324_v41  ;;  %v8452_v27 = vpop.permute.xlu0 %8451  ;;  %v17467_v8 = vrot.slane %v8098_v17, %v20785_v47 }
 0x7cc   :  { %v9789_v1 = vcombine.low %v17446_v49, %v17423_v44  ;;  %v8490_v33 = vrot.slane %v8476_v51, %v20785_v47  ;;  %v8506_v18 = vrot.slane %v8492_v37, %v20785_v47  ;;  %v7328_v45 = vpop.permute.xlu1 %7327  ;;  %v17472_v36 = vrot.slane %v9774_v14, %v13041_v29 }
 0x7cd   :  { %v9790_v46 = vcombine.high %v17446_v49, %v17423_v44  ;;  %v7462_v31 = vcombine.high %v7428_v48, %v17409_v38  ;;  %v7565_v41 = vcombine.low %v7320_v10, %v7328_v45  ;;  %v7566_v56 = vcombine.high %v7320_v10, %v7328_v45  ;;  %v20889_v44 = vld [vmem:[#allocation46_spill] sm:$0xff] }
 0x7ce   :  { %v20887_v17 = vpack.i.bf16 %v17094_v20, %v17015_v58  ;;  %v17482_v51 = vrot.slane %v7446_v23, %v13041_v29  ;;  %v8508_v37 = vcombine.high %v17362_v60, %v17366_v13  ;;  %v8611_v14 = vcombine.low %v17372_v30, %v8452_v27 }
 0x7cf   :  { %v8612_v39 = vcombine.high %v17372_v30, %v8452_v27  ;;  %10769 = vrot.lane.b32.xlu1 %v20889_v44, %s12894_s22  ;;  %v17491_v45 = vrot.slane %v7461_v2, %v13041_v29  ;;  %v17494_v10 = vrot.slane %v7549_v59, %v20785_v47  ;;  %v7564_v58 = vrot.slane %v7550_v52, %v20785_v47  ;;  %v8456_v38 = vpop.permute.xlu0 %8455 }
 0x7d0   :  { %12176 = vrot.lane.b32.xlu0 %v20887_v17, %s12886_s15  ;;  %20888 = vst [vmem:[#allocation35_spill] sm:$0xff] %v17482_v51  ;;  %v17498_v20 = vrot.slane %v7565_v41, %v20785_v47  ;;  %v7580_v23 = vrot.slane %v7566_v56, %v20785_v47  ;;  %v8523_v48 = vcombine.low %v8490_v33, %v8506_v18  ;;  %v17501_v17 = vpop.permute.xlu1 %8429 }
 0x7d1   :  { %20890 = vst [vmem:[#allocation30_spill] sm:$0xff] %v17491_v45  ;;  %20891 = vst [vmem:[#allocation37_spill] sm:$0xff] %v17494_v10  ;;  %v8524_v49 = vcombine.high %v8490_v33, %v8506_v18  ;;  %v8627_v30 = vcombine.low %v8448_v61, %v8456_v38  ;;  %v8628_v27 = vcombine.high %v8448_v61, %v8456_v38  ;;  %v20896_v38 = vld [vmem:[#allocation93_spill] sm:$0xff] }
 0x7d2   :  { %20892 = vst [vmem:[#allocation56_spill] sm:$0xff] %v17498_v20  ;;  %v7582_v59 = vcombine.high %v17494_v10, %v17498_v20  ;;  %v7597_v13 = vcombine.low %v7564_v58, %v7580_v23  ;;  %v7598_v52 = vcombine.high %v7564_v58, %v7580_v23  ;;  %v20893_v41 = vpack.i.bf16 %v17097_v42, %v17041_v16 }
 0x7d3   :  { %v17512_v56 = vrot.slane %v8611_v14, %v20785_v47  ;;  %v8626_v18 = vrot.slane %v8612_v39, %v20785_v47  ;;  %v17516_v61 = vrot.slane %v8627_v30, %v20785_v47  ;;  %v8642_v33 = vrot.slane %v8628_v27, %v20785_v47  ;;  %10773 = vrot.lane.b32.xlu1 %v20896_v38, %s12894_s22  ;;  %v17521_v2 = vpop.permute.xlu0 %9024 }
 0x7d4   :  { %12186 = vrot.lane.b32.xlu0 %v20893_v41, %s12884_s13  ;;  %v17524_v58 = vrot.slane %v7582_v59, %v13041_v29  ;;  %v17527_v16 = vrot.slane %v7597_v13, %v13041_v29  ;;  %v17530_v14 = vrot.slane %v7462_v31, %v13041_v29  ;;  %v17533_v39 = vrot.slane %v7598_v52, %v13041_v29  ;;  %v17539_v20 = vpop.permute.xlu1 %8433 }
 0x7d5   :  { %20894 = vst [vmem:[#allocation54_spill] sm:$0xff] %v17512_v56  ;;  %20895 = vst [vmem:[#allocation44_spill] sm:$0xff] %v17516_v61  ;;  %v8644_v30 = vcombine.high %v17512_v56, %v17516_v61  ;;  %v8659_v27 = vcombine.low %v8626_v18, %v8642_v33  ;;  %v8660_v41 = vcombine.high %v8626_v18, %v8642_v33  ;;  %v20904_v18 = vld [vmem:[#allocation47_spill] sm:$0xff] }
 0x7d6   :  { %20897 = vst [vmem:[#allocation6_spill] sm:$0xff] %v17524_v58  ;;  %20898 = vst [vmem:[#allocation45_spill] sm:$0xff] %v17527_v16  ;;  %v20901_v13 = vpack.i.bf16 %v17293_v4, %v17053_v9  ;;  %v17546_v31 = vrot.slane %v9789_v1, %v13041_v29  ;;  %v17549_v59 = vrot.slane %v8099_v3, %v20785_v47 }
 0x7d7   :  { %20899 = vst [vmem:[#allocation76_spill] sm:$0xff] %v17530_v14  ;;  %20900 = vst [vmem:[#allocation85_spill] sm:$0xff] %v17533_v39  ;;  %v17552_v52 = vrot.slane %v8508_v37, %v13041_v29  ;;  %v17555_v23 = vrot.slane %v8523_v48, %v13041_v29  ;;  %10777 = vrot.lane.b32.xlu1 %v20904_v18, %s12894_s22  ;;  %v17560_v33 = vrot.slane %v8644_v30, %v13041_v29  ;;  %v17571_v37 = vpop.permute.xlu0 %9028 }
 0x7d8   :  { %12196 = vrot.lane.b32.xlu0 %v20901_v13, %s12885_s14  ;;  %v17563_v13 = vrot.slane %v8659_v27, %v13041_v29  ;;  %v17566_v1 = vrot.slane %v8524_v49, %v13041_v29  ;;  %v17569_v3 = vrot.slane %v8660_v41, %v13041_v29  ;;  %v12205_v48 = vpack.i.bf16 %v17472_v36, %v17354_v40  ;;  %v17586_v49 = vpop.permute.xlu1 %8437 }
 0x7d9   :  { %20902 = vst [vmem:[#allocation25_spill] sm:$0xff] %v17552_v52  ;;  %20903 = vst [vmem:[#allocation46_spill] sm:$0xff] %v17555_v23  ;;  %v17576_v10 = vrot.slane %v9790_v46, %v13041_v29  ;;  %v17580_v30 = vcombine.high %v17524_v58, %v20337_v34  ;;  %v17584_v27 = vcombine.high %v17527_v16, %v20337_v34 }
 0x7da   :  { %20905 = vst [vmem:[#allocation93_spill] sm:$0xff] %v17560_v33  ;;  %20906 = vst [vmem:[#allocation47_spill] sm:$0xff] %v17563_v13  ;;  %v17590_v41 = vcombine.high %v17482_v51, %v20337_v34  ;;  %v17594_v60 = vcombine.high %v17491_v45, %v20337_v34  ;;  %v17598_v46 = vcombine.high %v17530_v14, %v20337_v34 }
 0x7db   :  { %20907 = vst [vmem:[#allocation103_spill] sm:$0xff] %v17566_v1  ;;  %20908 = vst [vmem:[#allocation104_spill] sm:$0xff] %v17569_v3  ;;  %v17602_v61 = vcombine.high %v17533_v39, %v20337_v34  ;;  %v17607_v56 = vcombine.high %v17552_v52, %v20337_v34  ;;  %v17611_v54 = vcombine.high %v17560_v33, %v20337_v34  ;;  %v20919_v39 = vld [vmem:[#allocation50_spill] sm:$0xff] }
 0x7dc   :  { %20909 = vst [vmem:[#allocation105_spill] sm:$0xff] %v17580_v30  ;;  %20910 = vst [vmem:[#allocation106_spill] sm:$0xff] %v17584_v27  ;;  %12206 = vrot.lane.b32.xlu0 %v12205_v48, %s12886_s15  ;;  %v17615_v16 = vcombine.high %v17555_v23, %v20337_v34  ;;  %v17619_v14 = vcombine.high %v17563_v13, %v20337_v34  ;;  %10781 = vrot.lane.b32.xlu1 %v20919_v39, %s12894_s22  ;;  %v17637_v23 = vpop.permute.xlu0 %9032  ;;  %v8442_v52 = vpop.permute.xlu1 %8441  ;;  %v20928_v27 = vld [vmem:[#allocation69_spill] sm:$0xff] }
 0x7dd   :  { %20911 = vst [vmem:[#allocation107_spill] sm:$0xff] %v17590_v41  ;;  %20912 = vst [vmem:[#allocation108_spill] sm:$0xff] %v17594_v60  ;;  %v17625_v48 = vcombine.high %v17566_v1, %v20337_v34  ;;  %v17629_v45 = vcombine.high %v17569_v3, %v20337_v34  ;;  %v8543_v13 = vcombine.low %v17501_v17, %v17586_v49 }
 0x7de   :  { %20913 = vst [vmem:[#allocation109_spill] sm:$0xff] %v17598_v46  ;;  %20914 = vst [vmem:[#allocation110_spill] sm:$0xff] %v17602_v61  ;;  %v12215_v33 = vpack.i.bf16 %v17546_v31, %v17357_v26  ;;  %v20922_v58 = vcombine.high %v16794_v15, %v16806_v53  ;;  %v9825_v60 = vcombine.low %v20896_v38, %v20919_v39 }
 0x7df   :  { %20915 = vst [vmem:[#allocation111_spill] sm:$0xff] %v17607_v56  ;;  %20916 = vst [vmem:[#allocation112_spill] sm:$0xff] %v17611_v54  ;;  %v8559_v1 = vcombine.low %v17539_v20, %v8442_v52  ;;  %v20923_v3 = vcombine.low %v16962_v7, %v17038_v63  ;;  %v20925_v53 = vcombine.low %v16995_v22, %v17080_v12  ;;  %v20938_v54 = vld [vmem:[#allocation18_spill] sm:$0xff] }
 0x7e0   :  { %20917 = vst [vmem:[#allocation113_spill] sm:$0xff] %v17615_v16  ;;  %20918 = vst [vmem:[#allocation114_spill] sm:$0xff] %v17619_v14  ;;  %v8097_v51 = vrot.slane %v20922_v58, %v20785_v47  ;;  %12216 = vrot.lane.b32.xlu0 %v12215_v33, %s12884_s13  ;;  %v9809_v58 = vcombine.low %v20889_v44, %v20904_v18  ;;  %v9072_v41 = vcombine.low %v17521_v2, %v17637_v23  ;;  %v20927_v33 = vld [vmem:[#allocation27_spill] sm:$0xff]  ;;  %v17688_v14 = vpop.permute.xlu0 %9036  ;;  %v17696_v56 = vpop.permute.xlu1 %8445 }
 0x7e1   :  { %20920 = vst [vmem:[#allocation50_spill] sm:$0xff] %v17625_v48  ;;  %20921 = vst [vmem:[#allocation115_spill] sm:$0xff] %v17629_v45  ;;  %v17661_v30 = vrot.slane %v20923_v3, %v20785_v47  ;;  %v17667_v15 = vrot.slane %v20925_v53, %v20785_v47  ;;  %v20929_v46 = vpack.i.bf16 %v20927_v33, %v20928_v27  ;;  %v20930_v48 = vld [vmem:[#allocation78_spill] sm:$0xff] }
 0x7e2   :  { %v8115_v3 = vcombine.high %v17456_v28, %v17467_v8  ;;  %v8130_v61 = vcombine.low %v8097_v51, %v17549_v59  ;;  %v17683_v45 = vrot.slane %v8543_v13, %v20785_v47  ;;  %v17686_v16 = vrot.slane %v8559_v1, %v20785_v47 }
 0x7e3   :  { %20924 = vst [vmem:[#allocation116_spill] sm:$0xff] %v17661_v30  ;;  %20926 = vst [vmem:[#allocation117_spill] sm:$0xff] %v17667_v15  ;;  %12146 = vrot.lane.b32.xlu1 %v20929_v46, %s12886_s15  ;;  %v12225_v27 = vpack.i.bf16 %v17576_v10, %v17377_v6  ;;  %v9826_v46 = vcombine.high %v20896_v38, %v20919_v39  ;;  %v9088_v33 = vcombine.low %v17571_v37, %v17688_v14 }
 0x7e4   :  { %20931 = vst [vmem:[#allocation27_spill] sm:$0xff] %v17683_v45  ;;  %20932 = vst [vmem:[#allocation69_spill] sm:$0xff] %v17686_v16  ;;  %v7994_v13 = vcombine.low %v17392_v11, %v17428_v5  ;;  %v7995_v1 = vcombine.high %v17392_v11, %v17428_v5  ;;  %v17703_v53 = vrot.slane %v9825_v60, %v20785_v47  ;;  %v20937_v5 = vld [vmem:[#allocation19_spill] sm:$0xff] }
 0x7e5   :  { %12226 = vrot.lane.b32.xlu0 %v12225_v27, %s12885_s14  ;;  %v8131_v38 = vcombine.high %v8097_v51, %v17549_v59  ;;  %v17710_v39 = vrot.slane %v9809_v58, %v20785_v47  ;;  %v9810_v6 = vcombine.high %v20889_v44, %v20904_v18  ;;  %v17715_v26 = vrot.slane %v9072_v41, %v20785_v47  ;;  %v17729_v58 = vpop.permute.xlu0 %9040 }
 0x7e6   :  { %20933 = vst [vmem:[#allocation78_spill] sm:$0xff] %v17703_v53  ;;  %v8560_v11 = vcombine.high %v17539_v20, %v8442_v52  ;;  %v17719_v60 = vrot.slane %v9088_v33, %v20785_v47  ;;  %v20939_v27 = vpack.i.bf16 %v20937_v5, %v20938_v54  ;;  %v20940_v51 = vcombine.high %v16995_v22, %v17080_v12  ;;  %v8450_v12 = vpop.permute.xlu1 %8449 }
 0x7e7   :  { %20934 = vst [vmem:[#allocation118_spill] sm:$0xff] %v17710_v39  ;;  %20935 = vst [vmem:[#allocation119_spill] sm:$0xff] %v17715_v26  ;;  %v17732_v44 = vrot.slane %v8115_v3, %v13041_v29  ;;  %v17735_v20 = vrot.slane %v8130_v61, %v13041_v29  ;;  %v9706_v52 = vcombine.high %v17661_v30, %v17667_v15 }
 0x7e8   :  { %20936 = vst [vmem:[#allocation120_spill] sm:$0xff] %v17719_v60  ;;  %12151 = vrot.lane.b32.xlu1 %v20939_v27, %s12884_s13  ;;  %v9704_v59 = vrot.slane %v20940_v51, %v20785_v47  ;;  %v17740_v18 = vrot.slane %v9826_v46, %v20785_v47  ;;  %v8544_v54 = vcombine.high %v17501_v17, %v17586_v49 }
 0x7e9   :  { %v9842_v41 = vcombine.high %v17710_v39, %v17703_v53  ;;  %v20941_v61 = vcombine.high %v16962_v7, %v17038_v63  ;;  %v20942_v46 = vpack.i.bf16 %v17297_v57, %v17061_v35  ;;  %v17757_v33 = vrot.slane %v7994_v13, %v13041_v29  ;;  %v20944_v63 = vld [vmem:[#allocation21_spill] sm:$0xff]  ;;  %v20945_v35 = vld [vmem:[#allocation79_spill] sm:$0xff]  ;;  %v9045_v51 = vpop.permute.xlu0 %9044  ;;  %v20952_v39 = vld [vmem:[#allocation102_spill] sm:$0xff] }
 0x7ea   :  { %v17760_v17 = vrot.slane %v8131_v38, %v13041_v29  ;;  %v17763_v49 = vrot.slane %v9810_v6, %v20785_v47  ;;  %v17767_v5 = vcombine.high %v17097_v42, %v20337_v34  ;;  %v17770_v7 = vrot.slane %v8560_v11, %v20785_v47 }
 0x7eb   :  { %v9688_v3 = vrot.slane %v20941_v61, %v20785_v47  ;;  %12236 = vrot.lane.b32.xlu0 %v20942_v46, %s12888_s19  ;;  %v20946_v57 = vpack.i.bf16 %v20944_v63, %v20945_v35  ;;  %v17777_v13 = vrot.slane %v7995_v1, %v13041_v29  ;;  %v12180_v6 = vpack.i.bf16 %v17732_v44, %v17380_v43 }
 0x7ec   :  { %20943 = vst [vmem:[#allocation19_spill] sm:$0xff] %v17760_v17  ;;  %v12190_v42 = vpack.i.bf16 %v17735_v20, %v17757_v33  ;;  %v17784_v11 = vrot.slane %v9706_v52, %v13041_v29  ;;  %v9857_v61 = vcombine.low %v17763_v49, %v17740_v18  ;;  %v8558_v46 = vrot.slane %v8544_v54, %v20785_v47  ;;  %v20949_v52 = vld [vmem:[#allocation74_spill] sm:$0xff] }
 0x7ed   :  { %12156 = vrot.lane.b32.xlu1 %v20946_v57, %s12885_s14  ;;  %20947 = vst [vmem:[#allocation18_spill] sm:$0xff] %v17777_v13  ;;  %v9721_v38 = vcombine.low %v9688_v3, %v9704_v59  ;;  %v9722_v27 = vcombine.high %v9688_v3, %v9704_v59  ;;  %v9073_v1 = vcombine.high %v17521_v2, %v17637_v23  ;;  %v8454_v3 = vpop.permute.xlu1 %8453  ;;  %v20950_v57 = vld [vmem:[#allocation83_spill] sm:$0xff]  ;;  %v9049_v2 = vpop.permute.xlu0 %9048 }
 0x7ee   :  { %20948 = vst [vmem:[#allocation21_spill] sm:$0xff] %v17784_v11  ;;  %v9089_v59 = vcombine.high %v17571_v37, %v17688_v14  ;;  %v17794_v63 = vrot.slane %v9842_v41, %v13041_v29  ;;  %v8576_v35 = vcombine.high %v17683_v45, %v17686_v16  ;;  %v20951_v22 = vpack.i.bf16 %v20949_v52, %v20950_v57  ;;  %v20954_v16 = vld [vmem:[#allocation31_spill] sm:$0xff] }
 0x7ef   :  { %v12200_v54 = vpack.i.bf16 %v17760_v17, %v17777_v13  ;;  %v17808_v14 = vcombine.high %v17293_v4, %v20337_v34  ;;  %v8591_v23 = vcombine.low %v8558_v46, %v17770_v7  ;;  %v17813_v37 = vrot.slane %v9721_v38, %v13041_v29  ;;  %v20953_v4 = vld [vmem:[#allocation80_spill] sm:$0xff]  ;;  %v20957_v38 = vld [vmem:[#allocation13_spill] sm:$0xff]  ;;  %v20961_v13 = vld [vmem:[#allocation75_spill] sm:$0xff] }
 0x7f0   :  { %12241 = vrot.lane.b32.xlu0 %v20951_v22, %s12887_s16  ;;  %v17816_v41 = vrot.slane %v9722_v27, %v13041_v29  ;;  %v8679_v52 = vcombine.low %v17696_v56, %v8454_v3  ;;  %v8680_v57 = vcombine.high %v17696_v56, %v8454_v3  ;;  %v20955_v45 = vcombine.low %v20953_v4, %v20954_v16 }
 0x7f1   :  { %12181 = vrot.lane.b32.xlu1 %v12180_v6, %s12886_s15  ;;  %v20958_v6 = vld [vmem:[#allocation82_spill] sm:$0xff]  ;;  %v9087_v15 = vrot.slane %v9073_v1, %v20785_v47  ;;  %v9103_v22 = vrot.slane %v9089_v59, %v20785_v47  ;;  %v8458_v17 = vpop.permute.xlu1 %8457  ;;  %v12210_v56 = vpack.i.bf16 %v17794_v63, %v17784_v11  ;;  %v17839_v3 = vrot.slane %v9857_v61, %v13041_v29 }
 0x7f2   :  { %v17826_v53 = vrot.slane %v20955_v45, %v13041_v29  ;;  %v20959_v30 = vcombine.low %v20957_v38, %v20958_v6  ;;  %v8592_v45 = vcombine.high %v8558_v46, %v17770_v7  ;;  %v8695_v16 = vcombine.low %v8450_v12, %v8458_v17  ;;  %v20962_v38 = vld [vmem:[#allocation72_spill] sm:$0xff] }
 0x7f3   :  { %v8696_v4 = vcombine.high %v8450_v12, %v8458_v17  ;;  %v17847_v1 = vrot.slane %v8576_v35, %v13041_v29  ;;  %v9105_v59 = vcombine.high %v17715_v26, %v17719_v60  ;;  %v9208_v6 = vcombine.low %v17729_v58, %v9049_v2  ;;  %v9053_v35 = vpop.permute.xlu0 %9052  ;;  %v20967_v26 = vld [vmem:[#allocation84_spill] sm:$0xff] }
 0x7f4   :  { %20956 = vst [vmem:[#allocation79_spill] sm:$0xff] %v17826_v53  ;;  %v17832_v27 = vrot.slane %v20959_v30, %v13041_v29  ;;  %v20963_v30 = vpack.i.bf16 %v20961_v13, %v20962_v38  ;;  %v9209_v61 = vcombine.high %v17729_v58, %v9049_v2  ;;  %v17855_v7 = vrot.slane %v8591_v23, %v13041_v29 }
 0x7f5   :  { %12191 = vrot.lane.b32.xlu1 %v12190_v42, %s12884_s13  ;;  %v17858_v12 = vrot.slane %v8679_v52, %v20785_v47  ;;  %v8694_v17 = vrot.slane %v8680_v57, %v20785_v47  ;;  %v17862_v13 = vrot.slane %v8695_v16, %v20785_v47  ;;  %v8710_v46 = vrot.slane %v8696_v4, %v20785_v47  ;;  %v17865_v2 = vpop.permute.xlu1 %9026  ;;  %v20966_v16 = vld [vmem:[#allocation20_spill] sm:$0xff] }
 0x7f6   :  { %20960 = vst [vmem:[#allocation74_spill] sm:$0xff] %v17832_v27  ;;  %12246 = vrot.lane.b32.xlu0 %v20963_v30, %s12882_s11  ;;  %v9120_v38 = vcombine.low %v9087_v15, %v9103_v22  ;;  %v9121_v30 = vcombine.high %v9087_v15, %v9103_v22  ;;  %v9224_v60 = vcombine.low %v9045_v51, %v9053_v35 }
 0x7f7   :  { %20964 = vst [vmem:[#allocation83_spill] sm:$0xff] %v17858_v12  ;;  %20965 = vst [vmem:[#allocation102_spill] sm:$0xff] %v17862_v13  ;;  %v9225_v58 = vcombine.high %v9045_v51, %v9053_v35  ;;  %v8712_v23 = vcombine.high %v17858_v12, %v17862_v13  ;;  %v8727_v52 = vcombine.low %v8694_v17, %v8710_v46  ;;  %v17884_v35 = vpop.permute.xlu0 %10154 }
 0x7f8   :  { %v8728_v57 = vcombine.high %v8694_v17, %v8710_v46  ;;  %v20968_v11 = vpack.i.bf16 %v20966_v16, %v20967_v26  ;;  %v17876_v4 = vrot.slane %v9208_v6, %v20785_v47  ;;  %v9223_v15 = vrot.slane %v9209_v61, %v20785_v47 }
 0x7f9   :  { %v17880_v51 = vrot.slane %v9224_v60, %v20785_v47  ;;  %v9239_v22 = vrot.slane %v9225_v58, %v20785_v47  ;;  %12201 = vrot.lane.b32.xlu1 %v12200_v54, %s12885_s14  ;;  %v17887_v17 = vrot.slane %v8712_v23, %v13041_v29  ;;  %v17890_v26 = vrot.slane %v8727_v52, %v13041_v29  ;;  %v17902_v58 = vpop.permute.xlu1 %9030 }
 0x7fa   :  { %12251 = vrot.lane.b32.xlu0 %v20968_v11, %s12883_s12  ;;  %20969 = vst [vmem:[#allocation80_spill] sm:$0xff] %v17876_v4  ;;  %v17893_v11 = vrot.slane %v8592_v45, %v13041_v29  ;;  %v17896_v6 = vrot.slane %v8728_v57, %v13041_v29  ;;  %v20972_v23 = vpack.i.bf16 %v17402_v19, %v20886_v50 }
 0x7fb   :  { %20970 = vst [vmem:[#allocation31_spill] sm:$0xff] %v17880_v51  ;;  %v9241_v54 = vcombine.high %v17876_v4, %v17880_v51  ;;  %v9256_v61 = vcombine.low %v9223_v15, %v9239_v22  ;;  %v9257_v46 = vcombine.high %v9223_v15, %v9239_v22  ;;  %v9637_v45 = vcombine.low %v17108_v0, %v17215_v32  ;;  %v17931_v32 = vpop.permute.xlu0 %10158 }
 0x7fc   :  { %20971 = vst [vmem:[#allocation13_spill] sm:$0xff] %v17896_v6  ;;  %v9773_v52 = vcombine.low %v17414_v24, %v17389_v25  ;;  %v17913_v57 = vrot.slane %v9105_v59, %v13041_v29  ;;  %v17916_v16 = vrot.slane %v9120_v38, %v13041_v29  ;;  %v17926_v50 = vrot.slane %v9121_v30, %v13041_v29 }
 0x7fd   :  { %12211 = vrot.lane.b32.xlu1 %v12210_v56, %s12886_s15  ;;  %v17920_v15 = vrot.slane %v9241_v54, %v13041_v29  ;;  %v17923_v19 = vrot.slane %v9256_v61, %v13041_v29  ;;  %v17929_v0 = vrot.slane %v9257_v46, %v13041_v29  ;;  %v12220_v25 = vpack.i.bf16 %v17839_v3, %v17813_v37  ;;  %v17949_v30 = vpop.permute.xlu1 %9034 }
 0x7fe   :  { %12276 = vrot.lane.b32.xlu0 %v20972_v23, %s12888_s19  ;;  %v20973_v24 = vcombine.high %v17763_v49, %v17740_v18  ;;  %v17943_v59 = vcombine.high %v17887_v17, %v20337_v34  ;;  %v17947_v38 = vcombine.high %v17890_v26, %v20337_v34  ;;  %v17953_v22 = vcombine.high %v17847_v1, %v20337_v34 }
 0x7ff   :  { %v17957_v54 = vcombine.high %v17855_v7, %v20337_v34  ;;  %v17961_v18 = vcombine.high %v17893_v11, %v20337_v34  ;;  %v17965_v49 = vcombine.high %v17896_v6, %v20337_v34  ;;  %v20980_v61 = vpack.i.bf16 %v17420_v62, %v20930_v48  ;;  %v18002_v12 = vpop.permute.xlu0 %10162 }
 0x800   :  { %v17939_v56 = vrot.slane %v20973_v24, %v13041_v29  ;;  %20974 = vst [vmem:[#allocation82_spill] sm:$0xff] %v17943_v59  ;;  %20975 = vst [vmem:[#allocation75_spill] sm:$0xff] %v17947_v38  ;;  %v17973_v46 = vcombine.high %v17913_v57, %v20337_v34  ;;  %v17977_v23 = vcombine.high %v17920_v15, %v20337_v34  ;;  %v21008_v59 = vld [vmem:[#allocation12_spill] sm:$0xff] }
 0x801   :  { %20976 = vst [vmem:[#allocation72_spill] sm:$0xff] %v17953_v22  ;;  %20977 = vst [vmem:[#allocation20_spill] sm:$0xff] %v17957_v54  ;;  %v17981_v24 = vcombine.high %v17916_v16, %v20337_v34  ;;  %v17985_v42 = vcombine.high %v17923_v19, %v20337_v34  ;;  %12221 = vrot.lane.b32.xlu1 %v12220_v25, %s12884_s13  ;;  %v17990_v62 = vcombine.high %v17926_v50, %v20337_v34  ;;  %v9039_v6 = vpop.permute.xlu1 %9038 }
 0x802   :  { %20978 = vst [vmem:[#allocation84_spill] sm:$0xff] %v17961_v18  ;;  %20979 = vst [vmem:[#allocation121_spill] sm:$0xff] %v17965_v49  ;;  %12286 = vrot.lane.b32.xlu0 %v20980_v61, %s12887_s16  ;;  %v17994_v48 = vcombine.high %v17929_v0, %v20337_v34  ;;  %v9140_v13 = vcombine.low %v17865_v2, %v17949_v30  ;;  %v18005_v25 = vrot.slane %v9773_v52, %v13041_v29 }
 0x803   :  { %20981 = vst [vmem:[#allocation122_spill] sm:$0xff] %v17973_v46  ;;  %20982 = vst [vmem:[#allocation123_spill] sm:$0xff] %v17977_v23  ;;  %v12230_v61 = vpack.i.bf16 %v17939_v56, %v17816_v41  ;;  %v6443_v60 = vcombine.high %v17832_v27, %v20337_v34  ;;  %v9156_v38 = vcombine.low %v17902_v58, %v9039_v6 }
 0x804   :  { %20983 = vst [vmem:[#allocation124_spill] sm:$0xff] %v17981_v24  ;;  %20984 = vst [vmem:[#allocation125_spill] sm:$0xff] %v17985_v42  ;;  %v20987_v51 = vpack.i.bf16 %v17767_v5, %v20952_v39  ;;  %v7945_v4 = vcombine.high %v17053_v9, %v20337_v34  ;;  %v18027_v22 = vrot.slane %v9637_v45, %v13041_v29  ;;  %v10167_v5 = vpop.permute.xlu0 %10166 }
 0x805   :  { %20985 = vst [vmem:[#allocation126_spill] sm:$0xff] %v17990_v62  ;;  %20986 = vst [vmem:[#allocation127_spill] sm:$0xff] %v17994_v48  ;;  %v10202_v27 = vcombine.low %v17884_v35, %v18002_v12  ;;  %12231 = vrot.lane.b32.xlu1 %v12230_v61, %s12885_s14  ;;  %v6307_v52 = vcombine.high %v17826_v53, %v20337_v34  ;;  %v18035_v54 = vrot.slane %v9140_v13, %v20785_v47  ;;  %v18044_v18 = vpop.permute.xlu1 %9042 }
 0x806   :  { %12296 = vrot.lane.b32.xlu0 %v20987_v51, %s12882_s11  ;;  %v18038_v39 = vrot.slane %v9156_v38, %v20785_v47  ;;  %v12305_v9 = vpack.i.bf16 %v17808_v14, %v7945_v4  ;;  %v9805_v51 = vcombine.high %v18005_v25, %v20337_v34  ;;  %v10218_v45 = vcombine.low %v17931_v32, %v10167_v5 }
 0x807   :  { %20988 = vst [vmem:[#allocation128_spill] sm:$0xff] %v18035_v54  ;;  %v12255_v61 = vpack.i.bf16 %v6443_v60, %v6307_v52  ;;  %v8114_v53 = vcombine.low %v17456_v28, %v17467_v8  ;;  %v9669_v38 = vcombine.high %v18027_v22, %v20337_v34  ;;  %v18054_v14 = vrot.slane %v10202_v27, %v20785_v47 }
 0x808   :  { %20989 = vst [vmem:[#allocation129_spill] sm:$0xff] %v18038_v39  ;;  %v9157_v4 = vcombine.high %v17902_v58, %v9039_v6  ;;  %v18058_v49 = vrot.slane %v10218_v45, %v20785_v47  ;;  %v7978_v8 = vcombine.low %v17310_v21, %v17283_v55  ;;  %v18063_v28 = vpop.permute.xlu0 %10170  ;;  %v9806_v52 = vcombine.high %v17472_v36, %v20337_v34 }
 0x809   :  { %20990 = vst [vmem:[#allocation130_spill] sm:$0xff] %v18054_v14  ;;  %12256 = vrot.lane.b32.xlu1 %v12255_v61, %s12888_s19  ;;  %v12315_v60 = vpack.i.bf16 %v9805_v51, %v9669_v38  ;;  %v9807_v27 = vcombine.high %v17546_v31, %v20337_v34  ;;  %v18071_v6 = vcombine.high %v17576_v10, %v20337_v34  ;;  %v9047_v55 = vpop.permute.xlu1 %9046  ;;  %v20993_v31 = vld [vmem:[#allocation70_spill] sm:$0xff]  ;;  %v20994_v10 = vld [vmem:[#allocation15_spill] sm:$0xff]  ;;  %v20996_v61 = vld [vmem:[#allocation81_spill] sm:$0xff] }
 0x80a   :  { %12306 = vrot.lane.b32.xlu0 %v12305_v9, %s12883_s12  ;;  %20991 = vst [vmem:[#allocation131_spill] sm:$0xff] %v18058_v49  ;;  %v9141_v58 = vcombine.high %v17865_v2, %v17949_v30  ;;  %v18078_v21 = vrot.slane %v8114_v53, %v13041_v29  ;;  %v9670_v36 = vcombine.high %v17354_v40, %v20337_v34  ;;  %v20995_v30 = vld [vmem:[#allocation88_spill] sm:$0xff] }
 0x80b   :  { %v9671_v51 = vcombine.high %v20993_v31, %v20337_v34  ;;  %v9672_v45 = vcombine.high %v20994_v10, %v20337_v34  ;;  %v18088_v2 = vrot.slane %v9157_v4, %v20785_v47  ;;  %v20997_v38 = vpack.i.bf16 %v20995_v30, %v20996_v61 }
 0x80c   :  { %20992 = vst [vmem:[#allocation132_spill] sm:$0xff] %v18078_v21  ;;  %v18095_v53 = vrot.slane %v7978_v8, %v13041_v29  ;;  %v18099_v40 = vcombine.high %v17732_v44, %v20337_v34  ;;  %v12325_v31 = vpack.i.bf16 %v9806_v52, %v9670_v36  ;;  %v18104_v4 = vcombine.high %v17380_v43, %v20337_v34 }
 0x80d   :  { %12261 = vrot.lane.b32.xlu1 %v20997_v38, %s12887_s16  ;;  %v12335_v13 = vpack.i.bf16 %v9807_v27, %v9671_v51  ;;  %v12345_v10 = vpack.i.bf16 %v18071_v6, %v9672_v45  ;;  %v9155_v9 = vrot.slane %v9141_v58, %v20785_v47  ;;  %v10203_v30 = vcombine.high %v17884_v35, %v18002_v12  ;;  %v9051_v61 = vpop.permute.xlu1 %9050  ;;  %v20999_v12 = vld [vmem:[#allocation18_spill] sm:$0xff] }
 0x80e   :  { %12316 = vrot.lane.b32.xlu0 %v12315_v60, %s12888_s19  ;;  %20998 = vst [vmem:[#allocation70_spill] sm:$0xff] %v18095_v53  ;;  %v10175_v60 = vpop.permute.xlu0 %10174  ;;  %v10219_v8 = vcombine.high %v17931_v32, %v10167_v5  ;;  %v8146_v44 = vcombine.high %v18078_v21, %v20337_v34  ;;  %v9173_v52 = vcombine.high %v18035_v54, %v18038_v39  ;;  %v21000_v5 = vld [vmem:[#allocation86_spill] sm:$0xff]  ;;  %v21005_v21 = vld [vmem:[#allocation116_spill] sm:$0xff] }
 0x80f   :  { %v18117_v43 = vcombine.high %v17757_v33, %v20337_v34  ;;  %v18121_v27 = vcombine.high %v17735_v20, %v20337_v34  ;;  %v18125_v35 = vcombine.high %v20999_v12, %v20337_v34  ;;  %v9188_v32 = vcombine.low %v9155_v9, %v18088_v2  ;;  %v21001_v6 = vld [vmem:[#allocation90_spill] sm:$0xff]  ;;  %v21003_v20 = vld [vmem:[#allocation19_spill] sm:$0xff]  ;;  %v21004_v12 = vld [vmem:[#allocation117_spill] sm:$0xff] }
 0x810   :  { %v21002_v58 = vpack.i.bf16 %v21000_v5, %v21001_v6  ;;  %v8010_v36 = vcombine.high %v18095_v53, %v20337_v34  ;;  %v12290_v33 = vpack.i.bf16 %v18099_v40, %v18104_v4  ;;  %v18138_v51 = vcombine.high %v21003_v20, %v20337_v34  ;;  %v21006_v5 = vld [vmem:[#allocation78_spill] sm:$0xff]  ;;  %v21009_v20 = vld [vmem:[#allocation28_spill] sm:$0xff] }
 0x811   :  { %v9276_v45 = vcombine.low %v18044_v18, %v9051_v61  ;;  %v9277_v38 = vcombine.high %v18044_v18, %v9051_v61  ;;  %v9705_v39 = vcombine.low %v21005_v21, %v21004_v12  ;;  %v21007_v6 = vld [vmem:[#allocation118_spill] sm:$0xff]  ;;  %v10217_v53 = vrot.slane %v10203_v30, %v20785_v47  ;;  %v9055_v40 = vpop.permute.xlu1 %9054 }
 0x812   :  { %12326 = vrot.lane.b32.xlu0 %v12325_v31, %s12887_s16  ;;  %12266 = vrot.lane.b32.xlu1 %v21002_v58, %s12882_s11  ;;  %v10179_v31 = vpop.permute.xlu0 %10178  ;;  %v9841_v58 = vcombine.low %v21007_v6, %v21006_v5  ;;  %v10233_v54 = vrot.slane %v10219_v8, %v20785_v47  ;;  %v12280_v4 = vpack.i.bf16 %v8146_v44, %v8010_v36  ;;  %v21010_v44 = vld [vmem:[#allocation48_spill] sm:$0xff]  ;;  %v21011_v36 = vld [vmem:[#allocation89_spill] sm:$0xff] }
 0x813   :  { %v12355_v62 = vpack.i.bf16 %v21009_v20, %v21008_v59  ;;  %v9189_v48 = vcombine.high %v9155_v9, %v18088_v2  ;;  %v9292_v24 = vcombine.low %v9047_v55, %v9055_v40  ;;  %v9293_v18 = vcombine.high %v9047_v55, %v9055_v40 }
 0x814   :  { %v18153_v21 = vrot.slane %v9173_v52, %v13041_v29  ;;  %v10235_v61 = vcombine.high %v18054_v14, %v18058_v49  ;;  %v10338_v30 = vcombine.low %v18063_v28, %v10179_v31  ;;  %v10339_v8 = vcombine.high %v18063_v28, %v10179_v31  ;;  %v21034_v14 = vld [vmem:[#allocation10_spill] sm:$0xff] }
 0x815   :  { %v21012_v59 = vpack.i.bf16 %v21010_v44, %v21011_v36  ;;  %v18164_v9 = vrot.slane %v9188_v32, %v13041_v29  ;;  %v9291_v55 = vrot.slane %v9277_v38, %v20785_v47  ;;  %v18171_v2 = vrot.slane %v9292_v24, %v20785_v47  ;;  %v18174_v40 = vpop.permute.xlu1 %10156 }
 0x816   :  { %12336 = vrot.lane.b32.xlu0 %v12335_v13, %s12882_s11  ;;  %v18167_v13 = vrot.slane %v9276_v45, %v20785_v47  ;;  %v9307_v52 = vrot.slane %v9293_v18, %v20785_v47  ;;  %v10183_v12 = vpop.permute.xlu0 %10182  ;;  %v10250_v28 = vcombine.low %v10217_v53, %v10233_v54  ;;  %v10251_v31 = vcombine.high %v10217_v53, %v10233_v54 }
 0x817   :  { %12271 = vrot.lane.b32.xlu1 %v21012_v59, %s12883_s12  ;;  %21014 = vst [vmem:[#allocation88_spill] sm:$0xff] %v18171_v2  ;;  %v10354_v5 = vcombine.low %v10175_v60, %v10183_v12  ;;  %v10355_v6 = vcombine.high %v10175_v60, %v10183_v12  ;;  %v18182_v24 = vrot.slane %v10338_v30, %v20785_v47 }
 0x818   :  { %21013 = vst [vmem:[#allocation15_spill] sm:$0xff] %v18167_v13  ;;  %v9309_v45 = vcombine.high %v18167_v13, %v18171_v2  ;;  %v9324_v20 = vcombine.low %v9291_v55, %v9307_v52  ;;  %v9325_v38 = vcombine.high %v9291_v55, %v9307_v52  ;;  %v10353_v18 = vrot.slane %v10339_v8, %v20785_v47 }
 0x819   :  { %21015 = vst [vmem:[#allocation81_spill] sm:$0xff] %v18182_v24  ;;  %v18186_v54 = vrot.slane %v10354_v5, %v20785_v47  ;;  %v10369_v53 = vrot.slane %v10355_v6, %v20785_v47  ;;  %v18208_v52 = vpop.permute.xlu1 %10160  ;;  %v12300_v12 = vpack.i.bf16 %v18121_v27, %v18117_v43  ;;  %v18217_v5 = vrot.slane %v10235_v61, %v13041_v29  ;;  %v21018_v27 = vld [vmem:[#allocation52_spill] sm:$0xff] }
 0x81a   :  { %12346 = vrot.lane.b32.xlu0 %v12345_v10, %s12883_s12  ;;  %v18190_v60 = vpop.permute.xlu0 %10751  ;;  %v18193_v44 = vrot.slane %v9309_v45, %v13041_v29  ;;  %v18196_v36 = vrot.slane %v9324_v20, %v13041_v29  ;;  %v18199_v10 = vrot.slane %v9189_v48, %v13041_v29  ;;  %v18202_v30 = vrot.slane %v9325_v38, %v13041_v29  ;;  %v21019_v61 = vld [vmem:[#allocation36_spill] sm:$0xff] }
 0x81b   :  { %21016 = vst [vmem:[#allocation18_spill] sm:$0xff] %v18186_v54  ;;  %12281 = vrot.lane.b32.xlu1 %v12280_v4, %s12888_s19  ;;  %v10371_v4 = vcombine.high %v18182_v24, %v18186_v54  ;;  %v10386_v59 = vcombine.low %v10353_v18, %v10369_v53  ;;  %v10387_v55 = vcombine.high %v10353_v18, %v10369_v53  ;;  %v21038_v24 = vld [vmem:[#allocation55_spill] sm:$0xff] }
 0x81c   :  { %v18214_v48 = vrot.slane %v9705_v39, %v13041_v29  ;;  %v18220_v6 = vrot.slane %v10250_v28, %v13041_v29  ;;  %v12365_v28 = vpack.i.bf16 %v21019_v61, %v21018_v27  ;;  %v18240_v38 = vrot.slane %v9841_v58, %v13041_v29 }
 0x81d   :  { %v18224_v45 = vrot.slane %v10371_v4, %v13041_v29  ;;  %v18227_v20 = vrot.slane %v10386_v59, %v13041_v29  ;;  %v18233_v39 = vrot.slane %v10387_v55, %v13041_v29  ;;  %v18248_v18 = vcombine.high %v18196_v36, %v20337_v34 }
 0x81e   :  { %12356 = vrot.lane.b32.xlu0 %v12355_v62, %s12886_s15  ;;  %21017 = vst [vmem:[#allocation86_spill] sm:$0xff] %v18214_v48  ;;  %v18230_v62 = vrot.slane %v10251_v31, %v13041_v29  ;;  %v18235_v43 = vpop.permute.xlu0 %10755  ;;  %21020 = vst [vmem:[#allocation90_spill] sm:$0xff] %v18240_v38  ;;  %v18250_v31 = vpop.permute.xlu1 %10164  ;;  %v18254_v53 = vcombine.high %v18153_v21, %v20337_v34  ;;  %v18258_v4 = vcombine.high %v18164_v9, %v20337_v34 }
 0x81f   :  { %12291 = vrot.lane.b32.xlu1 %v12290_v33, %s12887_s16  ;;  %v18244_v33 = vcombine.high %v18193_v44, %v20337_v34  ;;  %21022 = vst [vmem:[#allocation117_spill] sm:$0xff] %v18248_v18  ;;  %v18262_v58 = vcombine.high %v18199_v10, %v20337_v34  ;;  %v18266_v59 = vcombine.high %v18202_v30, %v20337_v34  ;;  %v21037_v18 = vld [vmem:[#allocation14_spill] sm:$0xff] }
 0x820   :  { %21023 = vst [vmem:[#allocation116_spill] sm:$0xff] %v18254_v53  ;;  %21024 = vst [vmem:[#allocation78_spill] sm:$0xff] %v18258_v4  ;;  %v18271_v55 = vcombine.high %v18217_v5, %v20337_v34  ;;  %v18275_v27 = vcombine.high %v18224_v45, %v20337_v34  ;;  %v18279_v61 = vcombine.high %v18220_v6, %v20337_v34 }
 0x821   :  { %21021 = vst [vmem:[#allocation19_spill] sm:$0xff] %v18244_v33  ;;  %21025 = vst [vmem:[#allocation118_spill] sm:$0xff] %v18262_v58  ;;  %v18283_v32 = vcombine.high %v18227_v20, %v20337_v34  ;;  %v18292_v8 = vcombine.high %v18233_v39, %v20337_v34  ;;  %v10270_v42 = vcombine.low %v18174_v40, %v18250_v31 }
 0x822   :  { %21026 = vst [vmem:[#allocation12_spill] sm:$0xff] %v18266_v59  ;;  %12366 = vrot.lane.b32.xlu0 %v12365_v28, %s12884_s13  ;;  %21027 = vst [vmem:[#allocation28_spill] sm:$0xff] %v18271_v55  ;;  %v18288_v28 = vcombine.high %v18230_v62, %v20337_v34  ;;  %v18300_v49 = vpop.permute.xlu0 %10759  ;;  %v10169_v23 = vpop.permute.xlu1 %10168  ;;  %v12310_v2 = vpack.i.bf16 %v18138_v51, %v18125_v35  ;;  %v9873_v13 = vcombine.high %v18240_v38, %v20337_v34  ;;  %v21048_v55 = vld [vmem:[#allocation98_spill] sm:$0xff] }
 0x823   :  { %21028 = vst [vmem:[#allocation48_spill] sm:$0xff] %v18275_v27  ;;  %21029 = vst [vmem:[#allocation89_spill] sm:$0xff] %v18279_v61  ;;  %12301 = vrot.lane.b32.xlu1 %v12300_v12, %s12882_s11  ;;  %v21033_v12 = vld [vmem:[#allocation51_spill] sm:$0xff]  ;;  %v9737_v35 = vcombine.high %v18214_v48, %v20337_v34  ;;  %v18324_v51 = vrot.slane %v10270_v42, %v20785_v47  ;;  %v12385_v58 = vpack.i.bf16 %v21038_v24, %v21037_v18  ;;  %v21039_v24 = vld [vmem:[#allocation21_spill] sm:$0xff] }
 0x824   :  { %21030 = vst [vmem:[#allocation52_spill] sm:$0xff] %v18283_v32  ;;  %21031 = vst [vmem:[#allocation36_spill] sm:$0xff] %v18288_v28  ;;  %v12375_v54 = vpack.i.bf16 %v21034_v14, %v21033_v12  ;;  %v10286_v14 = vcombine.low %v18208_v52, %v10169_v23  ;;  %v10799_v12 = vcombine.low %v18190_v60, %v18300_v49  ;;  %v21041_v28 = vld [vmem:[#allocation41_spill] sm:$0xff]  ;;  %v21043_v61 = vld [vmem:[#allocation67_spill] sm:$0xff] }
 0x825   :  { %21032 = vst [vmem:[#allocation133_spill] sm:$0xff] %v18292_v8  ;;  %21035 = vst [vmem:[#allocation51_spill] sm:$0xff] %v18324_v51  ;;  %v12320_v53 = vpack.i.bf16 %v9873_v13, %v9737_v35  ;;  %v9738_v18 = vcombine.high %v21039_v24, %v20337_v34  ;;  %v21040_v35 = vld [vmem:[#allocation64_spill] sm:$0xff]  ;;  %v21050_v48 = vld [vmem:[#allocation103_spill] sm:$0xff] }
 0x826   :  { %12376 = vrot.lane.b32.xlu0 %v12375_v54, %s12885_s14  ;;  %v18327_v4 = vrot.slane %v10286_v14, %v20785_v47  ;;  %v10764_v46 = vpop.permute.xlu0 %10763  ;;  %v10173_v59 = vpop.permute.xlu1 %10172  ;;  %v18338_v42 = vrot.slane %v10799_v12, %v20785_v47  ;;  %v9875_v12 = vcombine.high %v17839_v3, %v20337_v34  ;;  %v21042_v24 = vld [vmem:[#allocation40_spill] sm:$0xff] }
 0x827   :  { %12311 = vrot.lane.b32.xlu1 %v12310_v2, %s12883_s12  ;;  %v10815_v54 = vcombine.low %v18235_v43, %v10764_v46  ;;  %v9874_v2 = vcombine.high %v17794_v63, %v20337_v34  ;;  %v12395_v63 = vpack.i.bf16 %v21041_v28, %v21040_v35  ;;  %v12405_v32 = vpack.i.bf16 %v21043_v61, %v21042_v24 }
 0x828   :  { %21036 = vst [vmem:[#allocation10_spill] sm:$0xff] %v18327_v4  ;;  %v9876_v28 = vcombine.high %v17939_v56, %v20337_v34  ;;  %v10816_v3 = vcombine.high %v18235_v43, %v10764_v46  ;;  %v10287_v61 = vcombine.high %v18208_v52, %v10169_v23  ;;  %v21046_v43 = vld [vmem:[#allocation46_spill] sm:$0xff]  ;;  %v21052_v23 = vld [vmem:[#allocation23_spill] sm:$0xff]  ;;  %v21053_v52 = vld [vmem:[#allocation60_spill] sm:$0xff] }
 0x829   :  { %v18341_v14 = vrot.slane %v10815_v54, %v20785_v47 }
 0x82a   :  { %12386 = vrot.lane.b32.xlu0 %v12385_v58, %s12886_s15  ;;  %v10768_v13 = vpop.permute.xlu0 %10767  ;;  %v10177_v8 = vpop.permute.xlu1 %10176  ;;  %v12330_v58 = vpack.i.bf16 %v9874_v2, %v9738_v18  ;;  %v10271_v2 = vcombine.high %v18174_v40, %v18250_v31  ;;  %v9740_v18 = vcombine.high %v17816_v41, %v20337_v34  ;;  %v21049_v41 = vld [vmem:[#allocation68_spill] sm:$0xff] }
 0x82b   :  { %12321 = vrot.lane.b32.xlu1 %v12320_v53, %s12888_s19  ;;  %v9739_v53 = vcombine.high %v17813_v37, %v20337_v34  ;;  %v10800_v37 = vcombine.high %v18190_v60, %v18300_v49  ;;  %v12360_v27 = vpack.i.bf16 %v21049_v41, %v21048_v55  ;;  %v21051_v49 = vld [vmem:[#allocation104_spill] sm:$0xff] }
 0x82c   :  { %v12350_v31 = vpack.i.bf16 %v9876_v28, %v9740_v18  ;;  %v12435_v60 = vpack.i.bf16 %v21051_v49, %v21050_v48  ;;  %v10301_v18 = vrot.slane %v10287_v61, %v20785_v47  ;;  %v10832_v61 = vcombine.high %v18338_v42, %v18341_v14 }
 0x82d   :  { %v12340_v33 = vpack.i.bf16 %v9875_v12, %v9739_v53  ;;  %v21044_v12 = vld [vmem:[#allocation25_spill] sm:$0xff]  ;;  %v10814_v28 = vrot.slane %v10800_v37, %v20785_v47  ;;  %v10303_v37 = vcombine.high %v18324_v51, %v18327_v4  ;;  %v21069_v51 = vld [vmem:[#allocation30_spill] sm:$0xff] }
 0x82e   :  { %12396 = vrot.lane.b32.xlu0 %v12395_v63, %s12884_s13  ;;  %v10772_v54 = vpop.permute.xlu0 %10771  ;;  %v10181_v35 = vpop.permute.xlu1 %10180  ;;  %v21045_v53 = vld [vmem:[#allocation93_spill] sm:$0xff] }
 0x82f   :  { %12331 = vrot.lane.b32.xlu1 %v12330_v58, %s12887_s16  ;;  %v10406_v56 = vcombine.low %v10173_v59, %v10181_v35  ;;  %v10407_v63 = vcombine.high %v10173_v59, %v10181_v35  ;;  %v12415_v40 = vpack.i.bf16 %v21045_v53, %v21044_v12  ;;  %v10285_v59 = vrot.slane %v10271_v2, %v20785_v47 }
 0x830   :  { %v10830_v35 = vrot.slane %v10816_v3, %v20785_v47 }
 0x831   :  { %v18387_v48 = vrot.slane %v10406_v56, %v20785_v47  ;;  %v10318_v49 = vcombine.low %v10285_v59, %v10301_v18 }
 0x832   :  { %12406 = vrot.lane.b32.xlu0 %v12405_v32, %s12885_s14  ;;  %v10776_v58 = vpop.permute.xlu0 %10775  ;;  %v10185_v46 = vpop.permute.xlu1 %10184  ;;  %v21047_v32 = vld [vmem:[#allocation47_spill] sm:$0xff]  ;;  %v10847_v56 = vcombine.low %v10814_v28, %v10830_v35 }
 0x833   :  { %12341 = vrot.lane.b32.xlu1 %v12340_v33, %s12882_s11  ;;  %v12425_v24 = vpack.i.bf16 %v21047_v32, %v21046_v43  ;;  %v12370_v33 = vpack.i.bf16 %v21053_v52, %v21052_v23  ;;  %v10422_v38 = vcombine.low %v10177_v8, %v10185_v46  ;;  %v10423_v12 = vcombine.high %v10177_v8, %v10185_v46 }
 0x834   :  { %v10935_v53 = vcombine.low %v10768_v13, %v10776_v58  ;;  %v10936_v55 = vcombine.high %v10768_v13, %v10776_v58  ;;  %v10421_v43 = vrot.slane %v10407_v63, %v20785_v47  ;;  %v10319_v23 = vcombine.high %v10285_v59, %v10301_v18 }
 0x835   :  { %v18391_v2 = vrot.slane %v10422_v38, %v20785_v47  ;;  %v10437_v8 = vrot.slane %v10423_v12, %v20785_v47  ;;  %v10848_v52 = vcombine.high %v10814_v28, %v10830_v35  ;;  %v18430_v59 = vrot.slane %v10847_v56, %v13041_v29 }
 0x836   :  { %12416 = vrot.lane.b32.xlu0 %v12415_v40, %s12886_s15  ;;  %v10780_v3 = vpop.permute.xlu0 %10779  ;;  %v18398_v40 = vpop.permute.xlu1 %10753  ;;  %v18406_v46 = vrot.slane %v10935_v53, %v20785_v47  ;;  %v10950_v32 = vrot.slane %v10936_v55, %v20785_v47  ;;  %v18433_v35 = vrot.slane %v10303_v37, %v13041_v29  ;;  %v12445_v37 = vpack.i.bf16 %v17920_v15, %v17913_v57 }
 0x837   :  { %12351 = vrot.lane.b32.xlu1 %v12350_v31, %s12883_s12  ;;  %21054 = vst [vmem:[#allocation14_spill] sm:$0xff] %v18391_v2  ;;  %v10951_v13 = vcombine.low %v10772_v54, %v10780_v3  ;;  %v10952_v58 = vcombine.high %v10772_v54, %v10780_v3  ;;  %v10439_v38 = vcombine.high %v18387_v48, %v18391_v2 }
 0x838   :  { %v10454_v31 = vcombine.low %v10421_v43, %v10437_v8  ;;  %v10455_v18 = vcombine.high %v10421_v43, %v10437_v8  ;;  %v18456_v43 = vrot.slane %v10318_v49, %v13041_v29  ;;  %v18476_v15 = vcombine.high %v18430_v59, %v20337_v34 }
 0x839   :  { %v18410_v41 = vrot.slane %v10951_v13, %v20785_v47  ;;  %v10966_v54 = vrot.slane %v10952_v58, %v20785_v47  ;;  %v18417_v3 = vrot.slane %v10439_v38, %v13041_v29  ;;  %v18453_v38 = vrot.slane %v10848_v52, %v13041_v29 }
 0x83a   :  { %12426 = vrot.lane.b32.xlu0 %v12425_v24, %s12884_s13  ;;  %v18414_v12 = vpop.permute.xlu0 %12161  ;;  %v18423_v63 = vpop.permute.xlu1 %10757  ;;  %v18436_v28 = vrot.slane %v10454_v31, %v13041_v29  ;;  %v21058_v31 = vld [vmem:[#allocation59_spill] sm:$0xff]  ;;  %v18480_v49 = vcombine.high %v18433_v35, %v20337_v34 }
 0x83b   :  { %12361 = vrot.lane.b32.xlu1 %v12360_v27, %s12886_s15  ;;  %21055 = vst [vmem:[#allocation55_spill] sm:$0xff] %v18414_v12  ;;  %v10968_v53 = vcombine.high %v18406_v46, %v18410_v41  ;;  %v10983_v55 = vcombine.low %v10950_v32, %v10966_v54  ;;  %v10984_v13 = vcombine.high %v10950_v32, %v10966_v54  ;;  %v21059_v32 = vld [vmem:[#allocation99_spill] sm:$0xff]  ;;  %v21067_v12 = vld [vmem:[#allocation6_spill] sm:$0xff] }
 0x83c   :  { %v18427_v27 = vrot.slane %v10832_v61, %v13041_v29  ;;  %v12380_v54 = vpack.i.bf16 %v21059_v32, %v21058_v31  ;;  %21060 = vst [vmem:[#allocation41_spill] sm:$0xff] %v18480_v49  ;;  %v12465_v49 = vpack.i.bf16 %v17929_v0, %v17926_v50  ;;  %v21071_v0 = vld [vmem:[#allocation76_spill] sm:$0xff] }
 0x83d   :  { %v18440_v58 = vrot.slane %v10968_v53, %v13041_v29  ;;  %v18446_v61 = vrot.slane %v10984_v13, %v13041_v29  ;;  %v12455_v53 = vpack.i.bf16 %v17923_v19, %v17916_v16  ;;  %v18484_v16 = vcombine.high %v18436_v28, %v20337_v34 }
 0x83e   :  { %12436 = vrot.lane.b32.xlu0 %v12435_v60, %s12885_s14  ;;  %v18443_v60 = vrot.slane %v10983_v55, %v13041_v29  ;;  %v18448_v56 = vpop.permute.xlu0 %12166  ;;  %v10762_v8 = vpop.permute.xlu1 %10761  ;;  %v18467_v55 = vrot.slane %v10319_v23, %v13041_v29  ;;  %v18472_v57 = vcombine.high %v18427_v27, %v20337_v34  ;;  %v18488_v19 = vrot.slane %v10455_v18, %v13041_v29 }
 0x83f   :  { %12371 = vrot.lane.b32.xlu1 %v12370_v33, %s12884_s13  ;;  %21056 = vst [vmem:[#allocation21_spill] sm:$0xff] %v18448_v56  ;;  %v18460_v33 = vcombine.high %v18417_v3, %v20337_v34  ;;  %21061 = vst [vmem:[#allocation40_spill] sm:$0xff] %v18484_v16  ;;  %v18492_v23 = vcombine.high %v18440_v58, %v20337_v34  ;;  %v18500_v13 = vcombine.high %v18446_v61, %v20337_v34  ;;  %v21066_v56 = vld [vmem:[#allocation35_spill] sm:$0xff] }
 0x840   :  { %v18496_v52 = vcombine.high %v18443_v60, %v20337_v34  ;;  %v18507_v18 = vcombine.high %v18453_v38, %v20337_v34  ;;  %v12390_v4 = vpack.i.bf16 %v21067_v12, %v21066_v56  ;;  %v18530_v12 = vcombine.high %v18467_v55, %v20337_v34 }
 0x841   :  { %21057 = vst [vmem:[#allocation64_spill] sm:$0xff] %v18460_v33  ;;  %21062 = vst [vmem:[#allocation67_spill] sm:$0xff] %v18500_v13  ;;  %v18534_v56 = vcombine.high %v18488_v19, %v20337_v34 }
 0x842   :  { %12446 = vrot.lane.b32.xlu0 %v12445_v37, %s12886_s15  ;;  %v10867_v37 = vcombine.low %v18398_v40, %v10762_v8  ;;  %v18503_v31 = vpop.permute.xlu0 %12171  ;;  %21064 = vst [vmem:[#allocation93_spill] sm:$0xff] %v18507_v18  ;;  %v10766_v24 = vpop.permute.xlu1 %10765  ;;  %v21091_v18 = vld [vmem:[#allocation96_spill] sm:$0xff] }
 0x843   :  { %12381 = vrot.lane.b32.xlu1 %v12380_v54, %s12885_s14  ;;  %21063 = vst [vmem:[#allocation25_spill] sm:$0xff] %v18503_v31  ;;  %v18513_v54 = vcombine.high %v18456_v43, %v20337_v34  ;;  %v10883_v2 = vcombine.low %v18423_v63, %v10766_v24 }
 0x844   :  { %v18537_v31 = vrot.slane %v10867_v37, %v20785_v47  ;;  %v12475_v37 = vpack.i.bf16 %v18224_v45, %v18217_v5  ;;  %v12420_v5 = vpack.i.bf16 %v17887_v17, %v17847_v1 }
 0x845   :  { %21065 = vst [vmem:[#allocation46_spill] sm:$0xff] %v18513_v54  ;;  %v21070_v54 = vld [vmem:[#allocation45_spill] sm:$0xff] }
 0x846   :  { %12456 = vrot.lane.b32.xlu0 %v12455_v53, %s12884_s13  ;;  %v18540_v53 = vrot.slane %v10883_v2, %v20785_v47  ;;  %v18542_v32 = vpop.permute.xlu0 %12176  ;;  %v12400_v16 = vpack.i.bf16 %v21070_v54, %v21069_v51  ;;  %v10884_v51 = vcombine.high %v18423_v63, %v10766_v24 }
 0x847   :  { %12391 = vrot.lane.b32.xlu1 %v12390_v4, %s12886_s15  ;;  %21068 = vst [vmem:[#allocation47_spill] sm:$0xff] %v18542_v32  ;;  %v10770_v4 = vpop.permute.xlu1 %10769  ;;  %v21072_v32 = vld [vmem:[#allocation85_spill] sm:$0xff] }
 0x848   :  { %v12410_v13 = vpack.i.bf16 %v21072_v32, %v21071_v0  ;;  %v10898_v45 = vrot.slane %v10884_v51, %v20785_v47  ;;  %v12495_v32 = vpack.i.bf16 %v18233_v39, %v18230_v62  ;;  %v12505_v62 = vpack.i.bf16 %v18440_v58, %v18427_v27  ;;  %v21073_v51 = vld [vmem:[#allocation13_spill] sm:$0xff] }
 0x84a   :  { %12466 = vrot.lane.b32.xlu0 %v12465_v49, %s12885_s14  ;;  %v18554_v2 = vpop.permute.xlu0 %12186  ;;  %v12485_v49 = vpack.i.bf16 %v18227_v20, %v18220_v6 }
 0x84b   :  { %12401 = vrot.lane.b32.xlu1 %v12400_v16, %s12884_s13  ;;  %v10774_v50 = vpop.permute.xlu1 %10773  ;;  %v10868_v16 = vcombine.high %v18398_v40, %v10762_v8  ;;  %v12430_v40 = vpack.i.bf16 %v17890_v26, %v17855_v7  ;;  %v10900_v8 = vcombine.high %v18537_v31, %v18540_v53 }
 0x84d   :  { %v10882_v6 = vrot.slane %v10868_v16, %v20785_v47 }
 0x84e   :  { %12476 = vrot.lane.b32.xlu0 %v12475_v37, %s12886_s15  ;;  %v18563_v54 = vpop.permute.xlu0 %12196 }
 0x84f   :  { %12411 = vrot.lane.b32.xlu1 %v12410_v13, %s12885_s14  ;;  %v10778_v33 = vpop.permute.xlu1 %10777  ;;  %v10915_v37 = vcombine.low %v10882_v6, %v10898_v45 }
 0x850   :  { %v11003_v63 = vcombine.low %v10770_v4, %v10778_v33  ;;  %v11004_v24 = vcombine.high %v10770_v4, %v10778_v33  ;;  %v10916_v33 = vcombine.high %v10882_v6, %v10898_v45  ;;  %v21074_v45 = vld [vmem:[#allocation100_spill] sm:$0xff] }
 0x851   :  { %v18616_v6 = vrot.slane %v10915_v37, %v13041_v29 }
 0x852   :  { %12486 = vrot.lane.b32.xlu0 %v12485_v49, %s12884_s13  ;;  %v18573_v13 = vpop.permute.xlu0 %12206  ;;  %v18587_v39 = vrot.slane %v11003_v63, %v20785_v47  ;;  %v11018_v4 = vrot.slane %v11004_v24, %v20785_v47  ;;  %v12440_v49 = vpack.i.bf16 %v21073_v51, %v17893_v11  ;;  %v12515_v11 = vpack.i.bf16 %v18443_v60, %v18430_v59  ;;  %v21077_v60 = vld [vmem:[#allocation8_spill] sm:$0xff] }
 0x853   :  { %12421 = vrot.lane.b32.xlu1 %v12420_v5, %s12886_s15  ;;  %v10782_v20 = vpop.permute.xlu1 %10781  ;;  %v12450_v59 = vpack.i.bf16 %v18193_v44, %v18153_v21 }
 0x854   :  { %v11019_v1 = vcombine.low %v10774_v50, %v10782_v20  ;;  %v11020_v17 = vcombine.high %v10774_v50, %v10782_v20 }
 0x856   :  { %12496 = vrot.lane.b32.xlu0 %v12495_v32, %s12885_s14  ;;  %v18591_v7 = vrot.slane %v11019_v1, %v20785_v47  ;;  %v11034_v26 = vrot.slane %v11020_v17, %v20785_v47  ;;  %v18594_v50 = vpop.permute.xlu0 %12216  ;;  %v21075_v47 = vld [vmem:[#allocation22_spill] sm:$0xff]  ;;  %v10914_v32 = vrot.slane %v10900_v8, %v13041_v29  ;;  %v18623_v17 = vrot.slane %v10916_v33, %v13041_v29  ;;  %v21078_v8 = vld [vmem:[#allocation11_spill] sm:$0xff] }
 0x857   :  { %12431 = vrot.lane.b32.xlu1 %v12430_v40, %s12884_s13  ;;  %v18596_v0 = vpop.permute.xlu1 %12146  ;;  %v21076_v63 = vcombine.low %v21074_v45, %v21075_v47  ;;  %v21079_v37 = vcombine.low %v21077_v60, %v21078_v8 }
 0x858   :  { %v11036_v58 = vcombine.high %v18587_v39, %v18591_v7  ;;  %v11051_v16 = vcombine.low %v11018_v4, %v11034_v26  ;;  %v11052_v5 = vcombine.high %v11018_v4, %v11034_v26  ;;  %v18643_v51 = vcombine.high %v10914_v32, %v20337_v34 }
 0x859   :  { %v18609_v24 = vrot.slane %v21076_v63, %v13041_v29  ;;  %v18636_v26 = vrot.slane %v21079_v37, %v13041_v29  ;;  %v12460_v63 = vpack.i.bf16 %v18196_v36, %v18164_v9  ;;  %v12470_v36 = vpack.i.bf16 %v18202_v30, %v18199_v10  ;;  %v21086_v10 = vld [vmem:[#allocation42_spill] sm:$0xff]  ;;  %v21087_v30 = vld [vmem:[#allocation29_spill] sm:$0xff] }
 0x85a   :  { %12506 = vrot.lane.b32.xlu0 %v12505_v62, %s12886_s15  ;;  %v18618_v20 = vpop.permute.xlu0 %12226  ;;  %v11050_v40 = vrot.slane %v11036_v58, %v13041_v29  ;;  %v11059_v1 = vrot.slane %v11051_v16, %v13041_v29  ;;  %v18626_v62 = vrot.slane %v11052_v5, %v13041_v29  ;;  %v12525_v58 = vpack.i.bf16 %v18446_v61, %v18453_v38 }
 0x85b   :  { %12441 = vrot.lane.b32.xlu1 %v12440_v49, %s12885_s14  ;;  %v18628_v4 = vpop.permute.xlu1 %12151  ;;  %v6855_v33 = vcombine.high %v18609_v24, %v20337_v34  ;;  %v18657_v16 = vcombine.high %v18616_v6, %v20337_v34  ;;  %v18661_v5 = vcombine.high %v18623_v17, %v20337_v34  ;;  %v6719_v38 = vcombine.high %v18636_v26, %v20337_v34 }
 0x85c   :  { %v18646_v49 = vcombine.high %v11050_v40, %v20337_v34  ;;  %v18649_v21 = vcombine.high %v11059_v1, %v20337_v34  ;;  %v18665_v45 = vcombine.high %v18626_v62, %v20337_v34 }
 0x85d   :  { %21080 = vst [vmem:[#allocation98_spill] sm:$0xff] %v18657_v16  ;;  %21081 = vst [vmem:[#allocation68_spill] sm:$0xff] %v18661_v5  ;;  %v12535_v8 = vpack.i.bf16 %v6855_v33, %v6719_v38  ;;  %v21088_v38 = vcombine.low %v21086_v10, %v21087_v30 }
 0x85e   :  { %12516 = vrot.lane.b32.xlu0 %v12515_v11, %s12884_s13  ;;  %v18651_v44 = vpop.permute.xlu0 %12236  ;;  %21082 = vst [vmem:[#allocation103_spill] sm:$0xff] %v18665_v45  ;;  %v21084_v11 = vld [vmem:[#allocation7_spill] sm:$0xff] }
 0x85f   :  { %12451 = vrot.lane.b32.xlu1 %v12450_v59, %s12886_s15  ;;  %v18667_v47 = vpop.permute.xlu1 %12156  ;;  %v12480_v59 = vpack.i.bf16 %v18417_v3, %v18433_v35  ;;  %v12490_v3 = vpack.i.bf16 %v18436_v28, %v18456_v43  ;;  %v21090_v35 = vld [vmem:[#allocation95_spill] sm:$0xff]  ;;  %v12500_v28 = vpack.i.bf16 %v18488_v19, %v18467_v55  ;;  %v21100_v19 = vld [vmem:[#allocation38_spill] sm:$0xff] }
 0x860   :  { %v21097_v43 = vld [vmem:[#allocation43_spill] sm:$0xff] }
 0x862   :  { %12526 = vrot.lane.b32.xlu0 %v12525_v58, %s12885_s14  ;;  %v18681_v60 = vpop.permute.xlu0 %12241 }
 0x863   :  { %12461 = vrot.lane.b32.xlu1 %v12460_v63, %s12884_s13  ;;  %v18683_v9 = vpop.permute.xlu1 %12181  ;;  %v21083_v63 = vld [vmem:[#allocation39_spill] sm:$0xff] }
 0x864   :  { %v21085_v33 = vpack.i.bf16 %v21083_v63, %v21084_v11  ;;  %v21092_v11 = vcombine.low %v21090_v35, %v21091_v18  ;;  %v21098_v18 = vld [vmem:[#allocation32_spill] sm:$0xff] }
 0x865   :  { %v21099_v35 = vpack.i.bf16 %v21097_v43, %v21098_v18  ;;  %v21101_v43 = vld [vmem:[#allocation53_spill] sm:$0xff] }
 0x866   :  { %12536 = vrot.lane.b32.xlu0 %v12535_v8, %s12888_s19  ;;  %v18704_v8 = vrot.slane %v21088_v38, %v13041_v29  ;;  %v18716_v63 = vrot.slane %v21092_v11, %v13041_v29  ;;  %v21102_v18 = vcombine.low %v21100_v19, %v21101_v43  ;;  %v21111_v19 = vld [vmem:[#allocation54_spill] sm:$0xff]  ;;  %v21112_v43 = vld [vmem:[#allocation44_spill] sm:$0xff] }
 0x867   :  { %12471 = vrot.lane.b32.xlu1 %v12470_v36, %s12885_s14  ;;  %v18691_v58 = vpop.permute.xlu1 %12191 }
 0x868   :  { %v18689_v37 = vpop.permute.xlu0 %12246  ;;  %21089 = vst [vmem:[#allocation104_spill] sm:$0xff] %v18704_v8  ;;  %21093 = vst [vmem:[#allocation23_spill] sm:$0xff] %v18716_v63  ;;  %v7545_v30 = vcombine.high %v18704_v8, %v20337_v34 }
 0x86a   :  { %12546 = vrot.lane.b32.xlu0 %v21085_v33, %s12887_s16  ;;  %v21095_v33 = vld [vmem:[#allocation91_spill] sm:$0xff] }
 0x86b   :  { %12481 = vrot.lane.b32.xlu1 %v12480_v59, %s12886_s15  ;;  %v18708_v61 = vpop.permute.xlu1 %12201  ;;  %v21094_v59 = vld [vmem:[#allocation94_spill] sm:$0xff] }
 0x86c   :  { %v18706_v36 = vpop.permute.xlu0 %12251  ;;  %v21096_v27 = vpack.i.bf16 %v21094_v59, %v21095_v33  ;;  %v12510_v33 = vpack.i.bf16 %v11050_v40, %v10914_v32  ;;  %v21107_v40 = vld [vmem:[#allocation49_spill] sm:$0xff] }
 0x86e   :  { %12556 = vrot.lane.b32.xlu0 %v21096_v27, %s12882_s11  ;;  %v7409_v27 = vcombine.high %v18716_v63, %v20337_v34 }
 0x86f   :  { %12491 = vrot.lane.b32.xlu1 %v12490_v3, %s12884_s13  ;;  %v18727_v38 = vpop.permute.xlu1 %12211 }
 0x870   :  { %v18723_v10 = vpop.permute.xlu0 %12276  ;;  %v12575_v11 = vpack.i.bf16 %v7545_v30, %v7409_v27  ;;  %v21104_v30 = vld [vmem:[#allocation58_spill] sm:$0xff]  ;;  %v21105_v27 = vld [vmem:[#allocation9_spill] sm:$0xff] }
 0x871   :  { %v21106_v32 = vpack.i.bf16 %v21104_v30, %v21105_v27  ;;  %v12530_v30 = vpack.i.bf16 %v18626_v62, %v18623_v17 }
 0x872   :  { %12566 = vrot.lane.b32.xlu0 %v21099_v35, %s12883_s12  ;;  %v18750_v35 = vrot.slane %v21102_v18, %v13041_v29  ;;  %v21113_v18 = vcombine.low %v21111_v19, %v21112_v43  ;;  %v21121_v19 = vld [vmem:[#allocation33_spill] sm:$0xff] }
 0x873   :  { %12501 = vrot.lane.b32.xlu1 %v12500_v28, %s12885_s14  ;;  %v18740_v59 = vpop.permute.xlu1 %12221  ;;  %v12520_v28 = vpack.i.bf16 %v11059_v1, %v18616_v6 }
 0x874   :  { %v18738_v3 = vpop.permute.xlu0 %12286  ;;  %21103 = vst [vmem:[#allocation60_spill] sm:$0xff] %v18750_v35  ;;  %v18770_v5 = vrot.slane %v21113_v18, %v13041_v29  ;;  %v6923_v27 = vcombine.high %v18750_v35, %v20337_v34 }
 0x876   :  { %12576 = vrot.lane.b32.xlu0 %v12575_v11, %s12888_s19  ;;  %v21108_v11 = vld [vmem:[#allocation101_spill] sm:$0xff]  ;;  %21114 = vst [vmem:[#allocation99_spill] sm:$0xff] %v18770_v5  ;;  %v8675_v62 = vcombine.high %v18770_v5, %v20337_v34 }
 0x877   :  { %12511 = vrot.lane.b32.xlu1 %v12510_v33, %s12886_s15  ;;  %v18752_v63 = vpop.permute.xlu1 %12231  ;;  %v21109_v33 = vcombine.low %v21107_v40, %v21108_v11  ;;  %v21117_v40 = vld [vmem:[#allocation92_spill] sm:$0xff] }
 0x878   :  { %v18744_v55 = vpop.permute.xlu0 %12296 }
 0x879   :  { %v18763_v8 = vrot.slane %v21109_v33, %v13041_v29  ;;  %v21120_v33 = vld [vmem:[#allocation66_spill] sm:$0xff] }
 0x87a   :  { %12586 = vrot.lane.b32.xlu0 %v21106_v32, %s12887_s16  ;;  %v21116_v32 = vld [vmem:[#allocation73_spill] sm:$0xff]  ;;  %v21122_v43 = vpack.i.bf16 %v21120_v33, %v21121_v19 }
 0x87b   :  { %21110 = vst [vmem:[#allocation59_spill] sm:$0xff] %v18763_v8  ;;  %12521 = vrot.lane.b32.xlu1 %v12520_v28, %s12884_s13  ;;  %v18774_v1 = vpop.permute.xlu1 %12256  ;;  %v21118_v28 = vcombine.low %v21116_v32, %v21117_v40  ;;  %v6787_v18 = vcombine.high %v18763_v8, %v20337_v34  ;;  %v21123_v40 = vld [vmem:[#allocation17_spill] sm:$0xff] }
 0x87c   :  { %v18772_v6 = vpop.permute.xlu0 %12306 }
 0x87d   :  { %21115 = vst [vmem:[#allocation35_spill] sm:$0xff] %v18772_v6  ;;  %v18784_v11 = vrot.slane %v21118_v28, %v13041_v29  ;;  %v12540_v32 = vpack.i.bf16 %v6923_v27, %v6787_v18  ;;  %v21124_v28 = vld [vmem:[#allocation16_spill] sm:$0xff]  ;;  %v12208_v27 = vunpack.i.l.bf16 %v18573_v13 }
 0x87e   :  { %12596 = vrot.lane.b32.xlu0 %v21122_v43, %s12882_s11  ;;  %v21125_v16 = vpack.i.bf16 %v21123_v40, %v21124_v28  ;;  %v12209_v43 = vunpack.i.h.bf16 %v18573_v13 }
 0x87f   :  { %21119 = vst [vmem:[#allocation6_spill] sm:$0xff] %v18784_v11  ;;  %12531 = vrot.lane.b32.xlu1 %v12530_v30, %s12885_s14  ;;  %v18795_v45 = vpop.permute.xlu1 %12261  ;;  %v8539_v30 = vcombine.high %v18784_v11, %v20337_v34 }
 0x880   :  { %v12317_v17 = vpop.permute.xlu0 %12316 }
 0x881   :  { %v12319_v35 = vunpack.i.h.bf16 %v12317_v17  ;;  %v12318_v6 = vunpack.i.l.bf16 %v12317_v17  ;;  %v12615_v17 = vpack.i.bf16 %v8675_v62, %v8539_v30  ;;  %v12219_v62 = vunpack.i.h.bf16 %v18594_v50 }
 0x882   :  { %12606 = vrot.lane.b32.xlu0 %v21125_v16, %s12883_s12 }
 0x883   :  { %v9990_v33 = vsel %vm869_vm3, %v18005_v25, %v12319_v35  ;;  %v9989_v19 = vsel %vm869_vm3, %v18027_v22, %v12318_v6  ;;  %12541 = vrot.lane.b32.xlu1 %v12540_v32, %s12888_s19  ;;  %v21127_v35 = vld [vmem:[#allocation87_spill] sm:$0xff]  ;;  %v21128_v6 = vld [vmem:[#allocation65_spill] sm:$0xff]  ;;  %v12218_v32 = vunpack.i.l.bf16 %v18594_v50 }
 0x884   :  { %v12327_v18 = vpop.permute.xlu0 %12326  ;;  %v18810_v16 = vpop.permute.xlu1 %12266  ;;  %v9991_v28 = vsel %vm872_vm4, %v9989_v19, %v12208_v27  ;;  %v9992_v11 = vsel %vm872_vm4, %v9990_v33, %v12209_v43  ;;  %v21129_v13 = vpack.i.bf16 %v21127_v35, %v21128_v6  ;;  %v21130_v19 = vld [vmem:[#allocation37_spill] sm:$0xff]  ;;  %v21131_v27 = vld [vmem:[#allocation56_spill] sm:$0xff]  ;;  %v21136_v35 = vld [vmem:[#allocation111_spill] sm:$0xff] }
 0x885   :  { %v12329_v5 = vunpack.i.h.bf16 %v12327_v18  ;;  %v12328_v40 = vunpack.i.l.bf16 %v12327_v18  ;;  %21126 = vst [vmem:[#allocation30_spill] sm:$0xff] %v18810_v16  ;;  %v21132_v33 = vcombine.low %v21130_v19, %v21131_v27  ;;  %v21138_v50 = vld [vmem:[#allocation61_spill] sm:$0xff] }
 0x886   :  { %12616 = vrot.lane.b32.xlu0 %v12615_v17, %s12888_s19 }
 0x887   :  { %v9993_v22 = vsel %vm875_vm5, %v9991_v28, %v12328_v40  ;;  %v9994_v25 = vsel %vm875_vm5, %v9992_v11, %v12329_v5  ;;  %12551 = vrot.lane.b32.xlu1 %v21129_v13, %s12887_s16  ;;  %v18827_v43 = vrot.slane %v21132_v33, %v13041_v29  ;;  %v21135_v28 = vld [vmem:[#allocation112_spill] sm:$0xff]  ;;  %v21139_v13 = vld [vmem:[#allocation57_spill] sm:$0xff]  ;;  %v21142_v33 = vld [vmem:[#allocation71_spill] sm:$0xff] }
 0x888   :  { %v12337_v30 = vpop.permute.xlu0 %12336  ;;  %v9995_v5 = vsel %vm878_vm6, %v9993_v22, %v12218_v32  ;;  %v9996_v11 = vsel %vm878_vm6, %v9994_v25, %v12219_v62  ;;  %v21137_v6 = vpack.i.bf16 %v21135_v28, %v21136_v35  ;;  %v21140_v8 = vcombine.low %v21138_v50, %v21139_v13  ;;  %v21143_v22 = vld [vmem:[#allocation77_spill] sm:$0xff]  ;;  %v21145_v25 = vld [vmem:[#allocation80_spill] sm:$0xff]  ;;  %v21146_v62 = vld [vmem:[#allocation31_spill] sm:$0xff] }
 0x889   :  { %21133 = vst [vmem:[#allocation45_spill] sm:$0xff] %v18827_v43  ;;  %v12339_v18 = vunpack.i.h.bf16 %v12337_v30  ;;  %v12338_v17 = vunpack.i.l.bf16 %v12337_v30  ;;  %v18829_v40 = vpop.permute.xlu1 %12271  ;;  %v21144_v32 = vpack.i.bf16 %v21142_v33, %v21143_v22  ;;  %v21147_v28 = vcombine.low %v21145_v25, %v21146_v62  ;;  %v21151_v33 = vld [vmem:[#allocation120_spill] sm:$0xff]  ;;  %v21154_v25 = vld [vmem:[#allocation114_spill] sm:$0xff]  ;;  %v21155_v62 = vld [vmem:[#allocation113_spill] sm:$0xff] }
 0x88a   :  { %21134 = vst [vmem:[#allocation76_spill] sm:$0xff] %v18829_v40  ;;  %12626 = vrot.lane.b32.xlu0 %v21137_v6, %s12887_s16  ;;  %v18841_v19 = vrot.slane %v21140_v8, %v13041_v29  ;;  %v12229_v6 = vunpack.i.h.bf16 %v18618_v20  ;;  %v12228_v8 = vunpack.i.l.bf16 %v18618_v20  ;;  %v21157_v40 = vld [vmem:[#allocation62_spill] sm:$0xff] }
 0x88b   :  { %v9997_v27 = vsel %vm881_vm7, %v9995_v5, %v12338_v17  ;;  %v9998_v30 = vsel %vm881_vm7, %v9996_v11, %v12339_v18  ;;  %12561 = vrot.lane.b32.xlu1 %v21144_v32, %s12882_s11  ;;  %v18853_v35 = vrot.slane %v21147_v28, %v13041_v29  ;;  %v7613_v18 = vcombine.high %v18827_v43, %v20337_v34  ;;  %v21150_v11 = vld [vmem:[#allocation119_spill] sm:$0xff] }
 0x88c   :  { %21141 = vst [vmem:[#allocation85_spill] sm:$0xff] %v18841_v19  ;;  %v12347_v50 = vpop.permute.xlu0 %12346  ;;  %v21152_v22 = vcombine.low %v21150_v11, %v21151_v33  ;;  %v21156_v28 = vpack.i.bf16 %v21154_v25, %v21155_v62  ;;  %v9999_v20 = vsel %vm884_vm8, %v9997_v27, %v12228_v8  ;;  %v7477_v43 = vcombine.high %v18841_v19, %v20337_v34  ;;  %v21167_v62 = vld [vmem:[#allocation105_spill] sm:$0xff] }
 0x88d   :  { %21148 = vst [vmem:[#allocation13_spill] sm:$0xff] %v18853_v35  ;;  %v12349_v13 = vunpack.i.h.bf16 %v12347_v50  ;;  %v12348_v17 = vunpack.i.l.bf16 %v12347_v50  ;;  %v18857_v5 = vpop.permute.xlu1 %12281  ;;  %v10000_v50 = vsel %vm884_vm8, %v9998_v30, %v12229_v6  ;;  %v9272_v27 = vcombine.high %v18853_v35, %v20337_v34 }
 0x88e   :  { %21149 = vst [vmem:[#allocation100_spill] sm:$0xff] %v18857_v5  ;;  %v18865_v32 = vrot.slane %v21152_v22, %v13041_v29  ;;  %12636 = vrot.lane.b32.xlu0 %v21156_v28, %s12882_s11  ;;  %v21158_v5 = vld [vmem:[#allocation63_spill] sm:$0xff]  ;;  %v12580_v6 = vpack.i.bf16 %v7613_v18, %v7477_v43 }
 0x88f   :  { %v21159_v16 = vpack.i.bf16 %v21157_v40, %v21158_v5  ;;  %v18880_v11 = vsel %vm887_vm9, %v9999_v20, %v12348_v17  ;;  %v18883_v33 = vsel %vm887_vm9, %v10000_v50, %v12349_v13  ;;  %v21163_v40 = vld [vmem:[#allocation115_spill] sm:$0xff]  ;;  %v21172_v50 = vld [vmem:[#allocation102_spill] sm:$0xff] }
 0x890   :  { %21153 = vst [vmem:[#allocation22_spill] sm:$0xff] %v18865_v32  ;;  %21160 = vst [vmem:[#allocation8_spill] sm:$0xff] %v18880_v11  ;;  %v18885_v22 = vpop.permute.xlu0 %12356  ;;  %v9136_v17 = vcombine.high %v18865_v32, %v20337_v34  ;;  %v21168_v43 = vld [vmem:[#allocation107_spill] sm:$0xff]  ;;  %v21184_v11 = vld [vmem:[#allocation108_spill] sm:$0xff] }
 0x891   :  { %12571 = vrot.lane.b32.xlu1 %v21159_v16, %s12883_s12  ;;  %21161 = vst [vmem:[#allocation11_spill] sm:$0xff] %v18883_v33  ;;  %v18889_v30 = vpop.permute.xlu1 %12291  ;;  %v21164_v16 = vld [vmem:[#allocation50_spill] sm:$0xff]  ;;  %v21169_v18 = vpack.i.bf16 %v21167_v62, %v21168_v43  ;;  %v21171_v20 = vld [vmem:[#allocation83_spill] sm:$0xff]  ;;  %v21180_v33 = vld [vmem:[#allocation69_spill] sm:$0xff] }
 0x892   :  { %21162 = vst [vmem:[#allocation39_spill] sm:$0xff] %v18889_v30  ;;  %v21165_v8 = vpack.i.bf16 %v21163_v40, %v21164_v16  ;;  %v12655_v5 = vpack.i.bf16 %v9272_v27, %v9136_v17  ;;  %v21173_v40 = vcombine.low %v21171_v20, %v21172_v50  ;;  %v21176_v27 = vld [vmem:[#allocation123_spill] sm:$0xff]  ;;  %v21186_v20 = vld [vmem:[#allocation81_spill] sm:$0xff]  ;;  %v21187_v50 = vld [vmem:[#allocation18_spill] sm:$0xff] }
 0x894   :  { %12646 = vrot.lane.b32.xlu0 %v21165_v8, %s12883_s12  ;;  %v18898_v13 = vpop.permute.xlu0 %12366  ;;  %v18913_v16 = vrot.slane %v21173_v40, %v13041_v29  ;;  %v21177_v8 = vld [vmem:[#allocation122_spill] sm:$0xff]  ;;  %v21188_v40 = vcombine.low %v21186_v20, %v21187_v50 }
 0x895   :  { %12581 = vrot.lane.b32.xlu1 %v12580_v6, %s12888_s19  ;;  %v18900_v25 = vpop.permute.xlu1 %12301  ;;  %v21178_v17 = vpack.i.bf16 %v21176_v27, %v21177_v8  ;;  %v21198_v50 = vld [vmem:[#allocation110_spill] sm:$0xff] }
 0x896   :  { %21166 = vst [vmem:[#allocation7_spill] sm:$0xff] %v18900_v25  ;;  %21174 = vst [vmem:[#allocation29_spill] sm:$0xff] %v18913_v16  ;;  %v18935_v35 = vrot.slane %v21188_v40, %v13041_v29  ;;  %v8743_v8 = vcombine.high %v18913_v16, %v20337_v34  ;;  %v21199_v40 = vld [vmem:[#allocation109_spill] sm:$0xff] }
 0x897   :  { %v21200_v25 = vpack.i.bf16 %v21198_v50, %v21199_v40 }
 0x898   :  { %12656 = vrot.lane.b32.xlu0 %v12655_v5, %s12888_s19  ;;  %v18907_v28 = vpop.permute.xlu0 %12376  ;;  %v21179_v5 = vld [vmem:[#allocation27_spill] sm:$0xff]  ;;  %21189 = vst [vmem:[#allocation94_spill] sm:$0xff] %v18935_v35 }
 0x899   :  { %12591 = vrot.lane.b32.xlu1 %v21169_v18, %s12887_s16  ;;  %21170 = vst [vmem:[#allocation42_spill] sm:$0xff] %v18907_v28  ;;  %v18915_v6 = vpop.permute.xlu1 %12311  ;;  %v21181_v62 = vcombine.low %v21179_v5, %v21180_v33  ;;  %v21183_v18 = vld [vmem:[#allocation106_spill] sm:$0xff] }
 0x89a   :  { %21175 = vst [vmem:[#allocation95_spill] sm:$0xff] %v18915_v6  ;;  %v21185_v32 = vpack.i.bf16 %v21183_v18, %v21184_v11  ;;  %v21191_v33 = vld [vmem:[#allocation130_spill] sm:$0xff]  ;;  %v21195_v18 = vld [vmem:[#allocation125_spill] sm:$0xff]  ;;  %v21196_v6 = vld [vmem:[#allocation124_spill] sm:$0xff] }
 0x89b   :  { %v18925_v43 = vrot.slane %v21181_v62, %v13041_v29  ;;  %v21197_v20 = vpack.i.bf16 %v21195_v18, %v21196_v6  ;;  %v10402_v6 = vcombine.high %v18935_v35, %v20337_v34  ;;  %v12214_v18 = vunpack.i.h.bf16 %v18727_v38  ;;  %v21204_v28 = vld [vmem:[#allocation126_spill] sm:$0xff] }
 0x89c   :  { %12666 = vrot.lane.b32.xlu0 %v21178_v17, %s12887_s16  ;;  %v18937_v19 = vpop.permute.xlu0 %12386  ;;  %v21192_v17 = vld [vmem:[#allocation131_spill] sm:$0xff]  ;;  %v12224_v35 = vunpack.i.h.bf16 %v18740_v59 }
 0x89d   :  { %21182 = vst [vmem:[#allocation96_spill] sm:$0xff] %v18925_v43  ;;  %12601 = vrot.lane.b32.xlu1 %v21185_v32, %s12882_s11  ;;  %21190 = vst [vmem:[#allocation91_spill] sm:$0xff] %v18937_v19  ;;  %v12322_v27 = vpop.permute.xlu1 %12321  ;;  %v21193_v5 = vcombine.low %v21191_v33, %v21192_v17  ;;  %v8607_v16 = vcombine.high %v18925_v43, %v20337_v34  ;;  %v21201_v19 = vld [vmem:[#allocation90_spill] sm:$0xff]  ;;  %v21203_v43 = vld [vmem:[#allocation127_spill] sm:$0xff] }
 0x89e   :  { %v12324_v11 = vunpack.i.h.bf16 %v12322_v27  ;;  %v12323_v32 = vunpack.i.l.bf16 %v12322_v27  ;;  %v21202_v17 = vld [vmem:[#allocation86_spill] sm:$0xff] }
 0x89f   :  { %v18945_v62 = vrot.slane %v21193_v5, %v13041_v29 }
 0x8a0   :  { %12676 = vrot.lane.b32.xlu0 %v21197_v20, %s12882_s11  ;;  %v10004_v33 = vsel %vm869_vm3, %v21201_v19, %v12324_v11  ;;  %v10003_v5 = vsel %vm869_vm3, %v21202_v17, %v12323_v32  ;;  %v18961_v27 = vpop.permute.xlu0 %12396  ;;  %v12213_v20 = vunpack.i.l.bf16 %v18727_v38  ;;  %v21205_v19 = vpack.i.bf16 %v21203_v43, %v21204_v28 }
 0x8a1   :  { %21194 = vst [vmem:[#allocation43_spill] sm:$0xff] %v18945_v62  ;;  %12611 = vrot.lane.b32.xlu1 %v21200_v25, %s12883_s12  ;;  %v12332_v50 = vpop.permute.xlu1 %12331  ;;  %v12620_v25 = vpack.i.bf16 %v8743_v8, %v8607_v16  ;;  %v10266_v11 = vcombine.high %v18945_v62, %v20337_v34  ;;  %v10006_v17 = vsel %vm872_vm4, %v10004_v33, %v12214_v18  ;;  %v12223_v28 = vunpack.i.l.bf16 %v18740_v59  ;;  %v21207_v18 = vld [vmem:[#allocation72_spill] sm:$0xff]  ;;  %v21209_v59 = vld [vmem:[#allocation15_spill] sm:$0xff] }
 0x8a2   :  { %v12334_v40 = vunpack.i.h.bf16 %v12332_v50  ;;  %v12333_v30 = vunpack.i.l.bf16 %v12332_v50  ;;  %v10005_v32 = vsel %vm872_vm4, %v10003_v5, %v12213_v20 }
 0x8a3   :  { %v12695_v50 = vpack.i.bf16 %v10402_v6, %v10266_v11  ;;  %v21210_v11 = vld [vmem:[#allocation88_spill] sm:$0xff] }
 0x8a4   :  { %12686 = vrot.lane.b32.xlu0 %v21205_v19, %s12883_s12  ;;  %v10007_v38 = vsel %vm875_vm5, %v10005_v32, %v12333_v30  ;;  %v10008_v16 = vsel %vm875_vm5, %v10006_v17, %v12334_v40  ;;  %v18978_v8 = vpop.permute.xlu0 %12406  ;;  %v21206_v30 = vld [vmem:[#allocation82_spill] sm:$0xff]  ;;  %v21211_v32 = vcombine.low %v21209_v59, %v21210_v11  ;;  %v21221_v11 = vld [vmem:[#allocation20_spill] sm:$0xff] }
 0x8a5   :  { %12621 = vrot.lane.b32.xlu1 %v12620_v25, %s12888_s19  ;;  %v12342_v43 = vpop.permute.xlu1 %12341  ;;  %v10009_v33 = vsel %vm878_vm6, %v10007_v38, %v12223_v28  ;;  %v10010_v5 = vsel %vm878_vm6, %v10008_v16, %v12224_v35  ;;  %v21208_v20 = vpack.i.bf16 %v21206_v30, %v21207_v18  ;;  %v12234_v38 = vunpack.i.h.bf16 %v18752_v63 }
 0x8a6   :  { %v12344_v19 = vunpack.i.h.bf16 %v12342_v43  ;;  %v12343_v62 = vunpack.i.l.bf16 %v12342_v43  ;;  %v18997_v17 = vrot.slane %v21211_v32, %v13041_v29  ;;  %v12233_v35 = vunpack.i.l.bf16 %v18752_v63  ;;  %v21213_v43 = vld [vmem:[#allocation48_spill] sm:$0xff]  ;;  %v21220_v63 = vld [vmem:[#allocation75_spill] sm:$0xff] }
 0x8a7   :  { %v21222_v32 = vpack.i.bf16 %v21220_v63, %v21221_v11  ;;  %v21235_v11 = vld [vmem:[#allocation133_spill] sm:$0xff] }
 0x8a8   :  { %12696 = vrot.lane.b32.xlu0 %v12695_v50, %s12888_s19  ;;  %v10011_v6 = vsel %vm881_vm7, %v10009_v33, %v12343_v62  ;;  %v10012_v25 = vsel %vm881_vm7, %v10010_v5, %v12344_v19  ;;  %v18991_v40 = vpop.permute.xlu0 %12416  ;;  %21212 = vst [vmem:[#allocation32_spill] sm:$0xff] %v18997_v17  ;;  %v21214_v62 = vld [vmem:[#allocation28_spill] sm:$0xff]  ;;  %v21217_v5 = vld [vmem:[#allocation129_spill] sm:$0xff] }
 0x8a9   :  { %12631 = vrot.lane.b32.xlu1 %v21208_v20, %s12887_s16  ;;  %v12352_v16 = vpop.permute.xlu1 %12351  ;;  %v21215_v33 = vpack.i.bf16 %v21213_v43, %v21214_v62  ;;  %v21216_v19 = vld [vmem:[#allocation128_spill] sm:$0xff]  ;;  %v10013_v20 = vsel %vm884_vm8, %v10011_v6, %v12233_v35  ;;  %v10014_v59 = vsel %vm884_vm8, %v10012_v25, %v12234_v38  ;;  %v9340_v38 = vcombine.high %v18997_v17, %v20337_v34  ;;  %v21275_v17 = vld [vmem:[#allocation25_spill] sm:$0xff] }
 0x8aa   :  { %v12354_v50 = vunpack.i.h.bf16 %v12352_v16  ;;  %v12353_v28 = vunpack.i.l.bf16 %v12352_v16  ;;  %v21218_v30 = vcombine.low %v21216_v19, %v21217_v5  ;;  %v21223_v16 = vcombine.low %v18406_v46, %v18410_v41  ;;  %v21229_v41 = vld [vmem:[#allocation52_spill] sm:$0xff] }
 0x8ab   :  { %v21227_v35 = vcombine.low %v18338_v42, %v18341_v14  ;;  %v21233_v5 = vld [vmem:[#allocation84_spill] sm:$0xff] }
 0x8ac   :  { %12706 = vrot.lane.b32.xlu0 %v21215_v33, %s12887_s16  ;;  %v19009_v18 = vrot.slane %v21218_v30, %v13041_v29  ;;  %v19021_v43 = vrot.slane %v21223_v16, %v13041_v29  ;;  %v19024_v62 = vsel %vm887_vm9, %v10013_v20, %v12353_v28  ;;  %v19027_v33 = vsel %vm887_vm9, %v10014_v59, %v12354_v50  ;;  %v19029_v6 = vpop.permute.xlu0 %12426  ;;  %v21230_v28 = vld [vmem:[#allocation89_spill] sm:$0xff] }
 0x8ad   :  { %12641 = vrot.lane.b32.xlu1 %v21222_v32, %s12882_s11  ;;  %21225 = vst [vmem:[#allocation58_spill] sm:$0xff] %v19024_v62  ;;  %21226 = vst [vmem:[#allocation9_spill] sm:$0xff] %v19027_v33  ;;  %v19031_v25 = vpop.permute.xlu1 %12361  ;;  %v19039_v46 = vrot.slane %v21227_v35, %v13041_v29  ;;  %v21231_v19 = vpack.i.bf16 %v21229_v41, %v21230_v28  ;;  %v21232_v50 = vld [vmem:[#allocation121_spill] sm:$0xff]  ;;  %v21236_v32 = vld [vmem:[#allocation36_spill] sm:$0xff] }
 0x8ae   :  { %21219 = vst [vmem:[#allocation38_spill] sm:$0xff] %v19009_v18  ;;  %21224 = vst [vmem:[#allocation53_spill] sm:$0xff] %v19021_v43  ;;  %v21234_v30 = vpack.i.bf16 %v21232_v50, %v21233_v5  ;;  %v9204_v20 = vcombine.high %v19009_v18, %v20337_v34  ;;  %v10999_v42 = vcombine.high %v19021_v43, %v20337_v34  ;;  %v21238_v50 = vld [vmem:[#allocation19_spill] sm:$0xff] }
 0x8af   :  { %21228 = vst [vmem:[#allocation49_spill] sm:$0xff] %v19039_v46  ;;  %v21237_v16 = vpack.i.bf16 %v21235_v11, %v21236_v32  ;;  %v10863_v35 = vcombine.high %v19039_v46, %v20337_v34  ;;  %v21272_v43 = vld [vmem:[#allocation55_spill] sm:$0xff] }
 0x8b0   :  { %12716 = vrot.lane.b32.xlu0 %v21231_v19, %s12882_s11  ;;  %v19051_v59 = vpop.permute.xlu0 %12436  ;;  %v12660_v63 = vpack.i.bf16 %v9340_v38, %v9204_v20  ;;  %v21239_v38 = vld [vmem:[#allocation116_spill] sm:$0xff]  ;;  %v21241_v20 = vld [vmem:[#allocation14_spill] sm:$0xff] }
 0x8b1   :  { %12651 = vrot.lane.b32.xlu1 %v21234_v30, %s12883_s12  ;;  %v19055_v14 = vpop.permute.xlu1 %12371  ;;  %v12735_v28 = vpack.i.bf16 %v10999_v42, %v10863_v35  ;;  %v21240_v5 = vpack.i.bf16 %v21238_v50, %v21239_v38  ;;  %v21242_v11 = vcombine.low %v18387_v48, %v21241_v20  ;;  %v21244_v42 = vpack.i.bf16 %v18492_v23, %v18472_v57  ;;  %v21246_v35 = vld [vmem:[#allocation10_spill] sm:$0xff]  ;;  %v21249_v38 = vld [vmem:[#allocation117_spill] sm:$0xff]  ;;  %v21253_v23 = vld [vmem:[#allocation12_spill] sm:$0xff] }
 0x8b2   :  { %v21252_v57 = vpack.i.bf16 %v18496_v52, %v18476_v15  ;;  %v6158_v15 = vld [vmem:[%s19873_s6] sm:$0xf] }
 0x8b3   :  { %v19079_v32 = vrot.slane %v21242_v11, %v13041_v29 }
 0x8b4   :  { %12726 = vrot.lane.b32.xlu0 %v21237_v16, %s12883_s12  ;;  %v19064_v41 = vpop.permute.xlu0 %12446  ;;  %v21245_v16 = vld [vmem:[#allocation51_spill] sm:$0xff] }
 0x8b5   :  { %12661 = vrot.lane.b32.xlu1 %v12660_v63, %s12888_s19  ;;  %v19066_v19 = vpop.permute.xlu1 %12381  ;;  %21243 = vst [vmem:[#allocation101_spill] sm:$0xff] %v19079_v32  ;;  %v10470_v11 = vcombine.high %v19079_v32, %v20337_v34  ;;  %v21257_v32 = vld [vmem:[#allocation93_spill] sm:$0xff] }
 0x8b8   :  { %12736 = vrot.lane.b32.xlu0 %v12735_v28, %s12888_s19  ;;  %v19073_v30 = vpop.permute.xlu0 %12456  ;;  %v21247_v28 = vcombine.low %v21245_v16, %v21246_v35 }
 0x8b9   :  { %12671 = vrot.lane.b32.xlu1 %v21240_v5, %s12887_s16  ;;  %v19081_v63 = vpop.permute.xlu1 %12391  ;;  %v21250_v5 = vld [vmem:[#allocation78_spill] sm:$0xff] }
 0x8ba   :  { %v19091_v50 = vrot.slane %v21247_v28, %v13041_v29  ;;  %v21251_v33 = vpack.i.bf16 %v21249_v38, %v21250_v5  ;;  %v21256_v5 = vld [vmem:[#allocation67_spill] sm:$0xff] }
 0x8bb   :  { %v21258_v62 = vpack.i.bf16 %v21256_v5, %v21257_v32 }
 0x8bc   :  { %12746 = vrot.lane.b32.xlu0 %v21244_v42, %s12887_s16  ;;  %21248 = vst [vmem:[#allocation54_spill] sm:$0xff] %v19091_v50  ;;  %v19097_v48 = vpop.permute.xlu0 %12466  ;;  %v21254_v42 = vld [vmem:[#allocation118_spill] sm:$0xff] }
 0x8bd   :  { %12681 = vrot.lane.b32.xlu1 %v21251_v33, %s12882_s11  ;;  %v19099_v20 = vpop.permute.xlu1 %12401  ;;  %v21255_v16 = vpack.i.bf16 %v21253_v23, %v21254_v42  ;;  %v10334_v33 = vcombine.high %v19091_v50, %v20337_v34  ;;  %v21259_v23 = vld [vmem:[#allocation64_spill] sm:$0xff]  ;;  %v21260_v42 = vld [vmem:[#allocation41_spill] sm:$0xff]  ;;  %v12243_v50 = vunpack.i.l.bf16 %v18681_v60 }
 0x8bf   :  { %v12700_v38 = vpack.i.bf16 %v10470_v11, %v10334_v33  ;;  %v21261_v11 = vpack.i.bf16 %v21259_v23, %v21260_v42  ;;  %v21267_v42 = vld [vmem:[#allocation40_spill] sm:$0xff] }
 0x8c0   :  { %12756 = vrot.lane.b32.xlu0 %v21252_v57, %s12882_s11  ;;  %v19113_v35 = vpop.permute.xlu0 %12476 }
 0x8c1   :  { %12691 = vrot.lane.b32.xlu1 %v21255_v16, %s12883_s12  ;;  %v19115_v28 = vpop.permute.xlu1 %12411  ;;  %v12238_v16 = vunpack.i.l.bf16 %v18651_v44 }
 0x8c4   :  { %12766 = vrot.lane.b32.xlu0 %v21258_v62, %s12883_s12  ;;  %v19125_v52 = vpop.permute.xlu0 %12486  ;;  %v21262_v62 = vcombine.low %v18587_v39, %v18591_v7  ;;  %v21270_v7 = vld [vmem:[#allocation26_spill] sm:$0xff] }
 0x8c5   :  { %12701 = vrot.lane.b32.xlu1 %v12700_v38, %s12888_s19  ;;  %v19127_v57 = vpop.permute.xlu1 %12421  ;;  %v12239_v38 = vunpack.i.h.bf16 %v18651_v44 }
 0x8c6   :  { %v19137_v32 = vrot.slane %v21262_v62, %v13041_v29  ;;  %v6559_v62 = vsel %vm869_vm3, %v21270_v7, %v12238_v16  ;;  %v12149_v7 = vunpack.i.h.bf16 %v18596_v0 }
 0x8c8   :  { %11318 = vperm.xlu0 %12143, %v6158_v15   ;;  %21263 = vst [vmem:[#allocation44_spill] sm:$0xff] %v19137_v32  ;;  %v19140_v33 = vpop.permute.xlu0 %12496  ;;  %v21265_v15 = vcombine.low %v18537_v31, %v18540_v53  ;;  %v11067_v44 = vcombine.high %v19137_v32, %v20337_v34  ;;  %v21273_v31 = vld [vmem:[#allocation97_spill] sm:$0xff] }
 0x8c9   :  { %12711 = vrot.lane.b32.xlu1 %v21261_v11, %s12887_s16  ;;  %21264 = vst [vmem:[#allocation73_spill] sm:$0xff] %v19140_v33  ;;  %v19143_v5 = vpop.permute.xlu1 %12431  ;;  %v21268_v11 = vld [vmem:[#allocation46_spill] sm:$0xff]  ;;  %v6560_v53 = vsel %vm869_vm3, %v21273_v31, %v12239_v38  ;;  %v12249_v33 = vunpack.i.h.bf16 %v18689_v37 }
 0x8ca   :  { %v19149_v23 = vrot.slane %v21265_v15, %v13041_v29  ;;  %v21269_v39 = vpack.i.bf16 %v21267_v42, %v21268_v11  ;;  %v12148_v29 = vunpack.i.l.bf16 %v18596_v0  ;;  %v12244_v15 = vunpack.i.h.bf16 %v18681_v60  ;;  %v21274_v11 = vld [vmem:[#allocation21_spill] sm:$0xff] }
 0x8cb   :  { %v21276_v60 = vpack.i.bf16 %v18534_v56, %v18530_v12  ;;  %v6562_v31 = vsel %vm872_vm4, %v6560_v53, %v12149_v7  ;;  %v21278_v12 = vld [vmem:[#allocation47_spill] sm:$0xff]  ;;  %v12153_v7 = vunpack.i.l.bf16 %v18628_v4 }
 0x8cc   :  { %21266 = vst [vmem:[#allocation92_spill] sm:$0xff] %v19149_v23  ;;  %v19158_v46 = vpop.permute.xlu0 %12506  ;;  %v10931_v32 = vcombine.high %v19149_v23, %v20337_v34  ;;  %v6561_v38 = vsel %vm872_vm4, %v6559_v62, %v12148_v29  ;;  %v12248_v62 = vunpack.i.l.bf16 %v18689_v37  ;;  %v12279_v29 = vunpack.i.h.bf16 %v18723_v10 }
 0x8cd   :  { %12721 = vrot.lane.b32.xlu1 %v21269_v39, %s12882_s11  ;;  %21271 = vst [vmem:[#allocation66_spill] sm:$0xff] %v19158_v46  ;;  %v19167_v42 = vpop.permute.xlu1 %12441  ;;  %v6563_v0 = vsel %vm875_vm5, %v6561_v38, %v12243_v50  ;;  %v12278_v39 = vunpack.i.l.bf16 %v18723_v10  ;;  %v6564_v46 = vsel %vm875_vm5, %v6562_v31, %v12244_v15  ;;  %v12179_v56 = vunpack.i.h.bf16 %v21278_v12  ;;  %v21280_v15 = vld [vmem:[#allocation24_spill] sm:$0xff] }
 0x8ce   :  { %v12740_v18 = vpack.i.bf16 %v11067_v44, %v10931_v32  ;;  %v12178_v53 = vunpack.i.l.bf16 %v21278_v12  ;;  %v12154_v50 = vunpack.i.h.bf16 %v18628_v4  ;;  %v12189_v32 = vunpack.i.h.bf16 %v18554_v2 }
 0x8cf   :  { %v12188_v44 = vunpack.i.l.bf16 %v18554_v2  ;;  %v6565_v10 = vsel %vm878_vm6, %v6563_v0, %v12153_v7  ;;  %v12288_v12 = vunpack.i.l.bf16 %v18738_v3  ;;  %v8263_v37 = vsel %vm869_vm3, %v21280_v15, %v12279_v29 }
 0x8d0   :  { %v19185_v34 = vpop.permute.xlu0 %12516  ;;  %v6566_v38 = vsel %vm878_vm6, %v6564_v46, %v12154_v50  ;;  %v6567_v23 = vsel %vm881_vm7, %v6565_v10, %v12248_v62  ;;  %v12159_v46 = vunpack.i.h.bf16 %v18667_v47  ;;  %v12158_v0 = vunpack.i.l.bf16 %v18667_v47 }
 0x8d1   :  { %12731 = vrot.lane.b32.xlu1 %v21276_v60, %s12883_s12  ;;  %v19191_v16 = vpop.permute.xlu1 %12451  ;;  %v21279_v60 = vld [vmem:[#allocation34_spill] sm:$0xff]  ;;  %v6568_v2 = vsel %vm881_vm7, %v6566_v38, %v12249_v33  ;;  %v12253_v50 = vunpack.i.l.bf16 %v18706_v36  ;;  %v12183_v62 = vunpack.i.l.bf16 %v18683_v9  ;;  %v8265_v15 = vsel %vm872_vm4, %v8263_v37, %v12179_v56 }
 0x8d2   :  { %21277 = vst [vmem:[#allocation33_spill] sm:$0xff] %v19191_v16  ;;  %v8262_v31 = vsel %vm869_vm3, %v21279_v60, %v12278_v39  ;;  %v12254_v39 = vunpack.i.h.bf16 %v18706_v36  ;;  %v6569_v36 = vsel %vm884_vm8, %v6567_v23, %v12158_v0  ;;  %v6570_v38 = vsel %vm884_vm8, %v6568_v2, %v12159_v46  ;;  %v21282_v46 = vld [vmem:[#allocation98_spill] sm:$0xff] }
 0x8d3   :  { %v8264_v29 = vsel %vm872_vm4, %v8262_v31, %v12178_v53  ;;  %v12298_v33 = vunpack.i.l.bf16 %v18744_v55  ;;  %v19239_v56 = vsel %vm887_vm9, %v6569_v36, %v12253_v50  ;;  %v21283_v0 = vpack.i.bf16 %v18649_v21, %v21282_v46  ;;  %v21284_v36 = vld [vmem:[#allocation79_spill] sm:$0xff] }
 0x8d4   :  { %v19207_v4 = vpop.permute.xlu0 %12526  ;;  %v8266_v47 = vsel %vm875_vm5, %v8264_v29, %v12288_v12  ;;  %v19242_v37 = vsel %vm887_vm9, %v6570_v38, %v12254_v39  ;;  %v12258_v12 = vunpack.i.l.bf16 %v18774_v1  ;;  %v12299_v50 = vunpack.i.h.bf16 %v18744_v55  ;;  %v21288_v46 = vld [vmem:[#allocation35_spill] sm:$0xff] }
 0x8d5   :  { %12741 = vrot.lane.b32.xlu1 %v12740_v18, %s12888_s19  ;;  %v12289_v18 = vunpack.i.h.bf16 %v18738_v3  ;;  %v19214_v16 = vpop.permute.xlu1 %12461  ;;  %v21281_v3 = vpack.i.bf16 %v18646_v49, %v18643_v51  ;;  %v12193_v51 = vunpack.i.l.bf16 %v18691_v58  ;;  %v8268_v23 = vsel %vm878_vm6, %v8266_v47, %v12188_v44 }
 0x8d6   :  { %v12359_v29 = vunpack.i.h.bf16 %v18885_v22  ;;  %v12358_v44 = vunpack.i.l.bf16 %v18885_v22  ;;  %v12369_v21 = vunpack.i.h.bf16 %v18898_v13  ;;  %v6573_v22 = vsel %vm869_vm3, %v21284_v36, %v12258_v12  ;;  %v21291_v36 = vld [vmem:[#allocation42_spill] sm:$0xff] }
 0x8d7   :  { %v8267_v60 = vsel %vm875_vm5, %v8265_v15, %v12289_v18  ;;  %v8270_v15 = vsel %vm881_vm7, %v8268_v23, %v12298_v33  ;;  %v12263_v38 = vunpack.i.l.bf16 %v18795_v45 }
 0x8d8   :  { %v12537_v10 = vpop.permute.xlu0 %12536  ;;  %v8269_v39 = vsel %vm878_vm6, %v8267_v60, %v12189_v32  ;;  %v21285_v60 = vld [vmem:[#allocation103_spill] sm:$0xff] }
 0x8d9   :  { %12751 = vrot.lane.b32.xlu1 %v21281_v3, %s12887_s16  ;;  %v12539_v7 = vunpack.i.h.bf16 %v12537_v10  ;;  %v12538_v53 = vunpack.i.l.bf16 %v12537_v10  ;;  %v19234_v31 = vpop.permute.xlu1 %12471  ;;  %v12368_v10 = vunpack.i.l.bf16 %v18898_v13  ;;  %v8271_v13 = vsel %vm881_vm7, %v8269_v39, %v12299_v50 }
 0x8da   :  { %v21290_v50 = vunpack.i.l.bf16 %v21272_v43 }
 0x8db   :  { %v7040_v2 = vsel %vm869_vm3, %v18609_v24, %v12539_v7  ;;  %v7039_v18 = vsel %vm869_vm3, %v18636_v26, %v12538_v53  ;;  %v12259_v24 = vunpack.i.h.bf16 %v18774_v1  ;;  %v21286_v53 = vld [vmem:[#allocation68_spill] sm:$0xff] }
 0x8dc   :  { %v12547_v3 = vpop.permute.xlu0 %12546  ;;  %v7041_v55 = vsel %vm872_vm4, %v7039_v18, %v12358_v44  ;;  %v7042_v32 = vsel %vm872_vm4, %v7040_v2, %v12359_v29  ;;  %v21287_v23 = vpack.i.bf16 %v21285_v60, %v21286_v53  ;;  %v12309_v18 = vunpack.i.h.bf16 %v21288_v46  ;;  %v21289_v44 = vld [vmem:[#allocation74_spill] sm:$0xff] }
 0x8dd   :  { %12761 = vrot.lane.b32.xlu1 %v21283_v0, %s12882_s11  ;;  %v12549_v7 = vunpack.i.h.bf16 %v12547_v3  ;;  %v12548_v26 = vunpack.i.l.bf16 %v12547_v3  ;;  %v19260_v47 = vpop.permute.xlu1 %12481  ;;  %v12308_v29 = vunpack.i.l.bf16 %v21288_v46  ;;  %v6574_v3 = vsel %vm869_vm3, %v21289_v44, %v12259_v24 }
 0x8de   :  { %v6575_v39 = vsel %vm872_vm4, %v6573_v22, %v21290_v50  ;;  %v12379_v60 = vunpack.i.h.bf16 %v21291_v36  ;;  %v21294_v50 = vunpack.i.h.bf16 %v21272_v43 }
 0x8df   :  { %v7043_v33 = vsel %vm875_vm5, %v7041_v55, %v12548_v26  ;;  %v7044_v1 = vsel %vm875_vm5, %v7042_v32, %v12549_v7  ;;  %v12264_v32 = vunpack.i.h.bf16 %v18795_v45 }
 0x8e0   :  { %v12557_v0 = vpop.permute.xlu0 %12556  ;;  %v7045_v2 = vsel %vm878_vm6, %v7043_v33, %v12368_v10  ;;  %v7046_v12 = vsel %vm878_vm6, %v7044_v1, %v12369_v21  ;;  %v12378_v10 = vunpack.i.l.bf16 %v21291_v36  ;;  %v6577_v21 = vsel %vm875_vm5, %v6575_v39, %v12263_v38  ;;  %v21292_v33 = vld [vmem:[#allocation30_spill] sm:$0xff] }
 0x8e1   :  { %12771 = vrot.lane.b32.xlu1 %v21287_v23, %s12883_s12  ;;  %v12559_v7 = vunpack.i.h.bf16 %v12557_v0  ;;  %v12558_v26 = vunpack.i.l.bf16 %v12557_v0  ;;  %v19282_v55 = vpop.permute.xlu1 %12491  ;;  %v12268_v1 = vunpack.i.l.bf16 %v21292_v33  ;;  %v21293_v23 = vld [vmem:[#allocation100_spill] sm:$0xff]  ;;  %v21296_v39 = vunpack.i.h.bf16 %v18563_v54 }
 0x8e2   :  { %v12284_v46 = vunpack.i.h.bf16 %v21293_v23  ;;  %v12283_v45 = vunpack.i.l.bf16 %v21293_v23  ;;  %v21299_v23 = vld [vmem:[#allocation70_spill] sm:$0xff] }
 0x8e3   :  { %v7047_v24 = vsel %vm881_vm7, %v7045_v2, %v12558_v26  ;;  %v7048_v53 = vsel %vm881_vm7, %v7046_v12, %v12559_v7  ;;  %v6576_v2 = vsel %vm872_vm4, %v6574_v3, %v21294_v50  ;;  %v21295_v12 = vunpack.i.l.bf16 %v18563_v54  ;;  %v21300_v50 = vld [vmem:[#allocation39_spill] sm:$0xff] }
 0x8e4   :  { %v19296_v0 = vpop.permute.xlu0 %12566  ;;  %v19299_v22 = vsel %vm884_vm8, %v7047_v24, %v12378_v10  ;;  %v19302_v44 = vsel %vm884_vm8, %v7048_v53, %v12379_v60  ;;  %v8273_v36 = vsel %vm884_vm8, %v8271_v13, %v21296_v39  ;;  %v6578_v10 = vsel %vm875_vm5, %v6576_v2, %v12264_v32  ;;  %v21298_v32 = vld [vmem:[#allocation132_spill] sm:$0xff] }
 0x8e5   :  { %v19308_v26 = vpop.permute.xlu1 %12501  ;;  %v8272_v7 = vsel %vm884_vm8, %v8270_v15, %v21295_v12  ;;  %v12269_v60 = vunpack.i.h.bf16 %v21292_v33  ;;  %v21297_v24 = vunpack.i.l.bf16 %v21274_v11  ;;  %v6587_v15 = vpack.c.bf16 %v19239_v56, %v19239_v56 }
 0x8e6   :  { %v19322_v3 = vsel %vm887_vm9, %v8272_v7, %v12308_v29  ;;  %v6589_v54 = vpack.c.bf16 %v19242_v37, %v19242_v37  ;;  %v19330_v13 = vsel %vm887_vm9, %v8273_v36, %v12309_v18  ;;  %v8277_v33 = vsel %vm869_vm3, %v21298_v32, %v12284_v46  ;;  %v21303_v36 = vld [vmem:[#allocation76_spill] sm:$0xff] }
 0x8e7   :  { %v6579_v43 = vsel %vm878_vm6, %v6577_v21, %v21297_v24  ;;  %v8276_v21 = vsel %vm869_vm3, %v21299_v23, %v12283_v45  ;;  %v12294_v29 = vunpack.i.h.bf16 %v21300_v50  ;;  %v12293_v2 = vunpack.i.l.bf16 %v21300_v50  ;;  %v21306_v50 = vld [vmem:[#allocation104_spill] sm:$0xff] }
 0x8e8   :  { %v6581_v53 = vsel %vm881_vm7, %v6579_v43, %v12268_v1  ;;  %v12577_v1 = vpop.permute.xlu0 %12576  ;;  %v21301_v12 = vunpack.i.h.bf16 %v21274_v11  ;;  %v8290_v18 = vpack.c.bf16 %v19322_v3, %v19322_v3  ;;  %v12274_v45 = vunpack.i.h.bf16 %v21303_v36 }
 0x8e9   :  { %v12579_v7 = vunpack.i.h.bf16 %v12577_v1  ;;  %v12578_v37 = vunpack.i.l.bf16 %v12577_v1  ;;  %v19341_v39 = vpop.permute.xlu1 %12511  ;;  %v12273_v24 = vunpack.i.l.bf16 %v21303_v36  ;;  %v21304_v43 = vunpack.i.l.bf16 %v21275_v17  ;;  %v21308_v36 = vld [vmem:[#allocation91_spill] sm:$0xff] }
 0x8ea   :  { %v6580_v56 = vsel %vm878_vm6, %v6578_v10, %v21301_v12  ;;  %21302 = vst [vmem:[#allocation17_spill] sm:$0xff] %v19341_v39  ;;  %v8278_v11 = vsel %vm872_vm4, %v8276_v21, %v12183_v62  ;;  %v21305_v10 = vunpack.i.h.bf16 %v18683_v9  ;;  %v21309_v62 = vld [vmem:[#allocation7_spill] sm:$0xff] }
 0x8eb   :  { %v6582_v46 = vsel %vm881_vm7, %v6580_v56, %v12269_v60  ;;  %v6583_v32 = vsel %vm884_vm8, %v6581_v53, %v21304_v43  ;;  %v7730_v3 = vsel %vm869_vm3, %v21306_v50, %v12579_v7  ;;  %v21307_v60 = vld [vmem:[#allocation23_spill] sm:$0xff]  ;;  %v8280_v12 = vsel %vm875_vm5, %v8278_v11, %v12293_v2 }
 0x8ec   :  { %v8279_v23 = vsel %vm872_vm4, %v8277_v33, %v21305_v10  ;;  %v7729_v1 = vsel %vm869_vm3, %v21307_v60, %v12578_v37  ;;  %v12389_v53 = vunpack.i.h.bf16 %v21308_v36  ;;  %v12388_v43 = vunpack.i.l.bf16 %v21308_v36  ;;  %v12587_v49 = vpop.permute.xlu0 %12586 }
 0x8ed   :  { %v8281_v56 = vsel %vm875_vm5, %v8279_v23, %v12294_v29  ;;  %v12304_v21 = vunpack.i.h.bf16 %v21309_v62  ;;  %v12303_v9 = vunpack.i.l.bf16 %v21309_v62  ;;  %v12589_v33 = vunpack.i.h.bf16 %v12587_v49  ;;  %v19367_v38 = vpop.permute.xlu1 %12521 }
 0x8ee   :  { %v12588_v10 = vunpack.i.l.bf16 %v12587_v49  ;;  %21310 = vst [vmem:[#allocation16_spill] sm:$0xff] %v19367_v38  ;;  %v12399_v7 = vunpack.i.h.bf16 %v18961_v27  ;;  %v12398_v37 = vunpack.i.l.bf16 %v18961_v27  ;;  %v7731_v2 = vsel %vm872_vm4, %v7729_v1, %v12388_v43 }
 0x8ef   :  { %v7732_v29 = vsel %vm872_vm4, %v7730_v3, %v12389_v53  ;;  %v19376_v50 = vsel %vm887_vm9, %v6583_v32, %v12273_v24  ;;  %v21311_v60 = vunpack.i.h.bf16 %v21275_v17  ;;  %v8282_v36 = vsel %vm878_vm6, %v8280_v12, %v12193_v51  ;;  %v21314_v12 = vld [vmem:[#allocation95_spill] sm:$0xff] }
 0x8f0   :  { %v7733_v11 = vsel %vm875_vm5, %v7731_v2, %v12588_v10  ;;  %v7734_v23 = vsel %vm875_vm5, %v7732_v29, %v12589_v33  ;;  %v12597_v27 = vpop.permute.xlu0 %12596  ;;  %v21312_v43 = vunpack.i.h.bf16 %v18691_v58  ;;  %v8284_v17 = vsel %vm881_vm7, %v8282_v36, %v12303_v9 }
 0x8f1   :  { %v6584_v49 = vsel %vm884_vm8, %v6582_v46, %v21311_v60  ;;  %v7735_v1 = vsel %vm878_vm6, %v7733_v11, %v12398_v37  ;;  %v7736_v3 = vsel %vm878_vm6, %v7734_v23, %v12399_v7  ;;  %v12599_v32 = vunpack.i.h.bf16 %v12597_v27  ;;  %v19393_v62 = vpop.permute.xlu1 %12531 }
 0x8f2   :  { %v19387_v53 = vsel %vm887_vm9, %v6584_v49, %v12274_v45  ;;  %v8283_v24 = vsel %vm878_vm6, %v8281_v56, %v21312_v43  ;;  %v12598_v46 = vunpack.i.l.bf16 %v12597_v27  ;;  %21313 = vst [vmem:[#allocation87_spill] sm:$0xff] %v19393_v62  ;;  %v12313_v33 = vunpack.i.l.bf16 %v21314_v12 }
 0x8f3   :  { %v8285_v51 = vsel %vm881_vm7, %v8283_v24, %v12304_v21  ;;  %v12409_v10 = vunpack.i.h.bf16 %v18978_v8  ;;  %v12408_v7 = vunpack.i.l.bf16 %v18978_v8  ;;  %v7738_v58 = vsel %vm881_vm7, %v7736_v3, %v12599_v32 }
 0x8f4   :  { %v7737_v45 = vsel %vm881_vm7, %v7735_v1, %v12598_v46  ;;  %v19402_v56 = vsel %vm1392_vm10, %v6587_v15, 0  ;;  %v19405_v9 = vsel %vm1392_vm10, %v6589_v54, 0  ;;  %v19407_v37 = vpop.permute.xlu0 %12606  ;;  %v19416_v8 = vsel %vm1392_vm10, %v8290_v18, 0  ;;  %v21319_v54 = vld [vmem:[#allocation99_spill] sm:$0xff] }
 0x8f5   :  { %v19410_v21 = vsel %vm884_vm8, %v7737_v45, %v12408_v7  ;;  %v19413_v2 = vsel %vm884_vm8, %v7738_v58, %v12409_v10  ;;  %v12542_v11 = vpop.permute.xlu1 %12541  ;;  %v21315_v23 = vunpack.i.l.bf16 %v18708_v61  ;;  %v21316_v49 = vunpack.i.h.bf16 %v18708_v61  ;;  %v21318_v7 = vld [vmem:[#allocation59_spill] sm:$0xff] }
 0x8f6   :  { %v12544_v27 = vunpack.i.h.bf16 %v12542_v11  ;;  %v12543_v1 = vunpack.i.l.bf16 %v12542_v11  ;;  %v12419_v43 = vunpack.i.h.bf16 %v18991_v40  ;;  %v12418_v24 = vunpack.i.l.bf16 %v18991_v40 }
 0x8f7   :  { %v8286_v60 = vsel %vm884_vm8, %v8284_v17, %v21315_v23  ;;  %v19430_v36 = vsel %vm884_vm8, %v8285_v51, %v21316_v49  ;;  %v12429_v32 = vunpack.i.h.bf16 %v19029_v6  ;;  %v12428_v17 = vunpack.i.l.bf16 %v19029_v6  ;;  %v21317_v51 = vld [vmem:[#allocation60_spill] sm:$0xff] }
 0x8f8   :  { %v19434_v3 = vsel %vm887_vm9, %v8286_v60, %v12313_v33  ;;  %v12364_v61 = vunpack.i.h.bf16 %v19031_v25  ;;  %v12363_v46 = vunpack.i.l.bf16 %v19031_v25  ;;  %v7054_v10 = vsel %vm869_vm3, %v21317_v51, %v12544_v27  ;;  %v12617_v33 = vpop.permute.xlu0 %12616  ;;  %v21320_v51 = vld [vmem:[#allocation6_spill] sm:$0xff] }
 0x8f9   :  { %v7053_v45 = vsel %vm869_vm3, %v21318_v7, %v12543_v1  ;;  %v12374_v58 = vunpack.i.h.bf16 %v19055_v14  ;;  %v12373_v11 = vunpack.i.l.bf16 %v19055_v14  ;;  %v12619_v40 = vunpack.i.h.bf16 %v12617_v33  ;;  %v12552_v60 = vpop.permute.xlu1 %12551 }
 0x8fa   :  { %v12618_v23 = vunpack.i.l.bf16 %v12617_v33  ;;  %v12569_v6 = vunpack.i.h.bf16 %v19296_v0  ;;  %v12568_v49 = vunpack.i.l.bf16 %v19296_v0  ;;  %v12554_v29 = vunpack.i.h.bf16 %v12552_v60 }
 0x8fb   :  { %v12553_v25 = vunpack.i.l.bf16 %v12552_v60  ;;  %v8860_v27 = vsel %vm869_vm3, %v21319_v54, %v12619_v40  ;;  %v7055_v7 = vsel %vm872_vm4, %v7053_v45, %v12363_v46  ;;  %v7056_v15 = vsel %vm872_vm4, %v7054_v10, %v12364_v61 }
 0x8fc   :  { %v8859_v1 = vsel %vm869_vm3, %v21320_v51, %v12618_v23  ;;  %v12384_v14 = vunpack.i.h.bf16 %v19066_v19  ;;  %v12383_v33 = vunpack.i.l.bf16 %v19066_v19  ;;  %v7058_v0 = vsel %vm875_vm5, %v7056_v15, %v12554_v29  ;;  %v12627_v62 = vpop.permute.xlu0 %12626 }
 0x8fd   :  { %v7057_v18 = vsel %vm875_vm5, %v7055_v7, %v12553_v25  ;;  %v12629_v60 = vunpack.i.h.bf16 %v12627_v62  ;;  %v12628_v38 = vunpack.i.l.bf16 %v12627_v62  ;;  %v12562_v39 = vpop.permute.xlu1 %12561  ;;  %v7060_v40 = vsel %vm878_vm6, %v7058_v0, %v12374_v58 }
 0x8fe   :  { %v7059_v54 = vsel %vm878_vm6, %v7057_v18, %v12373_v11  ;;  %v8861_v46 = vsel %vm872_vm4, %v8859_v1, %v12418_v24  ;;  %v8862_v61 = vsel %vm872_vm4, %v8860_v27, %v12419_v43  ;;  %v12564_v10 = vunpack.i.h.bf16 %v12562_v39 }
 0x8ff   :  { %v12563_v45 = vunpack.i.l.bf16 %v12562_v39  ;;  %v8863_v19 = vsel %vm875_vm5, %v8861_v46, %v12628_v38  ;;  %v8864_v23 = vsel %vm875_vm5, %v8862_v61, %v12629_v60  ;;  %v7051_v29 = vsel %vm887_vm9, %v19299_v22, %v12568_v49 }
 0x900   :  { %v7052_v62 = vsel %vm887_vm9, %v19302_v44, %v12569_v6  ;;  %v7062_v18 = vsel %vm881_vm7, %v7060_v40, %v12564_v10  ;;  %v12637_v58 = vpop.permute.xlu0 %12636  ;;  %v8865_v24 = vsel %vm878_vm6, %v8863_v19, %v12428_v17  ;;  %v8866_v43 = vsel %vm878_vm6, %v8864_v23, %v12429_v32 }
 0x901   :  { %v7061_v15 = vsel %vm881_vm7, %v7059_v54, %v12563_v45  ;;  %v12639_v39 = vunpack.i.h.bf16 %v12637_v58  ;;  %v12638_v11 = vunpack.i.l.bf16 %v12637_v58  ;;  %v7064_v27 = vsel %vm884_vm8, %v7062_v18, %v12384_v14 }
 0x902   :  { %v7063_v25 = vsel %vm884_vm8, %v7061_v15, %v12383_v33  ;;  %v12439_v22 = vunpack.i.h.bf16 %v19051_v59  ;;  %v12438_v44 = vunpack.i.l.bf16 %v19051_v59  ;;  %v7067_v17 = vpack.c.bf16 %v7051_v29, %v7051_v29 }
 0x903   :  { %v12572_v38 = vpop.permute.xlu1 %12571  ;;  %v8867_v51 = vsel %vm881_vm7, %v8865_v24, %v12638_v11  ;;  %v8868_v1 = vsel %vm881_vm7, %v8866_v43, %v12639_v39  ;;  %v7069_v7 = vpack.c.bf16 %v7052_v62, %v7052_v62  ;;  %v8291_v46 = vpack.c.bf16 %v19434_v3, %v19434_v3  ;;  %v21322_v24 = vld [vmem:[#allocation45_spill] sm:$0xff]  ;;  %v6150_v11 = vld [vmem:[%s19872_s5 + $0x2] sm:$0x3] }
 0x904   :  { %v12574_v6 = vunpack.i.h.bf16 %v12572_v38  ;;  %v12573_v49 = vunpack.i.l.bf16 %v12572_v38  ;;  %v19485_v14 = vsel %vm884_vm8, %v8867_v51, %v12438_v44  ;;  %v19488_v33 = vsel %vm884_vm8, %v8868_v1, %v12439_v22  ;;  %v21323_v43 = vld [vmem:[#allocation85_spill] sm:$0xff] }
 0x905   :  { %v21321_v61 = vunpack.i.h.bf16 %v21314_v12  ;;  %v12449_v45 = vunpack.i.h.bf16 %v19064_v41  ;;  %v12448_v19 = vunpack.i.l.bf16 %v19064_v41  ;;  %v12459_v62 = vunpack.i.h.bf16 %v19073_v30 }
 0x906   :  { %v7065_v32 = vsel %vm887_vm9, %v7063_v25, %v12573_v49  ;;  %v7066_v0 = vsel %vm887_vm9, %v7064_v27, %v12574_v6  ;;  %v19482_v60 = vpop.permute.xlu0 %12646  ;;  %v12458_v15 = vunpack.i.l.bf16 %v19073_v30  ;;  %v7075_v12 = vsel %vm1392_vm10, %v7067_v17, 0 }
 0x907   :  { %v7068_v59 = vpack.c.bf16 %v7065_v32, %v7065_v32  ;;  %v7070_v54 = vpack.c.bf16 %v7066_v0, %v7066_v0  ;;  %v12582_v40 = vpop.permute.xlu1 %12581  ;;  %v19496_v10 = vsel %vm887_vm9, %v19430_v36, %v21321_v61  ;;  %v7122_v18 = vsel %vm1392_vm10, %v7069_v7, 0  ;;  %v21326_v7 = vld [vmem:[#allocation13_spill] sm:$0xff]  ;;  %v21327_v0 = vld [vmem:[#allocation22_spill] sm:$0xff] }
 0x908   :  { %v12584_v23 = vunpack.i.h.bf16 %v12582_v40  ;;  %v12583_v29 = vunpack.i.l.bf16 %v12582_v40  ;;  %v12394_v36 = vunpack.i.h.bf16 %v19081_v63  ;;  %v12393_v58 = vunpack.i.l.bf16 %v19081_v63 }
 0x909   :  { %11462 = vmatprep.subr.msk.bf16.mxu0 %vm1392_vm10, %v7068_v59  ;;  %11464 = vmatprep.subr.msk.bf16.mxu1 %vm1392_vm10, %v7070_v54  ;;  %v12404_v38 = vunpack.i.h.bf16 %v19099_v20  ;;  %v12403_v25 = vunpack.i.l.bf16 %v19099_v20  ;;  %v21324_v44 = vpack.c.bf16 %v19376_v50, %v19376_v50  ;;  %v21325_v6 = vpack.c.bf16 %v19387_v53, %v19387_v53 }
 0x90a   :  { %v7744_v41 = vsel %vm869_vm3, %v21322_v24, %v12584_v23  ;;  %v7743_v39 = vsel %vm869_vm3, %v21323_v43, %v12583_v29  ;;  %7081 = vmatpush1.bf16.msra.mxu0 %v7075_v12  ;;  %7128 = vmatpush1.bf16.msra.mxu1 %v7122_v18  ;;  %v12657_v30 = vpop.permute.xlu0 %12656  ;;  %v12609_v49 = vunpack.i.h.bf16 %v19407_v37  ;;  %v12608_v20 = vunpack.i.l.bf16 %v19407_v37 }
 0x90b   :  { %v12659_v27 = vunpack.i.h.bf16 %v12657_v30  ;;  %v12658_v22 = vunpack.i.l.bf16 %v12657_v30  ;;  %v12592_v63 = vpop.permute.xlu1 %12591  ;;  %11466 = vmatprep.subr.msk.bf16.mxu0 %vm1392_vm10, %v21324_v44  ;;  %11468 = vmatprep.subr.msk.bf16.mxu1 %vm1392_vm10, %v21325_v6  ;;  %v7745_v17 = vsel %vm872_vm4, %v7743_v39, %v12393_v58  ;;  %v7746_v59 = vsel %vm872_vm4, %v7744_v41, %v12394_v36 }
 0x90c   :  { %v12594_v51 = vunpack.i.h.bf16 %v12592_v63  ;;  %v12593_v1 = vunpack.i.l.bf16 %v12592_v63  ;;  %v12414_v53 = vunpack.i.h.bf16 %v19115_v28  ;;  %v12413_v54 = vunpack.i.l.bf16 %v19115_v28 }
 0x90d   :  { %v9457_v32 = vsel %vm869_vm3, %v21326_v7, %v12659_v27  ;;  %v9456_v50 = vsel %vm869_vm3, %v21327_v0, %v12658_v22  ;;  %11463 = vmatmul.mubr.msk.bf16.vlgmr.msra.gmra.mrb[36].mxu0 %vm1388_vm11, %v6150_v11  ;;  %11465 = vmatmul.mubr.msk.bf16.vlgmr.msra.gmra.mrb[36].mxu1 %vm1388_vm11, %v6150_v11  ;;  %v21328_v58 = vmov 0   ;;  %v7742_v39 = vsel %vm887_vm9, %v19413_v2, %v12609_v49 }
 0x90e   :  { %v7747_v40 = vsel %vm875_vm5, %v7745_v17, %v12593_v1  ;;  %v7748_v37 = vsel %vm875_vm5, %v7746_v59, %v12594_v51  ;;  %7178 = vmatpush1.bf16.msra.mxu0 %v19402_v56  ;;  %7225 = vmatpush1.bf16.msra.mxu1 %v19405_v9  ;;  %v12667_v61 = vpop.permute.xlu0 %12666  ;;  %v9458_v12 = vsel %vm872_vm4, %v9456_v50, %v12448_v19  ;;  %v12468_v6 = vunpack.i.l.bf16 %v19097_v48 }
 0x90f   :  { %v12669_v23 = vunpack.i.h.bf16 %v12667_v61  ;;  %v12668_v29 = vunpack.i.l.bf16 %v12667_v61  ;;  %v12602_v18 = vpop.permute.xlu1 %12601  ;;  %v7749_v36 = vsel %vm878_vm6, %v7747_v40, %v12403_v25  ;;  %7209 = vmatprep.mubr.bf16.mxu0 %v21328_v58  ;;  %7256 = vmatprep.mubr.bf16.mxu1 %v21328_v58  ;;  %v9459_v28 = vsel %vm872_vm4, %v9457_v32, %v12449_v45 }
 0x910   :  { %v12604_v24 = vunpack.i.h.bf16 %v12602_v18  ;;  %v12603_v41 = vunpack.i.l.bf16 %v12602_v18  ;;  %v7750_v56 = vsel %vm878_vm6, %v7748_v37, %v12404_v38  ;;  %v7741_v19 = vsel %vm887_vm9, %v19410_v21, %v12608_v20  ;;  %v6149_v38 = vld [vmem:[%s19872_s5] sm:$0x3] }
 0x911   :  { %v9460_v9 = vsel %vm875_vm5, %v9458_v12, %v12668_v29  ;;  %v9461_v43 = vsel %vm875_vm5, %v9459_v28, %v12669_v23  ;;  %v7757_v1 = vpack.c.bf16 %v7741_v19, %v7741_v19  ;;  %v7759_v17 = vpack.c.bf16 %v7742_v39, %v7742_v39  ;;  %v6151_v19 = vld [vmem:[%s19872_s5 + $0x4] sm:$0x3] }
 0x912   :  { %v7751_v30 = vsel %vm881_vm7, %v7749_v36, %v12603_v41  ;;  %v7752_v11 = vsel %vm881_vm7, %v7750_v56, %v12604_v24  ;;  %v12677_v25 = vpop.permute.xlu0 %12676  ;;  %v9462_v45 = vsel %vm878_vm6, %v9460_v9, %v12458_v15  ;;  %v9463_v27 = vsel %vm878_vm6, %v9461_v43, %v12459_v62  ;;  %v21330_v41 = vld [vmem:[#allocation29_spill] sm:$0xff]  ;;  %v21331_v9 = vld [vmem:[#allocation96_spill] sm:$0xff] }
 0x913   :  { %v12679_v22 = vunpack.i.h.bf16 %v12677_v25  ;;  %v12678_v63 = vunpack.i.l.bf16 %v12677_v25  ;;  %v12612_v44 = vpop.permute.xlu1 %12611  ;;  %v7753_v21 = vsel %vm884_vm8, %v7751_v30, %v12413_v54  ;;  %v7754_v2 = vsel %vm884_vm8, %v7752_v11, %v12414_v53 }
 0x914   :  { %v12614_v49 = vunpack.i.h.bf16 %v12612_v44  ;;  %v12613_v51 = vunpack.i.l.bf16 %v12612_v44  ;;  %v21329_v20 = vpack.c.bf16 %v19330_v13, %v19330_v13  ;;  %v12469_v32 = vunpack.i.h.bf16 %v19097_v48  ;;  %v21332_v44 = vld [vmem:[#allocation94_spill] sm:$0xff] }
 0x915   :  { %v9464_v15 = vsel %vm881_vm7, %v9462_v45, %v12678_v63  ;;  %v9465_v62 = vsel %vm881_vm7, %v9463_v27, %v12679_v22  ;;  %11467 = vmatmul.mubr.msk.bf16.vlgmr.msra.gmra.mrb[40].mxu0 %vm1388_vm11, %v6149_v38  ;;  %11469 = vmatmul.mubr.msk.bf16.vlgmr.msra.gmra.mrb[40].mxu1 %vm1388_vm11, %v6149_v38  ;;  %v12479_v54 = vunpack.i.h.bf16 %v19113_v35  ;;  %v8293_v48 = vpack.c.bf16 %v19496_v10, %v19496_v10 }
 0x916   :  { %v8345_v7 = vsel %vm1392_vm10, %v21329_v20, 0  ;;  %v7755_v0 = vsel %vm887_vm9, %v7753_v21, %v12613_v51  ;;  %v7756_v50 = vsel %vm887_vm9, %v7754_v2, %v12614_v49  ;;  %v19574_v59 = vpop.permute.xlu0 %12686  ;;  %7802 = vmatprep.mubr.bf16.mxu0 %v21328_v58  ;;  %7849 = vmatprep.mubr.bf16.mxu1 %v21328_v58  ;;  %v19579_v53 = vsel %vm884_vm8, %v9464_v15, %v12468_v6  ;;  %v21333_v21 = vld [vmem:[#allocation43_spill] sm:$0xff] }
 0x917   :  { %v7758_v13 = vpack.c.bf16 %v7755_v0, %v7755_v0  ;;  %v7760_v40 = vpack.c.bf16 %v7756_v50, %v7756_v50  ;;  %v12622_v37 = vpop.permute.xlu1 %12621  ;;  %v12478_v61 = vunpack.i.l.bf16 %v19113_v35  ;;  %v19586_v12 = vsel %vm884_vm8, %v9465_v62, %v12469_v32 }
 0x918   :  { %v12624_v23 = vunpack.i.h.bf16 %v12622_v37  ;;  %v12623_v29 = vunpack.i.l.bf16 %v12622_v37  ;;  %v12489_v18 = vunpack.i.h.bf16 %v19125_v52  ;;  %v12488_v36 = vunpack.i.l.bf16 %v19125_v52 }
 0x919   :  { %11470 = vmatprep.subr.msk.bf16.mxu0 %vm1392_vm10, %v7758_v13  ;;  %11472 = vmatprep.subr.msk.bf16.mxu1 %vm1392_vm10, %v7760_v40  ;;  %v7765_v28 = vsel %vm1392_vm10, %v7757_v1, 0  ;;  %v7812_v24 = vsel %vm1392_vm10, %v7759_v17, 0  ;;  %v12424_v10 = vunpack.i.h.bf16 %v19127_v57  ;;  %v12423_v35 = vunpack.i.l.bf16 %v19127_v57 }
 0x91a   :  { %v8874_v56 = vsel %vm869_vm3, %v21330_v41, %v12624_v23  ;;  %v8873_v43 = vsel %vm869_vm3, %v21331_v9, %v12623_v29  ;;  %7771 = vmatpush1.bf16.msra.mxu0 %v7765_v28  ;;  %7818 = vmatpush1.bf16.msra.mxu1 %v7812_v24  ;;  %v12697_v52 = vpop.permute.xlu0 %12696  ;;  %v12434_v39 = vunpack.i.h.bf16 %v19143_v5  ;;  %v12433_v30 = vunpack.i.l.bf16 %v19143_v5  ;;  %v6152_v29 = vld [vmem:[%s19872_s5 + $0x6] sm:$0x3] }
 0x91b   :  { %v12699_v11 = vunpack.i.h.bf16 %v12697_v52  ;;  %v12698_v25 = vunpack.i.l.bf16 %v12697_v52  ;;  %v12632_v57 = vpop.permute.xlu1 %12631  ;;  %11474 = vmatprep.subr.msk.bf16.mxu0 %vm1392_vm10, %v8291_v46  ;;  %11476 = vmatprep.subr.msk.bf16.mxu1 %vm1392_vm10, %v8293_v48  ;;  %v12649_v45 = vunpack.i.h.bf16 %v19482_v60  ;;  %v8875_v22 = vsel %vm872_vm4, %v8873_v43, %v12423_v35  ;;  %v21334_v35 = vld [vmem:[#allocation73_spill] sm:$0xff] }
 0x91c   :  { %v12634_v27 = vunpack.i.h.bf16 %v12632_v57  ;;  %v12633_v38 = vunpack.i.l.bf16 %v12632_v57  ;;  %v12648_v63 = vunpack.i.l.bf16 %v19482_v60  ;;  %v8876_v3 = vsel %vm872_vm4, %v8874_v56, %v12424_v10  ;;  %v21335_v57 = vld [vmem:[#allocation66_spill] sm:$0xff] }
 0x91d   :  { %v10587_v5 = vsel %vm869_vm3, %v21332_v44, %v12699_v11  ;;  %v10586_v2 = vsel %vm869_vm3, %v21333_v21, %v12698_v25  ;;  %11471 = vmatmul.mubr.msk.bf16.vlgmr.msra.gmra.mrb[44].mxu0 %vm1388_vm11, %v6151_v19  ;;  %11473 = vmatmul.mubr.msk.bf16.vlgmr.msra.gmra.mrb[44].mxu1 %vm1388_vm11, %v6151_v19  ;;  %v12444_v46 = vunpack.i.h.bf16 %v19167_v42  ;;  %v12443_v6 = vunpack.i.l.bf16 %v19167_v42 }
 0x91e   :  { %v8877_v49 = vsel %vm875_vm5, %v8875_v22, %v12633_v38  ;;  %v8878_v60 = vsel %vm875_vm5, %v8876_v3, %v12634_v27  ;;  %8304 = vmatpush1.bf16.msra.mxu0 %v19416_v8  ;;  %8351 = vmatpush1.bf16.msra.mxu1 %v8345_v7  ;;  %v12707_v51 = vpop.permute.xlu0 %12706  ;;  %v10588_v62 = vsel %vm872_vm4, %v10586_v2, %v12478_v61  ;;  %v12498_v41 = vunpack.i.l.bf16 %v21334_v35 }
 0x91f   :  { %v12709_v1 = vunpack.i.h.bf16 %v12707_v51  ;;  %v12708_v15 = vunpack.i.l.bf16 %v12707_v51  ;;  %v12642_v17 = vpop.permute.xlu1 %12641  ;;  %v8879_v20 = vsel %vm878_vm6, %v8877_v49, %v12433_v30  ;;  %8335 = vmatprep.mubr.bf16.mxu0 %v21328_v58  ;;  %8382 = vmatprep.mubr.bf16.mxu1 %v21328_v58  ;;  %v10589_v42 = vsel %vm872_vm4, %v10587_v5, %v12479_v54  ;;  %v21336_v49 = vld [vmem:[#allocation33_spill] sm:$0xff] }
 0x920   :  { %v12644_v32 = vunpack.i.h.bf16 %v12642_v17  ;;  %v12643_v0 = vunpack.i.l.bf16 %v12642_v17  ;;  %v8880_v50 = vsel %vm878_vm6, %v8878_v60, %v12434_v39  ;;  %v8871_v13 = vsel %vm887_vm9, %v19485_v14, %v12648_v63 }
 0x921   :  { %v10590_v8 = vsel %vm875_vm5, %v10588_v62, %v12708_v15  ;;  %v10591_v7 = vsel %vm875_vm5, %v10589_v42, %v12709_v1  ;;  %v8872_v40 = vsel %vm887_vm9, %v19488_v33, %v12649_v45  ;;  %v8887_v43 = vpack.c.bf16 %v8871_v13, %v8871_v13  ;;  %v21337_v1 = vld [vmem:[#allocation32_spill] sm:$0xff]  ;;  %v21338_v62 = vld [vmem:[#allocation38_spill] sm:$0xff] }
 0x922   :  { %v8881_v37 = vsel %vm881_vm7, %v8879_v20, %v12643_v0  ;;  %v8882_v48 = vsel %vm881_vm7, %v8880_v50, %v12644_v32  ;;  %v12717_v61 = vpop.permute.xlu0 %12716  ;;  %v10592_v54 = vsel %vm878_vm6, %v10590_v8, %v12488_v36  ;;  %v10593_v23 = vsel %vm878_vm6, %v10591_v7, %v12489_v18  ;;  %v6153_v20 = vld [vmem:[%s19872_s5 + $0x8] sm:$0x3] }
 0x923   :  { %v12719_v28 = vunpack.i.h.bf16 %v12717_v61  ;;  %v12718_v24 = vunpack.i.l.bf16 %v12717_v61  ;;  %v12652_v10 = vpop.permute.xlu1 %12651  ;;  %v8883_v14 = vsel %vm884_vm8, %v8881_v37, %v12443_v6  ;;  %v8884_v33 = vsel %vm884_vm8, %v8882_v48, %v12444_v46  ;;  %v21339_v61 = vld [vmem:[#allocation53_spill] sm:$0xff] }
 0x924   :  { %v12654_v56 = vunpack.i.h.bf16 %v12652_v10  ;;  %v12653_v9 = vunpack.i.l.bf16 %v12652_v10  ;;  %v8889_v52 = vpack.c.bf16 %v8872_v40, %v8872_v40  ;;  %v12499_v19 = vunpack.i.h.bf16 %v21334_v35 }
 0x925   :  { %v10594_v36 = vsel %vm881_vm7, %v10592_v54, %v12718_v24  ;;  %v10595_v18 = vsel %vm881_vm7, %v10593_v23, %v12719_v28  ;;  %11475 = vmatmul.mubr.msk.bf16.vlgmr.msra.gmra.mrb[48].mxu0 %vm1388_vm11, %v6152_v29  ;;  %11477 = vmatmul.mubr.msk.bf16.vlgmr.msra.gmra.mrb[48].mxu1 %vm1388_vm11, %v6152_v29  ;;  %v12509_v45 = vunpack.i.h.bf16 %v21335_v57  ;;  %v12508_v63 = vunpack.i.l.bf16 %v21335_v57  ;;  %v21340_v23 = vld [vmem:[#allocation49_spill] sm:$0xff] }
 0x926   :  { %v8885_v39 = vsel %vm887_vm9, %v8883_v14, %v12653_v9  ;;  %v8886_v30 = vsel %vm887_vm9, %v8884_v33, %v12654_v56  ;;  %v19654_v11 = vpop.permute.xlu0 %12726  ;;  %8932 = vmatprep.mubr.bf16.mxu0 %v21328_v58  ;;  %8979 = vmatprep.mubr.bf16.mxu1 %v21328_v58  ;;  %v19659_v25 = vsel %vm884_vm8, %v10594_v36, %v12498_v41  ;;  %v12519_v2 = vunpack.i.h.bf16 %v19185_v34 }
 0x927   :  { %v8888_v27 = vpack.c.bf16 %v8885_v39, %v8885_v39  ;;  %v8890_v38 = vpack.c.bf16 %v8886_v30, %v8886_v30  ;;  %v12662_v22 = vpop.permute.xlu1 %12661  ;;  %v19664_v21 = vsel %vm884_vm8, %v10595_v18, %v12499_v19  ;;  %v12518_v3 = vunpack.i.l.bf16 %v19185_v34 }
 0x928   :  { %v12664_v44 = vunpack.i.h.bf16 %v12662_v22  ;;  %v12663_v5 = vunpack.i.l.bf16 %v12662_v22  ;;  %v8895_v46 = vsel %vm1392_vm10, %v8887_v43, 0  ;;  %v8942_v6 = vsel %vm1392_vm10, %v8889_v52, 0 }
 0x929   :  { %11478 = vmatprep.subr.msk.bf16.mxu0 %vm1392_vm10, %v8888_v27  ;;  %11480 = vmatprep.subr.msk.bf16.mxu1 %vm1392_vm10, %v8890_v38  ;;  %v12454_v60 = vunpack.i.h.bf16 %v21336_v49  ;;  %v12453_v51 = vunpack.i.l.bf16 %v21336_v49  ;;  %v12464_v42 = vunpack.i.h.bf16 %v19214_v16  ;;  %v12463_v32 = vunpack.i.l.bf16 %v19214_v16 }
 0x92a   :  { %v9471_v15 = vsel %vm869_vm3, %v21337_v1, %v12664_v44  ;;  %v9470_v17 = vsel %vm869_vm3, %v21338_v62, %v12663_v5  ;;  %8901 = vmatpush1.bf16.msra.mxu0 %v8895_v46  ;;  %8948 = vmatpush1.bf16.msra.mxu1 %v8942_v6  ;;  %v12737_v34 = vpop.permute.xlu0 %12736  ;;  %v12689_v7 = vunpack.i.h.bf16 %v19574_v59  ;;  %v12688_v48 = vunpack.i.l.bf16 %v19574_v59 }
 0x92b   :  { %v12739_v0 = vunpack.i.h.bf16 %v12737_v34  ;;  %v12738_v50 = vunpack.i.l.bf16 %v12737_v34  ;;  %v12672_v8 = vpop.permute.xlu1 %12671  ;;  %v9472_v37 = vsel %vm872_vm4, %v9470_v17, %v12453_v51  ;;  %v9473_v28 = vsel %vm872_vm4, %v9471_v15, %v12454_v60 }
 0x92c   :  { %v12674_v13 = vunpack.i.h.bf16 %v12672_v8  ;;  %v12673_v40 = vunpack.i.l.bf16 %v12672_v8  ;;  %v12474_v16 = vunpack.i.h.bf16 %v19234_v31  ;;  %v12473_v24 = vunpack.i.l.bf16 %v19234_v31 }
 0x92d   :  { %v11184_v54 = vsel %vm869_vm3, %v21339_v61, %v12739_v0  ;;  %v11183_v29 = vsel %vm869_vm3, %v21340_v23, %v12738_v50  ;;  %11479 = vmatmul.mubr.msk.bf16.vlgmr.msra.gmra.mrb[52].mxu0 %vm1388_vm11, %v6153_v20  ;;  %11481 = vmatmul.mubr.msk.bf16.vlgmr.msra.gmra.mrb[52].mxu1 %vm1388_vm11, %v6153_v20  ;;  %v9468_v39 = vsel %vm887_vm9, %v19579_v53, %v12688_v48  ;;  %v12529_v53 = vunpack.i.h.bf16 %v19207_v4  ;;  %v21341_v50 = vld [vmem:[#allocation8_spill] sm:$0xff]  ;;  %v21344_v48 = vld [vmem:[#allocation9_spill] sm:$0xff] }
 0x92e   :  { %v9474_v10 = vsel %vm875_vm5, %v9472_v37, %v12673_v40  ;;  %v9475_v59 = vsel %vm875_vm5, %v9473_v28, %v12674_v13  ;;  %v12747_v14 = vpop.permute.xlu0 %12746  ;;  %9529 = vmatprep.mubr.bf16.mxu0 %v21328_v58  ;;  %9576 = vmatprep.mubr.bf16.mxu1 %v21328_v58  ;;  %v11185_v43 = vsel %vm872_vm4, %v11183_v29, %v12508_v63  ;;  %v21343_v40 = vld [vmem:[#allocation58_spill] sm:$0xff]  ;;  %v21345_v29 = vld [vmem:[#allocation101_spill] sm:$0xff] }
 0x92f   :  { %v12749_v33 = vunpack.i.h.bf16 %v12747_v14  ;;  %v12748_v35 = vunpack.i.l.bf16 %v12747_v14  ;;  %v12682_v41 = vpop.permute.xlu1 %12681  ;;  %v9476_v56 = vsel %vm878_vm6, %v9474_v10, %v12463_v32  ;;  %v9477_v9 = vsel %vm878_vm6, %v9475_v59, %v12464_v42  ;;  %v6154_v10 = vld [vmem:[%s19872_s5 + $0xa] sm:$0x3] }
 0x930   :  { %v11186_v31 = vsel %vm872_vm4, %v11184_v54, %v12509_v45  ;;  %v12684_v36 = vunpack.i.h.bf16 %v12682_v41  ;;  %v12683_v18 = vunpack.i.l.bf16 %v12682_v41  ;;  %v9469_v30 = vsel %vm887_vm9, %v19586_v12, %v12689_v7  ;;  %v21342_v7 = vld [vmem:[#allocation11_spill] sm:$0xff] }
 0x931   :  { %v11187_v52 = vsel %vm875_vm5, %v11185_v43, %v12748_v35  ;;  %v11188_v19 = vsel %vm875_vm5, %v11186_v31, %v12749_v33  ;;  %v12528_v12 = vunpack.i.l.bf16 %v19207_v4  ;;  %v9486_v15 = vpack.c.bf16 %v9469_v30, %v9469_v30 }
 0x932   :  { %v9478_v57 = vsel %vm881_vm7, %v9476_v56, %v12683_v18  ;;  %v9479_v27 = vsel %vm881_vm7, %v9477_v9, %v12684_v36  ;;  %v12757_v38 = vpop.permute.xlu0 %12756  ;;  %v11189_v22 = vsel %vm878_vm6, %v11187_v52, %v12518_v3  ;;  %v11190_v45 = vsel %vm878_vm6, %v11188_v19, %v12519_v2 }
 0x933   :  { %v12759_v63 = vunpack.i.h.bf16 %v12757_v38  ;;  %v12758_v44 = vunpack.i.l.bf16 %v12757_v38  ;;  %v12692_v5 = vpop.permute.xlu1 %12691  ;;  %v9480_v46 = vsel %vm884_vm8, %v9478_v57, %v12473_v24  ;;  %v9481_v6 = vsel %vm884_vm8, %v9479_v27, %v12474_v16  ;;  %v21346_v16 = vld [vmem:[#allocation54_spill] sm:$0xff] }
 0x934   :  { %v12694_v49 = vunpack.i.h.bf16 %v12692_v5  ;;  %v12693_v60 = vunpack.i.l.bf16 %v12692_v5  ;;  %v9484_v3 = vpack.c.bf16 %v9468_v39, %v9468_v39  ;;  %v10017_v8 = vpack.c.bf16 %v21341_v50, %v21341_v50 }
 0x935   :  { %v11191_v51 = vsel %vm881_vm7, %v11189_v22, %v12758_v44  ;;  %v11192_v1 = vsel %vm881_vm7, %v11190_v45, %v12759_v63  ;;  %v10019_v13 = vpack.c.bf16 %v21342_v7, %v21342_v7  ;;  %v10018_v37 = vpack.c.bf16 %v21343_v40, %v21343_v40  ;;  %v6155_v44 = vld [vmem:[%s19872_s5 + $0xc] sm:$0x3] }
 0x936   :  { %v9482_v2 = vsel %vm887_vm9, %v9480_v46, %v12693_v60  ;;  %v9483_v62 = vsel %vm887_vm9, %v9481_v6, %v12694_v49  ;;  %v19722_v17 = vsel %vm884_vm8, %v11191_v51, %v12528_v12  ;;  %v19725_v34 = vsel %vm884_vm8, %v11192_v1, %v12529_v53  ;;  %v21349_v7 = vld [vmem:[#allocation17_spill] sm:$0xff] }
 0x937   :  { %v9485_v20 = vpack.c.bf16 %v9482_v2, %v9482_v2  ;;  %v9487_v4 = vpack.c.bf16 %v9483_v62, %v9483_v62  ;;  %v12702_v42 = vpop.permute.xlu1 %12701  ;;  %v10020_v61 = vpack.c.bf16 %v21344_v48, %v21344_v48  ;;  %v9492_v54 = vsel %vm1392_vm10, %v9484_v3, 0 }
 0x938   :  { %v12704_v32 = vunpack.i.h.bf16 %v12702_v42  ;;  %v12703_v0 = vunpack.i.l.bf16 %v12702_v42  ;;  %v9539_v23 = vsel %vm1392_vm10, %v9486_v15, 0  ;;  %v12484_v59 = vunpack.i.h.bf16 %v19260_v47  ;;  %v21347_v42 = vld [vmem:[#allocation44_spill] sm:$0xff] }
 0x939   :  { %11482 = vmatprep.subr.msk.bf16.mxu0 %vm1392_vm10, %v9485_v20  ;;  %11484 = vmatprep.subr.msk.bf16.mxu1 %vm1392_vm10, %v9487_v4  ;;  %v12483_v14 = vunpack.i.l.bf16 %v19260_v47  ;;  %v10025_v56 = vsel %vm1392_vm10, %v10017_v8, 0  ;;  %v10072_v9 = vsel %vm1392_vm10, %v10019_v13, 0  ;;  %v12494_v43 = vunpack.i.h.bf16 %v19282_v55  ;;  %v6156_v8 = vld [vmem:[%s19872_s5 + $0xe] sm:$0x3] }
 0x93a   :  { %v10601_v28 = vsel %vm869_vm3, %v21345_v29, %v12704_v32  ;;  %v10600_v24 = vsel %vm869_vm3, %v21346_v16, %v12703_v0  ;;  %9498 = vmatpush1.bf16.msra.mxu0 %v9492_v54  ;;  %9545 = vmatpush1.bf16.msra.mxu1 %v9539_v23  ;;  %v12493_v31 = vunpack.i.l.bf16 %v19282_v55  ;;  %v12729_v47 = vunpack.i.h.bf16 %v19654_v11  ;;  %v21348_v0 = vld [vmem:[#allocation92_spill] sm:$0xff] }
 0x93b   :  { %v12712_v33 = vpop.permute.xlu1 %12711  ;;  %11486 = vmatprep.subr.msk.bf16.mxu0 %vm1392_vm10, %v10018_v37  ;;  %11488 = vmatprep.subr.msk.bf16.mxu1 %vm1392_vm10, %v10020_v61  ;;  %v10602_v36 = vsel %vm872_vm4, %v10600_v24, %v12483_v14  ;;  %v10603_v18 = vsel %vm872_vm4, %v10601_v28, %v12484_v59  ;;  %v12728_v52 = vunpack.i.l.bf16 %v19654_v11  ;;  %v12504_v22 = vunpack.i.h.bf16 %v19308_v26  ;;  %v12767_v37 = vpop.permute.xlu0 %12766  ;;  %v21350_v23 = vld [vmem:[#allocation16_spill] sm:$0xff] }
 0x93c   :  { %v12714_v35 = vunpack.i.h.bf16 %v12712_v33  ;;  %v12713_v41 = vunpack.i.l.bf16 %v12712_v33  ;;  %v12503_v11 = vunpack.i.l.bf16 %v19308_v26  ;;  %v10599_v46 = vsel %vm887_vm9, %v19664_v21, %v12729_v47 }
 0x93d   :  { %11483 = vmatmul.mubr.msk.bf16.vlgmr.msra.gmra.mrb[56].mxu0 %vm1388_vm11, %v6154_v10  ;;  %11485 = vmatmul.mubr.msk.bf16.vlgmr.msra.gmra.mrb[56].mxu1 %vm1388_vm11, %v6154_v10  ;;  %v10598_v5 = vsel %vm887_vm9, %v19659_v25, %v12728_v52  ;;  %v10616_v51 = vpack.c.bf16 %v10599_v46, %v10599_v46  ;;  %v12514_v13 = vunpack.i.h.bf16 %v21349_v7  ;;  %v12513_v40 = vunpack.i.l.bf16 %v21349_v7 }
 0x93e   :  { %v10604_v19 = vsel %vm875_vm5, %v10602_v36, %v12713_v41  ;;  %v10605_v39 = vsel %vm875_vm5, %v10603_v18, %v12714_v35  ;;  %10031 = vmatpush1.bf16.msra.mxu0 %v10025_v56  ;;  %10078 = vmatpush1.bf16.msra.mxu1 %v10072_v9  ;;  %v10614_v60 = vpack.c.bf16 %v10598_v5, %v10598_v5  ;;  %v12524_v29 = vunpack.i.h.bf16 %v21350_v23  ;;  %v6157_v5 = vld [vmem:[%s19872_s5 + $0x10] sm:$0x3] }
 0x93f   :  { %v12722_v30 = vpop.permute.xlu1 %12721  ;;  %v10606_v55 = vsel %vm878_vm6, %v10604_v19, %v12493_v31  ;;  %v10607_v57 = vsel %vm878_vm6, %v10605_v39, %v12494_v43  ;;  %10062 = vmatprep.mubr.bf16.mxu0 %v21328_v58  ;;  %10109 = vmatprep.mubr.bf16.mxu1 %v21328_v58  ;;  %v10669_v4 = vsel %vm1392_vm10, %v10616_v51, 0  ;;  %v12523_v28 = vunpack.i.l.bf16 %v21350_v23  ;;  %v21351_v31 = vld [vmem:[#allocation87_spill] sm:$0xff] }
 0x940   :  { %v12724_v27 = vunpack.i.h.bf16 %v12722_v30  ;;  %v12723_v38 = vunpack.i.l.bf16 %v12722_v30  ;;  %v10622_v20 = vsel %vm1392_vm10, %v10614_v60, 0  ;;  %v12769_v10 = vunpack.i.h.bf16 %v12767_v37 }
 0x941   :  { %v12768_v59 = vunpack.i.l.bf16 %v12767_v37  ;;  %v12534_v36 = vunpack.i.h.bf16 %v21351_v31  ;;  %v12533_v18 = vunpack.i.l.bf16 %v21351_v31 }
 0x942   :  { %v10608_v45 = vsel %vm881_vm7, %v10606_v55, %v12723_v38  ;;  %v10609_v63 = vsel %vm881_vm7, %v10607_v57, %v12724_v27 }
 0x943   :  { %v12732_v6 = vpop.permute.xlu1 %12731  ;;  %v10610_v53 = vsel %vm884_vm8, %v10608_v45, %v12503_v11  ;;  %v10611_v12 = vsel %vm884_vm8, %v10609_v63, %v12504_v22  ;;  %v11195_v19 = vsel %vm887_vm9, %v19722_v17, %v12768_v59 }
 0x944   :  { %v12734_v26 = vunpack.i.h.bf16 %v12732_v6  ;;  %v12733_v49 = vunpack.i.l.bf16 %v12732_v6  ;;  %v11211_v38 = vpack.c.bf16 %v11195_v19, %v11195_v19 }
 0x945   :  { %11487 = vmatmul.mubr.msk.bf16.vlgmr.msra.gmra.mrb[60].mxu0 %vm1388_vm11, %v6155_v44  ;;  %11489 = vmatmul.mubr.msk.bf16.vlgmr.msra.gmra.mrb[60].mxu1 %vm1388_vm11, %v6155_v44 }
 0x946   :  { %v10612_v1 = vsel %vm887_vm9, %v10610_v53, %v12733_v49  ;;  %v10613_v25 = vsel %vm887_vm9, %v10611_v12, %v12734_v26  ;;  %10659 = vmatprep.mubr.bf16.mxu0 %v21328_v58  ;;  %10706 = vmatprep.mubr.bf16.mxu1 %v21328_v58  ;;  %v11219_v17 = vsel %vm1392_vm10, %v11211_v38, 0 }
 0x947   :  { %v10615_v21 = vpack.c.bf16 %v10612_v1, %v10612_v1  ;;  %v10617_v3 = vpack.c.bf16 %v10613_v25, %v10613_v25  ;;  %v12742_v15 = vpop.permute.xlu1 %12741 }
 0x948   :  { %v12744_v2 = vunpack.i.h.bf16 %v12742_v15  ;;  %v12743_v62 = vunpack.i.l.bf16 %v12742_v15 }
 0x949   :  { %11490 = vmatprep.subr.msk.bf16.mxu0 %vm1392_vm10, %v10615_v21  ;;  %11492 = vmatprep.subr.msk.bf16.mxu1 %vm1392_vm10, %v10617_v3 }
 0x94a   :  { %v11198_v32 = vsel %vm869_vm3, %v21347_v42, %v12744_v2  ;;  %v11197_v50 = vsel %vm869_vm3, %v21348_v0, %v12743_v62  ;;  %10628 = vmatpush1.bf16.msra.mxu0 %v10622_v20  ;;  %10675 = vmatpush1.bf16.msra.mxu1 %v10669_v4 }
 0x94b   :  { %v12752_v48 = vpop.permute.xlu1 %12751  ;;  %v11199_v16 = vsel %vm872_vm4, %v11197_v50, %v12513_v40  ;;  %v11200_v24 = vsel %vm872_vm4, %v11198_v32, %v12514_v13 }
 0x94c   :  { %v12754_v61 = vunpack.i.h.bf16 %v12752_v48  ;;  %v12753_v54 = vunpack.i.l.bf16 %v12752_v48 }
 0x94d   :  { %11491 = vmatmul.mubr.msk.bf16.vlgmr.msra.gmra.mrb[64].mxu0 %vm1388_vm11, %v6156_v8  ;;  %11493 = vmatmul.mubr.msk.bf16.vlgmr.msra.gmra.mrb[64].mxu1 %vm1388_vm11, %v6156_v8 }
 0x94e   :  { %v11201_v14 = vsel %vm875_vm5, %v11199_v16, %v12753_v54  ;;  %v11202_v33 = vsel %vm875_vm5, %v11200_v24, %v12754_v61  ;;  %11256 = vmatprep.mubr.bf16.mxu0 %v21328_v58  ;;  %11303 = vmatprep.mubr.bf16.mxu1 %v21328_v58  ;;  %v11196_v58 = vsel %vm887_vm9, %v19725_v34, %v12769_v10 }
 0x94f   :  { %v12762_v35 = vpop.permute.xlu1 %12761  ;;  %v11203_v41 = vsel %vm878_vm6, %v11201_v14, %v12523_v28  ;;  %v11204_v56 = vsel %vm878_vm6, %v11202_v33, %v12524_v29  ;;  %v11213_v22 = vpack.c.bf16 %v11196_v58, %v11196_v58 }
 0x950   :  { %v12764_v9 = vunpack.i.h.bf16 %v12762_v35  ;;  %v12763_v43 = vunpack.i.l.bf16 %v12762_v35 }
 0x951   :  { %v11266_v34 = vsel %vm1392_vm10, %v11213_v22, 0 }
 0x952   :  { %v11205_v47 = vsel %vm881_vm7, %v11203_v41, %v12763_v43  ;;  %v11206_v52 = vsel %vm881_vm7, %v11204_v56, %v12764_v9 }
 0x953   :  { %v12772_v39 = vpop.permute.xlu1 %12771  ;;  %v11207_v30 = vsel %vm884_vm8, %v11205_v47, %v12533_v18  ;;  %v11208_v55 = vsel %vm884_vm8, %v11206_v52, %v12534_v36 }
 0x954   :  { %v12774_v57 = vunpack.i.h.bf16 %v12772_v39  ;;  %v12773_v27 = vunpack.i.l.bf16 %v12772_v39 }
 0x956   :  { %v11209_v11 = vsel %vm887_vm9, %v11207_v30, %v12773_v27  ;;  %v11210_v45 = vsel %vm887_vm9, %v11208_v55, %v12774_v57 }
 0x957   :  { %v11212_v63 = vpack.c.bf16 %v11209_v11, %v11209_v11  ;;  %v11214_v44 = vpack.c.bf16 %v11210_v45, %v11210_v45 }
 0x959   :  { %11494 = vmatprep.subr.msk.bf16.mxu0 %vm1392_vm10, %v11212_v63  ;;  %11496 = vmatprep.subr.msk.bf16.mxu1 %vm1392_vm10, %v11214_v44 }
 0x95a   :  { %11225 = vmatpush1.bf16.msra.mxu0 %v11219_v17  ;;  %11272 = vmatpush1.bf16.msra.mxu1 %v11266_v34 }
 0x95d   :  { %11495 = vmatmul.mubr.msk.bf16.vlgmr.msra.gmra.mrb[68].mxu0 %vm1388_vm11, %v6157_v5  ;;  %11497 = vmatmul.mubr.msk.bf16.vlgmr.msra.gmra.mrb[68].mxu1 %vm1388_vm11, %v6157_v5 }
 0x9e0   :  { %v7114_v46 = vpop.f32.mrb[36].mxu0  ;;  %v7161_v6 = vpop.f32.mrb[36].mxu1 }
 0x9e1   :  { %v7116_v53 = vpop.f32.mrb[37].mxu0  ;;  %v7163_v12 = vpop.f32.mrb[37].mxu1 }
 0x9e2   :  { %v7118_v26 = vpop.f32.mrb[38].mxu0  ;;  %v7165_v49 = vpop.f32.mrb[38].mxu1 }
 0x9e3   :  { %v7119_v60 = vpop.f32.mrb[39].mxu0  ;;  %v7166_v51 = vpop.f32.mrb[39].mxu1 }
 0x9e8   :  { %v7211_v1 = vpop.f32.mrb[40].mxu0  ;;  %v7258_v25 = vpop.f32.mrb[40].mxu1 }
 0x9e9   :  { %v7212_v21 = vadd.f32 %v7211_v1, %v7114_v46  ;;  %v7259_v3 = vadd.f32 %v7258_v25, %v7161_v6  ;;  %v7213_v15 = vpop.f32.mrb[41].mxu0  ;;  %v7260_v2 = vpop.f32.mrb[41].mxu1 }
 0x9ea   :  { %v7214_v62 = vadd.f32 %v7213_v15, %v7116_v53  ;;  %v7261_v20 = vadd.f32 %v7260_v2, %v7163_v12  ;;  %v7215_v4 = vpop.f32.mrb[42].mxu0  ;;  %v7262_v42 = vpop.f32.mrb[42].mxu1 }
 0x9eb   :  { %v7216_v32 = vpop.f32.mrb[43].mxu0  ;;  %v7263_v0 = vpop.f32.mrb[43].mxu1 }
 0x9f0   :  { %v7804_v50 = vpop.f32.mrb[44].mxu0  ;;  %v7851_v8 = vpop.f32.mrb[44].mxu1 }
 0x9f1   :  { %v7858_v7 = vadd.f32 %v7804_v50, %v7212_v21  ;;  %v7860_v13 = vadd.f32 %v7851_v8, %v7259_v3  ;;  %v7806_v40 = vpop.f32.mrb[45].mxu0  ;;  %v7853_v37 = vpop.f32.mrb[45].mxu1 }
 0x9f2   :  { %v7859_v48 = vadd.f32 %v7806_v40, %v7214_v62  ;;  %v7861_v61 = vadd.f32 %v7853_v37, %v7261_v20  ;;  %v7808_v54 = vpop.f32.mrb[46].mxu0  ;;  %v7855_v23 = vpop.f32.mrb[46].mxu1 }
 0x9f3   :  { %v7809_v29 = vpop.f32.mrb[47].mxu0  ;;  %v7856_v28 = vpop.f32.mrb[47].mxu1 }
 0x9f4   :  { %v11319_v54 = vpop.permute.xlu0 %11318 }
 0x9f8   :  { %v8337_v16 = vpop.f32.mrb[48].mxu0  ;;  %v8384_v24 = vpop.f32.mrb[48].mxu1 }
 0x9f9   :  { %v8391_v10 = vadd.f32 %v8337_v16, %v7858_v7  ;;  %v8393_v59 = vadd.f32 %v8384_v24, %v7860_v13  ;;  %v8339_v14 = vpop.f32.mrb[49].mxu0  ;;  %v8386_v33 = vpop.f32.mrb[49].mxu1 }
 0x9fa   :  { %v8392_v35 = vadd.f32 %v8339_v14, %v7859_v48  ;;  %v8394_v41 = vadd.f32 %v8386_v33, %v7861_v61  ;;  %v8341_v56 = vpop.f32.mrb[50].mxu0  ;;  %v8388_v9 = vpop.f32.mrb[50].mxu1 }
 0x9fb   :  { %v8342_v43 = vpop.f32.mrb[51].mxu0  ;;  %v8389_v31 = vpop.f32.mrb[51].mxu1 }
 0xa00   :  { %v8934_v36 = vpop.f32.mrb[52].mxu0  ;;  %v8981_v18 = vpop.f32.mrb[52].mxu1 }
 0xa01   :  { %v8988_v47 = vadd.f32 %v8934_v36, %v8391_v10  ;;  %v8990_v52 = vadd.f32 %v8981_v18, %v8393_v59  ;;  %v8936_v19 = vpop.f32.mrb[53].mxu0  ;;  %v8983_v58 = vpop.f32.mrb[53].mxu1 }
 0xa02   :  { %v8989_v39 = vadd.f32 %v8936_v19, %v8392_v35  ;;  %v8991_v30 = vadd.f32 %v8983_v58, %v8394_v41  ;;  %v8938_v55 = vpop.f32.mrb[54].mxu0  ;;  %v8985_v57 = vpop.f32.mrb[54].mxu1 }
 0xa03   :  { %v8939_v27 = vpop.f32.mrb[55].mxu0  ;;  %v8986_v38 = vpop.f32.mrb[55].mxu1 }
 0xa10   :  { %v9531_v22 = vpop.f32.mrb[56].mxu0  ;;  %v9578_v11 = vpop.f32.mrb[56].mxu1 }
 0xa11   :  { %v9585_v45 = vadd.f32 %v9531_v22, %v8988_v47  ;;  %v9587_v63 = vadd.f32 %v9578_v11, %v8990_v52  ;;  %v9533_v44 = vpop.f32.mrb[57].mxu0  ;;  %v9580_v17 = vpop.f32.mrb[57].mxu1 }
 0xa12   :  { %v9586_v34 = vadd.f32 %v9533_v44, %v8989_v39  ;;  %v9588_v5 = vadd.f32 %v9580_v17, %v8991_v30  ;;  %v9535_v46 = vpop.f32.mrb[58].mxu0  ;;  %v9582_v6 = vpop.f32.mrb[58].mxu1 }
 0xa13   :  { %v9536_v53 = vpop.f32.mrb[59].mxu0  ;;  %v9583_v12 = vpop.f32.mrb[59].mxu1 }
 0xa18   :  { %v10064_v26 = vpop.f32.mrb[60].mxu0  ;;  %v10111_v49 = vpop.f32.mrb[60].mxu1 }
 0xa19   :  { %v10118_v60 = vadd.f32 %v10064_v26, %v9585_v45  ;;  %v10120_v51 = vadd.f32 %v10111_v49, %v9587_v63  ;;  %v10066_v1 = vpop.f32.mrb[61].mxu0  ;;  %v10113_v25 = vpop.f32.mrb[61].mxu1 }
 0xa1a   :  { %v10119_v21 = vadd.f32 %v10066_v1, %v9586_v34  ;;  %v10121_v3 = vadd.f32 %v10113_v25, %v9588_v5  ;;  %v10068_v15 = vpop.f32.mrb[62].mxu0  ;;  %v10115_v2 = vpop.f32.mrb[62].mxu1 }
 0xa1b   :  { %v10069_v62 = vpop.f32.mrb[63].mxu0  ;;  %v10116_v20 = vpop.f32.mrb[63].mxu1 }
 0xa1c   :  { %v11325_v20 = vld [vmem:[%s19874_s7] sm:$0xf]  ;;  %s12896_s7 = smov [#allocation3]  }
 0xa1d   :  { %s11418_s3 = sshll.u32 %s12896_s7, 4  ;;  %s11419_s3 = int_to_ptr.vmem [resolvable:$true] %s11418_s3 }
 0xa1e   :  { %s12858_s13 = scalar_lea.vmem %s11419_s3, 256  ;;  %p12863_p1 = scmp.lt.s32.totalorder %s11419_s3, %s11419_s3 }
 0xa1f   :  { %p12859_p0 = scmp.ne.s32.totalorder %s11419_s3, %s12858_s13  ;;  %p12864_p2 = scmp.lt.s32.totalorder %s12858_s13, %s12858_s13 }
 0xa20   :  { %v10661_v4 = vpop.f32.mrb[64].mxu0  ;;  %v10708_v42 = vpop.f32.mrb[64].mxu1 }
 0xa21   :  { %v10715_v32 = vadd.f32 %v10661_v4, %v10118_v60  ;;  %v10717_v0 = vadd.f32 %v10708_v42, %v10120_v51  ;;  %v10663_v50 = vpop.f32.mrb[65].mxu0  ;;  %v10710_v8 = vpop.f32.mrb[65].mxu1  ;;  %v11326_v51 = vld [vmem:[%s19875_s8] sm:$0xf]  ;;  %p12865_p3 = por %p12864_p2, %p12863_p1 }
 0xa22   :  { %v10716_v7 = vadd.f32 %v10663_v50, %v10119_v21  ;;  %v10718_v13 = vadd.f32 %v10710_v8, %v10121_v3  ;;  %v10665_v40 = vpop.f32.mrb[66].mxu0  ;;  %v10712_v37 = vpop.f32.mrb[66].mxu1 }
 0xa23   :  { %v10666_v48 = vpop.f32.mrb[67].mxu0  ;;  %v10713_v61 = vpop.f32.mrb[67].mxu1  ;;  %p12866_p4 = pnand %p12865_p3, %p12859_p0 }
 0xa30   :  { %v11258_v23 = vpop.f32.mrb[68].mxu0  ;;  %v11305_v29 = vpop.f32.mrb[68].mxu1 }
 0xa31   :  { %v11312_v28 = vadd.f32 %v11258_v23, %v10715_v32  ;;  %v11314_v16 = vadd.f32 %v11305_v29, %v10717_v0  ;;  %v11260_v24 = vpop.f32.mrb[69].mxu0  ;;  %v11307_v10 = vpop.f32.mrb[69].mxu1  ;;  %v12853_v23 = vld [vmem:[%s19867_s0 + $0x4] ss:$8 sps:$4 sm:$0xff]  }
 0xa32   :  { %v11313_v59 = vadd.f32 %v11260_v24, %v10716_v7  ;;  %v11315_v14 = vadd.f32 %v11307_v10, %v10718_v13  ;;  %v11262_v33 = vpop.f32.mrb[70].mxu0  ;;  %v11309_v35 = vpop.f32.mrb[70].mxu1 }
 0xa33   :  { %v11321_v41 = vadd.f32 %v11319_v54, %v11312_v28  ;;  %v11323_v56 = vadd.f32 %v11319_v54, %v11314_v16  ;;  %v11263_v9 = vpop.f32.mrb[71].mxu0  ;;  %v11310_v43 = vpop.f32.mrb[71].mxu1 }
 0xa34   :  { %v11322_v31 = vadd.f32 %v11319_v54, %v11313_v59  ;;  %v11324_v36 = vadd.f32 %v11319_v54, %v11315_v14  ;;  %v12851_v54 = vld [vmem:[%s19867_s0] ss:$8 sps:$4 sm:$0xff]  }
 0xa35   :  { %v11327_v18 = vsel %vm5646_vm12, %v11321_v41, 0.0  ;;  %v11332_v47 = vsel %vm5646_vm12, %v11323_v56, 0.0 }
 0xa36   :  { %v11328_v52 = vsel %vm5646_vm12, %v11322_v31, 0.0  ;;  %v11333_v19 = vsel %vm5646_vm12, %v11324_v36, 0.0 }
 0xa37   :  { %v11334_v58 = vadd.f32 %v11333_v19, %v11332_v47  ;;  %v11329_v39 = vadd.f32 %v11328_v52, %v11327_v18 }
 0xa39   :  { %11335 = vadd.xlane.f32.xlu0 %v11334_v58  ;;  %11330 = vadd.xlane.f32.xlu1 %v11329_v39 }
 0xac6   :  { %v11336_v30 = vpop.xlane.xlu0 %11335  ;;  %v11331_v55 = vpop.xlane.xlu1 %11330 }
 0xac7   :  { %v11338_v57 = vsel %vm5646_vm12, %v11336_v30, 0.0  ;;  %v11337_v27 = vsel %vm5646_vm12, %v11331_v55, 0.0 }
 0xac8   :  { %v11339_v38 = vadd.f32 %v11338_v57, %v11337_v27 }
 0xaca   :  { %v11340_v22 = vmul.f32 0.001953125, %v11339_v38 }
 0xacc   :  { %v11343_v11 = vsub.f32 %v11323_v56, %v11340_v22  ;;  %v11344_v45 = vsub.f32 %v11324_v36, %v11340_v22  ;;  %v11341_v63 = vsub.f32 %v11321_v41, %v11340_v22  ;;  %v11342_v44 = vsub.f32 %v11322_v31, %v11340_v22 }
 0xace   :  { %v11347_v17 = vmul.f32 %v11343_v11, %v11343_v11  ;;  %v11348_v34 = vmul.f32 %v11344_v45, %v11344_v45  ;;  %v11345_v5 = vmul.f32 %v11341_v63, %v11341_v63  ;;  %v11346_v46 = vmul.f32 %v11342_v44, %v11342_v44 }
 0xad0   :  { %v11354_v6 = vsel %vm5646_vm12, %v11347_v17, 0.0  ;;  %v11355_v53 = vsel %vm5646_vm12, %v11348_v34, 0.0  ;;  %v11349_v12 = vsel %vm5646_vm12, %v11345_v5, 0.0  ;;  %v11350_v26 = vsel %vm5646_vm12, %v11346_v46, 0.0 }
 0xad1   :  { %v11356_v49 = vadd.f32 %v11355_v53, %v11354_v6  ;;  %v11351_v60 = vadd.f32 %v11350_v26, %v11349_v12 }
 0xad3   :  { %11357 = vadd.xlane.f32.xlu1 %v11356_v49  ;;  %11352 = vadd.xlane.f32.xlu0 %v11351_v60 }
 0xae4   :  { %11377 = vperm.xlu1 %12144, %v11326_v51  }
 0xb60   :  { %v11358_v1 = vpop.xlane.xlu1 %11357  ;;  %v11353_v25 = vpop.xlane.xlu0 %11352 }
 0xb61   :  { %v11360_v21 = vsel %vm5646_vm12, %v11358_v1, 0.0  ;;  %v11359_v3 = vsel %vm5646_vm12, %v11353_v25, 0.0 }
 0xb62   :  { %v11361_v15 = vadd.f32 %v11360_v21, %v11359_v3 }
 0xb64   :  { %v11362_v2 = vmul.f32 0.001953125, %v11361_v15  ;;  %v11378_v13 = vpop.permute.xlu1 %11377 }
 0xb66   :  { %v11363_v62 = vadd.f32 1e-05, %v11362_v2 }
 0xb68   :  { %12856 = vrsqrt.f32 %v11363_v62 }
 0xb72   :  { %v12857_v4 = vpop.eup %12856 }
 0xb73   :  { %v11365_v42 = vmul.f32 %v12857_v4, %v11325_v20 }
 0xb75   :  { %11368 = vperm.xlu0 %12143, %v11365_v42  }
 0xbf4   :  { %v11369_v32 = vpop.permute.xlu0 %11368 }
 0xbf5   :  { %v11371_v0 = vmul.f32 %v11369_v32, %v11341_v63  ;;  %v11372_v50 = vmul.f32 %v11369_v32, %v11342_v44  ;;  %v11373_v8 = vmul.f32 %v11369_v32, %v11343_v11  ;;  %v11374_v7 = vmul.f32 %v11369_v32, %v11344_v45 }
 0xbf7   :  { %v11380_v40 = vadd.f32 %v11378_v13, %v11371_v0  ;;  %v11381_v37 = vadd.f32 %v11378_v13, %v11372_v50  ;;  %v11382_v48 = vadd.f32 %v11378_v13, %v11373_v8  ;;  %v11383_v61 = vadd.f32 %v11378_v13, %v11374_v7 }
 0xbf9   :  { %v11388_v29 = vcombine.low %v11380_v40, %v11381_v37  ;;  %v11389_v28 = vcombine.low %v11382_v48, %v11383_v61 }
 0xbfb   :  { %v11400_v16 = vadd.f32 %v12851_v54, %v11388_v29  ;;  %v11401_v24 = vadd.f32 %v12853_v23, %v11389_v28 }
 0xbfd   :  { %v11402_v10 = vmax.f32 %v11400_v16, 0.0  ;;  %v11403_v59 = vmax.f32 %v11401_v24, 0.0 }
 0xbff   :  { %v11406_v14 = vcombine.low %v11402_v10, %v11403_v59  ;;  %v11407_v33 = vcombine.high %v11402_v10, %v11403_v59 }
 0xc01   :  { %11410 = vst [vmem:[#allocation3] sm:$0xff] %v11406_v14  ;;  %11411 = vst [vmem:[#allocation3 + $0x8] sm:$0xff] %v11407_v33 }
 0xc02   :  { %12869 = shalt.err (!%p12866_p4)
}
 0xc03   :  { %s12870_s11 = scalar_lea.hbm %s19876_s9, 256 }
 0xc04   :  { %p12871_p5 = scmp.ne.s32.totalorder %s19876_s9, %s12870_s11  ;;  %p12874_p6 = scmp.lt.u32.totalorder %s12870_s11, %s19876_s9 }
 0xc06   :  { %p12876_p7 = pnand %p12874_p6, %p12871_p5 }
 0xc08   :  { %12879 = shalt.err (!%p12876_p7)
}
 0xc09   :  { %11421 = dma.vmem_to_hbm [thread:$0]  %s11419_s3, 256, %s19876_s9, [#allocation4]  }
 0xc0a   :  { %12880 = dma.done.wait [#allocation4], 256  }
 0xc0b   :  { %12881 = vsyncadd [#allocation4], 4294967040 }
 0xc0c   :  { %11425 = vsyncpa [#allocation4], 1 }

</bundles_post_ra>
